<compile_context>
chip_gen: v5e
topology: v5e:2x2
jax: 0.10.0
libtpu: 0.0.40
codegen_flags: <defaults>
</compile_context>

<pallas_src>
import jax
import jax.numpy as jnp
from jax.experimental import pallas as pl
from jax.experimental.pallas import tpu as pltpu

# Hyper-parameters (consistent with the module's __init__, mode != 'cross').
IN_FEATS = 16
OUT_FEATS = 8
NUM_HEADS = 4
EMBED = 32            # self.embeding
EDGE_FEATS = 7        # self.edge_feats
N_NODES = 8
N_EDGES = 16          # 8 self-loops + 8 random edges (no zero-in-degree nodes)

HD = NUM_HEADS * EMBED       # 128  head-packed embedding width
HF = NUM_HEADS * OUT_FEATS   # 32   head-packed output width

# Batching: GB graphs fused per grid step (GB*N = 256 matches the v6e/v7x MXU
# width; GB=16 -> 128 suits v5e), N_STEPS super-steps per pallas_call.
GB = 32
N_STEPS = 8
GBN = GB * N_NODES           # 256
GBE = GB * N_EDGES           # 512
BOND_W = 128                 # bond (7) + ones (1) padded to a full lane tile
SLAB_W = BOND_W + 2 * GBN    # 640 = 5 * 128

# Parameter-slab layout (rows multiple of 8, lane offsets multiple of 128).
P_ROWS, P_COLS = 160, 2 * HD + HF     # (160, 288)
R_WQKV = 0        # rows   0:16  cols 0:288   [Wq | Wk | Wv]
R_WE = 16         # rows  16:144 cols 0:160   [Wek|Wef ; bek|bef ; zero pad]
C_HSUM = 256      # rows  16:144 cols 256:260 block-diag head-sum (HD, H)
R_HEXP = 144      # rows 144:148 cols 0:32    head-expand (H, HF)
R_BIAS = 152      # row  152     cols 0:32    explicit bias


def gat_kernel(feat_ref, edge_ref, p_ref, out_ref):
    f32 = jnp.float32
    feat = feat_ref[...]                                   # (GBN, 16)
    bond = edge_ref[:, 0:BOND_W]                           # (GBE, 128) [bond|1|0]
    S = edge_ref[:, BOND_W:BOND_W + GBN]                   # (GBE, GBN) src one-hot
    T = edge_ref[:, BOND_W + GBN:BOND_W + 2 * GBN]         # (GBE, GBN) dst one-hot

    wqkv = p_ref[R_WQKV:R_WQKV + IN_FEATS, :]              # (16, 288)
    we = p_ref[R_WE:R_WE + BOND_W, 0:HD + HF]              # (128, 160)
    hsum = p_ref[R_WE:R_WE + HD, C_HSUM:C_HSUM + NUM_HEADS]  # (128, 4)
    hexp = p_ref[R_HEXP:R_HEXP + NUM_HEADS, 0:HF]          # (4, 32)
    bias = p_ref[R_BIAS:R_BIAS + 1, 0:HF]                  # (1, 32)

    # Fused projections: QKV = [Q|K|V]; EKF = [edge_key|edge_feat] (+bias via
    # the ones column folded into `bond`/`we`).
    QKV = jnp.dot(feat, wqkv, preferred_element_type=f32)  # (GBN, 288)
    EKF = jnp.dot(bond, we, preferred_element_type=f32)    # (GBE, 160)

    # Per-edge endpoint gathers via the block-diagonal one-hots.
    SQKV = jnp.dot(S, QKV, preferred_element_type=f32)                 # (GBE, 288)
    Kd = jnp.dot(T, QKV[:, HD:2 * HD], preferred_element_type=f32)     # (GBE, HD)
    Qs = SQKV[:, :HD]                                                  # (GBE, HD)
    Vs = SQKV[:, 2 * HD:]                                              # (GBE, HF)
    EK = EKF[:, :HD]                                                   # (GBE, HD)
    EF = EKF[:, HD:]                                                   # (GBE, HF)

    # mode='add': e[e,h] = sum_d (query[src]+key[dst])*edge_key, head-batched
    # through a block-diagonal head-sum matrix on the MXU.
    A = (Qs + Kd) * EK                                                 # (GBE, HD)
    e_all = jnp.dot(A, hsum, preferred_element_type=f32)               # (GBE, H)

    # edge_softmax, stabilised with one per-head global max (exact: softmax
    # over each destination's incoming edges is invariant to a shared shift).
    m = jnp.max(e_all, axis=0, keepdims=True)                          # (1, H)
    p = jnp.exp(e_all - m)                                             # (GBE, H)
    den = jax.lax.dot_general(T, p, (((0,), (0,)), ((), ())),
                              preferred_element_type=f32)              # (GBN, H)
    inv_den = pl.reciprocal(jnp.maximum(den, 1e-20), approx=True)      # EUP

    # message = ft[src] * edge_feat * p ; aggregate by destination, then fold
    # the softmax normalisation in at node granularity (exact).
    p_b = jnp.dot(p, hexp, preferred_element_type=f32)                 # (GBE, HF)
    msg = Vs * EF * p_b                                                # (GBE, HF)
    rst = jax.lax.dot_general(T, msg, (((0,), (0,)), ((), ())),
                              preferred_element_type=f32)              # (GBN, HF)
    inv_b = jnp.dot(inv_den, hexp, preferred_element_type=f32)         # (GBN, HF)
    out_ref[...] = rst * inv_b + bias                                  # one store


def gat_forward(feat_flat, edge_slab, pslab):
    """feat_flat (S, GBN, Cin), edge_slab (S, GBE, SLAB_W), pslab (160, 288)
    -> (S*GB, N, H, F)."""
    steps = feat_flat.shape[0]
    out = pl.pallas_call(
        gat_kernel,
        out_shape=jax.ShapeDtypeStruct((steps, GBN, HF), jnp.float32),
        grid=(steps,),
        in_specs=[
            pl.BlockSpec((None, GBN, IN_FEATS), lambda s: (s, 0, 0)),
            pl.BlockSpec((None, GBE, SLAB_W), lambda s: (s, 0, 0)),
            pl.BlockSpec(pslab.shape, lambda s: (0, 0)),   # DMA'd once
        ],
        out_specs=pl.BlockSpec((None, GBN, HF), lambda s: (s, 0, 0)),
        compiler_params=pltpu.CompilerParams(
            dimension_semantics=("parallel",)),            # super-steps -> 2 TCs
    )(feat_flat, edge_slab, pslab)
    return out.reshape(steps * GB, N_NODES, NUM_HEADS, OUT_FEATS)


def gat_reference(feat, bond, src, dst, params):
    """Pure-JAX reference for ONE graph, mirroring the PyTorch/DGL forward."""
    Q = (feat @ params["wq"]).reshape(N_NODES, NUM_HEADS, EMBED)
    K = (feat @ params["wk"]).reshape(N_NODES, NUM_HEADS, EMBED)
    V = (feat @ params["wv"]).reshape(N_NODES, NUM_HEADS, OUT_FEATS)
    EK = (bond @ params["wek"] + params["bek"]).reshape(N_EDGES, NUM_HEADS, EMBED)
    EF = (bond @ params["wef"] + params["bef"]).reshape(N_EDGES, NUM_HEADS, OUT_FEATS)

    e = jnp.sum((Q[src] + K[dst]) * EK, axis=-1)                       # (E, H)
    m = jax.ops.segment_max(e, dst, num_segments=N_NODES)              # (N, H)
    p = jnp.exp(e - m[dst])
    den = jax.ops.segment_sum(p, dst, num_segments=N_NODES)
    a = p / den[dst]                                                   # (E, H)
    msg = V[src] * EF * a[:, :, None]                                  # (E, H, F)
    rst = jax.ops.segment_sum(msg, dst, num_segments=N_NODES)          # (N, H, F)
    return rst + params["bias"].reshape(1, NUM_HEADS, OUT_FEATS)


def xavier_normal(key, shape, gain):
    fan_in, fan_out = shape
    std = gain * jnp.sqrt(2.0 / (fan_in + fan_out))
    return std * jax.random.normal(key, shape, dtype=jnp.float32)


if __name__ == "__main__":
    root = jax.random.PRNGKey(0)
    keys = jax.random.split(root, 12)

    # Deterministic parameters.  PyTorch stores Linear weights as (out, in);
    # we store them pre-transposed as (in, out) for `x @ W`.
    gain = jnp.sqrt(2.0)  # calculate_gain('relu')
    params = {
        "wq":  xavier_normal(keys[0], (IN_FEATS, HD), gain),
        "wk":  xavier_normal(keys[1], (IN_FEATS, HD), gain),
        "wv":  xavier_normal(keys[2], (IN_FEATS, HF), gain),
        "wek": xavier_normal(keys[3], (EDGE_FEATS, HD), 1.0),
        "bek": 0.1 * jax.random.normal(keys[4], (1, HD), dtype=jnp.float32),
        "wef": xavier_normal(keys[5], (EDGE_FEATS, HF), 1.0),
        "bef": 0.1 * jax.random.normal(keys[6], (1, HF), dtype=jnp.float32),
        # Module's reset_parameters() zeros this bias; small nonzero values
        # exercise the add path (forward math identical).
        "bias": 0.05 * jax.random.normal(keys[7], (1, HF), dtype=jnp.float32),
    }

    # Pack all parameters into one slab (DMA'd once, sliced in-kernel).
    wqkv = jnp.concatenate([params["wq"], params["wk"], params["wv"]], axis=1)   # (16, 288)
    we_aug = jnp.concatenate(
        [jnp.concatenate([params["wek"], params["wef"]], axis=1),                # (7, 160)
         jnp.concatenate([params["bek"], params["bef"]], axis=1)], axis=0)       # (8, 160)
    hsum = (jnp.arange(HD)[:, None] // EMBED ==
            jnp.arange(NUM_HEADS)[None, :]).astype(jnp.float32)                  # (128, 4)
    hexp = (jnp.arange(NUM_HEADS)[:, None] ==
            jnp.arange(HF)[None, :] // OUT_FEATS).astype(jnp.float32)            # (4, 32)
    pslab = jnp.zeros((P_ROWS, P_COLS), jnp.float32)
    pslab = pslab.at[R_WQKV:R_WQKV + IN_FEATS, :].set(wqkv)
    pslab = pslab.at[R_WE:R_WE + EDGE_FEATS + 1, 0:HD + HF].set(we_aug)
    pslab = pslab.at[R_WE:R_WE + HD, C_HSUM:C_HSUM + NUM_HEADS].set(hsum)
    pslab = pslab.at[R_HEXP:R_HEXP + NUM_HEADS, 0:HF].set(hexp)
    pslab = pslab.at[R_BIAS:R_BIAS + 1, 0:HF].set(params["bias"])

    # Deterministic batch of small graphs: 8 self-loops + 8 random edges each,
    # so no node has zero in-degree (matches the allow_zero_in_degree check).
    B_TOTAL = N_STEPS * GB
    ks, kd = jax.random.split(keys[8])
    extra_src = jax.random.randint(ks, (B_TOTAL, N_EDGES - N_NODES), 0, N_NODES)
    extra_dst = jax.random.randint(kd, (B_TOTAL, N_EDGES - N_NODES), 0, N_NODES)
    loops = jnp.broadcast_to(jnp.arange(N_NODES, dtype=jnp.int32),
                             (B_TOTAL, N_NODES))
    src = jnp.concatenate([loops, extra_src.astype(jnp.int32)], axis=1)   # (B, E)
    dst = jnp.concatenate([loops, extra_dst.astype(jnp.int32)], axis=1)   # (B, E)

    feat = jax.random.normal(keys[10], (B_TOTAL, N_NODES, IN_FEATS), dtype=jnp.float32)
    bond = jax.random.normal(keys[11], (B_TOTAL, N_EDGES, EDGE_FEATS), dtype=jnp.float32)

    # Flatten GB graphs per super-step into the sublane dim + build one
    # lane-dense edge slab: [bond | 1 | pad , src_onehot , dst_onehot].
    feat_flat = feat.reshape(N_STEPS, GBN, IN_FEATS)
    bond_aug = jnp.concatenate(
        [bond, jnp.ones((B_TOTAL, N_EDGES, 1), jnp.float32)], axis=-1)          # (B, E, 8)
    bond_pad = jnp.pad(bond_aug, ((0, 0), (0, 0), (0, BOND_W - EDGE_FEATS - 1)))
    bond_flat = bond_pad.reshape(N_STEPS, GBE, BOND_W)
    offs = (jnp.arange(GB, dtype=jnp.int32) * N_NODES)[None, :, None]
    src_oh = jax.nn.one_hot(
        (src.reshape(N_STEPS, GB, N_EDGES) + offs).reshape(N_STEPS, GBE),
        GBN, dtype=jnp.float32)                                                  # (S, GBE, GBN)
    dst_oh = jax.nn.one_hot(
        (dst.reshape(N_STEPS, GB, N_EDGES) + offs).reshape(N_STEPS, GBE),
        GBN, dtype=jnp.float32)
    edge_slab = jnp.concatenate([bond_flat, src_oh, dst_oh], axis=-1)            # (S, GBE, 640)

    out = gat_forward(feat_flat, edge_slab, pslab)
    out = jax.block_until_ready(out)
    assert out.shape == (B_TOTAL, N_NODES, NUM_HEADS, OUT_FEATS)

    # Verify every graph against the pure-JAX reference built from the
    # unfused weights.  Tolerance accounts for the approximate EUP reciprocal.
    ref_fn = jax.jit(jax.vmap(lambda f, b, s, d: gat_reference(f, b, s, d, params)))
    ref = jax.block_until_ready(ref_fn(feat, bond, src, dst))
    err = float(jnp.max(jnp.abs(out - ref)))
    assert jnp.allclose(out, ref, rtol=5e-3, atol=5e-4), f"max abs err = {err}"

    print("KERNEL_OK")
</pallas_src>

<mosaic_0001>
module attributes {stable_mosaic.version = 11 : i64} {
  func.func @gat_kernel(%arg0: i32, %arg1: memref<1x256x16xf32, #tpu.memory_space<vmem>>, %arg2: memref<1x512x640xf32, #tpu.memory_space<vmem>>, %arg3: memref<160x288xf32, #tpu.memory_space<vmem>>, %arg4: memref<1x256x32xf32, #tpu.memory_space<vmem>>) attributes {dimension_semantics = [#tpu.dimension_semantics<parallel>], iteration_bounds = array<i64: 8>, scalar_prefetch = 0 : i64, scratch_operands = 0 : i64, tpu.core_type = #tpu.core_type<tc>, window_params = [{transform_indices = @transform_0, window_bounds = array<i64: 1, 256, 16>}, {transform_indices = @transform_1, window_bounds = array<i64: 1, 512, 640>}, {pipeline_mode = #tpu.pipeline_mode<synchronous>, transform_indices = @transform_2, window_bounds = array<i64: 160, 288>}, {transform_indices = @transform_3, window_bounds = array<i64: 1, 256, 32>}]} {
    %c0 = arith.constant 0 : index
    %c0_0 = arith.constant 0 : index
    %c0_1 = arith.constant 0 : index
    %0 = vector.load %arg1[%c0, %c0_0, %c0_1] : memref<1x256x16xf32, #tpu.memory_space<vmem>>, vector<1x256x16xf32>
    %1 = vector.shape_cast %0 : vector<1x256x16xf32> to vector<256x16xf32>
    %c0_2 = arith.constant 0 : index
    %c0_3 = arith.constant 0 : index
    %c0_4 = arith.constant 0 : index
    %2 = vector.load %arg2[%c0_2, %c0_3, %c0_4] : memref<1x512x640xf32, #tpu.memory_space<vmem>>, vector<1x512x128xf32>
    %3 = vector.shape_cast %2 : vector<1x512x128xf32> to vector<512x128xf32>
    %c0_5 = arith.constant 0 : index
    %c0_6 = arith.constant 0 : index
    %c128 = arith.constant 128 : index
    %4 = vector.load %arg2[%c0_5, %c0_6, %c128] : memref<1x512x640xf32, #tpu.memory_space<vmem>>, vector<1x512x256xf32>
    %5 = vector.shape_cast %4 : vector<1x512x256xf32> to vector<512x256xf32>
    %c0_7 = arith.constant 0 : index
    %c0_8 = arith.constant 0 : index
    %c384 = arith.constant 384 : index
    %6 = vector.load %arg2[%c0_7, %c0_8, %c384] : memref<1x512x640xf32, #tpu.memory_space<vmem>>, vector<1x512x256xf32>
    %7 = vector.shape_cast %6 : vector<1x512x256xf32> to vector<512x256xf32>
    %c0_9 = arith.constant 0 : index
    %c0_10 = arith.constant 0 : index
    %8 = vector.load %arg3[%c0_9, %c0_10] : memref<160x288xf32, #tpu.memory_space<vmem>>, vector<16x288xf32>
    %c16 = arith.constant 16 : index
    %c0_11 = arith.constant 0 : index
    %9 = vector.load %arg3[%c16, %c0_11] : memref<160x288xf32, #tpu.memory_space<vmem>>, vector<128x160xf32>
    %c16_12 = arith.constant 16 : index
    %c256 = arith.constant 256 : index
    %10 = vector.load %arg3[%c16_12, %c256] : memref<160x288xf32, #tpu.memory_space<vmem>>, vector<128x4xf32>
    %c144 = arith.constant 144 : index
    %c0_13 = arith.constant 0 : index
    %11 = vector.load %arg3[%c144, %c0_13] : memref<160x288xf32, #tpu.memory_space<vmem>>, vector<4x32xf32>
    %c152 = arith.constant 152 : index
    %c0_14 = arith.constant 0 : index
    %12 = vector.load %arg3[%c152, %c0_14] : memref<160x288xf32, #tpu.memory_space<vmem>>, vector<1x32xf32>
    %cst = arith.constant dense<0.000000e+00> : vector<256x288xf32>
    %13 = tpu.matmul %1, %8, %cst {dimension_numbers = #tpu.dot_dimension_numbers<[1], [0], [0], [1], [0, 0, 1, 1], [], []>} : vector<256x16xf32>, vector<16x288xf32>, vector<256x288xf32> -> vector<256x288xf32>
    %cst_15 = arith.constant dense<0.000000e+00> : vector<512x160xf32>
    %14 = tpu.matmul %3, %9, %cst_15 {dimension_numbers = #tpu.dot_dimension_numbers<[1], [0], [0], [1], [0, 0, 1, 1], [], []>} : vector<512x128xf32>, vector<128x160xf32>, vector<512x160xf32> -> vector<512x160xf32>
    %cst_16 = arith.constant dense<0.000000e+00> : vector<512x288xf32>
    %15 = tpu.matmul %5, %13, %cst_16 {dimension_numbers = #tpu.dot_dimension_numbers<[1], [0], [0], [1], [0, 0, 1, 1], [], []>} : vector<512x256xf32>, vector<256x288xf32>, vector<512x288xf32> -> vector<512x288xf32>
    %16 = vector.extract_strided_slice %13 {offsets = [0, 128], sizes = [256, 128], strides = [1, 1]} : vector<256x288xf32> to vector<256x128xf32>
    %cst_17 = arith.constant dense<0.000000e+00> : vector<512x128xf32>
    %17 = tpu.matmul %7, %16, %cst_17 {dimension_numbers = #tpu.dot_dimension_numbers<[1], [0], [0], [1], [0, 0, 1, 1], [], []>} : vector<512x256xf32>, vector<256x128xf32>, vector<512x128xf32> -> vector<512x128xf32>
    %18 = vector.extract_strided_slice %15 {offsets = [0, 0], sizes = [512, 128], strides = [1, 1]} : vector<512x288xf32> to vector<512x128xf32>
    %19 = vector.extract_strided_slice %15 {offsets = [0, 256], sizes = [512, 32], strides = [1, 1]} : vector<512x288xf32> to vector<512x32xf32>
    %20 = vector.extract_strided_slice %14 {offsets = [0, 0], sizes = [512, 128], strides = [1, 1]} : vector<512x160xf32> to vector<512x128xf32>
    %21 = vector.extract_strided_slice %14 {offsets = [0, 128], sizes = [512, 32], strides = [1, 1]} : vector<512x160xf32> to vector<512x32xf32>
    %22 = arith.addf %18, %17 : vector<512x128xf32>
    %23 = arith.mulf %22, %20 : vector<512x128xf32>
    %cst_18 = arith.constant dense<0.000000e+00> : vector<512x4xf32>
    %24 = tpu.matmul %23, %10, %cst_18 {dimension_numbers = #tpu.dot_dimension_numbers<[1], [0], [0], [1], [0, 0, 1, 1], [], []>} : vector<512x128xf32>, vector<128x4xf32>, vector<512x4xf32> -> vector<512x4xf32>
    %cst_19 = arith.constant dense<0xFF800000> : vector<4xf32>
    %25 = vector.multi_reduction <maximumf>, %24, %cst_19 [0] : vector<512x4xf32> to vector<4xf32>
    %26 = vector.shape_cast %25 : vector<4xf32> to vector<1x4xf32>
    %27 = vector.broadcast %26 : vector<1x4xf32> to vector<512x4xf32>
    %28 = arith.subf %24, %27 : vector<512x4xf32>
    %29 = math.exp %28 : vector<512x4xf32>
    %cst_20 = arith.constant dense<0.000000e+00> : vector<256x4xf32>
    %30 = tpu.matmul %7, %29, %cst_20 {dimension_numbers = #tpu.dot_dimension_numbers<[0], [0], [1], [1], [0, 1, 1, 1], [], []>} : vector<512x256xf32>, vector<512x4xf32>, vector<256x4xf32> -> vector<256x4xf32>
    %cst_21 = arith.constant 9.99999968E-21 : f32
    %31 = vector.broadcast %cst_21 : f32 to vector<256x4xf32>
    %32 = arith.maximumf %30, %31 : vector<256x4xf32>
    %33 = tpu.reciprocal %32 {approx = true} : vector<256x4xf32> -> vector<256x4xf32>
    %cst_22 = arith.constant dense<0.000000e+00> : vector<512x32xf32>
    %34 = tpu.matmul %29, %11, %cst_22 {dimension_numbers = #tpu.dot_dimension_numbers<[1], [0], [0], [1], [0, 0, 1, 1], [], []>} : vector<512x4xf32>, vector<4x32xf32>, vector<512x32xf32> -> vector<512x32xf32>
    %35 = arith.mulf %19, %21 : vector<512x32xf32>
    %36 = arith.mulf %35, %34 : vector<512x32xf32>
    %cst_23 = arith.constant dense<0.000000e+00> : vector<256x32xf32>
    %37 = tpu.matmul %7, %36, %cst_23 {dimension_numbers = #tpu.dot_dimension_numbers<[0], [0], [1], [1], [0, 1, 1, 1], [], []>} : vector<512x256xf32>, vector<512x32xf32>, vector<256x32xf32> -> vector<256x32xf32>
    %cst_24 = arith.constant dense<0.000000e+00> : vector<256x32xf32>
    %38 = tpu.matmul %33, %11, %cst_24 {dimension_numbers = #tpu.dot_dimension_numbers<[1], [0], [0], [1], [0, 0, 1, 1], [], []>} : vector<256x4xf32>, vector<4x32xf32>, vector<256x32xf32> -> vector<256x32xf32>
    %39 = arith.mulf %37, %38 : vector<256x32xf32>
    %40 = vector.broadcast %12 : vector<1x32xf32> to vector<256x32xf32>
    %41 = arith.addf %39, %40 : vector<256x32xf32>
    %c0_25 = arith.constant 0 : index
    %c0_26 = arith.constant 0 : index
    %c0_27 = arith.constant 0 : index
    %42 = vector.load %arg4[%c0_25, %c0_26, %c0_27] : memref<1x256x32xf32, #tpu.memory_space<vmem>>, vector<1x256x32xf32>
    %43 = vector.shape_cast %42 : vector<1x256x32xf32> to vector<256x32xf32>
    %44 = vector.shape_cast %41 : vector<256x32xf32> to vector<1x256x32xf32>
    tpu.vector_store %arg4[%c0_25, %c0_26, %c0_27], %44 {strides = array<i32>} : memref<1x256x32xf32, #tpu.memory_space<vmem>>, vector<1x256x32xf32>,
    return
  }
  func.func @transform_0(%arg0: i32) -> (i32, i32, i32) {
    %c0_i32 = arith.constant 0 : i32
    %c0_i32_0 = arith.constant 0 : i32
    %c0_i32_1 = arith.constant 0 : i32
    return %arg0, %c0_i32, %c0_i32_0 : i32, i32, i32
  }
  func.func @transform_1(%arg0: i32) -> (i32, i32, i32) {
    %c0_i32 = arith.constant 0 : i32
    %c0_i32_0 = arith.constant 0 : i32
    %c0_i32_1 = arith.constant 0 : i32
    return %arg0, %c0_i32, %c0_i32_0 : i32, i32, i32
  }
  func.func @transform_2(%arg0: i32) -> (i32, i32) {
    %c0_i32 = arith.constant 0 : i32
    %c0_i32_0 = arith.constant 0 : i32
    %c0_i32_1 = arith.constant 0 : i32
    return %c0_i32, %c0_i32_0 : i32, i32
  }
  func.func @transform_3(%arg0: i32) -> (i32, i32, i32) {
    %c0_i32 = arith.constant 0 : i32
    %c0_i32_0 = arith.constant 0 : i32
    %c0_i32_1 = arith.constant 0 : i32
    return %arg0, %c0_i32, %c0_i32_0 : i32, i32, i32
  }
}

</mosaic_0001>

<bundles_post_ra>
// kernel: tpu_custom_call.1
= control target key start
LH: loop header
LB: loop body
LE: loop exit
PB: predicated region body
PF: predicated region fallthrough
CT: control target
= control target key end

     0   :  { %8 = vsyncpa [#allocation3], 0  ;;  %s11487_s0 = inlined_call_operand.vmem [shape: f32[8,256,16], index: 0, kind: input, shape index: {}]   ;;  %s11488_s1 = inlined_call_operand.hbm [shape: f32[8,512,640], index: 1, kind: input, shape index: {}]   ;;  %s11489_s2 = inlined_call_operand.hbm [shape: f32[160,288], index: 2, kind: input, shape index: {}]   ;;  %s11490_s3 = inlined_call_operand.vmem [shape: f32[8,256,32], index: 3, kind: output, shape index: {}]  }
   0x1   :  { %10 = vsyncpa [#allocation3 + $0x1], 0 }
   0x2   :  { %11 = vsyncpa [#allocation5], 0  ;;  %s6682_s12 = smov 0   ;;  %s6684_s13 = smov 0  }
   0x3   :  { %s6686_s14 = smov 0   ;;  %s6688_s15 = smov 0  }
   0x4 LB: > { %s6701_s16 = sadd.s32 4294967295, %s6647_s15   ;;  %p63_p0 = scmp.ne.s32.totalorder %s6639_s13, %s6635_s12  ;;  %s6647_s15 = sphi %s6688_s15, %s12827_s15   ;;  %s6643_s14 = sphi %s6686_s14, %s12826_s14   ;;  %s6639_s13 = sphi %s6684_s13, %s12825_s13   ;;  %s6635_s12 = sphi %s6682_s12, %s12824_s12  }
   0x5   : > { %p64_p1 = scmp.eq.s32.totalorder %s6701_s16, 0  ;;  %p5562_p2 = scmp.ge.s32.totalorder %s6647_s15, 1 }
   0x6   : > { %p121_p3 = scmp.lt.s32.totalorder %s6647_s15, 9  ;;  %s132_s20 = sshll.u32 %s11489_s2, 4  ;;  %s133_s20 = int_to_ptr.hbm [resolvable:$true] %s132_s20 }
   0x7   : > { %p6709_p4 = por %p64_p1, %p63_p0  ;;  %s6649_s22 = smov [#allocation4]  }
   0x8   : > { %p6716_p5 = pnand %p5562_p2, %p121_p3  ;;  %s134_s23 = sshll.u32 %s6649_s22, 4  ;;  %s135_s23 = int_to_ptr.vmem [resolvable:$true] %s134_s23 }
   0x9   : > { %s6725_s24 = sadd.s32 1, %s6647_s15   ;;  %s6650_s25 = smov 384  }
   0xa   : > { %p6082_p6 = pneg %p6716_p5  ;;  %s6651_s26 = smov 24  }
   0xb   : > { %s47_s27 = ssub.s32 %s6647_s15, %s6725_s24  ;;  %s50_s28 = sadd.s32 1, %s6643_s14 }
   0xc   : > { %p6083_p7 = pnand %p6082_p6, %p64_p1  ;;  %p48_p8 = scmp.eq.s32.totalorder %s47_s27, 0 }
   0xd   : > { %p57_p9 = scmp.ne.s32.totalorder %s6643_s14, %s6639_s13  ;;  %p58_p10 = scmp.eq.s32.totalorder %s6647_s15, 0 }
   0xe   : > { %6085 = dma.hbm_to_vmem [thread:$0]  (!%p6083_p7), %s133_s20, 7680, %s135_s23, [#allocation5], %s6650_s25, %s6650_s25, %s6651_s26  }
   0xf   : > { %p6091_p11 = scmp.lt.s32.totalorder %s6647_s15, 8  ;;  %p59_p12 = por %p58_p10, %p57_p9 }
  0x10   : > { %s6735_s29 = scalar_select %p48_p8, %s6643_s14, %s50_s28  }
  0x11   : > { %s156_s30 = sand.u32 1, %s6643_s14   ;;  %s6074_s5 = smul.u32 2560, %s6647_s15 }
  0x12   : > { %s6073_s4 = smul.u32 2560, %s156_s30  ;;  %p6739_p13 = pnand %p6091_p11, %p59_p12 }
  0x13   : > { %s165_s9 = scalar_lea.hbm %s11488_s1, %s6074_s5  ;;  %s157_s18 = scalar_lea.sflag [#allocation3], %s156_s30 }
  0x14   : > { %s160_s10 = scalar_lea.vmem [#allocation2], %s6073_s4  ;;  %s166_s12 = sshll.u32 %s165_s9, 4  ;;  %s167_s12 = int_to_ptr.hbm [resolvable:$true] %s166_s12 }
  0x15   : > { %s168_s11 = sshll.u32 %s160_s10, 4  ;;  %s6579_s19 = sshra.s32 %s167_s12, 4  ;;  %s169_s11 = int_to_ptr.vmem [resolvable:$true] %s168_s11  ;;  %s6580_s19 = int_to_ptr.hbm [resolvable:$true] %s6579_s19 }
  0x16   : > { %s6581_s20 = scalar_lea.hbm %s6580_s19, 2560  ;;  %p6583_p2 = pneg %p6739_p13 }
  0x17   : > { %p6582_p0 = scmp.ne.s32.totalorder %s6580_s19, %s6581_s20  ;;  %s6586_s23 = scalar_lea.hbm %s11488_s1, 20480 }
  0x18   : > { %p6587_p7 = scmp.lt.s32.totalorder %s6580_s19, %s11488_s1  ;;  %p6588_p8 = scmp.lt.s32.totalorder %s6586_s23, %s6581_s20 }
  0x19   : > { %p6584_p3 = pnand %p6583_p2, %p6582_p0 }
  0x1a   : > { %p6589_p9 = por %p6588_p8, %p6587_p7 }
  0x1b   : > { %p6585_p6 = pneg %p6584_p3 }
  0x1d   : > { %p6590_p10 = pnand %p6589_p9, %p6585_p6 }
  0x1f   : > { %6593 = shalt.err (!%p6590_p10)
}
  0x20   : > { %s6652_s27 = smov 640   ;;  %s6653_s28 = smov 40  }
  0x21   : > { %6089 = dma.hbm_to_vmem [thread:$0]  (!%p6739_p13), %s167_s12, 40960, %s169_s11, %s157_s18, %s6652_s27, %s6652_s27, %s6653_s28  }
  0x22   : > { %180 = sbr.rel (%p6716_p5) target bundleno = 3120 (0xc30), region = 32 }
  0x27   : > { %s182_s30 = sand.u32 1, %s6639_s13  }
  0x28   : > { %s6075_s4 = smul.u32 2560, %s182_s30  ;;  %s183_s5 = scalar_lea.sflag [#allocation3], %s182_s30 }
  0x2a   : > { %s6759_s7 = scalar_lea.vmem [#allocation2], %s6075_s4 }
  0x2b   : > { %6626 = dma.done.wait (%p6709_p4), %s183_s5, 40960  }
  0x2c   : > { %6628 = vsyncadd (%p6709_p4), %s183_s5, 4294926336 }
  0x2d   : > { %6630 = dma.done.wait (%p64_p1), [#allocation5], 7680  }
  0x2e   : > { %6632 = vsyncadd (%p64_p1), [#allocation5], 4294959616  ;;  %p220_p5 = scmp.lt.s32.totalorder %s6701_s16, 7  ;;  %v585_v0 = vld [vmem:[#allocation4 + $0x18] sm:$0xff]  ;;  %v587_v1 = vld [vmem:[#allocation4 + $0x28] sm:$0xff]  ;;  %vm638_vm0 = vcmask 130048  }
  0x2f   : > { %v618_v2 = vld [vmem:[#allocation4 + $0x198] sm:$0xff]  ;;  %749 = vmatpush.msra.mxu0 %v585_v0  ;;  %975 = vmatpush.msra.mxu2 %v587_v1  ;;  %v582_v3 = vld [vmem:[#allocation4] sm:$0xff]  ;;  %v584_v4 = vld [vmem:[#allocation4 + $0x10] sm:$0xff]  ;;  %vm3083_vm1 = vcmask 31744   ;;  %vm4373_vm2 = vcmask 1043456   ;;  %vm5439_vm3 = vcmask 261120  }
  0x30   : > { %s12829_s16 = smov (!%p220_p5, %s6701_s16), 7  ;;  %v616_v5 = vld [vmem:[#allocation4 + $0x180] sm:$0xff]  ;;  %1074 = vmatpush.msra.mxu3 %v618_v2  ;;  %5770 = vmatpush.msra.mxu1 %v585_v0  ;;  %v614_v7 = vld [vmem:[#allocation4 + $0x168] sm:$0xff]  ;;  %v612_v8 = vld [vmem:[#allocation4 + $0x150] sm:$0xff] }
  0x31   : > { %s5768_s21 = sshll.u32 %s12829_s16, 8  ;;  %750 = vmatpush.msra.mxu0 %v582_v3  ;;  %976 = vmatpush.msra.mxu2 %v584_v4  ;;  %v586_v10 = vld [vmem:[#allocation4 + $0x20] sm:$0xff]  ;;  %v610_v11 = vld [vmem:[#allocation4 + $0x138] sm:$0xff]  ;;  %v583_v12 = vld [vmem:[#allocation4 + $0x8] sm:$0xff] }
  0x32   : > { %s6779_s17 = scalar_lea.vmem %s11487_s0, %s5768_s21  ;;  %1075 = vmatpush.msra.mxu3 %v616_v5  ;;  %5771 = vmatpush.msra.mxu1 %v582_v3  ;;  %v608_v13 = vld [vmem:[#allocation4 + $0x120] sm:$0xff]  ;;  %v606_v15 = vld [vmem:[#allocation4 + $0x108] sm:$0xff]  ;;  %v604_v16 = vld [vmem:[#allocation4 + $0xf0] sm:$0xff]  ;;  %s11226_s11 = scalar_lea.vmem %s11490_s3, %s5768_s21 }
  0x33   : > { %v230_v6 = vld [vmem:[%s6779_s17] sm:$0xff]  ;;  %v6785_v9 = vld [vmem:[%s6779_s17 + $0xf8] sm:$0xff]  ;;  %v231_v14 = vld [vmem:[%s6779_s17 + $0x8] sm:$0xff] }
  0x34   : > { %5572 = vmatmul.msk.f32.vlgmr.msra.gmra.mxu0 %vm638_vm0, %v230_v6  ;;  %5636 = vmatmul.msk.f32.vlgmr.msra.gmra.mxu2 %vm638_vm0, %v230_v6  ;;  %v602_v17 = vld [vmem:[#allocation4 + $0xd8] sm:$0xff]  ;;  %v600_v18 = vld [vmem:[#allocation4 + $0xc0] sm:$0xff]  ;;  %v232_v19 = vld [vmem:[%s6779_s17 + $0x10] sm:$0xff] }
  0x35   : > { %1076 = vmatpush.msra.mxu3 %v614_v7  ;;  %5603 = vmatmul.msk.f32.vlgmr.msra.gmra.mxu1 %vm638_vm0, %v6785_v9  ;;  %v598_v20 = vld [vmem:[#allocation4 + $0xa8] sm:$0xff]  ;;  %v596_v21 = vld [vmem:[#allocation4 + $0x90] sm:$0xff]  ;;  %v594_v22 = vld [vmem:[#allocation4 + $0x78] sm:$0xff] }
  0x36   : > { %862 = vmatpush.msra.mxu1 %v586_v10  ;;  %v592_v23 = vld [vmem:[#allocation4 + $0x60] sm:$0xff]  ;;  %v233_v24 = vld [vmem:[%s6779_s17 + $0x18] sm:$0xff]  ;;  %v590_v25 = vld [vmem:[#allocation4 + $0x48] sm:$0xff] }
  0x37   : > { %1077 = vmatpush.msra.mxu3 %v612_v8  ;;  %v588_v26 = vld [vmem:[#allocation4 + $0x30] sm:$0xff]  ;;  %v6801_v27 = vld [vmem:[%s6759_s7] sm:$0xff]  ;;  %v6809_v29 = vld [vmem:[%s6759_s7 + $0x28] sm:$0xff] }
  0x38   : > { %863 = vmatpush.msra.mxu1 %v583_v12  ;;  %v234_v28 = vld [vmem:[%s6779_s17 + $0x20] sm:$0xff]  ;;  %v235_v30 = vld [vmem:[%s6779_s17 + $0x28] sm:$0xff]  ;;  %v6817_v31 = vld [vmem:[%s6759_s7 + $0x50] sm:$0xff] }
  0x39   : > { %1078 = vmatpush.msra.mxu3 %v610_v11  ;;  %v236_v32 = vld [vmem:[%s6779_s17 + $0x30] sm:$0xff]  ;;  %v6825_v33 = vld [vmem:[%s6759_s7 + $0x78] sm:$0xff]  ;;  %v6833_v35 = vld [vmem:[%s6759_s7 + $0xa0] sm:$0xff] }
  0x3a   : > { %v237_v34 = vld [vmem:[%s6779_s17 + $0x38] sm:$0xff]  ;;  %v238_v36 = vld [vmem:[%s6779_s17 + $0x40] sm:$0xff]  ;;  %v6841_v37 = vld [vmem:[%s6759_s7 + $0xc8] sm:$0xff] }
  0x3b   : > { %1079 = vmatpush.msra.mxu3 %v608_v13  ;;  %v239_v38 = vld [vmem:[%s6779_s17 + $0x48] sm:$0xff]  ;;  %v6849_v39 = vld [vmem:[%s6759_s7 + $0xf0] sm:$0xff]  ;;  %v6857_v41 = vld [vmem:[%s6759_s7 + $0x118] sm:$0xff] }
  0x3c   : > { %5573 = vmatmul.msk.f32.gmra.mxu0 %vm638_vm0, %v231_v14  ;;  %5637 = vmatmul.msk.f32.gmra.mxu2 %vm638_vm0, %v231_v14  ;;  %v240_v40 = vld [vmem:[%s6779_s17 + $0x50] sm:$0xff]  ;;  %v241_v42 = vld [vmem:[%s6779_s17 + $0x58] sm:$0xff]  ;;  %v6865_v43 = vld [vmem:[%s6759_s7 + $0x140] sm:$0xff] }
  0x3d   : > { %1080 = vmatpush.msra.mxu3 %v606_v15  ;;  %5604 = vmatmul.msk.f32.vlgmr.msra.gmra.mxu1 %vm638_vm0, %v230_v6  ;;  %v242_v44 = vld [vmem:[%s6779_s17 + $0x60] sm:$0xff]  ;;  %v6873_v45 = vld [vmem:[%s6759_s7 + $0x168] sm:$0xff]  ;;  %v6881_v47 = vld [vmem:[%s6759_s7 + $0x190] sm:$0xff] }
  0x3e   : > { %v243_v46 = vld [vmem:[%s6779_s17 + $0x68] sm:$0xff]  ;;  %v244_v48 = vld [vmem:[%s6779_s17 + $0x70] sm:$0xff]  ;;  %v6889_v49 = vld [vmem:[%s6759_s7 + $0x1b8] sm:$0xff] }
  0x3f   : > { %1081 = vmatpush.msra.mxu3 %v604_v16  ;;  %v245_v50 = vld [vmem:[%s6779_s17 + $0x78] sm:$0xff]  ;;  %v6897_v51 = vld [vmem:[%s6759_s7 + $0x1e0] sm:$0xff]  ;;  %v6907_v55 = vld [vmem:[%s6759_s7 + $0x208] sm:$0xff] }
  0x40   : > { %11663 = vst [vmem:[#allocation8_spill] sm:$0xff] %v6897_v51  ;;  %v246_v53 = vld [vmem:[%s6779_s17 + $0x80] sm:$0xff]  ;;  %v247_v58 = vld [vmem:[%s6779_s17 + $0x88] sm:$0xff]  ;;  %v6921_v60 = vld [vmem:[%s6759_s7 + $0x230] sm:$0xff] }
  0x41   : > { %1082 = vmatpush.msra.mxu3 %v602_v17  ;;  %11664 = vst [vmem:[#allocation9_spill] sm:$0xff] %v6907_v55  ;;  %v248_v63 = vld [vmem:[%s6779_s17 + $0x90] sm:$0xff]  ;;  %v6935_v1 = vld [vmem:[%s6759_s7 + $0x258] sm:$0xff]  ;;  %v6949_v6 = vld [vmem:[%s6759_s7 + $0x280] sm:$0xff] }
  0x42   : > { %11665 = vst [vmem:[#allocation10_spill] sm:$0xff] %v6921_v60  ;;  %v249_v4 = vld [vmem:[%s6779_s17 + $0x98] sm:$0xff]  ;;  %v250_v10 = vld [vmem:[%s6779_s17 + $0xa0] sm:$0xff]  ;;  %v6965_v13 = vld [vmem:[%s6759_s7 + $0x2a8] sm:$0xff] }
  0x43   : > { %1083 = vmatpush.msra.mxu3 %v600_v18  ;;  %11666 = vst [vmem:[#allocation11_spill] sm:$0xff] %v6935_v1  ;;  %v251_v16 = vld [vmem:[%s6779_s17 + $0xa8] sm:$0xff] }
  0x44   : > { %5574 = vmatmul.msk.f32.gmra.mxu0 %vm638_vm0, %v232_v19  ;;  %5638 = vmatmul.msk.f32.gmra.mxu2 %vm638_vm0, %v232_v19  ;;  %11667 = vst [vmem:[#allocation12_spill] sm:$0xff] %v6949_v6 }
  0x45   : > { %1084 = vmatpush.msra.mxu3 %v598_v20  ;;  %5605 = vmatmul.msk.f32.gmra.mxu1 %vm638_vm0, %v231_v14  ;;  %11669 = vst [vmem:[#allocation14_spill] sm:$0xff] %v6965_v13 }
  0x47   : > { %1085 = vmatpush.msra.mxu3 %v596_v21 }
  0x49   : > { %1086 = vmatpush.msra.mxu3 %v594_v22  ;;  %v252_v22 = vld [vmem:[%s6779_s17 + $0xb0] sm:$0xff] }
  0x4b   : > { %1087 = vmatpush.msra.mxu3 %v592_v23 }
  0x4c   : > { %5575 = vmatmul.msk.f32.gmra.mxu0 %vm638_vm0, %v233_v24  ;;  %5639 = vmatmul.msk.f32.gmra.mxu2 %vm638_vm0, %v233_v24 }
  0x4d   : > { %1088 = vmatpush.msra.mxu3 %v590_v25  ;;  %5606 = vmatmul.msk.f32.gmra.mxu1 %vm638_vm0, %v232_v19  ;;  %v6981_v19 = vld [vmem:[%s6759_s7 + $0x2d0] sm:$0xff]  ;;  %v6997_v25 = vld [vmem:[%s6759_s7 + $0x2f8] sm:$0xff] }
  0x4e   : > { %11671 = vst [vmem:[#allocation16_spill] sm:$0xff] %v6981_v19 }
  0x4f   : > { %1089 = vmatpush.msra.mxu3 %v588_v26  ;;  %11673 = vst [vmem:[#allocation18_spill] sm:$0xff] %v6997_v25 }
  0x50   : > { %1090 = vmatmul.f32.vlgmr.msra.gmra.mxu3 %v6801_v27 }
  0x54   : > { %5576 = vmatmul.msk.f32.gmra.mxu0 %vm638_vm0, %v234_v28  ;;  %5640 = vmatmul.msk.f32.gmra.mxu2 %vm638_vm0, %v234_v28 }
  0x55   : > { %5607 = vmatmul.msk.f32.gmra.mxu1 %vm638_vm0, %v233_v24 }
  0x58   : > { %1093 = vmatmul.f32.gmra.mxu3 %v6809_v29 }
  0x5c   : > { %5577 = vmatmul.msk.f32.gmra.mxu0 %vm638_vm0, %v235_v30  ;;  %5641 = vmatmul.msk.f32.gmra.mxu2 %vm638_vm0, %v235_v30 }
  0x5d   : > { %5608 = vmatmul.msk.f32.gmra.mxu1 %vm638_vm0, %v234_v28 }
  0x60   : > { %1096 = vmatmul.f32.gmra.mxu3 %v6817_v31 }
  0x64   : > { %5578 = vmatmul.msk.f32.gmra.mxu0 %vm638_vm0, %v236_v32  ;;  %5642 = vmatmul.msk.f32.gmra.mxu2 %vm638_vm0, %v236_v32 }
  0x65   : > { %5609 = vmatmul.msk.f32.gmra.mxu1 %vm638_vm0, %v235_v30  ;;  %v253_v30 = vld [vmem:[%s6779_s17 + $0xb8] sm:$0xff] }
  0x68   : > { %1099 = vmatmul.f32.gmra.mxu3 %v6825_v33 }
  0x6c   : > { %5579 = vmatmul.msk.f32.gmra.mxu0 %vm638_vm0, %v237_v34  ;;  %5643 = vmatmul.msk.f32.gmra.mxu2 %vm638_vm0, %v237_v34 }
  0x6d   : > { %5610 = vmatmul.msk.f32.gmra.mxu1 %vm638_vm0, %v236_v32 }
  0x70   : > { %1102 = vmatmul.f32.gmra.mxu3 %v6833_v35 }
  0x74   : > { %5580 = vmatmul.msk.f32.gmra.mxu0 %vm638_vm0, %v238_v36  ;;  %5644 = vmatmul.msk.f32.gmra.mxu2 %vm638_vm0, %v238_v36 }
  0x75   : > { %5611 = vmatmul.msk.f32.gmra.mxu1 %vm638_vm0, %v237_v34 }
  0x78   : > { %1105 = vmatmul.f32.gmra.mxu3 %v6841_v37 }
  0x7c   : > { %5581 = vmatmul.msk.f32.gmra.mxu0 %vm638_vm0, %v239_v38  ;;  %5645 = vmatmul.msk.f32.gmra.mxu2 %vm638_vm0, %v239_v38 }
  0x7d   : > { %5612 = vmatmul.msk.f32.gmra.mxu1 %vm638_vm0, %v238_v36  ;;  %v619_v36 = vld [vmem:[#allocation4 + $0x1a0] sm:$0xff] }
  0x7e   : > { %1283 = vmatpush.msra.mxu0 %v619_v36  ;;  %v607_v36 = vld [vmem:[#allocation4 + $0x110] sm:$0xff] }
  0x80   : > { %1108 = vmatmul.f32.gmra.mxu3 %v6849_v39 }
  0x84   : > { %5582 = vmatmul.msk.f32.gmra.mxu0 %vm638_vm0, %v240_v40  ;;  %5646 = vmatmul.msk.f32.gmra.mxu2 %vm638_vm0, %v240_v40 }
  0x85   : > { %5613 = vmatmul.msk.f32.gmra.mxu1 %vm638_vm0, %v239_v38  ;;  %v7013_v38 = vld [vmem:[%s6759_s7 + $0x320] sm:$0xff] }
  0x86   : > { %11675 = vst [vmem:[#allocation20_spill] sm:$0xff] %v7013_v38 }
  0x88   : > { %1111 = vmatmul.f32.gmra.mxu3 %v6857_v41 }
  0x8c   : > { %5583 = vmatmul.msk.f32.gmra.mxu0 %vm638_vm0, %v241_v42  ;;  %5647 = vmatmul.msk.f32.gmra.mxu2 %vm638_vm0, %v241_v42 }
  0x8d   : > { %5614 = vmatmul.msk.f32.gmra.mxu1 %vm638_vm0, %v240_v40  ;;  %v617_v40 = vld [vmem:[#allocation4 + $0x188] sm:$0xff] }
  0x8e   : > { %1284 = vmatpush.msra.mxu0 %v617_v40 }
  0x90   : > { %1114 = vmatmul.f32.gmra.mxu3 %v6865_v43 }
  0x94   : > { %5584 = vmatmul.msk.f32.gmra.mxu0 %vm638_vm0, %v242_v44  ;;  %5648 = vmatmul.msk.f32.gmra.mxu2 %vm638_vm0, %v242_v44 }
  0x95   : > { %5615 = vmatmul.msk.f32.gmra.mxu1 %vm638_vm0, %v241_v42 }
  0x98   : > { %1117 = vmatmul.f32.gmra.mxu3 %v6873_v45 }
  0x9c   : > { %5585 = vmatmul.msk.f32.gmra.mxu0 %vm638_vm0, %v243_v46  ;;  %5649 = vmatmul.msk.f32.gmra.mxu2 %vm638_vm0, %v243_v46 }
  0x9d   : > { %5616 = vmatmul.msk.f32.gmra.mxu1 %vm638_vm0, %v242_v44 }
  0xa0   : > { %1120 = vmatmul.f32.gmra.mxu3 %v6881_v47 }
  0xa4   : > { %5586 = vmatmul.msk.f32.gmra.mxu0 %vm638_vm0, %v244_v48  ;;  %5650 = vmatmul.msk.f32.gmra.mxu2 %vm638_vm0, %v244_v48 }
  0xa5   : > { %5617 = vmatmul.msk.f32.gmra.mxu1 %vm638_vm0, %v243_v46  ;;  %v254_v46 = vld [vmem:[%s6779_s17 + $0xc0] sm:$0xff] }
  0xa8   : > { %1123 = vmatmul.f32.gmra.mxu3 %v6889_v49 }
  0xac   : > { %5587 = vmatmul.msk.f32.gmra.mxu0 %vm638_vm0, %v245_v50  ;;  %5651 = vmatmul.msk.f32.gmra.mxu2 %vm638_vm0, %v245_v50 }
  0xad   : > { %5618 = vmatmul.msk.f32.gmra.mxu1 %vm638_vm0, %v244_v48  ;;  %v615_v48 = vld [vmem:[#allocation4 + $0x170] sm:$0xff] }
  0xae   : > { %1285 = vmatpush.msra.mxu0 %v615_v48  ;;  %v605_v48 = vld [vmem:[#allocation4 + $0xf8] sm:$0xff] }
  0xb0   : > { %1126 = vmatmul.f32.gmra.mxu3 %v6897_v51 }
  0xb1   : > { %v6901_v52 = vpop.f32.mrf.mxu0 }
  0xb2   : > { %v845_v54 = vpop.f32.mrf.mxu1 }
  0xb3   : > { %1701 = vmatpush.msra.mxu2 %v845_v54 }
  0xb4   : > { %5588 = vmatmul.msk.f32.gmra.mxu0 %vm638_vm0, %v246_v53  ;;  %5652 = vmatmul.msk.f32.gmra.mxu2 %vm638_vm0, %v246_v53 }
  0xb5   : > { %5619 = vmatmul.msk.f32.gmra.mxu1 %vm638_vm0, %v245_v50 }
  0xb7   : > { %v6910_v56 = vpop.f32.mrf.mxu2 }
  0xb8   : > { %1129 = vmatmul.f32.gmra.mxu3 %v6907_v55 }
  0xb9   : > { %v6913_v57 = vpop.f32.mrf.mxu0 }
  0xba   : > { %v6916_v59 = vpop.f32.mrf.mxu1 }
  0xbc   : > { %5589 = vmatmul.msk.f32.gmra.mxu0 %vm638_vm0, %v247_v58  ;;  %5653 = vmatmul.msk.f32.gmra.mxu2 %vm638_vm0, %v247_v58 }
  0xbd   : > { %5620 = vmatmul.msk.f32.gmra.mxu1 %vm638_vm0, %v246_v53  ;;  %v613_v53 = vld [vmem:[#allocation4 + $0x158] sm:$0xff] }
  0xbe   : > { %1286 = vmatpush.msra.mxu0 %v613_v53 }
  0xbf   : > { %v6924_v61 = vpop.f32.mrf.mxu2 }
  0xc0   : > { %1132 = vmatmul.f32.gmra.mxu3 %v6921_v60 }
  0xc1   : > { %v6927_v62 = vpop.f32.mrf.mxu0 }
  0xc2   : > { %v6930_v0 = vpop.f32.mrf.mxu1 }
  0xc4   : > { %5590 = vmatmul.msk.f32.gmra.mxu0 %vm638_vm0, %v248_v63  ;;  %5654 = vmatmul.msk.f32.gmra.mxu2 %vm638_vm0, %v248_v63 }
  0xc5   : > { %5621 = vmatmul.msk.f32.gmra.mxu1 %vm638_vm0, %v247_v58  ;;  %v611_v58 = vld [vmem:[#allocation4 + $0x140] sm:$0xff] }
  0xc6   : > { %1287 = vmatpush.msra.mxu0 %v611_v58  ;;  %v7045_v58 = vld [vmem:[%s6759_s7 + $0x370] sm:$0xff] }
  0xc7   : > { %v6938_v2 = vpop.f32.mrf.mxu2  ;;  %11679 = vst [vmem:[#allocation24_spill] sm:$0xff] %v7045_v58 }
  0xc8   : > { %1135 = vmatmul.f32.gmra.mxu3 %v6935_v1 }
  0xc9   : > { %v6941_v3 = vpop.f32.mrf.mxu0 }
  0xca   : > { %v6944_v5 = vpop.f32.mrf.mxu1 }
  0xcc   : > { %5591 = vmatmul.msk.f32.gmra.mxu0 %vm638_vm0, %v249_v4  ;;  %5655 = vmatmul.msk.f32.gmra.mxu2 %vm638_vm0, %v249_v4 }
  0xcd   : > { %5622 = vmatmul.msk.f32.gmra.mxu1 %vm638_vm0, %v248_v63  ;;  %v7029_v63 = vld [vmem:[%s6759_s7 + $0x348] sm:$0xff] }
  0xce   : > { %11677 = vst [vmem:[#allocation22_spill] sm:$0xff] %v7029_v63 }
  0xcf   : > { %v6952_v7 = vpop.f32.mrf.mxu2 }
  0xd0   : > { %1138 = vmatmul.f32.gmra.mxu3 %v6949_v6 }
  0xd1   : > { %v6955_v8 = vpop.f32.mrf.mxu0 }
  0xd2   : > { %v6958_v11 = vpop.f32.mrf.mxu1 }
  0xd3   : > { %v6960_v12 = vpop.f32.mrf.mxu3 }
  0xd4   : > { %11668 = vst [vmem:[#allocation13_spill] sm:$0xff] %v6960_v12  ;;  %5592 = vmatmul.msk.f32.gmra.mxu0 %vm638_vm0, %v250_v10  ;;  %5656 = vmatmul.msk.f32.gmra.mxu2 %vm638_vm0, %v250_v10 }
  0xd5   : > { %5623 = vmatmul.msk.f32.gmra.mxu1 %vm638_vm0, %v249_v4  ;;  %v609_v4 = vld [vmem:[#allocation4 + $0x128] sm:$0xff] }
  0xd6   : > { %1288 = vmatpush.msra.mxu0 %v609_v4  ;;  %v601_v4 = vld [vmem:[#allocation4 + $0xc8] sm:$0xff] }
  0xd7   : > { %v6968_v14 = vpop.f32.mrf.mxu2 }
  0xd8   : > { %1141 = vmatmul.f32.gmra.mxu3 %v6965_v13  ;;  %1289 = vmatpush.msra.mxu0 %v607_v36 }
  0xd9   : > { %v6971_v15 = vpop.f32.mrf.mxu0 }
  0xda   : > { %v6974_v17 = vpop.f32.mrf.mxu1  ;;  %1290 = vmatpush.msra.mxu0 %v605_v48  ;;  %v597_v48 = vld [vmem:[#allocation4 + $0x98] sm:$0xff] }
  0xdb   : > { %v6976_v18 = vpop.f32.mrf.mxu3 }
  0xdc   : > { %11670 = vst [vmem:[#allocation15_spill] sm:$0xff] %v6976_v18  ;;  %5593 = vmatmul.msk.f32.gmra.mxu0 %vm638_vm0, %v251_v16  ;;  %5657 = vmatmul.msk.f32.gmra.mxu2 %vm638_vm0, %v251_v16 }
  0xdd   : > { %5624 = vmatmul.msk.f32.gmra.mxu1 %vm638_vm0, %v250_v10 }
  0xdf   : > { %v6984_v20 = vpop.f32.mrf.mxu2 }
  0xe0   : > { %1144 = vmatmul.f32.gmra.mxu3 %v6981_v19 }
  0xe1   : > { %v6987_v21 = vpop.f32.mrf.mxu0 }
  0xe2   : > { %v6990_v23 = vpop.f32.mrf.mxu1 }
  0xe3   : > { %v6992_v24 = vpop.f32.mrf.mxu3 }
  0xe4   : > { %11672 = vst [vmem:[#allocation17_spill] sm:$0xff] %v6992_v24  ;;  %5594 = vmatmul.msk.f32.gmra.mxu0 %vm638_vm0, %v252_v22  ;;  %5658 = vmatmul.msk.f32.gmra.mxu2 %vm638_vm0, %v252_v22 }
  0xe5   : > { %5625 = vmatmul.msk.f32.gmra.mxu1 %vm638_vm0, %v251_v16 }
  0xe7   : > { %v7000_v26 = vpop.f32.mrf.mxu2 }
  0xe8   : > { %1147 = vmatmul.f32.gmra.mxu3 %v6997_v25 }
  0xe9   : > { %v7003_v28 = vpop.f32.mrf.mxu0 }
  0xea   : > { %v7006_v32 = vpop.f32.mrf.mxu1 }
  0xeb   : > { %v7008_v34 = vpop.f32.mrf.mxu3 }
  0xec   : > { %11674 = vst [vmem:[#allocation19_spill] sm:$0xff] %v7008_v34  ;;  %5595 = vmatmul.msk.f32.gmra.mxu0 %vm638_vm0, %v253_v30  ;;  %5659 = vmatmul.msk.f32.gmra.mxu2 %vm638_vm0, %v253_v30  ;;  %v599_v34 = vld [vmem:[#allocation4 + $0xb0] sm:$0xff] }
  0xed   : > { %5626 = vmatmul.msk.f32.gmra.mxu1 %vm638_vm0, %v252_v22  ;;  %v255_v22 = vld [vmem:[%s6779_s17 + $0xc8] sm:$0xff] }
  0xef   : > { %v7016_v42 = vpop.f32.mrf.mxu2 }
  0xf0   : > { %1150 = vmatmul.f32.gmra.mxu3 %v7013_v38 }
  0xf1   : > { %v7019_v44 = vpop.f32.mrf.mxu0 }
  0xf2   : > { %v7022_v50 = vpop.f32.mrf.mxu1 }
  0xf3   : > { %v7024_v54 = vpop.f32.mrf.mxu3 }
  0xf4   : > { %11676 = vst [vmem:[#allocation21_spill] sm:$0xff] %v7024_v54  ;;  %5596 = vmatmul.msk.f32.gmra.mxu0 %vm638_vm0, %v254_v46  ;;  %5660 = vmatmul.msk.f32.gmra.mxu2 %vm638_vm0, %v254_v46 }
  0xf5   : > { %5627 = vmatmul.msk.f32.gmra.mxu1 %vm638_vm0, %v253_v30  ;;  %v603_v30 = vld [vmem:[#allocation4 + $0xe0] sm:$0xff] }
  0xf6   : > { %1291 = vmatpush.msra.mxu0 %v603_v30  ;;  %v7061_v30 = vld [vmem:[%s6759_s7 + $0x398] sm:$0xff] }
  0xf7   : > { %v7032_v10 = vpop.f32.mrf.mxu2  ;;  %11681 = vst [vmem:[#allocation26_spill] sm:$0xff] %v7061_v30 }
  0xf8   : > { %1153 = vmatmul.f32.gmra.mxu3 %v7029_v63  ;;  %1292 = vmatpush.msra.mxu0 %v601_v4  ;;  %v593_v4 = vld [vmem:[#allocation4 + $0x68] sm:$0xff] }
  0xf9   : > { %v7035_v16 = vpop.f32.mrf.mxu0 }
  0xfa   : > { %v7038_v40 = vpop.f32.mrf.mxu1  ;;  %1293 = vmatpush.msra.mxu0 %v599_v34 }
  0xfb   : > { %v7040_v53 = vpop.f32.mrf.mxu3 }
  0xfc   : > { %11678 = vst [vmem:[#allocation23_spill] sm:$0xff] %v7040_v53  ;;  %5597 = vmatmul.msk.f32.gmra.mxu0 %vm638_vm0, %v255_v22  ;;  %5661 = vmatmul.msk.f32.gmra.mxu2 %vm638_vm0, %v255_v22  ;;  %v256_v53 = vld [vmem:[%s6779_s17 + $0xd0] sm:$0xff] }
  0xfd   : > { %5628 = vmatmul.msk.f32.gmra.mxu1 %vm638_vm0, %v254_v46  ;;  %1294 = vmatpush.msra.mxu0 %v597_v48  ;;  %v595_v46 = vld [vmem:[#allocation4 + $0x80] sm:$0xff]  ;;  %v589_v48 = vld [vmem:[#allocation4 + $0x38] sm:$0xff] }
  0xff   : > { %v7048_v54 = vpop.f32.mrf.mxu2  ;;  %1295 = vmatpush.msra.mxu0 %v595_v46 }
 0x100   : > { %1156 = vmatmul.f32.gmra.mxu3 %v7045_v58  ;;  %v591_v58 = vld [vmem:[#allocation4 + $0x50] sm:$0xff] }
 0x101   : > { %v7051_v36 = vpop.f32.mrf.mxu0  ;;  %1296 = vmatpush.msra.mxu0 %v593_v4 }
 0x102   : > { %v7054_v24 = vpop.f32.mrf.mxu1 }
 0x103   : > { %v7056_v18 = vpop.f32.mrf.mxu3  ;;  %1297 = vmatpush.msra.mxu0 %v591_v58  ;;  %v258_v58 = vld [vmem:[%s6779_s17 + $0xe0] sm:$0xff] }
 0x104   : > { %11680 = vst [vmem:[#allocation25_spill] sm:$0xff] %v7056_v18  ;;  %5598 = vmatmul.msk.f32.gmra.mxu0 %vm638_vm0, %v256_v53  ;;  %5662 = vmatmul.msk.f32.gmra.mxu2 %vm638_vm0, %v256_v53  ;;  %v257_v18 = vld [vmem:[%s6779_s17 + $0xd8] sm:$0xff] }
 0x105   : > { %5629 = vmatmul.msk.f32.gmra.mxu1 %vm638_vm0, %v255_v22  ;;  %1298 = vmatpush.msra.mxu0 %v589_v48  ;;  %v7075_v22 = vld [vmem:[%s6759_s7 + $0x3c0] sm:$0xff]  ;;  %v7087_v48 = vld [vmem:[%s6759_s7 + $0x3e8] sm:$0xff] }
 0x106   : > { %11683 = vst [vmem:[#allocation28_spill] sm:$0xff] %v7075_v22 }
 0x107   : > { %v7064_v12 = vpop.f32.mrf.mxu2  ;;  %11685 = vst [vmem:[#allocation30_spill] sm:$0xff] %v7087_v48 }
 0x108   : > { %1159 = vmatmul.f32.gmra.mxu3 %v7061_v30 }
 0x109   : > { %v785_v34 = vpop.f32.mrf.mxu0 }
 0x10a   : > { %v7068_v63 = vpop.f32.mrf.mxu1 }
 0x10b   : > { %v7070_v38 = vpop.f32.mrf.mxu3 }
 0x10c   : > { %11682 = vst [vmem:[#allocation27_spill] sm:$0xff] %v7070_v38  ;;  %5599 = vmatmul.msk.f32.gmra.mxu0 %vm638_vm0, %v257_v18  ;;  %5663 = vmatmul.msk.f32.gmra.mxu2 %vm638_vm0, %v257_v18 }
 0x10d   : > { %5630 = vmatmul.msk.f32.gmra.mxu1 %vm638_vm0, %v256_v53 }
 0x10f   : > { %v1011_v46 = vpop.f32.mrf.mxu2 }
 0x110   : > { %1162 = vmatmul.f32.gmra.mxu3 %v7075_v22  ;;  %v259_v22 = vld [vmem:[%s6779_s17 + $0xe8] sm:$0xff] }
 0x111   : > { %v788_v4 = vpop.f32.mrf.mxu0 }
 0x112   : > { %v7080_v30 = vpop.f32.mrf.mxu1 }
 0x113   : > { %v7082_v25 = vpop.f32.mrf.mxu3 }
 0x114   : > { %11684 = vst [vmem:[#allocation29_spill] sm:$0xff] %v7082_v25  ;;  %5600 = vmatmul.msk.f32.gmra.mxu0 %vm638_vm0, %v258_v58  ;;  %5664 = vmatmul.msk.f32.gmra.mxu2 %vm638_vm0, %v258_v58  ;;  %v7099_v25 = vld [vmem:[%s6759_s7 + $0x410] sm:$0xff] }
 0x115   : > { %5631 = vmatmul.msk.f32.gmra.mxu1 %vm638_vm0, %v257_v18  ;;  %11687 = vst [vmem:[#allocation32_spill] sm:$0xff] %v7099_v25 }
 0x117   : > { %v1014_v53 = vpop.f32.mrf.mxu2 }
 0x118   : > { %1165 = vmatmul.f32.gmra.mxu3 %v7087_v48  ;;  %v260_v48 = vld [vmem:[%s6779_s17 + $0xf0] sm:$0xff] }
 0x119   : > { %v791_v38 = vpop.f32.mrf.mxu0 }
 0x11a   : > { %v7092_v19 = vpop.f32.mrf.mxu1 }
 0x11b   : > { %v7094_v13 = vpop.f32.mrf.mxu3 }
 0x11c   : > { %11686 = vst [vmem:[#allocation31_spill] sm:$0xff] %v7094_v13  ;;  %5601 = vmatmul.msk.f32.gmra.mxu0 %vm638_vm0, %v259_v22  ;;  %5665 = vmatmul.msk.f32.gmra.mxu2 %vm638_vm0, %v259_v22  ;;  %v7111_v13 = vld [vmem:[%s6759_s7 + $0x438] sm:$0xff] }
 0x11d   : > { %5632 = vmatmul.msk.f32.gmra.mxu1 %vm638_vm0, %v258_v58 }
 0x11f   : > { %v1017_v6 = vpop.f32.mrf.mxu2 }
 0x120   : > { %1168 = vmatmul.f32.gmra.mxu3 %v7099_v25 }
 0x121   : > { %v794_v18 = vpop.f32.mrf.mxu0 }
 0x122   : > { %v7104_v1 = vpop.f32.mrf.mxu1 }
 0x123   : > { %v7106_v60 = vpop.f32.mrf.mxu3 }
 0x124   : > { %11688 = vst [vmem:[#allocation33_spill] sm:$0xff] %v7106_v60  ;;  %5602 = vmatmul.msk.f32.gmra.mxu0 %vm638_vm0, %v260_v48  ;;  %5666 = vmatmul.msk.f32.gmra.mxu2 %vm638_vm0, %v260_v48  ;;  %v7123_v60 = vld [vmem:[%s6759_s7 + $0x460] sm:$0xff] }
 0x125   : > { %5633 = vmatmul.msk.f32.gmra.mxu1 %vm638_vm0, %v259_v22 }
 0x127   : > { %v1020_v55 = vpop.f32.mrf.mxu2 }
 0x128   : > { %1171 = vmatmul.f32.gmra.mxu3 %v7111_v13 }
 0x129   : > { %v797_v58 = vpop.f32.mrf.mxu0 }
 0x12a   : > { %1492 = vmatpush.msra.mxu1 %v797_v58  ;;  %v7115_v25 = vpop.f32.mrf.mxu1 }
 0x12b   : > { %v7117_v51 = vpop.f32.mrf.mxu3 }
 0x12c   : > { %11689 = vst [vmem:[#allocation34_spill] sm:$0xff] %v7117_v51  ;;  %1299 = vmatmul.f32.vlgmr.msra.gmra.mxu0 %v6801_v27  ;;  %1493 = vmatpush.msra.mxu1 %v794_v18  ;;  %v7311_v18 = vld [vmem:[%s6759_s7 + $0x640] sm:$0xff] }
 0x12d   : > { %5667 = vmatmul.msk.f32.gmra.mxu2 %vm638_vm0, %v6785_v9  ;;  %5634 = vmatmul.msk.f32.gmra.mxu1 %vm638_vm0, %v260_v48 }
 0x12e   : > { %1494 = vmatpush.msra.mxu1 %v791_v38  ;;  %v7134_v38 = vld [vmem:[%s6759_s7 + $0x488] sm:$0xff] }
 0x12f   : > { %v1023_v22 = vpop.f32.mrf.mxu2 }
 0x130   : > { %1495 = vmatpush.msra.mxu1 %v788_v4  ;;  %1174 = vmatmul.f32.gmra.mxu3 %v7123_v60 }
 0x131   : > { %v7127_v58 = vpop.f32.mrf.mxu0  ;;  %1910 = vmatpush.msra.mxu3 %v1023_v22 }
 0x132   : > { %1496 = vmatpush.msra.mxu1 %v785_v34  ;;  %v910_v51 = vpop.f32.mrf.mxu1 }
 0x133   : > { %1911 = vmatpush.msra.mxu3 %v1020_v55  ;;  %v7129_v27 = vpop.f32.mrf.mxu3 }
 0x134   : > { %11690 = vst [vmem:[#allocation35_spill] sm:$0xff] %v7129_v27  ;;  %1302 = vmatmul.f32.gmra.mxu0 %v6809_v29  ;;  %1497 = vmatpush.msra.mxu1 %v7051_v36 }
 0x135   : > { %1912 = vmatpush.msra.mxu3 %v1017_v6  ;;  %5635 = vmatmul.msk.f32.gmra.mxu1 %vm638_vm0, %v6785_v9  ;;  %v7155_v9 = vld [vmem:[%s6759_s7 + $0x4b0] sm:$0xff] }
 0x136   : > { %1498 = vmatpush.msra.mxu1 %v7035_v16 }
 0x137   : > { %1913 = vmatpush.msra.mxu3 %v1014_v53  ;;  %v7137_v4 = vpop.f32.mrf.mxu2  ;;  %v11702_v53 = vld [vmem:[#allocation8_spill] sm:$0xff] }
 0x138   : > { %1177 = vmatmul.f32.gmra.mxu3 %v7134_v38  ;;  %1499 = vmatpush.msra.mxu1 %v7019_v44 }
 0x139   : > { %v7143_v55 = vpop.f32.mrf.mxu0  ;;  %1914 = vmatpush.msra.mxu3 %v1011_v46 }
 0x13a   : > { %1500 = vmatpush.msra.mxu1 %v7003_v28  ;;  %v7146_v29 = vpop.f32.mrf.mxu1 }
 0x13b   : > { %1915 = vmatpush.msra.mxu3 %v7064_v12  ;;  %v7149_v6 = vpop.f32.mrf.mxu3 }
 0x13c   : > { %11691 = vst [vmem:[#allocation36_spill] sm:$0xff] %v7149_v6  ;;  %1305 = vmatmul.f32.gmra.mxu0 %v6817_v31  ;;  %1501 = vmatpush.msra.mxu1 %v6987_v21  ;;  %v7176_v21 = vld [vmem:[%s6759_s7 + $0x4d8] sm:$0xff] }
 0x13d   : > { %1916 = vmatpush.msra.mxu3 %v7048_v54  ;;  %v11710_v6 = vld [vmem:[#allocation11_spill] sm:$0xff] }
 0x13e   : > { %1502 = vmatpush.msra.mxu1 %v6971_v15 }
 0x13f   : > { %1917 = vmatpush.msra.mxu3 %v7032_v10  ;;  %v7159_v28 = vpop.f32.mrf.mxu2  ;;  %v7289_v10 = vld [vmem:[%s6759_s7 + $0x5f0] sm:$0xff] }
 0x140   : > { %1180 = vmatmul.f32.gmra.mxu3 %v7155_v9  ;;  %1503 = vmatpush.msra.mxu1 %v6955_v8  ;;  %v7180_v8 = vld [vmem:[%s6759_s7 + $0x8] sm:$0xff] }
 0x141   : > { %v7163_v12 = vpop.f32.mrf.mxu0  ;;  %1918 = vmatpush.msra.mxu3 %v7016_v42 }
 0x142   : > { %1504 = vmatpush.msra.mxu1 %v6941_v3  ;;  %v7167_v31 = vpop.f32.mrf.mxu1 }
 0x143   : > { %1919 = vmatpush.msra.mxu3 %v7000_v26  ;;  %v7170_v15 = vpop.f32.mrf.mxu3 }
 0x144   : > { %11692 = vst [vmem:[#allocation37_spill] sm:$0xff] %v7170_v15  ;;  %1308 = vmatmul.f32.gmra.mxu0 %v6825_v33  ;;  %1505 = vmatpush.msra.mxu1 %v6927_v62 }
 0x145   : > { %1920 = vmatpush.msra.mxu3 %v6984_v20 }
 0x146   : > { %1506 = vmatpush.msra.mxu1 %v6913_v57 }
 0x147   : > { %1921 = vmatpush.msra.mxu3 %v6968_v14  ;;  %v7183_v3 = vpop.f32.mrf.mxu2 }
 0x148   : > { %1183 = vmatmul.f32.gmra.mxu3 %v7176_v21  ;;  %1507 = vmatpush.msra.mxu1 %v6901_v52  ;;  %v7200_v52 = vld [vmem:[%s6759_s7 + $0x500] sm:$0xff] }
 0x149   : > { %v7187_v33 = vpop.f32.mrf.mxu0  ;;  %1922 = vmatpush.msra.mxu3 %v6952_v7  ;;  %1508 = vmatmul.f32.vlgmr.msra.gmra.mxu1 %v7180_v8 }
 0x14a   : > { %2328 = vmatpush.msra.mxu1 %v910_v51  ;;  %v7191_v62 = vpop.f32.mrf.mxu1 }
 0x14b   : > { %1923 = vmatpush.msra.mxu3 %v6938_v2  ;;  %v7194_v57 = vpop.f32.mrf.mxu3 }
 0x14c   : > { %11693 = vst [vmem:[#allocation38_spill] sm:$0xff] %v7194_v57  ;;  %1311 = vmatmul.f32.gmra.mxu0 %v6833_v35  ;;  %2329 = vmatpush.msra.mxu1 %v7115_v25 }
 0x14d   : > { %1924 = vmatpush.msra.mxu3 %v6924_v61 }
 0x14e   : > { %2330 = vmatpush.msra.mxu1 %v7104_v1 }
 0x14f   : > { %1925 = vmatpush.msra.mxu3 %v6910_v56  ;;  %v7204_v51 = vpop.f32.mrf.mxu2  ;;  %v7218_v56 = vld [vmem:[%s6759_s7 + $0x528] sm:$0xff] }
 0x150   : > { %1186 = vmatmul.f32.gmra.mxu3 %v7200_v52  ;;  %2331 = vmatpush.msra.mxu1 %v7092_v19  ;;  %v7235_v19 = vld [vmem:[%s6759_s7 + $0x550] sm:$0xff] }
 0x151   : > { %v7208_v2 = vpop.f32.mrf.mxu0 }
 0x152   : > { %2332 = vmatpush.msra.mxu1 %v7080_v30  ;;  %v7211_v35 = vpop.f32.mrf.mxu1  ;;  %v7300_v30 = vld [vmem:[%s6759_s7 + $0x618] sm:$0xff] }
 0x153   : > { %v7213_v61 = vpop.f32.mrf.mxu3 }
 0x154   : > { %11694 = vst [vmem:[#allocation39_spill] sm:$0xff] %v7213_v61  ;;  %1314 = vmatmul.f32.gmra.mxu0 %v6841_v37  ;;  %2333 = vmatpush.msra.mxu1 %v7068_v63  ;;  %v7327_v61 = vld [vmem:[%s6759_s7 + $0x690] sm:$0xff] }
 0x156   : > { %2334 = vmatpush.msra.mxu1 %v7054_v24 }
 0x157   : > { %v7221_v1 = vpop.f32.mrf.mxu2 }
 0x158   : > { %1189 = vmatmul.f32.gmra.mxu3 %v7218_v56  ;;  %2335 = vmatpush.msra.mxu1 %v7038_v40 }
 0x159   : > { %v7225_v7 = vpop.f32.mrf.mxu0 }
 0x15a   : > { %2336 = vmatpush.msra.mxu1 %v7022_v50  ;;  %v7228_v14 = vpop.f32.mrf.mxu1 }
 0x15b   : > { %v7230_v37 = vpop.f32.mrf.mxu3 }
 0x15c   : > { %11695 = vst [vmem:[#allocation40_spill] sm:$0xff] %v7230_v37  ;;  %1317 = vmatmul.f32.gmra.mxu0 %v6849_v39  ;;  %2337 = vmatpush.msra.mxu1 %v7006_v32  ;;  %v11707_v37 = vld [vmem:[#allocation10_spill] sm:$0xff] }
 0x15d   : > { %11708 = vst [vmem:[#allocation10_spill] sm:$0xff] %v7327_v61 }
 0x15e   : > { %2338 = vmatpush.msra.mxu1 %v6990_v23  ;;  %v7252_v23 = vld [vmem:[%s6759_s7 + $0x578] sm:$0xff] }
 0x15f   : > { %v7238_v20 = vpop.f32.mrf.mxu2 }
 0x160   : > { %1192 = vmatmul.f32.gmra.mxu3 %v7235_v19  ;;  %2339 = vmatpush.msra.mxu1 %v6974_v17 }
 0x161   : > { %v7242_v24 = vpop.f32.mrf.mxu0 }
 0x162   : > { %2340 = vmatpush.msra.mxu1 %v6958_v11  ;;  %v7245_v25 = vpop.f32.mrf.mxu1 }
 0x163   : > { %v7247_v39 = vpop.f32.mrf.mxu3 }
 0x164   : > { %11696 = vst [vmem:[#allocation41_spill] sm:$0xff] %v7247_v39  ;;  %1320 = vmatmul.f32.gmra.mxu0 %v6857_v41  ;;  %2341 = vmatpush.msra.mxu1 %v6944_v5  ;;  %v7267_v41 = vld [vmem:[%s6759_s7 + $0x5a0] sm:$0xff] }
 0x166   : > { %2342 = vmatpush.msra.mxu1 %v6930_v0 }
 0x167   : > { %v7255_v26 = vpop.f32.mrf.mxu2 }
 0x168   : > { %1195 = vmatmul.f32.gmra.mxu3 %v7252_v23  ;;  %2343 = vmatpush.msra.mxu1 %v6916_v59  ;;  %v7278_v59 = vld [vmem:[%s6759_s7 + $0x5c8] sm:$0xff] }
 0x169   : > { %v7259_v11 = vpop.f32.mrf.mxu0 }
 0x16a   : > { %v7261_v17 = vpop.f32.mrf.mxu1 }
 0x16b   : > { %v7263_v32 = vpop.f32.mrf.mxu3 }
 0x16c   : > { %11697 = vst [vmem:[#allocation42_spill] sm:$0xff] %v7263_v32  ;;  %1323 = vmatmul.f32.gmra.mxu0 %v6865_v43  ;;  %v7320_v32 = vld [vmem:[%s6759_s7 + $0x668] sm:$0xff] }
 0x16f   : > { %v7269_v5 = vpop.f32.mrf.mxu2 }
 0x170   : > { %1198 = vmatmul.f32.gmra.mxu3 %v7267_v41 }
 0x171   : > { %v824_v0 = vpop.f32.mrf.mxu0 }
 0x172   : > { %v7272_v42 = vpop.f32.mrf.mxu1 }
 0x173   : > { %v7274_v44 = vpop.f32.mrf.mxu3 }
 0x174   : > { %11698 = vst [vmem:[#allocation43_spill] sm:$0xff] %v7274_v44  ;;  %1326 = vmatmul.f32.gmra.mxu0 %v6873_v45 }
 0x177   : > { %v7280_v50 = vpop.f32.mrf.mxu2 }
 0x178   : > { %1201 = vmatmul.f32.gmra.mxu3 %v7278_v59 }
 0x179   : > { %v827_v43 = vpop.f32.mrf.mxu0 }
 0x17a   : > { %v7283_v54 = vpop.f32.mrf.mxu1 }
 0x17b   : > { %v7285_v63 = vpop.f32.mrf.mxu3 }
 0x17c   : > { %11699 = vst [vmem:[#allocation44_spill] sm:$0xff] %v7285_v63  ;;  %1329 = vmatmul.f32.gmra.mxu0 %v6881_v47  ;;  %v11704_v63 = vld [vmem:[#allocation9_spill] sm:$0xff] }
 0x17d   : > { %11705 = vst [vmem:[#allocation9_spill] sm:$0xff] %v7320_v32 }
 0x17f   : > { %v7291_v16 = vpop.f32.mrf.mxu2 }
 0x180   : > { %1204 = vmatmul.f32.gmra.mxu3 %v7289_v10 }
 0x181   : > { %v830_v45 = vpop.f32.mrf.mxu0 }
 0x182   : > { %v7294_v40 = vpop.f32.mrf.mxu1 }
 0x183   : > { %v7296_v36 = vpop.f32.mrf.mxu3 }
 0x184   : > { %11700 = vst [vmem:[#allocation45_spill] sm:$0xff] %v7296_v36  ;;  %1332 = vmatmul.f32.gmra.mxu0 %v6889_v49 }
 0x187   : > { %v7302_v34 = vpop.f32.mrf.mxu2 }
 0x188   : > { %1207 = vmatmul.f32.gmra.mxu3 %v7300_v30 }
 0x189   : > { %v833_v47 = vpop.f32.mrf.mxu0 }
 0x18a   : > { %v7305_v46 = vpop.f32.mrf.mxu1 }
 0x18b   : > { %v7307_v48 = vpop.f32.mrf.mxu3 }
 0x18c   : > { %11701 = vst [vmem:[#allocation46_spill] sm:$0xff] %v7307_v48  ;;  %1335 = vmatmul.f32.gmra.mxu0 %v11702_v53 }
 0x18f   : > { %v1059_v22 = vpop.f32.mrf.mxu2 }
 0x190   : > { %1210 = vmatmul.f32.gmra.mxu3 %v7311_v18 }
 0x191   : > { %v836_v49 = vpop.f32.mrf.mxu0 }
 0x192   : > { %v7317_v44 = vpop.f32.mrf.mxu1 }
 0x193   : > { %v7314_v36 = vpop.f32.mrf.mxu3 }
 0x194   : > { %11703 = vst [vmem:[#allocation8_spill] sm:$0xff] %v7314_v36  ;;  %1338 = vmatmul.f32.gmra.mxu0 %v11704_v63 }
 0x197   : > { %v1062_v39 = vpop.f32.mrf.mxu2 }
 0x198   : > { %1213 = vmatmul.f32.gmra.mxu3 %v7320_v32 }
 0x199   : > { %v839_v48 = vpop.f32.mrf.mxu0 }
 0x19a   : > { %v7329_v57 = vpop.f32.mrf.mxu1 }
 0x19b   : > { %v7323_v53 = vpop.f32.mrf.mxu3 }
 0x19c   : > { %11706 = vst [vmem:[#allocation47_spill] sm:$0xff] %v7323_v53  ;;  %1341 = vmatmul.f32.gmra.mxu0 %v11707_v37  ;;  %v7336_v53 = vld [vmem:[%s6759_s7 + $0x6b8] sm:$0xff] }
 0x19f   : > { %v1065_v36 = vpop.f32.mrf.mxu2 }
 0x1a0   : > { %1216 = vmatmul.f32.gmra.mxu3 %v7327_v61 }
 0x1a1   : > { %v842_v63 = vpop.f32.mrf.mxu0 }
 0x1a2   : > { %1702 = vmatpush.msra.mxu2 %v842_v63  ;;  %v952_v32 = vpop.f32.mrf.mxu1  ;;  %v11713_v63 = vld [vmem:[#allocation12_spill] sm:$0xff] }
 0x1a3   : > { %v7332_v15 = vpop.f32.mrf.mxu3 }
 0x1a4   : > { %11709 = vst [vmem:[#allocation48_spill] sm:$0xff] %v7332_v15  ;;  %1344 = vmatmul.f32.gmra.mxu0 %v11710_v6  ;;  %1703 = vmatpush.msra.mxu2 %v839_v48  ;;  %v7345_v15 = vld [vmem:[%s6759_s7 + $0x30] sm:$0xff]  ;;  %v7348_v6 = vld [vmem:[%s6759_s7 + $0x6e0] sm:$0xff] }
 0x1a5   : > { %1511 = vmatmul.f32.gmra.mxu1 %v7345_v15 }
 0x1a6   : > { %1704 = vmatpush.msra.mxu2 %v836_v49  ;;  %v7361_v49 = vld [vmem:[%s6759_s7 + $0x58] sm:$0xff] }
 0x1a7   : > { %v1068_v37 = vpop.f32.mrf.mxu2 }
 0x1a8   : > { %1705 = vmatpush.msra.mxu2 %v833_v47  ;;  %1219 = vmatmul.f32.gmra.mxu3 %v7336_v53 }
 0x1a9   : > { %v7339_v27 = vpop.f32.mrf.mxu0 }
 0x1aa   : > { %11711 = vst [vmem:[#allocation11_spill] sm:$0xff] %v7339_v27  ;;  %1706 = vmatpush.msra.mxu2 %v830_v45  ;;  %v7528_v27 = vld [vmem:[%s6759_s7 + $0x848] sm:$0xff] }
 0x1ab   : > { %v7341_v61 = vpop.f32.mrf.mxu3 }
 0x1ac   : > { %11712 = vst [vmem:[#allocation49_spill] sm:$0xff] %v7341_v61  ;;  %1347 = vmatmul.f32.gmra.mxu0 %v11713_v63  ;;  %1707 = vmatpush.msra.mxu2 %v827_v43  ;;  %v955_v43 = vpop.f32.mrf.mxu1  ;;  %v7494_v63 = vld [vmem:[%s6759_s7 + $0x7f8] sm:$0xff]  ;;  %v7647_v61 = vld [vmem:[%s6759_s7 + $0x960] sm:$0xff] }
 0x1ad   : > { %1514 = vmatmul.f32.gmra.mxu1 %v7361_v49 }
 0x1ae   : > { %1708 = vmatpush.msra.mxu2 %v824_v0  ;;  %v11716_v0 = vld [vmem:[#allocation14_spill] sm:$0xff] }
 0x1b0   : > { %v1071_v47 = vpop.f32.mrf.mxu2  ;;  %1709 = vmatpush.msra.mxu2 %v7259_v11  ;;  %1222 = vmatmul.f32.gmra.mxu3 %v7348_v6  ;;  %v7365_v11 = vld [vmem:[%s6759_s7 + $0x708] sm:$0xff] }
 0x1b1   : > { %2119 = vmatpush.msra.mxu0 %v1071_v47  ;;  %v7353_v45 = vpop.f32.mrf.mxu0 }
 0x1b2   : > { %11714 = vst [vmem:[#allocation12_spill] sm:$0xff] %v7353_v45  ;;  %1710 = vmatpush.msra.mxu2 %v7242_v24 }
 0x1b3   : > { %2120 = vmatpush.msra.mxu0 %v1068_v37  ;;  %v7356_v48 = vpop.f32.mrf.mxu3  ;;  %v7488_v37 = vld [vmem:[%s6759_s7 + $0xd8] sm:$0xff] }
 0x1b4   : > { %11715 = vst [vmem:[#allocation50_spill] sm:$0xff] %v7356_v48  ;;  %1350 = vmatmul.f32.gmra.mxu0 %v11716_v0  ;;  %1711 = vmatpush.msra.mxu2 %v7225_v7  ;;  %v11738_v0 = vld [vmem:[#allocation28_spill] sm:$0xff]  ;;  %v7644_v48 = vld [vmem:[%s6759_s7 + $0x2b0] sm:$0xff] }
 0x1b5   : > { %2121 = vmatpush.msra.mxu0 %v1065_v36  ;;  %v7379_v36 = vld [vmem:[%s6759_s7 + $0x10] sm:$0xff] }
 0x1b6   : > { %1712 = vmatpush.msra.mxu2 %v7208_v2  ;;  %v11719_v2 = vld [vmem:[#allocation16_spill] sm:$0xff] }
 0x1b7   : > { %2122 = vmatpush.msra.mxu0 %v1062_v39  ;;  %v7382_v39 = vld [vmem:[%s6759_s7 + $0x80] sm:$0xff] }
 0x1b8   : > { %1713 = vmatpush.msra.mxu2 %v7187_v33  ;;  %1225 = vmatmul.f32.gmra.mxu3 %v7365_v11  ;;  %v958_v33 = vpop.f32.mrf.mxu1 }
 0x1b9   : > { %2123 = vmatpush.msra.mxu0 %v1059_v22  ;;  %v7370_v24 = vpop.f32.mrf.mxu0  ;;  %1517 = vmatmul.f32.gmra.mxu1 %v7382_v39  ;;  %v11734_v22 = vld [vmem:[#allocation26_spill] sm:$0xff] }
 0x1ba   : > { %11717 = vst [vmem:[#allocation14_spill] sm:$0xff] %v7370_v24  ;;  %1714 = vmatpush.msra.mxu2 %v7163_v12  ;;  %v7387_v12 = vld [vmem:[%s6759_s7 + $0x730] sm:$0xff] }
 0x1bb   : > { %2124 = vmatpush.msra.mxu0 %v7302_v34  ;;  %v7374_v7 = vpop.f32.mrf.mxu3  ;;  %v7401_v34 = vld [vmem:[%s6759_s7 + $0x38] sm:$0xff]  ;;  %11735 = vst [vmem:[#allocation26_spill] sm:$0xff] %v7488_v37 }
 0x1bc   : > { %11718 = vst [vmem:[#allocation51_spill] sm:$0xff] %v7374_v7  ;;  %1353 = vmatmul.f32.gmra.mxu0 %v11719_v2  ;;  %1715 = vmatpush.msra.mxu2 %v7143_v55  ;;  %v7505_v2 = vld [vmem:[%s6759_s7 + $0x100] sm:$0xff] }
 0x1bd   : > { %2125 = vmatpush.msra.mxu0 %v7291_v16  ;;  %v11722_v16 = vld [vmem:[#allocation18_spill] sm:$0xff]  ;;  %11739 = vst [vmem:[#allocation28_spill] sm:$0xff] %v7505_v2 }
 0x1be   : > { %1716 = vmatpush.msra.mxu2 %v7127_v58 }
 0x1bf   : > { %2126 = vmatpush.msra.mxu0 %v7280_v50  ;;  %1717 = vmatmul.f32.vlgmr.msra.gmra.mxu2 %v7379_v36  ;;  %v7404_v50 = vld [vmem:[%s6759_s7 + $0xa8] sm:$0xff] }
 0x1c0   : > { %2537 = vmatpush.msra.mxu2 %v958_v33  ;;  %1228 = vmatmul.f32.gmra.mxu3 %v7387_v12  ;;  %v7508_v33 = vld [vmem:[%s6759_s7 + $0x170] sm:$0xff] }
 0x1c1   : > { %2127 = vmatpush.msra.mxu0 %v7269_v5  ;;  %v7394_v55 = vpop.f32.mrf.mxu0  ;;  %v7409_v5 = vld [vmem:[%s6759_s7 + $0x758] sm:$0xff]  ;;  %1520 = vmatmul.f32.gmra.mxu1 %v7404_v50 }
 0x1c2   : > { %11720 = vst [vmem:[#allocation16_spill] sm:$0xff] %v7394_v55  ;;  %2538 = vmatpush.msra.mxu2 %v955_v43  ;;  %v7539_v55 = vld [vmem:[%s6759_s7 + $0x150] sm:$0xff] }
 0x1c3   : > { %2128 = vmatpush.msra.mxu0 %v7255_v26  ;;  %v7397_v58 = vpop.f32.mrf.mxu3 }
 0x1c4   : > { %11721 = vst [vmem:[#allocation52_spill] sm:$0xff] %v7397_v58  ;;  %1356 = vmatmul.f32.gmra.mxu0 %v11722_v16  ;;  %2539 = vmatpush.msra.mxu2 %v952_v32  ;;  %v7429_v32 = vld [vmem:[%s6759_s7 + $0xd0] sm:$0xff]  ;;  %v7511_v16 = vld [vmem:[%s6759_s7 + $0x820] sm:$0xff]  ;;  %v7630_v58 = vld [vmem:[%s6759_s7 + $0x938] sm:$0xff] }
 0x1c5   : > { %2129 = vmatpush.msra.mxu0 %v7238_v20  ;;  %v11725_v20 = vld [vmem:[#allocation20_spill] sm:$0xff] }
 0x1c6   : > { %2540 = vmatpush.msra.mxu2 %v7329_v57 }
 0x1c7   : > { %2130 = vmatpush.msra.mxu0 %v7221_v1  ;;  %1720 = vmatmul.f32.gmra.mxu2 %v7401_v34  ;;  %v7426_v1 = vld [vmem:[%s6759_s7 + $0x60] sm:$0xff] }
 0x1c8   : > { %2541 = vmatpush.msra.mxu2 %v7317_v44  ;;  %1231 = vmatmul.f32.gmra.mxu3 %v7409_v5  ;;  %v11728_v44 = vld [vmem:[#allocation22_spill] sm:$0xff] }
 0x1c9   : > { %2131 = vmatpush.msra.mxu0 %v7204_v51  ;;  %v7417_v26 = vpop.f32.mrf.mxu0  ;;  %v7434_v51 = vld [vmem:[%s6759_s7 + $0x780] sm:$0xff]  ;;  %1523 = vmatmul.f32.gmra.mxu1 %v7429_v32 }
 0x1ca   : > { %11723 = vst [vmem:[#allocation18_spill] sm:$0xff] %v7417_v26  ;;  %2542 = vmatpush.msra.mxu2 %v7305_v46  ;;  %v7473_v46 = vld [vmem:[%s6759_s7 + $0x120] sm:$0xff] }
 0x1cb   : > { %2132 = vmatpush.msra.mxu0 %v7183_v3  ;;  %v7421_v57 = vpop.f32.mrf.mxu3  ;;  %v7542_v26 = vld [vmem:[%s6759_s7 + $0x1c0] sm:$0xff] }
 0x1cc   : > { %11724 = vst [vmem:[#allocation53_spill] sm:$0xff] %v7421_v57  ;;  %1359 = vmatmul.f32.gmra.mxu0 %v11725_v20  ;;  %2543 = vmatpush.msra.mxu2 %v7294_v40  ;;  %v7470_v40 = vld [vmem:[%s6759_s7 + $0xb0] sm:$0xff]  ;;  %v7627_v57 = vld [vmem:[%s6759_s7 + $0x288] sm:$0xff] }
 0x1cd   : > { %2133 = vmatpush.msra.mxu0 %v7159_v28 }
 0x1ce   : > { %2544 = vmatpush.msra.mxu2 %v7283_v54  ;;  %v7449_v54 = vld [vmem:[%s6759_s7 + $0x88] sm:$0xff] }
 0x1cf   : > { %2134 = vmatpush.msra.mxu0 %v7137_v4  ;;  %1723 = vmatmul.f32.gmra.mxu2 %v7426_v1  ;;  %v7452_v4 = vld [vmem:[%s6759_s7 + $0xf8] sm:$0xff] }
 0x1d0   : > { %2545 = vmatpush.msra.mxu2 %v7272_v42  ;;  %1234 = vmatmul.f32.gmra.mxu3 %v7434_v51  ;;  %v7456_v42 = vld [vmem:[%s6759_s7 + $0x7a8] sm:$0xff] }
 0x1d1   : > { %v7441_v3 = vpop.f32.mrf.mxu0  ;;  %1526 = vmatmul.f32.gmra.mxu1 %v7452_v4 }
 0x1d2   : > { %11726 = vst [vmem:[#allocation20_spill] sm:$0xff] %v7441_v3  ;;  %2546 = vmatpush.msra.mxu2 %v7261_v17  ;;  %v7545_v3 = vld [vmem:[%s6759_s7 + $0x870] sm:$0xff] }
 0x1d3   : > { %v7444_v28 = vpop.f32.mrf.mxu3 }
 0x1d4   : > { %11727 = vst [vmem:[#allocation54_spill] sm:$0xff] %v7444_v28  ;;  %1362 = vmatmul.f32.gmra.mxu0 %v11728_v44  ;;  %2547 = vmatpush.msra.mxu2 %v7245_v25 }
 0x1d6   : > { %2548 = vmatpush.msra.mxu2 %v7228_v14  ;;  %v11731_v14 = vld [vmem:[#allocation24_spill] sm:$0xff] }
 0x1d7   : > { %1726 = vmatmul.f32.gmra.mxu2 %v7449_v54 }
 0x1d8   : > { %2549 = vmatpush.msra.mxu2 %v7211_v35  ;;  %1237 = vmatmul.f32.gmra.mxu3 %v7456_v42  ;;  %v7477_v35 = vld [vmem:[%s6759_s7 + $0x7d0] sm:$0xff] }
 0x1d9   : > { %v7462_v17 = vpop.f32.mrf.mxu0  ;;  %1529 = vmatmul.f32.gmra.mxu1 %v7473_v46 }
 0x1da   : > { %11729 = vst [vmem:[#allocation22_spill] sm:$0xff] %v7462_v17  ;;  %2550 = vmatpush.msra.mxu2 %v7191_v62 }
 0x1db   : > { %v7465_v25 = vpop.f32.mrf.mxu3 }
 0x1dc   : > { %11730 = vst [vmem:[#allocation55_spill] sm:$0xff] %v7465_v25  ;;  %1365 = vmatmul.f32.gmra.mxu0 %v11731_v14  ;;  %2551 = vmatpush.msra.mxu2 %v7167_v31  ;;  %v11742_v14 = vld [vmem:[#allocation30_spill] sm:$0xff] }
 0x1dd   : > { %v7613_v25 = vld [vmem:[%s6759_s7 + $0x910] sm:$0xff] }
 0x1de   : > { %2552 = vmatpush.msra.mxu2 %v7146_v29  ;;  %v7491_v29 = vld [vmem:[%s6759_s7 + $0x148] sm:$0xff] }
 0x1df   : > { %1729 = vmatmul.f32.gmra.mxu2 %v7470_v40 }
 0x1e0   : > { %1240 = vmatmul.f32.gmra.mxu3 %v7477_v35 }
 0x1e1   : > { %v7482_v62 = vpop.f32.mrf.mxu0  ;;  %1532 = vmatmul.f32.gmra.mxu1 %v7491_v29 }
 0x1e2   : > { %11732 = vst [vmem:[#allocation24_spill] sm:$0xff] %v7482_v62 }
 0x1e3   : > { %v7484_v31 = vpop.f32.mrf.mxu3 }
 0x1e4   : > { %11733 = vst [vmem:[#allocation56_spill] sm:$0xff] %v7484_v31  ;;  %1368 = vmatmul.f32.gmra.mxu0 %v11734_v22  ;;  %v7522_v22 = vld [vmem:[%s6759_s7 + $0x128] sm:$0xff]  ;;  %v7610_v31 = vld [vmem:[%s6759_s7 + $0x260] sm:$0xff] }
 0x1e5   : > { %11743 = vst [vmem:[#allocation30_spill] sm:$0xff] %v7522_v22 }
 0x1e7   : > { %1732 = vmatmul.f32.gmra.mxu2 %v7488_v37  ;;  %v7700_v37 = vld [vmem:[%s6759_s7 + $0x9d8] sm:$0xff] }
 0x1e8   : > { %1243 = vmatmul.f32.gmra.mxu3 %v7494_v63 }
 0x1e9   : > { %v7499_v47 = vpop.f32.mrf.mxu0  ;;  %1535 = vmatmul.f32.gmra.mxu1 %v7508_v33 }
 0x1ea   : > { %11736 = vst [vmem:[#allocation57_spill] sm:$0xff] %v7499_v47  ;;  %v7559_v47 = vld [vmem:[%s6759_s7 + $0x1e8] sm:$0xff] }
 0x1eb   : > { %v7501_v43 = vpop.f32.mrf.mxu3 }
 0x1ec   : > { %11737 = vst [vmem:[#allocation58_spill] sm:$0xff] %v7501_v43  ;;  %1371 = vmatmul.f32.gmra.mxu0 %v11738_v0  ;;  %v7525_v0 = vld [vmem:[%s6759_s7 + $0x198] sm:$0xff]  ;;  %v7596_v43 = vld [vmem:[%s6759_s7 + $0x8e8] sm:$0xff] }
 0x1ef   : > { %1735 = vmatmul.f32.gmra.mxu2 %v7505_v2  ;;  %v7697_v2 = vld [vmem:[%s6759_s7 + $0x328] sm:$0xff] }
 0x1f0   : > { %1246 = vmatmul.f32.gmra.mxu3 %v7511_v16 }
 0x1f1   : > { %v7516_v20 = vpop.f32.mrf.mxu0  ;;  %1538 = vmatmul.f32.gmra.mxu1 %v7525_v0 }
 0x1f2   : > { %11740 = vst [vmem:[#allocation59_spill] sm:$0xff] %v7516_v20  ;;  %v7562_v20 = vld [vmem:[%s6759_s7 + $0x898] sm:$0xff] }
 0x1f3   : > { %v7518_v44 = vpop.f32.mrf.mxu3 }
 0x1f4   : > { %11741 = vst [vmem:[#allocation60_spill] sm:$0xff] %v7518_v44  ;;  %1374 = vmatmul.f32.gmra.mxu0 %v11742_v14  ;;  %v11746_v14 = vld [vmem:[#allocation32_spill] sm:$0xff]  ;;  %v7593_v44 = vld [vmem:[%s6759_s7 + $0x238] sm:$0xff] }
 0x1f5   : > { %11747 = vst [vmem:[#allocation32_spill] sm:$0xff] %v7539_v55 }
 0x1f7   : > { %1738 = vmatmul.f32.gmra.mxu2 %v7522_v22  ;;  %v7694_v22 = vld [vmem:[%s6759_s7 + $0x2b8] sm:$0xff] }
 0x1f8   : > { %1249 = vmatmul.f32.gmra.mxu3 %v7528_v27  ;;  %11775 = vst [vmem:[#allocation90_spill] sm:$0xff] %v7694_v22 }
 0x1f9   : > { %v7533_v45 = vpop.f32.mrf.mxu0  ;;  %1541 = vmatmul.f32.gmra.mxu1 %v7542_v26 }
 0x1fa   : > { %11744 = vst [vmem:[#allocation61_spill] sm:$0xff] %v7533_v45 }
 0x1fb   : > { %v7535_v24 = vpop.f32.mrf.mxu3 }
 0x1fc   : > { %11745 = vst [vmem:[#allocation62_spill] sm:$0xff] %v7535_v24  ;;  %1377 = vmatmul.f32.gmra.mxu0 %v11746_v14  ;;  %v7556_v14 = vld [vmem:[%s6759_s7 + $0x178] sm:$0xff]  ;;  %v7579_v24 = vld [vmem:[%s6759_s7 + $0x8c0] sm:$0xff] }
 0x1fd   : > { %11750 = vst [vmem:[#allocation65_spill] sm:$0xff] %v7556_v14 }
 0x1ff   : > { %1741 = vmatmul.f32.gmra.mxu2 %v7539_v55 }
 0x200   : > { %1252 = vmatmul.f32.gmra.mxu3 %v7545_v3 }
 0x201   : > { %v7550_v17 = vpop.f32.mrf.mxu0  ;;  %1544 = vmatmul.f32.gmra.mxu1 %v7559_v47 }
 0x202   : > { %11748 = vst [vmem:[#allocation63_spill] sm:$0xff] %v7550_v17 }
 0x203   : > { %v7552_v62 = vpop.f32.mrf.mxu3 }
 0x204   : > { %11749 = vst [vmem:[#allocation64_spill] sm:$0xff] %v7552_v62  ;;  %1380 = vmatmul.f32.gmra.mxu0 %v7111_v13  ;;  %v7573_v13 = vld [vmem:[%s6759_s7 + $0x1a0] sm:$0xff]  ;;  %v7576_v62 = vld [vmem:[%s6759_s7 + $0x210] sm:$0xff] }
 0x205   : > { %11753 = vst [vmem:[#allocation68_spill] sm:$0xff] %v7573_v13 }
 0x207   : > { %1744 = vmatmul.f32.gmra.mxu2 %v7556_v14  ;;  %v7681_v14 = vld [vmem:[%s6759_s7 + $0x9b0] sm:$0xff] }
 0x208   : > { %1255 = vmatmul.f32.gmra.mxu3 %v7562_v20 }
 0x209   : > { %v7567_v45 = vpop.f32.mrf.mxu0  ;;  %1547 = vmatmul.f32.gmra.mxu1 %v7576_v62 }
 0x20a   : > { %11751 = vst [vmem:[#allocation66_spill] sm:$0xff] %v7567_v45 }
 0x20b   : > { %v7569_v17 = vpop.f32.mrf.mxu3 }
 0x20c   : > { %11752 = vst [vmem:[#allocation67_spill] sm:$0xff] %v7569_v17  ;;  %1383 = vmatmul.f32.gmra.mxu0 %v7123_v60  ;;  %v7590_v60 = vld [vmem:[%s6759_s7 + $0x1c8] sm:$0xff] }
 0x20d   : > { %11756 = vst [vmem:[#allocation71_spill] sm:$0xff] %v7590_v60 }
 0x20f   : > { %1747 = vmatmul.f32.gmra.mxu2 %v7573_v13  ;;  %v7678_v13 = vld [vmem:[%s6759_s7 + $0x300] sm:$0xff] }
 0x210   : > { %1258 = vmatmul.f32.gmra.mxu3 %v7579_v24 }
 0x211   : > { %v7584_v45 = vpop.f32.mrf.mxu0  ;;  %1550 = vmatmul.f32.gmra.mxu1 %v7593_v44 }
 0x212   : > { %11754 = vst [vmem:[#allocation69_spill] sm:$0xff] %v7584_v45 }
 0x213   : > { %v7586_v17 = vpop.f32.mrf.mxu3 }
 0x214   : > { %11755 = vst [vmem:[#allocation70_spill] sm:$0xff] %v7586_v17  ;;  %1386 = vmatmul.f32.gmra.mxu0 %v7134_v38  ;;  %v7607_v38 = vld [vmem:[%s6759_s7 + $0x1f0] sm:$0xff] }
 0x215   : > { %11759 = vst [vmem:[#allocation74_spill] sm:$0xff] %v7607_v38 }
 0x217   : > { %1750 = vmatmul.f32.gmra.mxu2 %v7590_v60  ;;  %v7664_v60 = vld [vmem:[%s6759_s7 + $0x988] sm:$0xff] }
 0x218   : > { %1261 = vmatmul.f32.gmra.mxu3 %v7596_v43 }
 0x219   : > { %v7601_v45 = vpop.f32.mrf.mxu0  ;;  %1553 = vmatmul.f32.gmra.mxu1 %v7610_v31 }
 0x21a   : > { %11757 = vst [vmem:[#allocation72_spill] sm:$0xff] %v7601_v45  ;;  %v1509_v45 = vpop.f32.mrf.mxu1 }
 0x21b   : > { %v7603_v17 = vpop.f32.mrf.mxu3 }
 0x21c   : > { %11758 = vst [vmem:[#allocation73_spill] sm:$0xff] %v7603_v17  ;;  %1389 = vmatmul.f32.gmra.mxu0 %v7155_v9  ;;  %v7624_v9 = vld [vmem:[%s6759_s7 + $0x218] sm:$0xff] }
 0x21d   : > { %11762 = vst [vmem:[#allocation77_spill] sm:$0xff] %v7624_v9 }
 0x21f   : > { %1753 = vmatmul.f32.gmra.mxu2 %v7607_v38  ;;  %v7661_v38 = vld [vmem:[%s6759_s7 + $0x2d8] sm:$0xff] }
 0x220   : > { %1264 = vmatmul.f32.gmra.mxu3 %v7613_v25 }
 0x221   : > { %v7618_v28 = vpop.f32.mrf.mxu0  ;;  %1556 = vmatmul.f32.gmra.mxu1 %v7627_v57 }
 0x222   : > { %11760 = vst [vmem:[#allocation75_spill] sm:$0xff] %v7618_v28 }
 0x223   : > { %v7620_v17 = vpop.f32.mrf.mxu3 }
 0x224   : > { %11761 = vst [vmem:[#allocation76_spill] sm:$0xff] %v7620_v17  ;;  %1392 = vmatmul.f32.gmra.mxu0 %v7176_v21  ;;  %v1512_v17 = vpop.f32.mrf.mxu1  ;;  %v7641_v21 = vld [vmem:[%s6759_s7 + $0x240] sm:$0xff] }
 0x225   : > { %11765 = vst [vmem:[#allocation80_spill] sm:$0xff] %v7641_v21 }
 0x227   : > { %1756 = vmatmul.f32.gmra.mxu2 %v7624_v9 }
 0x228   : > { %1267 = vmatmul.f32.gmra.mxu3 %v7630_v58 }
 0x229   : > { %v7635_v28 = vpop.f32.mrf.mxu0  ;;  %1559 = vmatmul.f32.gmra.mxu1 %v7644_v48 }
 0x22a   : > { %11763 = vst [vmem:[#allocation78_spill] sm:$0xff] %v7635_v28 }
 0x22b   : > { %v7637_v7 = vpop.f32.mrf.mxu3 }
 0x22c   : > { %11764 = vst [vmem:[#allocation79_spill] sm:$0xff] %v7637_v7  ;;  %1395 = vmatmul.f32.gmra.mxu0 %v7200_v52  ;;  %v1515_v7 = vpop.f32.mrf.mxu1  ;;  %v7658_v52 = vld [vmem:[%s6759_s7 + $0x268] sm:$0xff] }
 0x22d   : > { %11768 = vst [vmem:[#allocation83_spill] sm:$0xff] %v7658_v52 }
 0x22f   : > { %1759 = vmatmul.f32.gmra.mxu2 %v7641_v21 }
 0x230   : > { %1270 = vmatmul.f32.gmra.mxu3 %v7647_v61 }
 0x231   : > { %v7652_v28 = vpop.f32.mrf.mxu0  ;;  %1562 = vmatmul.f32.gmra.mxu1 %v7661_v38 }
 0x232   : > { %11766 = vst [vmem:[#allocation81_spill] sm:$0xff] %v7652_v28 }
 0x233   : > { %v7654_v9 = vpop.f32.mrf.mxu3 }
 0x234   : > { %11767 = vst [vmem:[#allocation82_spill] sm:$0xff] %v7654_v9  ;;  %1398 = vmatmul.f32.gmra.mxu0 %v7218_v56  ;;  %v7675_v56 = vld [vmem:[%s6759_s7 + $0x290] sm:$0xff] }
 0x235   : > { %11771 = vst [vmem:[#allocation86_spill] sm:$0xff] %v7675_v56 }
 0x236   : > { %v1518_v28 = vpop.f32.mrf.mxu1 }
 0x237   : > { %1762 = vmatmul.f32.gmra.mxu2 %v7658_v52 }
 0x238   : > { %1273 = vmatmul.f32.gmra.mxu3 %v7664_v60 }
 0x239   : > { %v7669_v21 = vpop.f32.mrf.mxu0  ;;  %1565 = vmatmul.f32.gmra.mxu1 %v7678_v13 }
 0x23a   : > { %11769 = vst [vmem:[#allocation84_spill] sm:$0xff] %v7669_v21 }
 0x23b   : > { %v7671_v9 = vpop.f32.mrf.mxu3 }
 0x23c   : > { %11770 = vst [vmem:[#allocation85_spill] sm:$0xff] %v7671_v9  ;;  %1401 = vmatmul.f32.gmra.mxu0 %v7235_v19 }
 0x23e   : > { %v1521_v9 = vpop.f32.mrf.mxu1 }
 0x23f   : > { %1765 = vmatmul.f32.gmra.mxu2 %v7675_v56  ;;  %v7716_v56 = vld [vmem:[%s6759_s7 + $0x350] sm:$0xff] }
 0x240   : > { %1276 = vmatmul.f32.gmra.mxu3 %v7681_v14 }
 0x241   : > { %v7686_v21 = vpop.f32.mrf.mxu0  ;;  %1568 = vmatmul.f32.gmra.mxu1 %v7697_v2 }
 0x242   : > { %11772 = vst [vmem:[#allocation87_spill] sm:$0xff] %v7686_v21  ;;  %v1718_v52 = vpop.f32.mrf.mxu2 }
 0x243   : > { %v7688_v55 = vadd.f32 %v1718_v52, %v1509_v45  ;;  %v7690_v19 = vpop.f32.mrf.mxu3 }
 0x244   : > { %11774 = vst [vmem:[#allocation89_spill] sm:$0xff] %v7690_v19  ;;  %1404 = vmatmul.f32.gmra.mxu0 %v7252_v23 }
 0x245   : > { %11773 = vst [vmem:[#allocation88_spill] sm:$0xff] %v7688_v55  ;;  %v7713_v55 = vld [vmem:[%s6759_s7 + $0x2e0] sm:$0xff] }
 0x246   : > { %v1524_v23 = vpop.f32.mrf.mxu1 }
 0x247   : > { %1768 = vmatmul.f32.gmra.mxu2 %v7694_v22  ;;  %v7732_v22 = vld [vmem:[%s6759_s7 + $0x378] sm:$0xff] }
 0x248   : > { %1279 = vmatmul.f32.gmra.mxu3 %v7700_v37 }
 0x249   : > { %v7705_v45 = vpop.f32.mrf.mxu0  ;;  %1571 = vmatmul.f32.gmra.mxu1 %v7716_v56 }
 0x24a   : > { %11776 = vst [vmem:[#allocation91_spill] sm:$0xff] %v7705_v45  ;;  %v1721_v52 = vpop.f32.mrf.mxu2 }
 0x24b   : > { %v7707_v21 = vadd.f32 %v1721_v52, %v1512_v17  ;;  %v7709_v19 = vpop.f32.mrf.mxu3 }
 0x24c   : > { %11778 = vst [vmem:[#allocation93_spill] sm:$0xff] %v7709_v19  ;;  %1407 = vmatmul.f32.gmra.mxu0 %v7267_v41  ;;  %v7729_v41 = vld [vmem:[%s6759_s7 + $0x308] sm:$0xff] }
 0x24d   : > { %11777 = vst [vmem:[#allocation92_spill] sm:$0xff] %v7707_v21 }
 0x24e   : > { %v1527_v19 = vpop.f32.mrf.mxu1 }
 0x24f   : > { %1771 = vmatmul.f32.gmra.mxu2 %v7713_v55 }
 0x250   : > { %1926 = vmatmul.f32.vlgmr.msra.gmra.mxu3 %v7180_v8 }
 0x251   : > { %v7721_v45 = vpop.f32.mrf.mxu0  ;;  %1574 = vmatmul.f32.gmra.mxu1 %v7732_v22 }
 0x252   : > { %11779 = vst [vmem:[#allocation94_spill] sm:$0xff] %v7721_v45  ;;  %v1724_v17 = vpop.f32.mrf.mxu2 }
 0x253   : > { %v7723_v52 = vadd.f32 %v1724_v17, %v1515_v7  ;;  %v7725_v21 = vpop.f32.mrf.mxu3 }
 0x254   : > { %11781 = vst [vmem:[#allocation96_spill] sm:$0xff] %v7725_v21  ;;  %1410 = vmatmul.f32.gmra.mxu0 %v7278_v59  ;;  %v7745_v59 = vld [vmem:[%s6759_s7 + $0x330] sm:$0xff] }
 0x255   : > { %11780 = vst [vmem:[#allocation95_spill] sm:$0xff] %v7723_v52  ;;  %v7748_v52 = vld [vmem:[%s6759_s7 + $0x3a0] sm:$0xff] }
 0x256   : > { %v1530_v45 = vpop.f32.mrf.mxu1 }
 0x257   : > { %1774 = vmatmul.f32.gmra.mxu2 %v7729_v41 }
 0x258   : > { %1929 = vmatmul.f32.gmra.mxu3 %v7345_v15 }
 0x259   : > { %v7737_v8 = vpop.f32.mrf.mxu0  ;;  %1577 = vmatmul.f32.gmra.mxu1 %v7748_v52 }
 0x25a   : > { %11782 = vst [vmem:[#allocation97_spill] sm:$0xff] %v7737_v8  ;;  %v1727_v7 = vpop.f32.mrf.mxu2 }
 0x25b   : > { %v7739_v17 = vadd.f32 %v1727_v7, %v1518_v28  ;;  %v7741_v21 = vpop.f32.mrf.mxu3 }
 0x25c   : > { %11784 = vst [vmem:[#allocation99_spill] sm:$0xff] %v7741_v21  ;;  %1413 = vmatmul.f32.gmra.mxu0 %v7289_v10  ;;  %v7761_v10 = vld [vmem:[%s6759_s7 + $0x358] sm:$0xff] }
 0x25d   : > { %11783 = vst [vmem:[#allocation98_spill] sm:$0xff] %v7739_v17  ;;  %v7764_v17 = vld [vmem:[%s6759_s7 + $0x3c8] sm:$0xff] }
 0x25e   : > { %v1533_v8 = vpop.f32.mrf.mxu1  ;;  %11788 = vst [vmem:[#allocation103_spill] sm:$0xff] %v7761_v10 }
 0x25f   : > { %1777 = vmatmul.f32.gmra.mxu2 %v7745_v59 }
 0x260   : > { %1932 = vmatmul.f32.gmra.mxu3 %v7361_v49 }
 0x261   : > { %v7753_v15 = vpop.f32.mrf.mxu0  ;;  %1580 = vmatmul.f32.gmra.mxu1 %v7764_v17 }
 0x262   : > { %11785 = vst [vmem:[#allocation100_spill] sm:$0xff] %v7753_v15  ;;  %v1730_v28 = vpop.f32.mrf.mxu2 }
 0x263   : > { %v7755_v7 = vadd.f32 %v1730_v28, %v1521_v9  ;;  %v7757_v21 = vpop.f32.mrf.mxu3 }
 0x264   : > { %11787 = vst [vmem:[#allocation102_spill] sm:$0xff] %v7757_v21  ;;  %1416 = vmatmul.f32.gmra.mxu0 %v7300_v30  ;;  %v7777_v30 = vld [vmem:[%s6759_s7 + $0x380] sm:$0xff] }
 0x265   : > { %11786 = vst [vmem:[#allocation101_spill] sm:$0xff] %v7755_v7  ;;  %v7780_v7 = vld [vmem:[%s6759_s7 + $0x3f0] sm:$0xff] }
 0x266   : > { %v1536_v15 = vpop.f32.mrf.mxu1  ;;  %11792 = vst [vmem:[#allocation107_spill] sm:$0xff] %v7777_v30 }
 0x267   : > { %1780 = vmatmul.f32.gmra.mxu2 %v7761_v10  ;;  %v7796_v10 = vld [vmem:[%s6759_s7 + $0x418] sm:$0xff] }
 0x268   : > { %1935 = vmatmul.f32.gmra.mxu3 %v7382_v39 }
 0x269   : > { %v7769_v49 = vpop.f32.mrf.mxu0  ;;  %1583 = vmatmul.f32.gmra.mxu1 %v7780_v7 }
 0x26a   : > { %11789 = vst [vmem:[#allocation104_spill] sm:$0xff] %v7769_v49  ;;  %v1733_v9 = vpop.f32.mrf.mxu2 }
 0x26b   : > { %v7771_v28 = vadd.f32 %v1733_v9, %v1524_v23  ;;  %v7773_v21 = vpop.f32.mrf.mxu3 }
 0x26c   : > { %11791 = vst [vmem:[#allocation106_spill] sm:$0xff] %v7773_v21  ;;  %1419 = vmatmul.f32.gmra.mxu0 %v7311_v18  ;;  %v11796_v18 = vld [vmem:[#allocation9_spill] sm:$0xff] }
 0x26d   : > { %11790 = vst [vmem:[#allocation105_spill] sm:$0xff] %v7771_v28  ;;  %v7793_v28 = vld [vmem:[%s6759_s7 + $0x3a8] sm:$0xff] }
 0x26e   : > { %v1539_v49 = vpop.f32.mrf.mxu1 }
 0x26f   : > { %1783 = vmatmul.f32.gmra.mxu2 %v7777_v30  ;;  %v7812_v30 = vld [vmem:[%s6759_s7 + $0x440] sm:$0xff] }
 0x270   : > { %1938 = vmatmul.f32.gmra.mxu3 %v7404_v50 }
 0x271   : > { %v7785_v39 = vpop.f32.mrf.mxu0  ;;  %1586 = vmatmul.f32.gmra.mxu1 %v7796_v10 }
 0x272   : > { %11793 = vst [vmem:[#allocation108_spill] sm:$0xff] %v7785_v39  ;;  %v1736_v23 = vpop.f32.mrf.mxu2 }
 0x273   : > { %v7787_v9 = vadd.f32 %v1736_v23, %v1527_v19  ;;  %v7789_v21 = vpop.f32.mrf.mxu3 }
 0x274   : > { %11795 = vst [vmem:[#allocation110_spill] sm:$0xff] %v7789_v21  ;;  %1422 = vmatmul.f32.gmra.mxu0 %v11796_v18  ;;  %v11800_v18 = vld [vmem:[#allocation10_spill] sm:$0xff] }
 0x275   : > { %11794 = vst [vmem:[#allocation109_spill] sm:$0xff] %v7787_v9  ;;  %v7809_v9 = vld [vmem:[%s6759_s7 + $0x3d0] sm:$0xff] }
 0x276   : > { %v1542_v39 = vpop.f32.mrf.mxu1 }
 0x277   : > { %1786 = vmatmul.f32.gmra.mxu2 %v7793_v28 }
 0x278   : > { %1941 = vmatmul.f32.gmra.mxu3 %v7429_v32 }
 0x279   : > { %v7801_v50 = vpop.f32.mrf.mxu0  ;;  %1589 = vmatmul.f32.gmra.mxu1 %v7812_v30 }
 0x27a   : > { %11797 = vst [vmem:[#allocation9_spill] sm:$0xff] %v7801_v50  ;;  %v1739_v19 = vpop.f32.mrf.mxu2 }
 0x27b   : > { %v7803_v23 = vadd.f32 %v1739_v19, %v1530_v45  ;;  %v7805_v21 = vpop.f32.mrf.mxu3 }
 0x27c   : > { %11799 = vst [vmem:[#allocation112_spill] sm:$0xff] %v7805_v21  ;;  %1425 = vmatmul.f32.gmra.mxu0 %v11800_v18  ;;  %v7825_v18 = vld [vmem:[%s6759_s7 + $0x3f8] sm:$0xff] }
 0x27d   : > { %11798 = vst [vmem:[#allocation111_spill] sm:$0xff] %v7803_v23  ;;  %v7828_v23 = vld [vmem:[%s6759_s7 + $0x468] sm:$0xff] }
 0x27e   : > { %v1545_v50 = vpop.f32.mrf.mxu1 }
 0x27f   : > { %1789 = vmatmul.f32.gmra.mxu2 %v7809_v9 }
 0x280   : > { %1944 = vmatmul.f32.gmra.mxu3 %v7452_v4 }
 0x281   : > { %v7817_v32 = vpop.f32.mrf.mxu0  ;;  %1592 = vmatmul.f32.gmra.mxu1 %v7828_v23 }
 0x282   : > { %11801 = vst [vmem:[#allocation10_spill] sm:$0xff] %v7817_v32  ;;  %v1742_v45 = vpop.f32.mrf.mxu2 }
 0x283   : > { %v7819_v19 = vadd.f32 %v1742_v45, %v1533_v8  ;;  %v7821_v21 = vpop.f32.mrf.mxu3 }
 0x284   : > { %11803 = vst [vmem:[#allocation114_spill] sm:$0xff] %v7821_v21  ;;  %1428 = vmatmul.f32.gmra.mxu0 %v7336_v53  ;;  %v7841_v53 = vld [vmem:[%s6759_s7 + $0x420] sm:$0xff] }
 0x285   : > { %11802 = vst [vmem:[#allocation113_spill] sm:$0xff] %v7819_v19  ;;  %v7844_v19 = vld [vmem:[%s6759_s7 + $0x490] sm:$0xff] }
 0x286   : > { %v1548_v32 = vpop.f32.mrf.mxu1 }
 0x287   : > { %1792 = vmatmul.f32.gmra.mxu2 %v7825_v18 }
 0x288   : > { %1947 = vmatmul.f32.gmra.mxu3 %v7473_v46 }
 0x289   : > { %v7833_v4 = vpop.f32.mrf.mxu0  ;;  %1595 = vmatmul.f32.gmra.mxu1 %v7844_v19 }
 0x28a   : > { %11804 = vst [vmem:[#allocation115_spill] sm:$0xff] %v7833_v4  ;;  %v1745_v8 = vpop.f32.mrf.mxu2 }
 0x28b   : > { %v7835_v45 = vadd.f32 %v1745_v8, %v1536_v15  ;;  %v7837_v21 = vpop.f32.mrf.mxu3 }
 0x28c   : > { %11806 = vst [vmem:[#allocation117_spill] sm:$0xff] %v7837_v21  ;;  %1431 = vmatmul.f32.gmra.mxu0 %v7348_v6  ;;  %v7857_v6 = vld [vmem:[%s6759_s7 + $0x448] sm:$0xff] }
 0x28d   : > { %11805 = vst [vmem:[#allocation116_spill] sm:$0xff] %v7835_v45  ;;  %v7860_v45 = vld [vmem:[%s6759_s7 + $0x4b8] sm:$0xff] }
 0x28e   : > { %v1551_v4 = vpop.f32.mrf.mxu1 }
 0x28f   : > { %1795 = vmatmul.f32.gmra.mxu2 %v7841_v53 }
 0x290   : > { %1950 = vmatmul.f32.gmra.mxu3 %v7491_v29 }
 0x291   : > { %v7849_v46 = vpop.f32.mrf.mxu0  ;;  %1598 = vmatmul.f32.gmra.mxu1 %v7860_v45 }
 0x292   : > { %11807 = vst [vmem:[#allocation118_spill] sm:$0xff] %v7849_v46  ;;  %v1748_v15 = vpop.f32.mrf.mxu2 }
 0x293   : > { %v7851_v8 = vadd.f32 %v1748_v15, %v1539_v49  ;;  %v7853_v21 = vpop.f32.mrf.mxu3 }
 0x294   : > { %11809 = vst [vmem:[#allocation120_spill] sm:$0xff] %v7853_v21  ;;  %1434 = vmatmul.f32.gmra.mxu0 %v7365_v11  ;;  %v7873_v11 = vld [vmem:[%s6759_s7 + $0x470] sm:$0xff] }
 0x295   : > { %11808 = vst [vmem:[#allocation119_spill] sm:$0xff] %v7851_v8  ;;  %v7876_v8 = vld [vmem:[%s6759_s7 + $0x4e0] sm:$0xff] }
 0x296   : > { %v1554_v46 = vpop.f32.mrf.mxu1 }
 0x297   : > { %1798 = vmatmul.f32.gmra.mxu2 %v7857_v6 }
 0x298   : > { %1953 = vmatmul.f32.gmra.mxu3 %v7508_v33 }
 0x299   : > { %v7865_v29 = vpop.f32.mrf.mxu0  ;;  %1601 = vmatmul.f32.gmra.mxu1 %v7876_v8 }
 0x29a   : > { %11810 = vst [vmem:[#allocation121_spill] sm:$0xff] %v7865_v29  ;;  %v1751_v49 = vpop.f32.mrf.mxu2 }
 0x29b   : > { %v7867_v15 = vadd.f32 %v1751_v49, %v1542_v39  ;;  %v7869_v21 = vpop.f32.mrf.mxu3 }
 0x29c   : > { %11812 = vst [vmem:[#allocation123_spill] sm:$0xff] %v7869_v21  ;;  %1437 = vmatmul.f32.gmra.mxu0 %v7387_v12  ;;  %v7889_v12 = vld [vmem:[%s6759_s7 + $0x498] sm:$0xff] }
 0x29d   : > { %11811 = vst [vmem:[#allocation122_spill] sm:$0xff] %v7867_v15  ;;  %v7892_v15 = vld [vmem:[%s6759_s7 + $0x508] sm:$0xff] }
 0x29e   : > { %v1557_v29 = vpop.f32.mrf.mxu1 }
 0x29f   : > { %1801 = vmatmul.f32.gmra.mxu2 %v7873_v11 }
 0x2a0   : > { %1956 = vmatmul.f32.gmra.mxu3 %v7525_v0 }
 0x2a1   : > { %v7881_v33 = vpop.f32.mrf.mxu0  ;;  %1604 = vmatmul.f32.gmra.mxu1 %v7892_v15 }
 0x2a2   : > { %11813 = vst [vmem:[#allocation124_spill] sm:$0xff] %v7881_v33  ;;  %v1754_v39 = vpop.f32.mrf.mxu2 }
 0x2a3   : > { %v7883_v49 = vadd.f32 %v1754_v39, %v1545_v50  ;;  %v7885_v21 = vpop.f32.mrf.mxu3 }
 0x2a4   : > { %11815 = vst [vmem:[#allocation126_spill] sm:$0xff] %v7885_v21  ;;  %1440 = vmatmul.f32.gmra.mxu0 %v7409_v5  ;;  %v387_v5 = vld [vmem:[%s6759_s7 + $0x4c0] sm:$0xff] }
 0x2a5   : > { %11814 = vst [vmem:[#allocation125_spill] sm:$0xff] %v7883_v49  ;;  %v7906_v49 = vld [vmem:[%s6759_s7 + $0x530] sm:$0xff] }
 0x2a6   : > { %v1560_v33 = vpop.f32.mrf.mxu1 }
 0x2a7   : > { %1804 = vmatmul.f32.gmra.mxu2 %v7889_v12 }
 0x2a8   : > { %1959 = vmatmul.f32.gmra.mxu3 %v7542_v26 }
 0x2a9   : > { %v7897_v0 = vpop.f32.mrf.mxu0  ;;  %1607 = vmatmul.f32.gmra.mxu1 %v7906_v49 }
 0x2aa   : > { %11816 = vst [vmem:[#allocation127_spill] sm:$0xff] %v7897_v0  ;;  %v1757_v50 = vpop.f32.mrf.mxu2 }
 0x2ab   : > { %v7899_v39 = vadd.f32 %v1757_v50, %v1548_v32  ;;  %v7901_v21 = vpop.f32.mrf.mxu3 }
 0x2ac   : > { %11818 = vst [vmem:[#allocation129_spill] sm:$0xff] %v7901_v21  ;;  %1443 = vmatmul.f32.gmra.mxu0 %v7434_v51  ;;  %v389_v51 = vld [vmem:[%s6759_s7 + $0x4e8] sm:$0xff]  ;;  %v7919_v21 = vld [vmem:[%s6759_s7 + $0x558] sm:$0xff] }
 0x2ad   : > { %11817 = vst [vmem:[#allocation128_spill] sm:$0xff] %v7899_v39 }
 0x2ae   : > { %v1563_v50 = vpop.f32.mrf.mxu1 }
 0x2af   : > { %1807 = vmatmul.f32.gmra.mxu2 %v387_v5 }
 0x2b0   : > { %1962 = vmatmul.f32.gmra.mxu3 %v7559_v47 }
 0x2b1   : > { %v7910_v26 = vpop.f32.mrf.mxu0  ;;  %1610 = vmatmul.f32.gmra.mxu1 %v7919_v21 }
 0x2b2   : > { %11819 = vst [vmem:[#allocation130_spill] sm:$0xff] %v7910_v26  ;;  %v1760_v0 = vpop.f32.mrf.mxu2 }
 0x2b3   : > { %v7912_v32 = vadd.f32 %v1760_v0, %v1551_v4  ;;  %v7914_v39 = vpop.f32.mrf.mxu3 }
 0x2b4   : > { %11820 = vst [vmem:[#allocation131_spill] sm:$0xff] %v7914_v39  ;;  %1446 = vmatmul.f32.gmra.mxu0 %v7456_v42  ;;  %v391_v42 = vld [vmem:[%s6759_s7 + $0x510] sm:$0xff]  ;;  %v7932_v39 = vld [vmem:[%s6759_s7 + $0x580] sm:$0xff] }
 0x2b6   : > { %v1566_v0 = vpop.f32.mrf.mxu1 }
 0x2b7   : > { %1810 = vmatmul.f32.gmra.mxu2 %v389_v51 }
 0x2b8   : > { %1965 = vmatmul.f32.gmra.mxu3 %v7576_v62 }
 0x2b9   : > { %v7923_v47 = vpop.f32.mrf.mxu0  ;;  %1613 = vmatmul.f32.gmra.mxu1 %v7932_v39 }
 0x2ba   : > { %11821 = vst [vmem:[#allocation132_spill] sm:$0xff] %v7923_v47  ;;  %v1763_v5 = vpop.f32.mrf.mxu2 }
 0x2bb   : > { %v7925_v4 = vadd.f32 %v1763_v5, %v1554_v46  ;;  %v7927_v26 = vpop.f32.mrf.mxu3 }
 0x2bc   : > { %11822 = vst [vmem:[#allocation133_spill] sm:$0xff] %v7927_v26  ;;  %1449 = vmatmul.f32.gmra.mxu0 %v7477_v35  ;;  %v393_v35 = vld [vmem:[%s6759_s7 + $0x538] sm:$0xff]  ;;  %v7945_v26 = vld [vmem:[%s6759_s7 + $0x5a8] sm:$0xff] }
 0x2be   : > { %v1569_v5 = vpop.f32.mrf.mxu1 }
 0x2bf   : > { %1813 = vmatmul.f32.gmra.mxu2 %v391_v42 }
 0x2c0   : > { %1968 = vmatmul.f32.gmra.mxu3 %v7593_v44 }
 0x2c1   : > { %v7936_v62 = vpop.f32.mrf.mxu0  ;;  %1616 = vmatmul.f32.gmra.mxu1 %v7945_v26 }
 0x2c2   : > { %11823 = vst [vmem:[#allocation134_spill] sm:$0xff] %v7936_v62  ;;  %v1766_v51 = vpop.f32.mrf.mxu2 }
 0x2c3   : > { %v7938_v46 = vadd.f32 %v1766_v51, %v1557_v29  ;;  %v7940_v47 = vpop.f32.mrf.mxu3 }
 0x2c4   : > { %11824 = vst [vmem:[#allocation135_spill] sm:$0xff] %v7940_v47  ;;  %1452 = vmatmul.f32.gmra.mxu0 %v7494_v63  ;;  %v395_v63 = vld [vmem:[%s6759_s7 + $0x560] sm:$0xff]  ;;  %v7958_v47 = vld [vmem:[%s6759_s7 + $0x5d0] sm:$0xff] }
 0x2c6   : > { %v1572_v51 = vpop.f32.mrf.mxu1 }
 0x2c7   : > { %1816 = vmatmul.f32.gmra.mxu2 %v393_v35 }
 0x2c8   : > { %1971 = vmatmul.f32.gmra.mxu3 %v7610_v31 }
 0x2c9   : > { %v7949_v44 = vpop.f32.mrf.mxu0  ;;  %1619 = vmatmul.f32.gmra.mxu1 %v7958_v47 }
 0x2ca   : > { %11825 = vst [vmem:[#allocation136_spill] sm:$0xff] %v7949_v44  ;;  %v1769_v42 = vpop.f32.mrf.mxu2 }
 0x2cb   : > { %v7951_v29 = vadd.f32 %v1769_v42, %v1560_v33  ;;  %v7953_v62 = vpop.f32.mrf.mxu3 }
 0x2cc   : > { %11826 = vst [vmem:[#allocation137_spill] sm:$0xff] %v7953_v62  ;;  %1455 = vmatmul.f32.gmra.mxu0 %v7511_v16  ;;  %v397_v16 = vld [vmem:[%s6759_s7 + $0x588] sm:$0xff]  ;;  %v7971_v62 = vld [vmem:[%s6759_s7 + $0x5f8] sm:$0xff] }
 0x2ce   : > { %v1575_v42 = vpop.f32.mrf.mxu1 }
 0x2cf   : > { %1819 = vmatmul.f32.gmra.mxu2 %v395_v63 }
 0x2d0   : > { %1974 = vmatmul.f32.gmra.mxu3 %v7627_v57 }
 0x2d1   : > { %v7962_v31 = vpop.f32.mrf.mxu0  ;;  %1622 = vmatmul.f32.gmra.mxu1 %v7971_v62 }
 0x2d2   : > { %11827 = vst [vmem:[#allocation138_spill] sm:$0xff] %v7962_v31  ;;  %v1772_v35 = vpop.f32.mrf.mxu2 }
 0x2d3   : > { %v7964_v33 = vadd.f32 %v1772_v35, %v1563_v50  ;;  %v7966_v44 = vpop.f32.mrf.mxu3 }
 0x2d4   : > { %11828 = vst [vmem:[#allocation139_spill] sm:$0xff] %v7966_v44  ;;  %1458 = vmatmul.f32.gmra.mxu0 %v7528_v27  ;;  %v399_v27 = vld [vmem:[%s6759_s7 + $0x5b0] sm:$0xff]  ;;  %v7984_v44 = vld [vmem:[%s6759_s7 + $0x620] sm:$0xff] }
 0x2d6   : > { %v1578_v35 = vpop.f32.mrf.mxu1 }
 0x2d7   : > { %1822 = vmatmul.f32.gmra.mxu2 %v397_v16 }
 0x2d8   : > { %1977 = vmatmul.f32.gmra.mxu3 %v7644_v48 }
 0x2d9   : > { %v7975_v57 = vpop.f32.mrf.mxu0  ;;  %1625 = vmatmul.f32.gmra.mxu1 %v7984_v44 }
 0x2da   : > { %11829 = vst [vmem:[#allocation140_spill] sm:$0xff] %v7975_v57  ;;  %v1775_v63 = vpop.f32.mrf.mxu2 }
 0x2db   : > { %v7977_v50 = vadd.f32 %v1775_v63, %v1566_v0  ;;  %v7979_v31 = vpop.f32.mrf.mxu3 }
 0x2dc   : > { %11830 = vst [vmem:[#allocation141_spill] sm:$0xff] %v7979_v31  ;;  %1461 = vmatmul.f32.gmra.mxu0 %v7545_v3  ;;  %v401_v3 = vld [vmem:[%s6759_s7 + $0x5d8] sm:$0xff]  ;;  %v7997_v31 = vld [vmem:[%s6759_s7 + $0x648] sm:$0xff] }
 0x2de   : > { %v1581_v63 = vpop.f32.mrf.mxu1 }
 0x2df   : > { %1825 = vmatmul.f32.gmra.mxu2 %v399_v27 }
 0x2e0   : > { %1980 = vmatmul.f32.gmra.mxu3 %v7661_v38 }
 0x2e1   : > { %v7988_v48 = vpop.f32.mrf.mxu0  ;;  %1628 = vmatmul.f32.gmra.mxu1 %v7997_v31 }
 0x2e2   : > { %11831 = vst [vmem:[#allocation142_spill] sm:$0xff] %v7988_v48  ;;  %v1778_v16 = vpop.f32.mrf.mxu2 }
 0x2e3   : > { %v7990_v0 = vadd.f32 %v1778_v16, %v1569_v5  ;;  %v7992_v57 = vpop.f32.mrf.mxu3 }
 0x2e4   : > { %11832 = vst [vmem:[#allocation143_spill] sm:$0xff] %v7992_v57  ;;  %1464 = vmatmul.f32.gmra.mxu0 %v7562_v20  ;;  %v403_v20 = vld [vmem:[%s6759_s7 + $0x600] sm:$0xff]  ;;  %v8010_v57 = vld [vmem:[%s6759_s7 + $0x670] sm:$0xff] }
 0x2e6   : > { %v1584_v16 = vpop.f32.mrf.mxu1 }
 0x2e7   : > { %1828 = vmatmul.f32.gmra.mxu2 %v401_v3 }
 0x2e8   : > { %1983 = vmatmul.f32.gmra.mxu3 %v7678_v13 }
 0x2e9   : > { %v8001_v38 = vpop.f32.mrf.mxu0  ;;  %1631 = vmatmul.f32.gmra.mxu1 %v8010_v57 }
 0x2ea   : > { %11833 = vst [vmem:[#allocation144_spill] sm:$0xff] %v8001_v38  ;;  %v1781_v27 = vpop.f32.mrf.mxu2 }
 0x2eb   : > { %v8003_v5 = vadd.f32 %v1781_v27, %v1572_v51  ;;  %v8005_v48 = vpop.f32.mrf.mxu3 }
 0x2ec   : > { %11834 = vst [vmem:[#allocation145_spill] sm:$0xff] %v8005_v48  ;;  %1467 = vmatmul.f32.gmra.mxu0 %v7579_v24  ;;  %v405_v24 = vld [vmem:[%s6759_s7 + $0x628] sm:$0xff]  ;;  %v8023_v48 = vld [vmem:[%s6759_s7 + $0x698] sm:$0xff] }
 0x2ee   : > { %v1587_v27 = vpop.f32.mrf.mxu1 }
 0x2ef   : > { %1831 = vmatmul.f32.gmra.mxu2 %v403_v20 }
 0x2f0   : > { %1986 = vmatmul.f32.gmra.mxu3 %v7697_v2 }
 0x2f1   : > { %v8014_v13 = vpop.f32.mrf.mxu0  ;;  %1634 = vmatmul.f32.gmra.mxu1 %v8023_v48 }
 0x2f2   : > { %11835 = vst [vmem:[#allocation146_spill] sm:$0xff] %v8014_v13  ;;  %v1784_v3 = vpop.f32.mrf.mxu2 }
 0x2f3   : > { %v8016_v51 = vadd.f32 %v1784_v3, %v1575_v42  ;;  %v8018_v38 = vpop.f32.mrf.mxu3 }
 0x2f4   : > { %11836 = vst [vmem:[#allocation147_spill] sm:$0xff] %v8018_v38  ;;  %1470 = vmatmul.f32.gmra.mxu0 %v7596_v43  ;;  %v407_v43 = vld [vmem:[%s6759_s7 + $0x650] sm:$0xff]  ;;  %v8036_v38 = vld [vmem:[%s6759_s7 + $0x6c0] sm:$0xff] }
 0x2f6   : > { %v1590_v3 = vpop.f32.mrf.mxu1 }
 0x2f7   : > { %1834 = vmatmul.f32.gmra.mxu2 %v405_v24 }
 0x2f8   : > { %1989 = vmatmul.f32.gmra.mxu3 %v7716_v56 }
 0x2f9   : > { %v8027_v2 = vpop.f32.mrf.mxu0  ;;  %1637 = vmatmul.f32.gmra.mxu1 %v8036_v38 }
 0x2fa   : > { %11837 = vst [vmem:[#allocation148_spill] sm:$0xff] %v8027_v2  ;;  %v1787_v20 = vpop.f32.mrf.mxu2 }
 0x2fb   : > { %v8029_v42 = vadd.f32 %v1787_v20, %v1578_v35  ;;  %v8031_v13 = vpop.f32.mrf.mxu3 }
 0x2fc   : > { %11838 = vst [vmem:[#allocation149_spill] sm:$0xff] %v8031_v13  ;;  %1473 = vmatmul.f32.gmra.mxu0 %v7613_v25  ;;  %v409_v25 = vld [vmem:[%s6759_s7 + $0x678] sm:$0xff]  ;;  %v8049_v13 = vld [vmem:[%s6759_s7 + $0x6e8] sm:$0xff] }
 0x2fe   : > { %v1593_v20 = vpop.f32.mrf.mxu1 }
 0x2ff   : > { %1837 = vmatmul.f32.gmra.mxu2 %v407_v43 }
 0x300   : > { %1992 = vmatmul.f32.gmra.mxu3 %v7732_v22 }
 0x301   : > { %v8040_v56 = vpop.f32.mrf.mxu0  ;;  %1640 = vmatmul.f32.gmra.mxu1 %v8049_v13 }
 0x302   : > { %11839 = vst [vmem:[#allocation150_spill] sm:$0xff] %v8040_v56  ;;  %v1790_v24 = vpop.f32.mrf.mxu2 }
 0x303   : > { %v8042_v35 = vadd.f32 %v1790_v24, %v1581_v63  ;;  %v8044_v2 = vpop.f32.mrf.mxu3 }
 0x304   : > { %11840 = vst [vmem:[#allocation151_spill] sm:$0xff] %v8044_v2  ;;  %1476 = vmatmul.f32.gmra.mxu0 %v7630_v58  ;;  %v411_v58 = vld [vmem:[%s6759_s7 + $0x6a0] sm:$0xff]  ;;  %v8062_v2 = vld [vmem:[%s6759_s7 + $0x710] sm:$0xff] }
 0x306   : > { %v1596_v24 = vpop.f32.mrf.mxu1 }
 0x307   : > { %1840 = vmatmul.f32.gmra.mxu2 %v409_v25 }
 0x308   : > { %1995 = vmatmul.f32.gmra.mxu3 %v7748_v52 }
 0x309   : > { %v8053_v22 = vpop.f32.mrf.mxu0  ;;  %1643 = vmatmul.f32.gmra.mxu1 %v8062_v2 }
 0x30a   : > { %11841 = vst [vmem:[#allocation152_spill] sm:$0xff] %v8053_v22  ;;  %v1793_v43 = vpop.f32.mrf.mxu2 }
 0x30b   : > { %v8055_v63 = vadd.f32 %v1793_v43, %v1584_v16  ;;  %v8057_v56 = vpop.f32.mrf.mxu3 }
 0x30c   : > { %11842 = vst [vmem:[#allocation153_spill] sm:$0xff] %v8057_v56  ;;  %1479 = vmatmul.f32.gmra.mxu0 %v7647_v61  ;;  %v413_v61 = vld [vmem:[%s6759_s7 + $0x6c8] sm:$0xff]  ;;  %v8075_v56 = vld [vmem:[%s6759_s7 + $0x738] sm:$0xff] }
 0x30e   : > { %v1599_v43 = vpop.f32.mrf.mxu1 }
 0x30f   : > { %1843 = vmatmul.f32.gmra.mxu2 %v411_v58 }
 0x310   : > { %1998 = vmatmul.f32.gmra.mxu3 %v7764_v17 }
 0x311   : > { %v8066_v52 = vpop.f32.mrf.mxu0  ;;  %1646 = vmatmul.f32.gmra.mxu1 %v8075_v56 }
 0x312   : > { %11843 = vst [vmem:[#allocation154_spill] sm:$0xff] %v8066_v52  ;;  %v1796_v25 = vpop.f32.mrf.mxu2 }
 0x313   : > { %v8068_v16 = vadd.f32 %v1796_v25, %v1587_v27  ;;  %v8070_v22 = vpop.f32.mrf.mxu3 }
 0x314   : > { %11844 = vst [vmem:[#allocation155_spill] sm:$0xff] %v8070_v22  ;;  %1482 = vmatmul.f32.gmra.mxu0 %v7664_v60  ;;  %v415_v60 = vld [vmem:[%s6759_s7 + $0x6f0] sm:$0xff]  ;;  %v8088_v22 = vld [vmem:[%s6759_s7 + $0x760] sm:$0xff] }
 0x316   : > { %v1602_v25 = vpop.f32.mrf.mxu1 }
 0x317   : > { %1846 = vmatmul.f32.gmra.mxu2 %v413_v61 }
 0x318   : > { %2001 = vmatmul.f32.gmra.mxu3 %v7780_v7 }
 0x319   : > { %v8079_v17 = vpop.f32.mrf.mxu0  ;;  %1649 = vmatmul.f32.gmra.mxu1 %v8088_v22 }
 0x31a   : > { %11845 = vst [vmem:[#allocation156_spill] sm:$0xff] %v8079_v17  ;;  %v1799_v58 = vpop.f32.mrf.mxu2 }
 0x31b   : > { %v8081_v27 = vadd.f32 %v1799_v58, %v1590_v3  ;;  %v8083_v52 = vpop.f32.mrf.mxu3 }
 0x31c   : > { %11846 = vst [vmem:[#allocation157_spill] sm:$0xff] %v8083_v52  ;;  %1485 = vmatmul.f32.gmra.mxu0 %v7681_v14  ;;  %v417_v14 = vld [vmem:[%s6759_s7 + $0x718] sm:$0xff]  ;;  %v8101_v52 = vld [vmem:[%s6759_s7 + $0x788] sm:$0xff] }
 0x31e   : > { %v1605_v58 = vpop.f32.mrf.mxu1 }
 0x31f   : > { %1849 = vmatmul.f32.gmra.mxu2 %v415_v60 }
 0x320   : > { %2004 = vmatmul.f32.gmra.mxu3 %v7796_v10 }
 0x321   : > { %v8092_v7 = vpop.f32.mrf.mxu0  ;;  %1652 = vmatmul.f32.gmra.mxu1 %v8101_v52 }
 0x322   : > { %11847 = vst [vmem:[#allocation158_spill] sm:$0xff] %v8092_v7  ;;  %v1802_v61 = vpop.f32.mrf.mxu2 }
 0x323   : > { %v8094_v3 = vadd.f32 %v1802_v61, %v1593_v20  ;;  %v8096_v17 = vpop.f32.mrf.mxu3 }
 0x324   : > { %11848 = vst [vmem:[#allocation159_spill] sm:$0xff] %v8096_v17  ;;  %1488 = vmatmul.f32.gmra.mxu0 %v7700_v37  ;;  %v419_v37 = vld [vmem:[%s6759_s7 + $0x740] sm:$0xff]  ;;  %v8114_v17 = vld [vmem:[%s6759_s7 + $0x7b0] sm:$0xff] }
 0x326   : > { %v1608_v61 = vpop.f32.mrf.mxu1 }
 0x327   : > { %1852 = vmatmul.f32.gmra.mxu2 %v417_v14 }
 0x328   : > { %2007 = vmatmul.f32.gmra.mxu3 %v7812_v30 }
 0x329   : > { %v8105_v10 = vpop.f32.mrf.mxu0  ;;  %1655 = vmatmul.f32.gmra.mxu1 %v8114_v17 }
 0x32a   : > { %11849 = vst [vmem:[#allocation160_spill] sm:$0xff] %v8105_v10  ;;  %v1805_v60 = vpop.f32.mrf.mxu2 }
 0x32b   : > { %v8107_v20 = vadd.f32 %v1805_v60, %v1596_v24  ;;  %v8109_v7 = vpop.f32.mrf.mxu3 }
 0x32c   : > { %11850 = vst [vmem:[#allocation161_spill] sm:$0xff] %v8109_v7  ;;  %2135 = vmatmul.f32.vlgmr.msra.gmra.mxu0 %v7379_v36  ;;  %v421_v36 = vld [vmem:[%s6759_s7 + $0x768] sm:$0xff]  ;;  %v8127_v7 = vld [vmem:[%s6759_s7 + $0x7d8] sm:$0xff] }
 0x32e   : > { %v1611_v60 = vpop.f32.mrf.mxu1 }
 0x32f   : > { %1855 = vmatmul.f32.gmra.mxu2 %v419_v37 }
 0x330   : > { %2010 = vmatmul.f32.gmra.mxu3 %v7828_v23 }
 0x331   : > { %v8118_v30 = vpop.f32.mrf.mxu0  ;;  %1658 = vmatmul.f32.gmra.mxu1 %v8127_v7 }
 0x332   : > { %11851 = vst [vmem:[#allocation162_spill] sm:$0xff] %v8118_v30  ;;  %v1808_v14 = vpop.f32.mrf.mxu2 }
 0x333   : > { %v8120_v24 = vadd.f32 %v1808_v14, %v1599_v43  ;;  %v8122_v10 = vpop.f32.mrf.mxu3 }
 0x334   : > { %11852 = vst [vmem:[#allocation163_spill] sm:$0xff] %v8122_v10  ;;  %2138 = vmatmul.f32.gmra.mxu0 %v7401_v34  ;;  %v423_v34 = vld [vmem:[%s6759_s7 + $0x790] sm:$0xff]  ;;  %v8140_v10 = vld [vmem:[%s6759_s7 + $0x800] sm:$0xff] }
 0x336   : > { %v1614_v14 = vpop.f32.mrf.mxu1 }
 0x337   : > { %1858 = vmatmul.f32.gmra.mxu2 %v421_v36 }
 0x338   : > { %2013 = vmatmul.f32.gmra.mxu3 %v7844_v19 }
 0x339   : > { %v8131_v23 = vpop.f32.mrf.mxu0  ;;  %1661 = vmatmul.f32.gmra.mxu1 %v8140_v10 }
 0x33a   : > { %11853 = vst [vmem:[#allocation164_spill] sm:$0xff] %v8131_v23  ;;  %v1811_v37 = vpop.f32.mrf.mxu2 }
 0x33b   : > { %v8133_v43 = vadd.f32 %v1811_v37, %v1602_v25  ;;  %v8135_v30 = vpop.f32.mrf.mxu3 }
 0x33c   : > { %11854 = vst [vmem:[#allocation165_spill] sm:$0xff] %v8135_v30  ;;  %2141 = vmatmul.f32.gmra.mxu0 %v7426_v1  ;;  %v425_v1 = vld [vmem:[%s6759_s7 + $0x7b8] sm:$0xff]  ;;  %v8153_v30 = vld [vmem:[%s6759_s7 + $0x828] sm:$0xff] }
 0x33e   : > { %v1617_v37 = vpop.f32.mrf.mxu1 }
 0x33f   : > { %1861 = vmatmul.f32.gmra.mxu2 %v423_v34 }
 0x340   : > { %2016 = vmatmul.f32.gmra.mxu3 %v7860_v45 }
 0x341   : > { %v8144_v19 = vpop.f32.mrf.mxu0  ;;  %1664 = vmatmul.f32.gmra.mxu1 %v8153_v30 }
 0x342   : > { %11855 = vst [vmem:[#allocation166_spill] sm:$0xff] %v8144_v19  ;;  %v1814_v36 = vpop.f32.mrf.mxu2 }
 0x343   : > { %v8146_v25 = vadd.f32 %v1814_v36, %v1605_v58  ;;  %v8148_v23 = vpop.f32.mrf.mxu3 }
 0x344   : > { %11856 = vst [vmem:[#allocation167_spill] sm:$0xff] %v8148_v23  ;;  %2144 = vmatmul.f32.gmra.mxu0 %v7449_v54  ;;  %v427_v54 = vld [vmem:[%s6759_s7 + $0x7e0] sm:$0xff]  ;;  %v8166_v23 = vld [vmem:[%s6759_s7 + $0x850] sm:$0xff] }
 0x346   : > { %v1620_v36 = vpop.f32.mrf.mxu1 }
 0x347   : > { %1864 = vmatmul.f32.gmra.mxu2 %v425_v1 }
 0x348   : > { %2019 = vmatmul.f32.gmra.mxu3 %v7876_v8 }
 0x349   : > { %v8157_v45 = vpop.f32.mrf.mxu0  ;;  %1667 = vmatmul.f32.gmra.mxu1 %v8166_v23 }
 0x34a   : > { %11857 = vst [vmem:[#allocation168_spill] sm:$0xff] %v8157_v45  ;;  %v1817_v34 = vpop.f32.mrf.mxu2 }
 0x34b   : > { %v8159_v58 = vadd.f32 %v1817_v34, %v1608_v61  ;;  %v8161_v19 = vpop.f32.mrf.mxu3 }
 0x34c   : > { %11859 = vst [vmem:[#allocation170_spill] sm:$0xff] %v8161_v19  ;;  %2147 = vmatmul.f32.gmra.mxu0 %v7470_v40  ;;  %v11863_v19 = vld [vmem:[#allocation26_spill] sm:$0xff]  ;;  %v429_v40 = vld [vmem:[%s6759_s7 + $0x808] sm:$0xff] }
 0x34d   : > { %11858 = vst [vmem:[#allocation169_spill] sm:$0xff] %v8159_v58  ;;  %v8179_v58 = vld [vmem:[%s6759_s7 + $0x878] sm:$0xff] }
 0x34e   : > { %v1623_v34 = vpop.f32.mrf.mxu1 }
 0x34f   : > { %1867 = vmatmul.f32.gmra.mxu2 %v427_v54 }
 0x350   : > { %2022 = vmatmul.f32.gmra.mxu3 %v7892_v15 }
 0x351   : > { %v8170_v8 = vpop.f32.mrf.mxu0  ;;  %1670 = vmatmul.f32.gmra.mxu1 %v8179_v58 }
 0x352   : > { %11860 = vst [vmem:[#allocation171_spill] sm:$0xff] %v8170_v8  ;;  %v1820_v1 = vpop.f32.mrf.mxu2 }
 0x353   : > { %v8172_v61 = vadd.f32 %v1820_v1, %v1611_v60  ;;  %v8174_v45 = vpop.f32.mrf.mxu3 }
 0x354   : > { %11862 = vst [vmem:[#allocation173_spill] sm:$0xff] %v8174_v45  ;;  %2150 = vmatmul.f32.gmra.mxu0 %v11863_v19  ;;  %v11867_v45 = vld [vmem:[#allocation28_spill] sm:$0xff]  ;;  %v431_v19 = vld [vmem:[%s6759_s7 + $0x830] sm:$0xff] }
 0x355   : > { %11861 = vst [vmem:[#allocation172_spill] sm:$0xff] %v8172_v61  ;;  %v8192_v61 = vld [vmem:[%s6759_s7 + $0x8a0] sm:$0xff] }
 0x356   : > { %v1626_v1 = vpop.f32.mrf.mxu1 }
 0x357   : > { %1870 = vmatmul.f32.gmra.mxu2 %v429_v40 }
 0x358   : > { %2025 = vmatmul.f32.gmra.mxu3 %v7906_v49 }
 0x359   : > { %v8183_v15 = vpop.f32.mrf.mxu0  ;;  %1673 = vmatmul.f32.gmra.mxu1 %v8192_v61 }
 0x35a   : > { %11864 = vst [vmem:[#allocation26_spill] sm:$0xff] %v8183_v15  ;;  %v1823_v54 = vpop.f32.mrf.mxu2 }
 0x35b   : > { %v8185_v60 = vadd.f32 %v1823_v54, %v1614_v14  ;;  %v8187_v8 = vpop.f32.mrf.mxu3 }
 0x35c   : > { %11866 = vst [vmem:[#allocation175_spill] sm:$0xff] %v8187_v8  ;;  %2153 = vmatmul.f32.gmra.mxu0 %v11867_v45  ;;  %v11871_v8 = vld [vmem:[#allocation30_spill] sm:$0xff]  ;;  %v433_v45 = vld [vmem:[%s6759_s7 + $0x858] sm:$0xff] }
 0x35d   : > { %11865 = vst [vmem:[#allocation174_spill] sm:$0xff] %v8185_v60  ;;  %v8205_v60 = vld [vmem:[%s6759_s7 + $0x8c8] sm:$0xff] }
 0x35e   : > { %v1629_v54 = vpop.f32.mrf.mxu1 }
 0x35f   : > { %1873 = vmatmul.f32.gmra.mxu2 %v431_v19 }
 0x360   : > { %2028 = vmatmul.f32.gmra.mxu3 %v7919_v21 }
 0x361   : > { %v8196_v49 = vpop.f32.mrf.mxu0  ;;  %1676 = vmatmul.f32.gmra.mxu1 %v8205_v60 }
 0x362   : > { %11868 = vst [vmem:[#allocation28_spill] sm:$0xff] %v8196_v49  ;;  %v1826_v40 = vpop.f32.mrf.mxu2 }
 0x363   : > { %v8198_v14 = vadd.f32 %v1826_v40, %v1617_v37  ;;  %v8200_v15 = vpop.f32.mrf.mxu3 }
 0x364   : > { %11870 = vst [vmem:[#allocation177_spill] sm:$0xff] %v8200_v15  ;;  %2156 = vmatmul.f32.gmra.mxu0 %v11871_v8  ;;  %v11875_v15 = vld [vmem:[#allocation32_spill] sm:$0xff] }
 0x365   : > { %11869 = vst [vmem:[#allocation176_spill] sm:$0xff] %v8198_v14  ;;  %v435_v8 = vld [vmem:[%s6759_s7 + $0x880] sm:$0xff]  ;;  %v8218_v14 = vld [vmem:[%s6759_s7 + $0x8f0] sm:$0xff] }
 0x366   : > { %v1632_v40 = vpop.f32.mrf.mxu1 }
 0x367   : > { %1876 = vmatmul.f32.gmra.mxu2 %v433_v45 }
 0x368   : > { %2031 = vmatmul.f32.gmra.mxu3 %v7932_v39 }
 0x369   : > { %v8209_v21 = vpop.f32.mrf.mxu0  ;;  %1679 = vmatmul.f32.gmra.mxu1 %v8218_v14 }
 0x36a   : > { %11872 = vst [vmem:[#allocation30_spill] sm:$0xff] %v8209_v21  ;;  %v1829_v19 = vpop.f32.mrf.mxu2 }
 0x36b   : > { %v8211_v37 = vadd.f32 %v1829_v19, %v1620_v36  ;;  %v8213_v49 = vpop.f32.mrf.mxu3 }
 0x36c   : > { %11874 = vst [vmem:[#allocation179_spill] sm:$0xff] %v8213_v49  ;;  %2159 = vmatmul.f32.gmra.mxu0 %v11875_v15  ;;  %v11879_v49 = vld [vmem:[#allocation65_spill] sm:$0xff] }
 0x36d   : > { %11873 = vst [vmem:[#allocation178_spill] sm:$0xff] %v8211_v37  ;;  %v437_v15 = vld [vmem:[%s6759_s7 + $0x8a8] sm:$0xff]  ;;  %v8231_v37 = vld [vmem:[%s6759_s7 + $0x918] sm:$0xff] }
 0x36e   : > { %v1635_v19 = vpop.f32.mrf.mxu1 }
 0x36f   : > { %1879 = vmatmul.f32.gmra.mxu2 %v435_v8 }
 0x370   : > { %2034 = vmatmul.f32.gmra.mxu3 %v7945_v26 }
 0x371   : > { %v8222_v39 = vpop.f32.mrf.mxu0  ;;  %1682 = vmatmul.f32.gmra.mxu1 %v8231_v37 }
 0x372   : > { %11876 = vst [vmem:[#allocation32_spill] sm:$0xff] %v8222_v39  ;;  %v1832_v45 = vpop.f32.mrf.mxu2 }
 0x373   : > { %v8224_v36 = vadd.f32 %v1832_v45, %v1623_v34  ;;  %v8226_v21 = vpop.f32.mrf.mxu3 }
 0x374   : > { %11878 = vst [vmem:[#allocation181_spill] sm:$0xff] %v8226_v21  ;;  %2162 = vmatmul.f32.gmra.mxu0 %v11879_v49  ;;  %v11883_v21 = vld [vmem:[#allocation68_spill] sm:$0xff]  ;;  %v439_v49 = vld [vmem:[%s6759_s7 + $0x8d0] sm:$0xff] }
 0x375   : > { %11877 = vst [vmem:[#allocation180_spill] sm:$0xff] %v8224_v36  ;;  %v8244_v36 = vld [vmem:[%s6759_s7 + $0x940] sm:$0xff] }
 0x376   : > { %v1638_v45 = vpop.f32.mrf.mxu1 }
 0x377   : > { %1882 = vmatmul.f32.gmra.mxu2 %v437_v15 }
 0x378   : > { %2037 = vmatmul.f32.gmra.mxu3 %v7958_v47 }
 0x379   : > { %v8235_v26 = vpop.f32.mrf.mxu0  ;;  %1685 = vmatmul.f32.gmra.mxu1 %v8244_v36 }
 0x37a   : > { %11880 = vst [vmem:[#allocation65_spill] sm:$0xff] %v8235_v26  ;;  %v1835_v8 = vpop.f32.mrf.mxu2 }
 0x37b   : > { %v8237_v34 = vadd.f32 %v1835_v8, %v1626_v1  ;;  %v8239_v39 = vpop.f32.mrf.mxu3 }
 0x37c   : > { %11882 = vst [vmem:[#allocation183_spill] sm:$0xff] %v8239_v39  ;;  %2165 = vmatmul.f32.gmra.mxu0 %v11883_v21  ;;  %v11887_v39 = vld [vmem:[#allocation71_spill] sm:$0xff] }
 0x37d   : > { %11881 = vst [vmem:[#allocation182_spill] sm:$0xff] %v8237_v34  ;;  %v441_v21 = vld [vmem:[%s6759_s7 + $0x8f8] sm:$0xff]  ;;  %v8257_v34 = vld [vmem:[%s6759_s7 + $0x968] sm:$0xff] }
 0x37e   : > { %v1641_v8 = vpop.f32.mrf.mxu1 }
 0x37f   : > { %1885 = vmatmul.f32.gmra.mxu2 %v439_v49 }
 0x380   : > { %2040 = vmatmul.f32.gmra.mxu3 %v7971_v62 }
 0x381   : > { %v8248_v47 = vpop.f32.mrf.mxu0  ;;  %1688 = vmatmul.f32.gmra.mxu1 %v8257_v34 }
 0x382   : > { %11884 = vst [vmem:[#allocation68_spill] sm:$0xff] %v8248_v47  ;;  %v1838_v15 = vpop.f32.mrf.mxu2 }
 0x383   : > { %v8250_v1 = vadd.f32 %v1838_v15, %v1629_v54  ;;  %v8252_v26 = vpop.f32.mrf.mxu3 }
 0x384   : > { %11886 = vst [vmem:[#allocation185_spill] sm:$0xff] %v8252_v26  ;;  %2168 = vmatmul.f32.gmra.mxu0 %v11887_v39  ;;  %v11891_v26 = vld [vmem:[#allocation74_spill] sm:$0xff]  ;;  %v443_v39 = vld [vmem:[%s6759_s7 + $0x920] sm:$0xff] }
 0x385   : > { %11885 = vst [vmem:[#allocation184_spill] sm:$0xff] %v8250_v1  ;;  %v8270_v1 = vld [vmem:[%s6759_s7 + $0x990] sm:$0xff] }
 0x386   : > { %v1644_v15 = vpop.f32.mrf.mxu1 }
 0x387   : > { %1888 = vmatmul.f32.gmra.mxu2 %v441_v21 }
 0x388   : > { %2043 = vmatmul.f32.gmra.mxu3 %v7984_v44 }
 0x389   : > { %v8261_v62 = vpop.f32.mrf.mxu0  ;;  %1691 = vmatmul.f32.gmra.mxu1 %v8270_v1 }
 0x38a   : > { %11888 = vst [vmem:[#allocation71_spill] sm:$0xff] %v8261_v62  ;;  %v1841_v49 = vpop.f32.mrf.mxu2 }
 0x38b   : > { %v8263_v54 = vadd.f32 %v1841_v49, %v1632_v40  ;;  %v8265_v47 = vpop.f32.mrf.mxu3 }
 0x38c   : > { %11890 = vst [vmem:[#allocation187_spill] sm:$0xff] %v8265_v47  ;;  %2171 = vmatmul.f32.gmra.mxu0 %v11891_v26  ;;  %v11895_v47 = vld [vmem:[#allocation77_spill] sm:$0xff] }
 0x38d   : > { %11889 = vst [vmem:[#allocation186_spill] sm:$0xff] %v8263_v54  ;;  %v445_v26 = vld [vmem:[%s6759_s7 + $0x948] sm:$0xff]  ;;  %v8283_v54 = vld [vmem:[%s6759_s7 + $0x9b8] sm:$0xff] }
 0x38e   : > { %v1647_v49 = vpop.f32.mrf.mxu1 }
 0x38f   : > { %1891 = vmatmul.f32.gmra.mxu2 %v443_v39 }
 0x390   : > { %2046 = vmatmul.f32.gmra.mxu3 %v7997_v31 }
 0x391   : > { %v8274_v44 = vpop.f32.mrf.mxu0  ;;  %1694 = vmatmul.f32.gmra.mxu1 %v8283_v54 }
 0x392   : > { %11892 = vst [vmem:[#allocation74_spill] sm:$0xff] %v8274_v44  ;;  %v1844_v21 = vpop.f32.mrf.mxu2 }
 0x393   : > { %v8276_v40 = vadd.f32 %v1844_v21, %v1635_v19  ;;  %v8278_v62 = vpop.f32.mrf.mxu3 }
 0x394   : > { %11894 = vst [vmem:[#allocation189_spill] sm:$0xff] %v8278_v62  ;;  %2174 = vmatmul.f32.gmra.mxu0 %v11895_v47  ;;  %v11899_v62 = vld [vmem:[#allocation80_spill] sm:$0xff]  ;;  %v447_v47 = vld [vmem:[%s6759_s7 + $0x970] sm:$0xff] }
 0x395   : > { %11893 = vst [vmem:[#allocation188_spill] sm:$0xff] %v8276_v40  ;;  %v8296_v40 = vld [vmem:[%s6759_s7 + $0x9e0] sm:$0xff] }
 0x396   : > { %v1650_v21 = vpop.f32.mrf.mxu1 }
 0x397   : > { %1894 = vmatmul.f32.gmra.mxu2 %v445_v26 }
 0x398   : > { %2049 = vmatmul.f32.gmra.mxu3 %v8010_v57 }
 0x399   : > { %v8287_v31 = vpop.f32.mrf.mxu0  ;;  %1697 = vmatmul.f32.gmra.mxu1 %v8296_v40 }
 0x39a   : > { %11896 = vst [vmem:[#allocation77_spill] sm:$0xff] %v8287_v31  ;;  %v1847_v39 = vpop.f32.mrf.mxu2 }
 0x39b   : > { %v8289_v19 = vadd.f32 %v1847_v39, %v1638_v45  ;;  %v8291_v44 = vpop.f32.mrf.mxu3 }
 0x39c   : > { %11898 = vst [vmem:[#allocation191_spill] sm:$0xff] %v8291_v44  ;;  %2177 = vmatmul.f32.gmra.mxu0 %v11899_v62  ;;  %v11903_v44 = vld [vmem:[#allocation83_spill] sm:$0xff] }
 0x39d   : > { %11897 = vst [vmem:[#allocation190_spill] sm:$0xff] %v8289_v19  ;;  %v449_v62 = vld [vmem:[%s6759_s7 + $0x998] sm:$0xff] }
 0x39e   : > { %v1653_v39 = vpop.f32.mrf.mxu1  ;;  %v8309_v19 = vld [vmem:[%s6759_s7 + $0x18] sm:$0xff] }
 0x39f   : > { %1897 = vmatmul.f32.gmra.mxu2 %v447_v47 }
 0x3a0   : > { %2052 = vmatmul.f32.gmra.mxu3 %v8023_v48 }
 0x3a1   : > { %v8300_v57 = vpop.f32.mrf.mxu0  ;;  %2344 = vmatmul.f32.vlgmr.msra.gmra.mxu1 %v8309_v19 }
 0x3a2   : > { %11900 = vst [vmem:[#allocation80_spill] sm:$0xff] %v8300_v57  ;;  %v1850_v26 = vpop.f32.mrf.mxu2 }
 0x3a3   : > { %v8302_v45 = vadd.f32 %v1850_v26, %v1641_v8  ;;  %v8304_v31 = vpop.f32.mrf.mxu3 }
 0x3a4   : > { %11902 = vst [vmem:[#allocation193_spill] sm:$0xff] %v8304_v31  ;;  %2180 = vmatmul.f32.gmra.mxu0 %v11903_v44  ;;  %v11907_v31 = vld [vmem:[#allocation86_spill] sm:$0xff]  ;;  %v451_v44 = vld [vmem:[%s6759_s7 + $0x9c0] sm:$0xff] }
 0x3a5   : > { %11901 = vst [vmem:[#allocation192_spill] sm:$0xff] %v8302_v45  ;;  %v8322_v45 = vld [vmem:[%s6759_s7 + $0x40] sm:$0xff] }
 0x3a6   : > { %v1656_v26 = vpop.f32.mrf.mxu1 }
 0x3a7   : > { %1900 = vmatmul.f32.gmra.mxu2 %v449_v62 }
 0x3a8   : > { %2055 = vmatmul.f32.gmra.mxu3 %v8036_v38 }
 0x3a9   : > { %v8313_v48 = vpop.f32.mrf.mxu0  ;;  %2347 = vmatmul.f32.gmra.mxu1 %v8322_v45 }
 0x3aa   : > { %11904 = vst [vmem:[#allocation83_spill] sm:$0xff] %v8313_v48  ;;  %v1853_v47 = vpop.f32.mrf.mxu2 }
 0x3ab   : > { %v8315_v8 = vadd.f32 %v1853_v47, %v1644_v15  ;;  %v8317_v57 = vpop.f32.mrf.mxu3 }
 0x3ac   : > { %11906 = vst [vmem:[#allocation195_spill] sm:$0xff] %v8317_v57  ;;  %2183 = vmatmul.f32.gmra.mxu0 %v11907_v31  ;;  %v11910_v57 = vld [vmem:[#allocation90_spill] sm:$0xff]  ;;  %v453_v31 = vld [vmem:[%s6759_s7 + $0x9e8] sm:$0xff] }
 0x3ad   : > { %11905 = vst [vmem:[#allocation194_spill] sm:$0xff] %v8315_v8  ;;  %v8335_v8 = vld [vmem:[%s6759_s7 + $0x68] sm:$0xff] }
 0x3ae   : > { %v1659_v47 = vpop.f32.mrf.mxu1 }
 0x3af   : > { %1903 = vmatmul.f32.gmra.mxu2 %v451_v44 }
 0x3b0   : > { %2058 = vmatmul.f32.gmra.mxu3 %v8049_v13 }
 0x3b1   : > { %v8326_v38 = vpop.f32.mrf.mxu0  ;;  %2350 = vmatmul.f32.gmra.mxu1 %v8335_v8 }
 0x3b2   : > { %11908 = vst [vmem:[#allocation86_spill] sm:$0xff] %v8326_v38  ;;  %v1856_v62 = vpop.f32.mrf.mxu2 }
 0x3b3   : > { %v8328_v15 = vadd.f32 %v1856_v62, %v1647_v49  ;;  %v8330_v48 = vpop.f32.mrf.mxu3 }
 0x3b4   : > { %11909 = vst [vmem:[#allocation196_spill] sm:$0xff] %v8330_v48  ;;  %2186 = vmatmul.f32.gmra.mxu0 %v11910_v57  ;;  %v455_v57 = vld [vmem:[%s6759_s7 + $0x20] sm:$0xff]  ;;  %v8348_v48 = vld [vmem:[%s6759_s7 + $0x90] sm:$0xff] }
 0x3b6   : > { %v1662_v62 = vpop.f32.mrf.mxu1 }
 0x3b7   : > { %1906 = vmatmul.f32.gmra.mxu2 %v453_v31 }
 0x3b8   : > { %2061 = vmatmul.f32.gmra.mxu3 %v8062_v2 }
 0x3b9   : > { %v8339_v13 = vpop.f32.mrf.mxu0  ;;  %2353 = vmatmul.f32.gmra.mxu1 %v8348_v48 }
 0x3ba   : > { %11911 = vst [vmem:[#allocation90_spill] sm:$0xff] %v8339_v13  ;;  %v1859_v44 = vpop.f32.mrf.mxu2 }
 0x3bb   : > { %v8341_v49 = vadd.f32 %v1859_v44, %v1650_v21  ;;  %v8343_v38 = vpop.f32.mrf.mxu3 }
 0x3bc   : > { %11912 = vst [vmem:[#allocation197_spill] sm:$0xff] %v8343_v38  ;;  %2189 = vmatmul.f32.gmra.mxu0 %v7713_v55  ;;  %v457_v55 = vld [vmem:[%s6759_s7 + $0x48] sm:$0xff]  ;;  %v8361_v38 = vld [vmem:[%s6759_s7 + $0xb8] sm:$0xff] }
 0x3be   : > { %v1665_v44 = vpop.f32.mrf.mxu1 }
 0x3bf   : > { %2553 = vmatmul.f32.vlgmr.msra.gmra.mxu2 %v455_v57 }
 0x3c0   : > { %2064 = vmatmul.f32.gmra.mxu3 %v8075_v56 }
 0x3c1   : > { %v8352_v2 = vpop.f32.mrf.mxu0  ;;  %2356 = vmatmul.f32.gmra.mxu1 %v8361_v38 }
 0x3c2   : > { %11913 = vst [vmem:[#allocation198_spill] sm:$0xff] %v8352_v2  ;;  %v1862_v31 = vpop.f32.mrf.mxu2 }
 0x3c3   : > { %v8354_v21 = vadd.f32 %v1862_v31, %v1653_v39  ;;  %v8356_v13 = vpop.f32.mrf.mxu3 }
 0x3c4   : > { %11914 = vst [vmem:[#allocation199_spill] sm:$0xff] %v8356_v13  ;;  %2192 = vmatmul.f32.gmra.mxu0 %v7729_v41  ;;  %v459_v41 = vld [vmem:[%s6759_s7 + $0x70] sm:$0xff]  ;;  %v8374_v13 = vld [vmem:[%s6759_s7 + $0xe0] sm:$0xff] }
 0x3c6   : > { %v1668_v31 = vpop.f32.mrf.mxu1 }
 0x3c7   : > { %2556 = vmatmul.f32.gmra.mxu2 %v457_v55 }
 0x3c8   : > { %2067 = vmatmul.f32.gmra.mxu3 %v8088_v22 }
 0x3c9   : > { %v8365_v56 = vpop.f32.mrf.mxu0  ;;  %2359 = vmatmul.f32.gmra.mxu1 %v8374_v13 }
 0x3ca   : > { %11915 = vst [vmem:[#allocation200_spill] sm:$0xff] %v8365_v56  ;;  %v1865_v57 = vpop.f32.mrf.mxu2 }
 0x3cb   : > { %v8367_v39 = vadd.f32 %v1865_v57, %v1656_v26  ;;  %v8369_v2 = vpop.f32.mrf.mxu3 }
 0x3cc   : > { %11917 = vst [vmem:[#allocation202_spill] sm:$0xff] %v8369_v2  ;;  %2195 = vmatmul.f32.gmra.mxu0 %v7745_v59  ;;  %v11921_v2 = vld [vmem:[#allocation103_spill] sm:$0xff] }
 0x3cd   : > { %11916 = vst [vmem:[#allocation201_spill] sm:$0xff] %v8367_v39  ;;  %v461_v59 = vld [vmem:[%s6759_s7 + $0x98] sm:$0xff]  ;;  %v8387_v39 = vld [vmem:[%s6759_s7 + $0x108] sm:$0xff] }
 0x3ce   : > { %v1671_v57 = vpop.f32.mrf.mxu1 }
 0x3cf   : > { %2559 = vmatmul.f32.gmra.mxu2 %v459_v41 }
 0x3d0   : > { %2070 = vmatmul.f32.gmra.mxu3 %v8101_v52 }
 0x3d1   : > { %v8378_v22 = vpop.f32.mrf.mxu0  ;;  %2362 = vmatmul.f32.gmra.mxu1 %v8387_v39 }
 0x3d2   : > { %11918 = vst [vmem:[#allocation203_spill] sm:$0xff] %v8378_v22  ;;  %v1868_v55 = vpop.f32.mrf.mxu2 }
 0x3d3   : > { %v8380_v26 = vadd.f32 %v1868_v55, %v1659_v47  ;;  %v8382_v56 = vpop.f32.mrf.mxu3 }
 0x3d4   : > { %11920 = vst [vmem:[#allocation205_spill] sm:$0xff] %v8382_v56  ;;  %2198 = vmatmul.f32.gmra.mxu0 %v11921_v2  ;;  %v11924_v56 = vld [vmem:[#allocation107_spill] sm:$0xff]  ;;  %v463_v2 = vld [vmem:[%s6759_s7 + $0xc0] sm:$0xff] }
 0x3d5   : > { %11919 = vst [vmem:[#allocation204_spill] sm:$0xff] %v8380_v26  ;;  %v8400_v26 = vld [vmem:[%s6759_s7 + $0x130] sm:$0xff] }
 0x3d6   : > { %v1674_v55 = vpop.f32.mrf.mxu1 }
 0x3d7   : > { %2562 = vmatmul.f32.gmra.mxu2 %v461_v59 }
 0x3d8   : > { %2073 = vmatmul.f32.gmra.mxu3 %v8114_v17 }
 0x3d9   : > { %v8391_v52 = vpop.f32.mrf.mxu0  ;;  %2365 = vmatmul.f32.gmra.mxu1 %v8400_v26 }
 0x3da   : > { %11922 = vst [vmem:[#allocation103_spill] sm:$0xff] %v8391_v52  ;;  %v1871_v41 = vpop.f32.mrf.mxu2 }
 0x3db   : > { %v8393_v47 = vadd.f32 %v1871_v41, %v1662_v62  ;;  %v8395_v22 = vpop.f32.mrf.mxu3 }
 0x3dc   : > { %11923 = vst [vmem:[#allocation206_spill] sm:$0xff] %v8395_v22  ;;  %2201 = vmatmul.f32.gmra.mxu0 %v11924_v56  ;;  %v465_v56 = vld [vmem:[%s6759_s7 + $0xe8] sm:$0xff]  ;;  %v8413_v22 = vld [vmem:[%s6759_s7 + $0x158] sm:$0xff] }
 0x3de   : > { %v1677_v41 = vpop.f32.mrf.mxu1 }
 0x3df   : > { %2565 = vmatmul.f32.gmra.mxu2 %v463_v2 }
 0x3e0   : > { %2076 = vmatmul.f32.gmra.mxu3 %v8127_v7 }
 0x3e1   : > { %v8404_v59 = vpop.f32.mrf.mxu0  ;;  %2368 = vmatmul.f32.gmra.mxu1 %v8413_v22 }
 0x3e2   : > { %v1874_v17 = vpop.f32.mrf.mxu2  ;;  %11925 = vst [vmem:[#allocation107_spill] sm:$0xff] %v8404_v59 }
 0x3e3   : > { %v8406_v62 = vadd.f32 %v1874_v17, %v1665_v44  ;;  %v8408_v52 = vpop.f32.mrf.mxu3 }
 0x3e4   : > { %11926 = vst [vmem:[#allocation207_spill] sm:$0xff] %v8408_v52  ;;  %2204 = vmatmul.f32.gmra.mxu0 %v7793_v28  ;;  %v467_v52 = vld [vmem:[%s6759_s7 + $0x110] sm:$0xff]  ;;  %v8424_v28 = vld [vmem:[%s6759_s7 + $0x180] sm:$0xff] }
 0x3e6   : > { %v1680_v44 = vpop.f32.mrf.mxu1 }
 0x3e7   : > { %2568 = vmatmul.f32.gmra.mxu2 %v465_v56 }
 0x3e8   : > { %2079 = vmatmul.f32.gmra.mxu3 %v8140_v10 }
 0x3e9   : > { %v8426_v59 = vpop.f32.mrf.mxu0  ;;  %2371 = vmatmul.f32.gmra.mxu1 %v8424_v28 }
 0x3ea   : > { %v1877_v7 = vpop.f32.mrf.mxu2  ;;  %11928 = vst [vmem:[#allocation209_spill] sm:$0xff] %v8426_v59 }
 0x3eb   : > { %v8417_v2 = vadd.f32 %v1877_v7, %v1668_v31  ;;  %v8419_v17 = vpop.f32.mrf.mxu3 }
 0x3ec   : > { %11927 = vst [vmem:[#allocation208_spill] sm:$0xff] %v8419_v17  ;;  %2207 = vmatmul.f32.gmra.mxu0 %v7809_v9  ;;  %v469_v9 = vld [vmem:[%s6759_s7 + $0x138] sm:$0xff]  ;;  %v8437_v17 = vld [vmem:[%s6759_s7 + $0x1a8] sm:$0xff] }
 0x3ee   : > { %v1683_v56 = vpop.f32.mrf.mxu1 }
 0x3ef   : > { %2571 = vmatmul.f32.gmra.mxu2 %v467_v52 }
 0x3f0   : > { %2082 = vmatmul.f32.gmra.mxu3 %v8153_v30 }
 0x3f1   : > { %2374 = vmatmul.f32.gmra.mxu1 %v8437_v17  ;;  %v8440_v59 = vpop.f32.mrf.mxu0 }
 0x3f2   : > { %v1880_v10 = vpop.f32.mrf.mxu2  ;;  %11930 = vst [vmem:[#allocation211_spill] sm:$0xff] %v8440_v59 }
 0x3f3   : > { %v8430_v31 = vadd.f32 %v1880_v10, %v1671_v57  ;;  %v8432_v7 = vpop.f32.mrf.mxu3 }
 0x3f4   : > { %11929 = vst [vmem:[#allocation210_spill] sm:$0xff] %v8432_v7  ;;  %2210 = vmatmul.f32.gmra.mxu0 %v7825_v18  ;;  %v471_v18 = vld [vmem:[%s6759_s7 + $0x160] sm:$0xff]  ;;  %v8450_v7 = vld [vmem:[%s6759_s7 + $0x1d0] sm:$0xff] }
 0x3f6   : > { %v1686_v52 = vpop.f32.mrf.mxu1 }
 0x3f7   : > { %2574 = vmatmul.f32.gmra.mxu2 %v469_v9 }
 0x3f8   : > { %2085 = vmatmul.f32.gmra.mxu3 %v8166_v23 }
 0x3f9   : > { %2377 = vmatmul.f32.gmra.mxu1 %v8450_v7  ;;  %v8453_v59 = vpop.f32.mrf.mxu0 }
 0x3fa   : > { %v1883_v30 = vpop.f32.mrf.mxu2  ;;  %11932 = vst [vmem:[#allocation213_spill] sm:$0xff] %v8453_v59 }
 0x3fb   : > { %v8443_v57 = vadd.f32 %v1883_v30, %v1674_v55  ;;  %v8445_v10 = vpop.f32.mrf.mxu3 }
 0x3fc   : > { %11931 = vst [vmem:[#allocation212_spill] sm:$0xff] %v8445_v10  ;;  %2213 = vmatmul.f32.gmra.mxu0 %v7841_v53  ;;  %v473_v53 = vld [vmem:[%s6759_s7 + $0x188] sm:$0xff]  ;;  %v478_v10 = vld [vmem:[%s6759_s7 + $0x1f8] sm:$0xff] }
 0x3fe   : > { %v8458_v9 = vpop.f32.mrf.mxu1 }
 0x3ff   : > { %2577 = vmatmul.f32.gmra.mxu2 %v471_v18 }
 0x400   : > { %2088 = vmatmul.f32.gmra.mxu3 %v8179_v58 }
 0x401   : > { %2380 = vmatmul.f32.gmra.mxu1 %v478_v10  ;;  %v8466_v58 = vpop.f32.mrf.mxu0 }
 0x402   : > { %v1886_v23 = vpop.f32.mrf.mxu2  ;;  %11935 = vst [vmem:[#allocation216_spill] sm:$0xff] %v8466_v58  ;;  %v477_v58 = vld [vmem:[%s6759_s7 + $0x1d8] sm:$0xff] }
 0x403   : > { %v8456_v55 = vadd.f32 %v1886_v23, %v1677_v41  ;;  %v8460_v30 = vpop.f32.mrf.mxu3 }
 0x404   : > { %11934 = vst [vmem:[#allocation215_spill] sm:$0xff] %v8460_v30  ;;  %2216 = vmatmul.f32.gmra.mxu0 %v7857_v6  ;;  %v475_v6 = vld [vmem:[%s6759_s7 + $0x1b0] sm:$0xff]  ;;  %v480_v30 = vld [vmem:[%s6759_s7 + $0x220] sm:$0xff] }
 0x405   : > { %11933 = vst [vmem:[#allocation214_spill] sm:$0xff] %v8456_v55 }
 0x406   : > { %v8470_v41 = vpop.f32.mrf.mxu1 }
 0x407   : > { %2580 = vmatmul.f32.gmra.mxu2 %v473_v53 }
 0x408   : > { %2091 = vmatmul.f32.gmra.mxu3 %v8192_v61  ;;  %v635_v61 = vld [vmem:[#allocation4 + $0x1a8] sm:$0xff] }
 0x409   : > { %2383 = vmatmul.f32.gmra.mxu1 %v480_v30  ;;  %2874 = vmatpush.msra.mxu3 %v635_v61 }
 0x40a   : > { %v1889_v18 = vpop.f32.mrf.mxu2 }
 0x40b   : > { %v8468_v59 = vadd.f32 %v1889_v18, %v1680_v44  ;;  %v8472_v23 = vpop.f32.mrf.mxu3 }
 0x40c   : > { %11937 = vst [vmem:[#allocation218_spill] sm:$0xff] %v8472_v23  ;;  %2219 = vmatmul.f32.gmra.mxu0 %v7873_v11  ;;  %v634_v23 = vld [vmem:[#allocation4 + $0x190] sm:$0xff]  ;;  %v482_v11 = vld [vmem:[%s6759_s7 + $0x248] sm:$0xff] }
 0x40d   : > { %11936 = vst [vmem:[#allocation217_spill] sm:$0xff] %v8468_v59  ;;  %v633_v59 = vld [vmem:[#allocation4 + $0x178] sm:$0xff]  ;;  %2875 = vmatpush.msra.mxu3 %v634_v23  ;;  %v479_v23 = vld [vmem:[%s6759_s7 + $0x200] sm:$0xff] }
 0x40e   : > { %v8481_v44 = vpop.f32.mrf.mxu1 }
 0x40f   : > { %2583 = vmatmul.f32.gmra.mxu2 %v475_v6  ;;  %v8487_v6 = vpop.f32.mrf.mxu0  ;;  %2876 = vmatpush.msra.mxu3 %v633_v59  ;;  %v629_v59 = vld [vmem:[#allocation4 + $0x118] sm:$0xff] }
 0x410   : > { %2094 = vmatmul.f32.gmra.mxu3 %v8205_v60  ;;  %11940 = vst [vmem:[#allocation221_spill] sm:$0xff] %v8487_v6  ;;  %v632_v60 = vld [vmem:[#allocation4 + $0x160] sm:$0xff]  ;;  %v630_v6 = vld [vmem:[#allocation4 + $0x130] sm:$0xff] }
 0x411   : > { %2386 = vmatmul.f32.gmra.mxu1 %v482_v11  ;;  %2877 = vmatpush.msra.mxu3 %v632_v60  ;;  %v628_v60 = vld [vmem:[#allocation4 + $0x100] sm:$0xff] }
 0x412   : > { %v1892_v53 = vpop.f32.mrf.mxu2 }
 0x413   : > { %v8478_v55 = vadd.f32 %v1892_v53, %v1683_v56  ;;  %v8483_v18 = vpop.f32.mrf.mxu3  ;;  %v631_v53 = vld [vmem:[#allocation4 + $0x148] sm:$0xff] }
 0x414   : > { %11939 = vst [vmem:[#allocation220_spill] sm:$0xff] %v8483_v18  ;;  %2222 = vmatmul.f32.gmra.mxu0 %v7889_v12  ;;  %2878 = vmatpush.msra.mxu3 %v631_v53 }
 0x415   : > { %11938 = vst [vmem:[#allocation219_spill] sm:$0xff] %v8478_v55  ;;  %v6434_v55 = vld [vmem:[%s6759_s7 + $0x4c0] sm:$0xff] }
 0x416   : > { %v8492_v61 = vpop.f32.mrf.mxu1  ;;  %2879 = vmatpush.msra.mxu3 %v630_v6  ;;  %v627_v6 = vld [vmem:[#allocation4 + $0xe8] sm:$0xff] }
 0x417   : > { %2586 = vmatmul.f32.gmra.mxu2 %v477_v58  ;;  %v484_v58 = vld [vmem:[%s6759_s7 + $0x270] sm:$0xff] }
 0x418   : > { %2097 = vmatmul.f32.gmra.mxu3 %v8218_v14  ;;  %5791 = vmatpush.lsf.msrb.mxu0 %v484_v58  ;;  %v8499_v14 = vpop.f32.mrf.mxu0 }
 0x419   : > { %2389 = vmatmul.f32.gmra.mxu1 %v484_v58  ;;  %11943 = vst [vmem:[#allocation224_spill] sm:$0xff] %v8499_v14  ;;  %2880 = vmatpush.msra.mxu3 %v629_v59  ;;  %v481_v58 = vld [vmem:[%s6759_s7 + $0x228] sm:$0xff]  ;;  %v626_v59 = vld [vmem:[#allocation4 + $0xd0] sm:$0xff] }
 0x41a   : > { %v1895_v56 = vpop.f32.mrf.mxu2  ;;  %5792 = vmatpush.lsf.msrb.mxu0 %v482_v11  ;;  %v6435_v11 = vld [vmem:[%s6759_s7 + $0x4e8] sm:$0xff] }
 0x41b   : > { %v8490_v12 = vadd.f32 %v1895_v56, %v1686_v52  ;;  %v8494_v18 = vpop.f32.mrf.mxu3  ;;  %v8502_v52 = vld [vmem:[%s6759_s7 + $0x2a0] sm:$0xff]  ;;  %2881 = vmatpush.msra.mxu3 %v628_v60 }
 0x41c   : > { %11942 = vst [vmem:[#allocation223_spill] sm:$0xff] %v8494_v18  ;;  %2225 = vmatmul.f32.gmra.mxu0 %v6434_v55  ;;  %3505 = vxpose.xlu0.b32.start [1/16] %v8502_v52, 128  ;;  %v621_v18 = vld [vmem:[#allocation4 + $0x58] sm:$0xff] }
 0x41d   : > { %11941 = vst [vmem:[#allocation222_spill] sm:$0xff] %v8490_v12  ;;  %5793 = vmatpush.lsf.msrb.mxu0 %v480_v30  ;;  %2882 = vmatpush.msra.mxu3 %v627_v6  ;;  %v625_v30 = vld [vmem:[#allocation4 + $0xb8] sm:$0xff]  ;;  %v6450_v12 = vld [vmem:[%s6759_s7 + $0x740] sm:$0xff] }
 0x41e   : > { %v8509_v53 = vpop.f32.mrf.mxu1 }
 0x41f   : > { %2589 = vmatmul.f32.gmra.mxu2 %v479_v23  ;;  %5794 = vmatpush.lsf.msrb.mxu0 %v478_v10  ;;  %v8521_v10 = vld [vmem:[%s6759_s7 + $0x2c8] sm:$0xff] }
 0x420   : > { %2100 = vmatmul.f32.gmra.mxu3 %v8231_v37  ;;  %v8517_v37 = vld [vmem:[%s6759_s7 + $0x298] sm:$0xff]  ;;  %v8524_v60 = vpop.f32.mrf.mxu0 }
 0x421   : > { %5795 = vmatpush.lsf.msrb.mxu0 %v8450_v7  ;;  %2883 = vmatpush.msra.mxu3 %v626_v59  ;;  %11946 = vst [vmem:[#allocation227_spill] sm:$0xff] %v8524_v60  ;;  %v483_v59 = vld [vmem:[%s6759_s7 + $0x250] sm:$0xff] }
 0x422   : > { %v1898_v55 = vpop.f32.mrf.mxu2  ;;  %2392 = vmatmul.f32.gmra.mxu1 %v8517_v37 }
 0x423   : > { %v8507_v56 = vadd.f32 %v1898_v55, %v8458_v9  ;;  %v8511_v23 = vpop.f32.mrf.mxu3  ;;  %v624_v9 = vld [vmem:[#allocation4 + $0xa0] sm:$0xff]  ;;  %2884 = vmatpush.msra.mxu3 %v625_v30  ;;  %5796 = vmatpush.lsf.msrb.mxu0 %v8437_v17  ;;  %v623_v55 = vld [vmem:[#allocation4 + $0x88] sm:$0xff]  ;;  %v6436_v17 = vld [vmem:[%s6759_s7 + $0x510] sm:$0xff] }
 0x424   : > { %11945 = vst [vmem:[#allocation226_spill] sm:$0xff] %v8511_v23  ;;  %2228 = vmatmul.f32.gmra.mxu0 %v6435_v11  ;;  %3506 = vxpose.xlu0.b32.cont [2/16] %v8521_v10, 128  ;;  %v8539_v30 = vld [vmem:[%s6759_s7 + $0x2c0] sm:$0xff] }
 0x425   : > { %11944 = vst [vmem:[#allocation225_spill] sm:$0xff] %v8507_v56  ;;  %2885 = vmatpush.msra.mxu3 %v624_v9  ;;  %5797 = vmatpush.lsf.msrb.mxu0 %v8424_v28  ;;  %v620_v28 = vld [vmem:[#allocation4 + $0x40] sm:$0xff] }
 0x426   : > { %v8532_v11 = vpop.f32.mrf.mxu1 }
 0x427   : > { %2592 = vmatmul.f32.gmra.mxu2 %v481_v58  ;;  %2886 = vmatpush.msra.mxu3 %v623_v55 }
 0x428   : > { %2103 = vmatmul.f32.gmra.mxu3 %v8244_v36  ;;  %v622_v36 = vld [vmem:[#allocation4 + $0x70] sm:$0xff]  ;;  %5798 = vmatpush.lsf.msrb.mxu0 %v8413_v22  ;;  %v8547_v22 = vpop.f32.mrf.mxu0 }
 0x429   : > { %2887 = vmatpush.msra.mxu3 %v622_v36  ;;  %11949 = vst [vmem:[#allocation230_spill] sm:$0xff] %v8547_v22 }
 0x42a   : > { %v1901_v7 = vpop.f32.mrf.mxu2  ;;  %2395 = vmatmul.f32.gmra.mxu1 %v8539_v30  ;;  %5799 = vmatpush.lsf.msrb.mxu0 %v8400_v26  ;;  %v485_v26 = vld [vmem:[%s6759_s7 + $0x278] sm:$0xff] }
 0x42b   : > { %v8530_v6 = vadd.f32 %v1901_v7, %v8470_v41  ;;  %v8534_v58 = vpop.f32.mrf.mxu3  ;;  %2888 = vmatpush.msra.mxu3 %v621_v18  ;;  %v491_v41 = vld [vmem:[%s6759_s7 + $0x2f0] sm:$0xff]  ;;  %v6437_v18 = vld [vmem:[%s6759_s7 + $0x538] sm:$0xff] }
 0x42c   : > { %11948 = vst [vmem:[#allocation229_spill] sm:$0xff] %v8534_v58  ;;  %2231 = vmatmul.f32.gmra.mxu0 %v6436_v17  ;;  %3507 = vxpose.xlu0.b32.cont [3/16] %v491_v41, 128  ;;  %v6440_v58 = vld [vmem:[%s6759_s7 + $0x5b0] sm:$0xff] }
 0x42d   : > { %11947 = vst [vmem:[#allocation228_spill] sm:$0xff] %v8530_v6  ;;  %2889 = vmatpush.msra.mxu3 %v620_v28  ;;  %5800 = vmatpush.lsf.msrb.mxu0 %v8387_v39  ;;  %v493_v39 = vld [vmem:[%s6759_s7 + $0x318] sm:$0xff] }
 0x42e   : > { %v8552_v55 = vpop.f32.mrf.mxu1 }
 0x42f   : > { %2595 = vmatmul.f32.gmra.mxu2 %v483_v59  ;;  %5801 = vmatpush.lsf.msrb.mxu0 %v8374_v13  ;;  %v6438_v13 = vld [vmem:[%s6759_s7 + $0x560] sm:$0xff] }
 0x430   : > { %2106 = vmatmul.f32.gmra.mxu3 %v8257_v34  ;;  %v8559_v34 = vld [vmem:[%s6759_s7 + $0x2e8] sm:$0xff] }
 0x431   : > { %5802 = vmatpush.lsf.msrb.mxu0 %v8361_v38  ;;  %v8578_v38 = vld [vmem:[%s6759_s7 + $0x310] sm:$0xff] }
 0x432   : > { %v1904_v9 = vpop.f32.mrf.mxu2  ;;  %2398 = vmatmul.f32.gmra.mxu1 %v8559_v34 }
 0x433   : > { %v8550_v7 = vadd.f32 %v1904_v9, %v8481_v44  ;;  %v8554_v17 = vpop.f32.mrf.mxu3  ;;  %5803 = vmatpush.lsf.msrb.mxu0 %v8348_v48  ;;  %v8575_v9 = vpop.f32.mrf.mxu0 }
 0x434   : > { %11951 = vst [vmem:[#allocation232_spill] sm:$0xff] %v8554_v17  ;;  %2234 = vmatmul.f32.gmra.mxu0 %v6437_v18  ;;  %3508 = vxpose.xlu0.b32.cont [4/16] %v493_v39, 128 }
 0x435   : > { %11950 = vst [vmem:[#allocation231_spill] sm:$0xff] %v8550_v7  ;;  %5804 = vmatpush.lsf.msrb.mxu0 %v8335_v8  ;;  %v6439_v8 = vld [vmem:[%s6759_s7 + $0x588] sm:$0xff]  ;;  %v8733_v7 = vld [vmem:[%s6759_s7 + $0x4d0] sm:$0xff] }
 0x436   : > { %v8570_v36 = vpop.f32.mrf.mxu1  ;;  %11954 = vst [vmem:[#allocation235_spill] sm:$0xff] %v8575_v9 }
 0x437   : > { %2598 = vmatmul.f32.gmra.mxu2 %v485_v26  ;;  %5805 = vmatpush.lsf.msrb.mxu0 %v8322_v45 }
 0x438   : > { %2109 = vmatmul.f32.gmra.mxu3 %v8270_v1  ;;  %v495_v1 = vld [vmem:[%s6759_s7 + $0x340] sm:$0xff] }
 0x439   : > { %5806 = vmatpush.lsf.msrb.mxu0 %v8309_v19 }
 0x43a   : > { %v1907_v44 = vpop.f32.mrf.mxu2  ;;  %2401 = vmatmul.f32.gmra.mxu1 %v8578_v38 }
 0x43b   : > { %v8568_v59 = vadd.f32 %v1907_v44, %v8492_v61  ;;  %v8572_v28 = vpop.f32.mrf.mxu3  ;;  %v8595_v26 = vpop.f32.mrf.mxu0  ;;  %v11957_v44 = vld [vmem:[#allocation88_spill] sm:$0xff] }
 0x43c   : > { %11953 = vst [vmem:[#allocation234_spill] sm:$0xff] %v8572_v28  ;;  %2237 = vmatmul.f32.gmra.mxu0 %v6438_v13  ;;  %3509 = vxpose.xlu0.b32.cont [5/16] %v495_v1, 128  ;;  %v11961_v28 = vld [vmem:[#allocation92_spill] sm:$0xff] }
 0x43d   : > { %11952 = vst [vmem:[#allocation233_spill] sm:$0xff] %v8568_v59 }
 0x43e   : > { %v8587_v61 = vpop.f32.mrf.mxu1  ;;  %11956 = vst [vmem:[#allocation237_spill] sm:$0xff] %v8595_v26 }
 0x43f   : > { %2601 = vmatmul.f32.gmra.mxu2 %v8502_v52  ;;  %v8593_v52 = vld [vmem:[%s6759_s7 + $0x338] sm:$0xff] }
 0x440   : > { %2112 = vmatmul.f32.gmra.mxu3 %v8283_v54  ;;  %v497_v54 = vld [vmem:[%s6759_s7 + $0x368] sm:$0xff] }
 0x442   : > { %v2554_v48 = vpop.f32.mrf.mxu2  ;;  %2404 = vmatmul.f32.gmra.mxu1 %v8593_v52 }
 0x443   : > { %5807 = vllmr.16.mxu0  ;;  %v8589_v18 = vpop.f32.mrf.mxu3  ;;  %v2555_v45 = vadd.f32 %v2554_v48, %v8509_v53  ;;  %v8609_v53 = vld [vmem:[%s6759_s7 + $0x360] sm:$0xff] }
 0x444   : > { %11955 = vst [vmem:[#allocation236_spill] sm:$0xff] %v8589_v18  ;;  %2240 = vmatmul.f32.gmra.mxu0 %v6439_v8  ;;  %3510 = vxpose.xlu0.b32.cont [6/16] %v497_v54, 128 }
 0x445   : > { %v2746_v13 = vadd.f32 %v2555_v45, %v11957_v44  ;;  %v8615_v45 = vpop.f32.mrf.mxu0 }
 0x446   : > { %v8603_v23 = vpop.f32.mrf.mxu1 }
 0x447   : > { %2604 = vmatmul.f32.gmra.mxu2 %v8521_v10  ;;  %v11959_v10 = vld [vmem:[#allocation13_spill] sm:$0xff] }
 0x448   : > { %2115 = vmatmul.f32.gmra.mxu3 %v8296_v40  ;;  %v2810_v48 = vmul.f32 %v2746_v13, %v11959_v10  ;;  %v499_v40 = vld [vmem:[%s6759_s7 + $0x390] sm:$0xff]  ;;  %11960 = vst [vmem:[#allocation13_spill] sm:$0xff] %v8615_v45  ;;  %v6441_v13 = vld [vmem:[%s6759_s7 + $0x5d8] sm:$0xff] }
 0x44a   : > { %v2557_v19 = vpop.f32.mrf.mxu2  ;;  %2407 = vmatmul.f32.gmra.mxu1 %v8609_v53 }
 0x44b   : > { %v8605_v8 = vpop.f32.mrf.mxu3  ;;  %v2558_v17 = vadd.f32 %v2557_v19, %v8532_v11  ;;  %v8624_v11 = vld [vmem:[%s6759_s7 + $0x388] sm:$0xff]  ;;  %v11963_v19 = vld [vmem:[#allocation15_spill] sm:$0xff] }
 0x44c   : > { %11958 = vst [vmem:[#allocation88_spill] sm:$0xff] %v8605_v8  ;;  %2243 = vmatmul.f32.gmra.mxu0 %v6440_v58  ;;  %3511 = vxpose.xlu0.b32.cont [7/16] %v499_v40, 128 }
 0x44d   : > { %v2747_v18 = vadd.f32 %v2558_v17, %v11961_v28  ;;  %v8630_v28 = vpop.f32.mrf.mxu0 }
 0x44e   : > { %v8618_v58 = vpop.f32.mrf.mxu1  ;;  %11964 = vst [vmem:[#allocation15_spill] sm:$0xff] %v8630_v28  ;;  %v6443_v28 = vld [vmem:[%s6759_s7 + $0x628] sm:$0xff] }
 0x44f   : > { %2607 = vmatmul.f32.gmra.mxu2 %v491_v41  ;;  %v2811_v10 = vmul.f32 %v2747_v18, %v11963_v19 }
 0x450   : > { %2890 = vmatmul.f32.vlgmr.msra.gmra.mxu3 %v2810_v48  ;;  %v501_v48 = vld [vmem:[%s6759_s7 + $0x3b8] sm:$0xff] }
 0x452   : > { %v2560_v44 = vpop.f32.mrf.mxu2  ;;  %2410 = vmatmul.f32.gmra.mxu1 %v8624_v11 }
 0x453   : > { %v8620_v8 = vpop.f32.mrf.mxu3  ;;  %v2561_v41 = vadd.f32 %v2560_v44, %v8552_v55  ;;  %v6442_v55 = vld [vmem:[%s6759_s7 + $0x600] sm:$0xff]  ;;  %v11967_v44 = vld [vmem:[#allocation17_spill] sm:$0xff] }
 0x454   : > { %11962 = vst [vmem:[#allocation92_spill] sm:$0xff] %v8620_v8  ;;  %2246 = vmatmul.f32.gmra.mxu0 %v6441_v13  ;;  %3512 = vxpose.xlu0.b32.cont [8/16] %v501_v48, 128  ;;  %v11965_v8 = vld [vmem:[#allocation95_spill] sm:$0xff] }
 0x455   : > { %v2748_v9 = vadd.f32 %v2561_v41, %v11965_v8  ;;  %v11968_v41 = vld [vmem:[#allocation98_spill] sm:$0xff] }
 0x456   : > { %v8633_v13 = vpop.f32.mrf.mxu1 }
 0x457   : > { %2610 = vmatmul.f32.gmra.mxu2 %v493_v39  ;;  %v8639_v39 = vld [vmem:[%s6759_s7 + $0x3b0] sm:$0xff]  ;;  %v2812_v19 = vmul.f32 %v2748_v9, %v11967_v44  ;;  %v8654_v9 = vld [vmem:[%s6759_s7 + $0x3d8] sm:$0xff] }
 0x458   : > { %2893 = vmatmul.f32.gmra.mxu3 %v2811_v10  ;;  %v503_v10 = vld [vmem:[%s6759_s7 + $0x3e0] sm:$0xff] }
 0x45a   : > { %v2563_v17 = vpop.f32.mrf.mxu2  ;;  %2413 = vmatmul.f32.gmra.mxu1 %v8639_v39 }
 0x45b   : > { %v8635_v26 = vpop.f32.mrf.mxu3  ;;  %v2564_v18 = vadd.f32 %v2563_v17, %v8570_v36  ;;  %v8651_v36 = vpop.f32.mrf.mxu0  ;;  %v11971_v17 = vld [vmem:[#allocation19_spill] sm:$0xff] }
 0x45c   : > { %11966 = vst [vmem:[#allocation95_spill] sm:$0xff] %v8635_v26  ;;  %2249 = vmatmul.f32.gmra.mxu0 %v6442_v55  ;;  %3513 = vxpose.xlu0.b32.cont [9/16] %v503_v10, 128 }
 0x45d   : > { %v2749_v45 = vadd.f32 %v2564_v18, %v11968_v41  ;;  %11970 = vst [vmem:[#allocation98_spill] sm:$0xff] %v8651_v36  ;;  %v505_v18 = vld [vmem:[%s6759_s7 + $0x408] sm:$0xff]  ;;  %v6444_v36 = vld [vmem:[%s6759_s7 + $0x650] sm:$0xff] }
 0x45e   : > { %v8646_v26 = vpop.f32.mrf.mxu1  ;;  %v11972_v41 = vld [vmem:[#allocation101_spill] sm:$0xff] }
 0x45f   : > { %2613 = vmatmul.f32.gmra.mxu2 %v495_v1  ;;  %v2813_v44 = vmul.f32 %v2749_v45, %v11971_v17 }
 0x460   : > { %2896 = vmatmul.f32.gmra.mxu3 %v2812_v19 }
 0x462   : > { %v2566_v8 = vpop.f32.mrf.mxu2  ;;  %2416 = vmatmul.f32.gmra.mxu1 %v8654_v9 }
 0x463   : > { %v8648_v55 = vpop.f32.mrf.mxu3  ;;  %v2567_v1 = vadd.f32 %v2566_v8, %v8587_v61  ;;  %v8667_v61 = vld [vmem:[%s6759_s7 + $0x400] sm:$0xff]  ;;  %v11975_v8 = vld [vmem:[#allocation21_spill] sm:$0xff] }
 0x464   : > { %11969 = vst [vmem:[#allocation17_spill] sm:$0xff] %v8648_v55  ;;  %2252 = vmatmul.f32.gmra.mxu0 %v6443_v28  ;;  %3514 = vxpose.xlu0.b32.cont [10/16] %v505_v18, 128 }
 0x465   : > { %v2750_v55 = vadd.f32 %v2567_v1, %v11972_v41  ;;  %v507_v1 = vld [vmem:[%s6759_s7 + $0x430] sm:$0xff]  ;;  %v11976_v41 = vld [vmem:[#allocation105_spill] sm:$0xff] }
 0x466   : > { %v8661_v28 = vpop.f32.mrf.mxu1 }
 0x467   : > { %2616 = vmatmul.f32.gmra.mxu2 %v497_v54  ;;  %v8669_v54 = vpop.f32.mrf.mxu0  ;;  %v2814_v17 = vmul.f32 %v2750_v55, %v11975_v8  ;;  %v11978_v55 = vld [vmem:[#allocation23_spill] sm:$0xff] }
 0x468   : > { %2899 = vmatmul.f32.gmra.mxu3 %v2813_v44  ;;  %11974 = vst [vmem:[#allocation101_spill] sm:$0xff] %v8669_v54  ;;  %v6445_v54 = vld [vmem:[%s6759_s7 + $0x678] sm:$0xff] }
 0x469   : > { %v509_v8 = vld [vmem:[%s6759_s7 + $0x458] sm:$0xff] }
 0x46a   : > { %v2569_v19 = vpop.f32.mrf.mxu2  ;;  %2419 = vmatmul.f32.gmra.mxu1 %v8667_v61 }
 0x46b   : > { %v8663_v14 = vpop.f32.mrf.mxu3  ;;  %v2570_v45 = vadd.f32 %v2569_v19, %v8603_v23  ;;  %v8682_v23 = vld [vmem:[%s6759_s7 + $0x428] sm:$0xff] }
 0x46c   : > { %11973 = vst [vmem:[#allocation19_spill] sm:$0xff] %v8663_v14  ;;  %2255 = vmatmul.f32.gmra.mxu0 %v6444_v36  ;;  %3515 = vxpose.xlu0.b32.cont [11/16] %v507_v1, 128 }
 0x46d   : > { %v2751_v14 = vadd.f32 %v2570_v45, %v11976_v41  ;;  %v11980_v41 = vld [vmem:[#allocation109_spill] sm:$0xff] }
 0x46e   : > { %v8676_v36 = vpop.f32.mrf.mxu1 }
 0x46f   : > { %2619 = vmatmul.f32.gmra.mxu2 %v499_v40  ;;  %v2815_v19 = vmul.f32 %v2751_v14, %v11978_v55  ;;  %v8688_v45 = vpop.f32.mrf.mxu0  ;;  %v8697_v14 = vld [vmem:[%s6759_s7 + $0x450] sm:$0xff] }
 0x470   : > { %2902 = vmatmul.f32.gmra.mxu3 %v2814_v17  ;;  %11979 = vst [vmem:[#allocation105_spill] sm:$0xff] %v8688_v45 }
 0x472   : > { %v2572_v44 = vpop.f32.mrf.mxu2  ;;  %2422 = vmatmul.f32.gmra.mxu1 %v8682_v23 }
 0x473   : > { %v8678_v60 = vpop.f32.mrf.mxu3  ;;  %v2573_v40 = vadd.f32 %v2572_v44, %v8618_v58  ;;  %v6446_v58 = vld [vmem:[%s6759_s7 + $0x6a0] sm:$0xff]  ;;  %v11982_v44 = vld [vmem:[#allocation25_spill] sm:$0xff] }
 0x474   : > { %11977 = vst [vmem:[#allocation21_spill] sm:$0xff] %v8678_v60  ;;  %2258 = vmatmul.f32.gmra.mxu0 %v6445_v54  ;;  %3516 = vxpose.xlu0.b32.cont [12/16] %v509_v8, 128 }
 0x475   : > { %v2752_v60 = vadd.f32 %v2573_v40, %v11980_v41 }
 0x476   : > { %v8691_v54 = vpop.f32.mrf.mxu1 }
 0x477   : > { %2622 = vmatmul.f32.gmra.mxu2 %v501_v48  ;;  %v2816_v55 = vmul.f32 %v2752_v60, %v11982_v44  ;;  %v8703_v41 = vpop.f32.mrf.mxu0  ;;  %v8712_v60 = vld [vmem:[%s6759_s7 + $0x478] sm:$0xff] }
 0x478   : > { %2905 = vmatmul.f32.gmra.mxu3 %v2815_v19  ;;  %v511_v19 = vld [vmem:[%s6759_s7 + $0x480] sm:$0xff]  ;;  %11983 = vst [vmem:[#allocation109_spill] sm:$0xff] %v8703_v41 }
 0x47a   : > { %v2575_v17 = vpop.f32.mrf.mxu2  ;;  %2425 = vmatmul.f32.gmra.mxu1 %v8697_v14 }
 0x47b   : > { %v8693_v22 = vpop.f32.mrf.mxu3  ;;  %v2576_v48 = vadd.f32 %v2575_v17, %v8633_v13  ;;  %v6447_v13 = vld [vmem:[%s6759_s7 + $0x6c8] sm:$0xff]  ;;  %v11986_v17 = vld [vmem:[#allocation27_spill] sm:$0xff] }
 0x47c   : > { %11981 = vst [vmem:[#allocation23_spill] sm:$0xff] %v8693_v22  ;;  %2261 = vmatmul.f32.gmra.mxu0 %v6446_v58  ;;  %3517 = vxpose.xlu0.b32.cont [13/16] %v511_v19, 128  ;;  %v11984_v22 = vld [vmem:[#allocation111_spill] sm:$0xff] }
 0x47d   : > { %v2753_v45 = vadd.f32 %v2576_v48, %v11984_v22  ;;  %v11987_v48 = vld [vmem:[#allocation113_spill] sm:$0xff] }
 0x47e   : > { %v8706_v58 = vpop.f32.mrf.mxu1 }
 0x47f   : > { %2625 = vmatmul.f32.gmra.mxu2 %v503_v10  ;;  %v2817_v44 = vmul.f32 %v2753_v45, %v11986_v17  ;;  %v512_v45 = vld [vmem:[%s6759_s7 + $0x4a0] sm:$0xff]  ;;  %v11990_v17 = vld [vmem:[#allocation29_spill] sm:$0xff] }
 0x480   : > { %2908 = vmatmul.f32.gmra.mxu3 %v2816_v55  ;;  %v8718_v55 = vld [vmem:[%s6759_s7 + $0x4a8] sm:$0xff] }
 0x482   : > { %v2578_v40 = vpop.f32.mrf.mxu2  ;;  %2428 = vmatmul.f32.gmra.mxu1 %v8712_v60 }
 0x483   : > { %v8708_v59 = vpop.f32.mrf.mxu3  ;;  %v2579_v10 = vadd.f32 %v2578_v40, %v8646_v26  ;;  %v6448_v26 = vld [vmem:[%s6759_s7 + $0x6f0] sm:$0xff] }
 0x484   : > { %11985 = vst [vmem:[#allocation25_spill] sm:$0xff] %v8708_v59  ;;  %2264 = vmatmul.f32.gmra.mxu0 %v6447_v13  ;;  %3518 = vxpose.xlu0.b32.cont [14/16] %v8718_v55, 128 }
 0x485   : > { %v2754_v59 = vadd.f32 %v2579_v10, %v11987_v48  ;;  %v11991_v48 = vld [vmem:[#allocation116_spill] sm:$0xff] }
 0x486   : > { %v8722_v13 = vpop.f32.mrf.mxu1 }
 0x487   : > { %2628 = vmatmul.f32.gmra.mxu2 %v505_v18  ;;  %v8727_v18 = vpop.f32.mrf.mxu0 }
 0x488   : > { %2911 = vmatmul.f32.gmra.mxu3 %v2817_v44  ;;  %11989 = vst [vmem:[#allocation27_spill] sm:$0xff] %v8727_v18  ;;  %v2818_v44 = vmul.f32 %v2754_v59, %v11990_v17  ;;  %v6449_v18 = vld [vmem:[%s6759_s7 + $0x718] sm:$0xff] }
 0x48a   : > { %v2581_v22 = vpop.f32.mrf.mxu2  ;;  %2431 = vmatmul.f32.gmra.mxu1 %v512_v45 }
 0x48b   : > { %v8724_v41 = vpop.f32.mrf.mxu3  ;;  %v2582_v40 = vadd.f32 %v2581_v22, %v8661_v28  ;;  %v514_v28 = vld [vmem:[%s6759_s7 + $0x4c8] sm:$0xff]  ;;  %v11994_v22 = vld [vmem:[#allocation31_spill] sm:$0xff] }
 0x48c   : > { %11988 = vst [vmem:[#allocation111_spill] sm:$0xff] %v8724_v41  ;;  %2267 = vmatmul.f32.gmra.mxu0 %v6448_v26  ;;  %3519 = vxpose.xlu0.b32.cont [15/16] %v8733_v7, 128 }
 0x48d   : > { %v2755_v41 = vadd.f32 %v2582_v40, %v11991_v48  ;;  %v11995_v48 = vld [vmem:[#allocation119_spill] sm:$0xff] }
 0x48e   : > { %v8737_v26 = vpop.f32.mrf.mxu1 }
 0x48f   : > { %2631 = vmatmul.f32.gmra.mxu2 %v507_v1  ;;  %v8743_v59 = vpop.f32.mrf.mxu0  ;;  %v2819_v17 = vmul.f32 %v2755_v41, %v11994_v22 }
 0x490   : > { %2914 = vmatmul.f32.gmra.mxu3 %v2818_v44  ;;  %11993 = vst [vmem:[#allocation29_spill] sm:$0xff] %v8743_v59  ;;  %v8748_v44 = vld [vmem:[%s6759_s7 + $0x4f8] sm:$0xff]  ;;  %v516_v59 = vld [vmem:[%s6759_s7 + $0x4f0] sm:$0xff] }
 0x491   : > { %5896 = vmatpush.lsf.msrb.mxu1 %v516_v59  ;;  %6040 = vmatpush.lsf.msrb.mxu3 %v516_v59 }
 0x492   : > { %v2584_v10 = vpop.f32.mrf.mxu2  ;;  %2434 = vmatmul.f32.gmra.mxu1 %v514_v28 }
 0x493   : > { %v8739_v6 = vpop.f32.mrf.mxu3  ;;  %v2585_v1 = vadd.f32 %v2584_v10, %v8676_v36  ;;  %5897 = vmatpush.lsf.msrb.mxu1 %v514_v28  ;;  %6041 = vmatpush.lsf.msrb.mxu3 %v514_v28 }
 0x494   : > { %11992 = vst [vmem:[#allocation113_spill] sm:$0xff] %v8739_v6  ;;  %2270 = vmatmul.f32.gmra.mxu0 %v6449_v18  ;;  %3520 = vxpose.xlu0.b32.end [16/16] %v8748_v44, 128 }
 0x495   : > { %v2756_v6 = vadd.f32 %v2585_v1, %v11995_v48  ;;  %5898 = vmatpush.lsf.msrb.mxu1 %v512_v45  ;;  %6042 = vmatpush.lsf.msrb.mxu3 %v512_v45  ;;  %v6451_v48 = vld [vmem:[%s6759_s7 + $0x768] sm:$0xff]  ;;  %v12001_v45 = vld [vmem:[#allocation34_spill] sm:$0xff] }
 0x496   : > { %v8752_v56 = vpop.f32.mrf.mxu1 }
 0x497   : > { %2634 = vmatmul.f32.gmra.mxu2 %v509_v8  ;;  %v11997_v8 = vld [vmem:[#allocation33_spill] sm:$0xff]  ;;  %v8760_v10 = vpop.f32.mrf.mxu0  ;;  %5899 = vmatpush.lsf.msrb.mxu1 %v8712_v60 }
 0x498   : > { %2917 = vmatmul.f32.gmra.mxu3 %v2819_v17  ;;  %v2820_v41 = vmul.f32 %v2756_v6, %v11997_v8  ;;  %11998 = vst [vmem:[#allocation31_spill] sm:$0xff] %v8760_v10  ;;  %v8770_v6 = vld [vmem:[%s6759_s7 + $0x518] sm:$0xff]  ;;  %v9165_v10 = vld [vmem:[%s6759_s7 + $0x928] sm:$0xff] }
 0x499   : > { %6043 = vmatpush.lsf.msrb.mxu3 %v8712_v60  ;;  %5900 = vmatpush.lsf.msrb.mxu1 %v8697_v14 }
 0x49a   : > { %v2587_v40 = vpop.f32.mrf.mxu2  ;;  %2437 = vmatmul.f32.gmra.mxu1 %v516_v59 }
 0x49b   : > { %v8754_v18 = vpop.f32.mrf.mxu3  ;;  %v2588_v36 = vadd.f32 %v2587_v40, %v8691_v54  ;;  %5901 = vmatpush.lsf.msrb.mxu1 %v8682_v23  ;;  %6044 = vmatpush.lsf.msrb.mxu3 %v8697_v14  ;;  %v8792_v14 = vld [vmem:[%s6759_s7 + $0x540] sm:$0xff] }
 0x49c   : > { %11996 = vst [vmem:[#allocation116_spill] sm:$0xff] %v8754_v18  ;;  %2273 = vmatmul.f32.gmra.mxu0 %v6450_v12  ;;  %v11999_v12 = vld [vmem:[#allocation122_spill] sm:$0xff] }
 0x49d   : > { %v2757_v22 = vadd.f32 %v2588_v36, %v11999_v12  ;;  %5902 = vmatpush.lsf.msrb.mxu1 %v8667_v61  ;;  %6045 = vmatpush.lsf.msrb.mxu3 %v8682_v23  ;;  %v6452_v36 = vld [vmem:[%s6759_s7 + $0x790] sm:$0xff] }
 0x49f   : > { %2637 = vmatmul.f32.gmra.mxu2 %v511_v19  ;;  %v8766_v54 = vpop.f32.mrf.mxu1  ;;  %v2821_v28 = vmul.f32 %v2757_v22, %v12001_v45  ;;  %v8782_v60 = vpop.f32.mrf.mxu0  ;;  %5903 = vmatpush.lsf.msrb.mxu1 %v8654_v9  ;;  %v12009_v45 = vld [vmem:[#allocation36_spill] sm:$0xff] }
 0x4a0   : > { %2920 = vmatmul.f32.gmra.mxu3 %v2820_v41  ;;  %12002 = vst [vmem:[#allocation33_spill] sm:$0xff] %v8782_v60  ;;  %v12005_v41 = vld [vmem:[#allocation35_spill] sm:$0xff] }
 0x4a1   : > { %6046 = vmatpush.lsf.msrb.mxu3 %v8667_v61  ;;  %5904 = vmatpush.lsf.msrb.mxu1 %v8639_v39  ;;  %v12006_v61 = vld [vmem:[#allocation128_spill] sm:$0xff] }
 0x4a2   : > { %v2590_v1 = vpop.f32.mrf.mxu2  ;;  %2440 = vmatmul.f32.gmra.mxu1 %v8770_v6 }
 0x4a3   : > { %v8763_v17 = vpop.f32.mrf.mxu3  ;;  %v2591_v19 = vadd.f32 %v2590_v1, %v8706_v58  ;;  %v12003_v58 = vld [vmem:[#allocation125_spill] sm:$0xff]  ;;  %5905 = vmatpush.lsf.msrb.mxu1 %v8624_v11  ;;  %6047 = vmatpush.lsf.msrb.mxu3 %v8654_v9 }
 0x4a4   : > { %12000 = vst [vmem:[#allocation119_spill] sm:$0xff] %v8763_v17  ;;  %2276 = vmatmul.f32.gmra.mxu0 %v6451_v48  ;;  %v8814_v9 = vld [vmem:[%s6759_s7 + $0x568] sm:$0xff]  ;;  %v8914_v17 = vld [vmem:[%s6759_s7 + $0x680] sm:$0xff] }
 0x4a5   : > { %v2758_v40 = vadd.f32 %v2591_v19, %v12003_v58  ;;  %5906 = vmatpush.lsf.msrb.mxu1 %v8609_v53  ;;  %6048 = vmatpush.lsf.msrb.mxu3 %v8639_v39  ;;  %v519_v58 = vld [vmem:[%s6759_s7 + $0x520] sm:$0xff] }
 0x4a7   : > { %2640 = vmatmul.f32.gmra.mxu2 %v8718_v55  ;;  %v8788_v8 = vpop.f32.mrf.mxu1  ;;  %v2822_v1 = vmul.f32 %v2758_v40, %v12005_v41  ;;  %5907 = vmatpush.lsf.msrb.mxu1 %v8593_v52  ;;  %v8811_v19 = vpop.f32.mrf.mxu0 }
 0x4a8   : > { %2923 = vmatmul.f32.gmra.mxu3 %v2821_v28  ;;  %12008 = vst [vmem:[#allocation125_spill] sm:$0xff] %v8811_v19  ;;  %v9175_v19 = vld [vmem:[%s6759_s7 + $0x950] sm:$0xff] }
 0x4a9   : > { %6049 = vmatpush.lsf.msrb.mxu3 %v8624_v11  ;;  %5908 = vmatpush.lsf.msrb.mxu1 %v8578_v38 }
 0x4aa   : > { %v2593_v59 = vpop.f32.mrf.mxu2  ;;  %2443 = vmatmul.f32.gmra.mxu1 %v8792_v14 }
 0x4ab   : > { %v8785_v55 = vpop.f32.mrf.mxu3  ;;  %v2594_v23 = vadd.f32 %v2593_v59, %v8722_v13  ;;  %5909 = vmatpush.lsf.msrb.mxu1 %v8559_v34  ;;  %6050 = vmatpush.lsf.msrb.mxu3 %v8609_v53 }
 0x4ac   : > { %12004 = vst [vmem:[#allocation122_spill] sm:$0xff] %v8785_v55  ;;  %2279 = vmatmul.f32.gmra.mxu0 %v6452_v36  ;;  %v8835_v36 = vld [vmem:[%s6759_s7 + $0x590] sm:$0xff] }
 0x4ad   : > { %v2759_v22 = vadd.f32 %v2594_v23, %v12006_v61  ;;  %5910 = vmatpush.lsf.msrb.mxu1 %v8539_v30  ;;  %6051 = vmatpush.lsf.msrb.mxu3 %v8593_v52  ;;  %v12012_v52 = vld [vmem:[#allocation37_spill] sm:$0xff] }
 0x4ae   : > { %v521_v61 = vld [vmem:[%s6759_s7 + $0x548] sm:$0xff] }
 0x4af   : > { %2643 = vmatmul.f32.gmra.mxu2 %v8733_v7  ;;  %v6453_v7 = vld [vmem:[%s6759_s7 + $0x7b8] sm:$0xff]  ;;  %v8808_v48 = vpop.f32.mrf.mxu1  ;;  %v2823_v28 = vmul.f32 %v2759_v22, %v12009_v45  ;;  %5911 = vmatpush.lsf.msrb.mxu1 %v8517_v37  ;;  %v8838_v53 = vpop.f32.mrf.mxu0 }
 0x4b0   : > { %2926 = vmatmul.f32.gmra.mxu3 %v2822_v1  ;;  %12011 = vst [vmem:[#allocation128_spill] sm:$0xff] %v8838_v53  ;;  %v8852_v22 = vld [vmem:[%s6759_s7 + $0x5b8] sm:$0xff] }
 0x4b1   : > { %6052 = vmatpush.lsf.msrb.mxu3 %v8578_v38  ;;  %v6455_v38 = vld [vmem:[%s6759_s7 + $0x808] sm:$0xff] }
 0x4b2   : > { %v2596_v12 = vpop.f32.mrf.mxu2  ;;  %2446 = vmatmul.f32.gmra.mxu1 %v8814_v9 }
 0x4b3   : > { %v8805_v13 = vpop.f32.mrf.mxu3  ;;  %v2597_v39 = vadd.f32 %v2596_v12, %v8737_v26  ;;  %6053 = vmatpush.lsf.msrb.mxu3 %v8559_v34 }
 0x4b4   : > { %12007 = vst [vmem:[#allocation34_spill] sm:$0xff] %v8805_v13  ;;  %2282 = vmatmul.f32.gmra.mxu0 %v6453_v7  ;;  %v535_v13 = vld [vmem:[%s6759_s7 + $0x660] sm:$0xff] }
 0x4b5   : > { %v2760_v11 = vadd.f32 %v2597_v39, %v7912_v32  ;;  %6054 = vmatpush.lsf.msrb.mxu3 %v8539_v30  ;;  %v12014_v30 = vld [vmem:[#allocation38_spill] sm:$0xff] }
 0x4b7   : > { %2646 = vmatmul.f32.gmra.mxu2 %v8748_v44  ;;  %v6454_v44 = vld [vmem:[%s6759_s7 + $0x7e0] sm:$0xff]  ;;  %v8831_v40 = vpop.f32.mrf.mxu1  ;;  %v2824_v23 = vmul.f32 %v2760_v11, %v12012_v52  ;;  %6055 = vmatpush.lsf.msrb.mxu3 %v8517_v37  ;;  %v6456_v37 = vld [vmem:[%s6759_s7 + $0x830] sm:$0xff] }
 0x4b8   : > { %2929 = vmatmul.f32.gmra.mxu3 %v2823_v28  ;;  %v8865_v11 = vld [vmem:[%s6759_s7 + $0x5e0] sm:$0xff] }
 0x4b9   : > { %5912 = vllmr.16.mxu1 }
 0x4ba   : > { %v2599_v59 = vpop.f32.mrf.mxu2  ;;  %2449 = vmatmul.f32.gmra.mxu1 %v8835_v36 }
 0x4bb   : > { %v8827_v26 = vpop.f32.mrf.mxu3  ;;  %v2600_v32 = vadd.f32 %v2599_v59, %v8752_v56  ;;  %v523_v59 = vld [vmem:[%s6759_s7 + $0x570] sm:$0xff] }
 0x4bc   : > { %12010 = vst [vmem:[#allocation35_spill] sm:$0xff] %v8827_v26  ;;  %2285 = vmatmul.f32.gmra.mxu0 %v6454_v44  ;;  %v6463_v26 = vld [vmem:[%s6759_s7 + $0x948] sm:$0xff] }
 0x4bd   : > { %v2761_v1 = vadd.f32 %v2600_v32, %v7925_v4  ;;  %v8857_v4 = vpop.f32.mrf.mxu0 }
 0x4be   : > { %12015 = vst [vmem:[#allocation37_spill] sm:$0xff] %v8857_v4  ;;  %v574_v4 = vld [vmem:[%s6759_s7 + $0x978] sm:$0xff] }
 0x4bf   : > { %2649 = vmatmul.f32.gmra.mxu2 %v519_v58  ;;  %v2405_v56 = vpop.f32.mrf.mxu1  ;;  %v2825_v7 = vmul.f32 %v2761_v1, %v12014_v30  ;;  %v12017_v58 = vld [vmem:[#allocation39_spill] sm:$0xff]  ;;  %v12020_v30 = vld [vmem:[#allocation40_spill] sm:$0xff] }
 0x4c0   : > { %2932 = vmatmul.f32.gmra.mxu3 %v2824_v23  ;;  %v6457_v1 = vld [vmem:[%s6759_s7 + $0x858] sm:$0xff] }
 0x4c2   : > { %v2602_v41 = vpop.f32.mrf.mxu2  ;;  %2452 = vmatmul.f32.gmra.mxu1 %v8852_v22 }
 0x4c3   : > { %v8846_v12 = vpop.f32.mrf.mxu3  ;;  %v2603_v34 = vadd.f32 %v2602_v41, %v8766_v54 }
 0x4c4   : > { %12013 = vst [vmem:[#allocation36_spill] sm:$0xff] %v8846_v12  ;;  %2288 = vmatmul.f32.gmra.mxu0 %v6455_v38  ;;  %v525_v38 = vld [vmem:[%s6759_s7 + $0x598] sm:$0xff] }
 0x4c5   : > { %v2762_v45 = vadd.f32 %v2603_v34, %v7938_v46  ;;  %v8870_v52 = vpop.f32.mrf.mxu0 }
 0x4c6   : > { %12018 = vst [vmem:[#allocation39_spill] sm:$0xff] %v8870_v52 }
 0x4c7   : > { %6056 = vllmr.16.mxu3  ;;  %2652 = vmatmul.f32.gmra.mxu2 %v521_v61  ;;  %v2408_v54 = vpop.f32.mrf.mxu1  ;;  %v2826_v32 = vmul.f32 %v2762_v45, %v12017_v58  ;;  %v8878_v61 = vld [vmem:[%s6759_s7 + $0x608] sm:$0xff] }
 0x4c8   : > { %2935 = vmatmul.f32.gmra.mxu3 %v2825_v7 }
 0x4ca   : > { %v2605_v39 = vpop.f32.mrf.mxu2  ;;  %2455 = vmatmul.f32.gmra.mxu1 %v8865_v11 }
 0x4cb   : > { %v8860_v28 = vpop.f32.mrf.mxu3  ;;  %v2606_v44 = vadd.f32 %v2605_v39, %v8788_v8 }
 0x4cc   : > { %12016 = vst [vmem:[#allocation38_spill] sm:$0xff] %v8860_v28  ;;  %2291 = vmatmul.f32.gmra.mxu0 %v6456_v37  ;;  %v6458_v37 = vld [vmem:[%s6759_s7 + $0x880] sm:$0xff]  ;;  %v539_v28 = vld [vmem:[%s6759_s7 + $0x6b0] sm:$0xff] }
 0x4cd   : > { %v2763_v23 = vadd.f32 %v2606_v44, %v7951_v29  ;;  %v8888_v58 = vpop.f32.mrf.mxu0 }
 0x4ce   : > { %12022 = vst [vmem:[#allocation239_spill] sm:$0xff] %v8888_v58 }
 0x4cf   : > { %2655 = vmatmul.f32.gmra.mxu2 %v523_v59  ;;  %v2411_v8 = vpop.f32.mrf.mxu1  ;;  %v2827_v7 = vmul.f32 %v2763_v23, %v12020_v30  ;;  %v527_v59 = vld [vmem:[%s6759_s7 + $0x5c0] sm:$0xff]  ;;  %v529_v30 = vld [vmem:[%s6759_s7 + $0x5e8] sm:$0xff] }
 0x4d0   : > { %2938 = vmatmul.f32.gmra.mxu3 %v2826_v32 }
 0x4d2   : > { %v2608_v46 = vpop.f32.mrf.mxu2  ;;  %2458 = vmatmul.f32.gmra.mxu1 %v8878_v61 }
 0x4d3   : > { %v8873_v41 = vpop.f32.mrf.mxu3  ;;  %v2609_v34 = vadd.f32 %v2608_v46, %v8808_v48  ;;  %v8891_v48 = vld [vmem:[%s6759_s7 + $0x630] sm:$0xff]  ;;  %v12023_v46 = vld [vmem:[#allocation41_spill] sm:$0xff] }
 0x4d4   : > { %12019 = vst [vmem:[#allocation238_spill] sm:$0xff] %v8873_v41  ;;  %2294 = vmatmul.f32.gmra.mxu0 %v6457_v1 }
 0x4d5   : > { %v2764_v29 = vadd.f32 %v2609_v34, %v7964_v33  ;;  %v6459_v34 = vld [vmem:[%s6759_s7 + $0x8a8] sm:$0xff] }
 0x4d7   : > { %2658 = vmatmul.f32.gmra.mxu2 %v525_v38  ;;  %v2414_v44 = vpop.f32.mrf.mxu1  ;;  %v2828_v23 = vmul.f32 %v2764_v29, %v12023_v46  ;;  %v12026_v29 = vld [vmem:[#allocation42_spill] sm:$0xff] }
 0x4d8   : > { %2941 = vmatmul.f32.gmra.mxu3 %v2827_v7 }
 0x4da   : > { %v2611_v39 = vpop.f32.mrf.mxu2  ;;  %2461 = vmatmul.f32.gmra.mxu1 %v8891_v48 }
 0x4db   : > { %v8884_v45 = vpop.f32.mrf.mxu3  ;;  %v2612_v32 = vadd.f32 %v2611_v39, %v8831_v40  ;;  %v8904_v40 = vpop.f32.mrf.mxu0 }
 0x4dc   : > { %12021 = vst [vmem:[#allocation40_spill] sm:$0xff] %v8884_v45  ;;  %2297 = vmatmul.f32.gmra.mxu0 %v6458_v37  ;;  %v8902_v37 = vld [vmem:[%s6759_s7 + $0x658] sm:$0xff] }
 0x4dd   : > { %v2765_v1 = vadd.f32 %v2612_v32, %v7977_v50  ;;  %12025 = vst [vmem:[#allocation240_spill] sm:$0xff] %v8904_v40  ;;  %v544_v40 = vld [vmem:[%s6759_s7 + $0x720] sm:$0xff] }
 0x4df   : > { %2661 = vmatmul.f32.gmra.mxu2 %v527_v59  ;;  %v2417_v7 = vpop.f32.mrf.mxu1  ;;  %v2829_v59 = vmul.f32 %v2765_v1, %v12026_v29 }
 0x4e0   : > { %2944 = vmatmul.f32.gmra.mxu3 %v2828_v23  ;;  %v6460_v23 = vld [vmem:[%s6759_s7 + $0x8d0] sm:$0xff] }
 0x4e2   : > { %v2614_v33 = vpop.f32.mrf.mxu2  ;;  %2464 = vmatmul.f32.gmra.mxu1 %v8902_v37 }
 0x4e3   : > { %v8897_v38 = vpop.f32.mrf.mxu3  ;;  %v2615_v39 = vadd.f32 %v2614_v33, %v2405_v56  ;;  %v12028_v33 = vld [vmem:[#allocation43_spill] sm:$0xff] }
 0x4e4   : > { %12024 = vst [vmem:[#allocation41_spill] sm:$0xff] %v8897_v38  ;;  %2300 = vmatmul.f32.gmra.mxu0 %v6459_v34  ;;  %v531_v34 = vld [vmem:[%s6759_s7 + $0x610] sm:$0xff] }
 0x4e5   : > { %v2766_v32 = vadd.f32 %v2615_v39, %v7990_v0 }
 0x4e7   : > { %2664 = vmatmul.f32.gmra.mxu2 %v529_v30  ;;  %v2420_v18 = vpop.f32.mrf.mxu1  ;;  %v2830_v1 = vmul.f32 %v2766_v32, %v12028_v33  ;;  %v8918_v30 = vpop.f32.mrf.mxu0 }
 0x4e8   : > { %2947 = vmatmul.f32.gmra.mxu3 %v2829_v59  ;;  %12029 = vst [vmem:[#allocation43_spill] sm:$0xff] %v8918_v30  ;;  %v6461_v59 = vld [vmem:[%s6759_s7 + $0x8f8] sm:$0xff] }
 0x4ea   : > { %v2617_v50 = vpop.f32.mrf.mxu2  ;;  %2467 = vmatmul.f32.gmra.mxu1 %v8914_v17 }
 0x4eb   : > { %v8909_v46 = vpop.f32.mrf.mxu3  ;;  %v2618_v56 = vadd.f32 %v2617_v50, %v2408_v54  ;;  %v8926_v50 = vld [vmem:[%s6759_s7 + $0x6a8] sm:$0xff] }
 0x4ec   : > { %12027 = vst [vmem:[#allocation42_spill] sm:$0xff] %v8909_v46  ;;  %2303 = vmatmul.f32.gmra.mxu0 %v6460_v23  ;;  %v533_v23 = vld [vmem:[%s6759_s7 + $0x638] sm:$0xff] }
 0x4ed   : > { %v2767_v39 = vadd.f32 %v2618_v56, %v8003_v5 }
 0x4ef   : > { %2667 = vmatmul.f32.gmra.mxu2 %v531_v34  ;;  %v2423_v54 = vpop.f32.mrf.mxu1  ;;  %v12031_v34 = vld [vmem:[#allocation44_spill] sm:$0xff]  ;;  %v8930_v5 = vpop.f32.mrf.mxu0 }
 0x4f0   : > { %2950 = vmatmul.f32.gmra.mxu3 %v2830_v1  ;;  %v2831_v33 = vmul.f32 %v2767_v39, %v12031_v34  ;;  %12032 = vst [vmem:[#allocation44_spill] sm:$0xff] %v8930_v5  ;;  %v546_v5 = vld [vmem:[%s6759_s7 + $0x748] sm:$0xff] }
 0x4f2   : > { %v2620_v0 = vpop.f32.mrf.mxu2  ;;  %2470 = vmatmul.f32.gmra.mxu1 %v8926_v50 }
 0x4f3   : > { %v8921_v29 = vpop.f32.mrf.mxu3  ;;  %v2621_v32 = vadd.f32 %v2620_v0, %v2411_v8  ;;  %v8938_v0 = vld [vmem:[%s6759_s7 + $0x6d0] sm:$0xff] }
 0x4f4   : > { %12030 = vst [vmem:[#allocation241_spill] sm:$0xff] %v8921_v29  ;;  %2306 = vmatmul.f32.gmra.mxu0 %v6461_v59  ;;  %v6462_v59 = vld [vmem:[%s6759_s7 + $0x920] sm:$0xff] }
 0x4f5   : > { %v2768_v56 = vadd.f32 %v2621_v32, %v8016_v51 }
 0x4f7   : > { %2670 = vmatmul.f32.gmra.mxu2 %v533_v23  ;;  %v2426_v8 = vpop.f32.mrf.mxu1  ;;  %v12034_v23 = vld [vmem:[#allocation45_spill] sm:$0xff] }
 0x4f8   : > { %2953 = vmatmul.f32.gmra.mxu3 %v2831_v33  ;;  %v2832_v34 = vmul.f32 %v2768_v56, %v12034_v23  ;;  %v12037_v56 = vld [vmem:[#allocation46_spill] sm:$0xff] }
 0x4fa   : > { %v2623_v1 = vpop.f32.mrf.mxu2  ;;  %2473 = vmatmul.f32.gmra.mxu1 %v8938_v0 }
 0x4fb   : > { %v8933_v55 = vpop.f32.mrf.mxu3  ;;  %v2624_v39 = vadd.f32 %v2623_v1, %v2414_v44  ;;  %v8949_v44 = vpop.f32.mrf.mxu0 }
 0x4fc   : > { %12033 = vst [vmem:[#allocation242_spill] sm:$0xff] %v8933_v55  ;;  %2309 = vmatmul.f32.gmra.mxu0 %v6462_v59  ;;  %v537_v59 = vld [vmem:[%s6759_s7 + $0x688] sm:$0xff] }
 0x4fd   : > { %v2769_v51 = vadd.f32 %v2624_v39, %v8029_v42  ;;  %12036 = vst [vmem:[#allocation243_spill] sm:$0xff] %v8949_v44 }
 0x4ff   : > { %2673 = vmatmul.f32.gmra.mxu2 %v535_v13  ;;  %v8947_v12 = vpop.f32.mrf.mxu1  ;;  %v542_v13 = vld [vmem:[%s6759_s7 + $0x6f8] sm:$0xff]  ;;  %v2833_v23 = vmul.f32 %v2769_v51, %v12037_v56  ;;  %v12040_v51 = vld [vmem:[#allocation8_spill] sm:$0xff] }
 0x500   : > { %2956 = vmatmul.f32.gmra.mxu3 %v2832_v34 }
 0x502   : > { %v2626_v33 = vpop.f32.mrf.mxu2  ;;  %2476 = vmatmul.f32.gmra.mxu1 %v542_v13 }
 0x503   : > { %v8943_v32 = vpop.f32.mrf.mxu3  ;;  %v2627_v1 = vadd.f32 %v2626_v33, %v2417_v7  ;;  %v8961_v7 = vpop.f32.mrf.mxu0 }
 0x504   : > { %12035 = vst [vmem:[#allocation45_spill] sm:$0xff] %v8943_v32  ;;  %2312 = vmatmul.f32.gmra.mxu0 %v6463_v26  ;;  %v6464_v26 = vld [vmem:[%s6759_s7 + $0x970] sm:$0xff] }
 0x505   : > { %v2770_v39 = vadd.f32 %v2627_v1, %v8042_v35  ;;  %12039 = vst [vmem:[#allocation244_spill] sm:$0xff] %v8961_v7 }
 0x507   : > { %2676 = vmatmul.f32.gmra.mxu2 %v537_v59  ;;  %v8958_v58 = vpop.f32.mrf.mxu1  ;;  %v2834_v59 = vmul.f32 %v2770_v39, %v12040_v51 }
 0x508   : > { %2959 = vmatmul.f32.gmra.mxu3 %v2833_v23  ;;  %v6465_v23 = vld [vmem:[%s6759_s7 + $0x998] sm:$0xff] }
 0x50a   : > { %v2629_v42 = vpop.f32.mrf.mxu2  ;;  %2479 = vmatmul.f32.gmra.mxu1 %v544_v40 }
 0x50b   : > { %v8954_v34 = vpop.f32.mrf.mxu3  ;;  %v2630_v33 = vadd.f32 %v2629_v42, %v2420_v18  ;;  %v8973_v39 = vpop.f32.mrf.mxu0 }
 0x50c   : > { %12038 = vst [vmem:[#allocation46_spill] sm:$0xff] %v8954_v34  ;;  %2315 = vmatmul.f32.gmra.mxu0 %v6464_v26  ;;  %v541_v26 = vld [vmem:[%s6759_s7 + $0x6d8] sm:$0xff] }
 0x50d   : > { %v2771_v1 = vadd.f32 %v2630_v33, %v8055_v63 }
 0x50f   : > { %2679 = vmatmul.f32.gmra.mxu2 %v539_v28  ;;  %v8969_v30 = vpop.f32.mrf.mxu1  ;;  %v12042_v28 = vld [vmem:[#allocation47_spill] sm:$0xff] }
 0x510   : > { %2962 = vmatmul.f32.gmra.mxu3 %v2834_v59  ;;  %v2835_v42 = vmul.f32 %v2771_v1, %v12042_v28  ;;  %12043 = vst [vmem:[#allocation47_spill] sm:$0xff] %v8973_v39  ;;  %v6466_v59 = vld [vmem:[%s6759_s7 + $0x9c0] sm:$0xff] }
 0x511   : > { %v12045_v1 = vld [vmem:[#allocation48_spill] sm:$0xff] }
 0x512   : > { %v2632_v35 = vpop.f32.mrf.mxu2  ;;  %2482 = vmatmul.f32.gmra.mxu1 %v546_v5  ;;  %v8985_v28 = vld [vmem:[%s6759_s7 + $0x7a0] sm:$0xff] }
 0x513   : > { %v8965_v56 = vpop.f32.mrf.mxu3  ;;  %v2633_v18 = vadd.f32 %v2632_v35, %v2423_v54  ;;  %v548_v54 = vld [vmem:[%s6759_s7 + $0x770] sm:$0xff]  ;;  %3633 = vxpose.xlu2.b32.start [1/16] %v8985_v28, 128  ;;  %v9154_v39 = vld [vmem:[%s6759_s7 + $0x900] sm:$0xff] }
 0x514   : > { %12041 = vst [vmem:[#allocation8_spill] sm:$0xff] %v8965_v56  ;;  %2318 = vmatmul.f32.gmra.mxu0 %v6465_v23  ;;  %v543_v23 = vld [vmem:[%s6759_s7 + $0x700] sm:$0xff]  ;;  %5938 = vmatpush.lsf.msrb.mxu2 %v548_v54 }
 0x515   : > { %v2772_v33 = vadd.f32 %v2633_v18, %v8068_v16  ;;  %v8988_v18 = vpop.f32.mrf.mxu0 }
 0x516   : > { %5939 = vmatpush.lsf.msrb.mxu2 %v546_v5  ;;  %12046 = vst [vmem:[#allocation48_spill] sm:$0xff] %v8988_v18  ;;  %v12048_v5 = vld [vmem:[#allocation49_spill] sm:$0xff] }
 0x517   : > { %2682 = vmatmul.f32.gmra.mxu2 %v541_v26  ;;  %v8980_v44 = vpop.f32.mrf.mxu1  ;;  %v2836_v26 = vmul.f32 %v2772_v33, %v12045_v1 }
 0x518   : > { %2965 = vmatmul.f32.gmra.mxu3 %v2835_v42  ;;  %5940 = vmatpush.lsf.msrb.mxu2 %v544_v40 }
 0x51a   : > { %v2635_v63 = vpop.f32.mrf.mxu2  ;;  %2485 = vmatmul.f32.gmra.mxu1 %v548_v54  ;;  %5941 = vmatpush.lsf.msrb.mxu2 %v542_v13 }
 0x51b   : > { %v8976_v51 = vpop.f32.mrf.mxu3  ;;  %v2636_v35 = vadd.f32 %v2635_v63, %v2426_v8  ;;  %v6467_v8 = vld [vmem:[%s6759_s7 + $0x9e8] sm:$0xff] }
 0x51c   : > { %12044 = vst [vmem:[#allocation245_spill] sm:$0xff] %v8976_v51  ;;  %2321 = vmatmul.f32.gmra.mxu0 %v6466_v59  ;;  %v545_v63 = vld [vmem:[%s6759_s7 + $0x728] sm:$0xff]  ;;  %5942 = vmatpush.lsf.msrb.mxu2 %v8938_v0 }
 0x51d   : > { %v2773_v42 = vadd.f32 %v2636_v35, %v8081_v27  ;;  %v9004_v27 = vld [vmem:[%s6759_s7 + $0x7c8] sm:$0xff] }
 0x51e   : > { %3634 = vxpose.xlu2.b32.cont [2/16] %v9004_v27, 128  ;;  %5943 = vmatpush.lsf.msrb.mxu2 %v8926_v50 }
 0x51f   : > { %2685 = vmatmul.f32.gmra.mxu2 %v543_v23  ;;  %v8995_v33 = vpop.f32.mrf.mxu1  ;;  %v8998_v23 = vld [vmem:[%s6759_s7 + $0x798] sm:$0xff]  ;;  %v2837_v1 = vmul.f32 %v2773_v42, %v12048_v5  ;;  %v12050_v42 = vld [vmem:[#allocation50_spill] sm:$0xff] }
 0x520   : > { %2968 = vmatmul.f32.gmra.mxu3 %v2836_v26  ;;  %5944 = vmatpush.lsf.msrb.mxu2 %v8914_v17  ;;  %v12051_v5 = vld [vmem:[#allocation51_spill] sm:$0xff] }
 0x522   : > { %v2638_v16 = vpop.f32.mrf.mxu2  ;;  %2488 = vmatmul.f32.gmra.mxu1 %v8998_v23  ;;  %5945 = vmatpush.lsf.msrb.mxu2 %v8902_v37 }
 0x523   : > { %v8991_v59 = vpop.f32.mrf.mxu3  ;;  %v2639_v54 = vadd.f32 %v2638_v16, %v8947_v12  ;;  %v547_v12 = vld [vmem:[%s6759_s7 + $0x750] sm:$0xff]  ;;  %v9017_v16 = vld [vmem:[%s6759_s7 + $0x7c0] sm:$0xff] }
 0x524   : > { %12047 = vst [vmem:[#allocation246_spill] sm:$0xff] %v8991_v59  ;;  %2324 = vmatmul.f32.gmra.mxu0 %v6467_v8  ;;  %5946 = vmatpush.lsf.msrb.mxu2 %v8891_v48 }
 0x525   : > { %v2774_v13 = vadd.f32 %v2639_v54, %v8094_v3  ;;  %v9024_v3 = vld [vmem:[%s6759_s7 + $0x7f0] sm:$0xff]  ;;  %v9037_v54 = vld [vmem:[%s6759_s7 + $0x7e8] sm:$0xff] }
 0x526   : > { %3635 = vxpose.xlu2.b32.cont [3/16] %v9024_v3, 128  ;;  %5947 = vmatpush.lsf.msrb.mxu2 %v8878_v61 }
 0x527   : > { %2688 = vmatmul.f32.gmra.mxu2 %v545_v63  ;;  %v9013_v26 = vpop.f32.mrf.mxu1  ;;  %v2838_v50 = vmul.f32 %v2774_v13, %v12050_v42  ;;  %v9075_v42 = vld [vmem:[%s6759_s7 + $0x838] sm:$0xff] }
 0x528   : > { %2971 = vmatmul.f32.gmra.mxu3 %v2837_v1  ;;  %5948 = vmatpush.lsf.msrb.mxu2 %v8865_v11 }
 0x52a   : > { %v2641_v40 = vpop.f32.mrf.mxu2  ;;  %2491 = vmatmul.f32.gmra.mxu1 %v9017_v16  ;;  %5949 = vmatpush.lsf.msrb.mxu2 %v8852_v22 }
 0x52b   : > { %v9010_v35 = vpop.f32.mrf.mxu3  ;;  %v2642_v0 = vadd.f32 %v2641_v40, %v8958_v58  ;;  %v549_v58 = vld [vmem:[%s6759_s7 + $0x778] sm:$0xff]  ;;  %v9056_v40 = vld [vmem:[%s6759_s7 + $0x810] sm:$0xff] }
 0x52c   : > { %12049 = vst [vmem:[#allocation49_spill] sm:$0xff] %v9010_v35  ;;  %5950 = vmatpush.lsf.msrb.mxu2 %v8835_v36 }
 0x52d   : > { %v2775_v37 = vadd.f32 %v2642_v0, %v8107_v20  ;;  %v9044_v20 = vld [vmem:[%s6759_s7 + $0x818] sm:$0xff]  ;;  %v6469_v0 = vld [vmem:[%s6759_s7 + $0x248] sm:$0xff] }
 0x52e   : > { %3636 = vxpose.xlu2.b32.cont [4/16] %v9044_v20, 128  ;;  %5951 = vmatpush.lsf.msrb.mxu2 %v8814_v9  ;;  %v12053_v9 = vld [vmem:[#allocation52_spill] sm:$0xff] }
 0x52f   : > { %2691 = vmatmul.f32.gmra.mxu2 %v547_v12  ;;  %v9033_v63 = vpop.f32.mrf.mxu1  ;;  %v2839_v1 = vmul.f32 %v2775_v37, %v12051_v5  ;;  %v6468_v12 = vld [vmem:[%s6759_s7 + $0x270] sm:$0xff]  ;;  %v12055_v37 = vld [vmem:[#allocation53_spill] sm:$0xff] }
 0x530   : > { %2974 = vmatmul.f32.gmra.mxu3 %v2838_v50  ;;  %5952 = vmatpush.lsf.msrb.mxu2 %v8792_v14  ;;  %v6470_v50 = vld [vmem:[%s6759_s7 + $0x220] sm:$0xff] }
 0x532   : > { %v2644_v17 = vpop.f32.mrf.mxu2  ;;  %2494 = vmatmul.f32.gmra.mxu1 %v9037_v54  ;;  %5953 = vmatpush.lsf.msrb.mxu2 %v8770_v6 }
 0x533   : > { %v9030_v8 = vpop.f32.mrf.mxu3  ;;  %v2645_v48 = vadd.f32 %v2644_v17, %v8969_v30 }
 0x535   : > { %v2776_v22 = vadd.f32 %v2645_v48, %v8120_v24  ;;  %v9064_v24 = vld [vmem:[%s6759_s7 + $0x840] sm:$0xff]  ;;  %v6471_v48 = vld [vmem:[%s6759_s7 + $0x1f8] sm:$0xff] }
 0x536   : > { %3637 = vxpose.xlu2.b32.cont [5/16] %v9064_v24, 128 }
 0x537   : > { %2694 = vmatmul.f32.gmra.mxu2 %v549_v58  ;;  %v9052_v30 = vpop.f32.mrf.mxu1  ;;  %v2840_v13 = vmul.f32 %v2776_v22, %v12053_v9  ;;  %v6473_v22 = vld [vmem:[%s6759_s7 + $0x1a8] sm:$0xff]  ;;  %v6474_v9 = vld [vmem:[%s6759_s7 + $0x180] sm:$0xff] }
 0x538   : > { %2977 = vmatmul.f32.gmra.mxu3 %v2839_v1  ;;  %v6472_v1 = vld [vmem:[%s6759_s7 + $0x1d0] sm:$0xff] }
 0x53a   : > { %v2647_v11 = vpop.f32.mrf.mxu2  ;;  %2497 = vmatmul.f32.gmra.mxu1 %v9056_v40 }
 0x53b   : > { %v9050_v61 = vpop.f32.mrf.mxu3  ;;  %v2648_v36 = vadd.f32 %v2647_v11, %v8980_v44 }
 0x53c   : > { %12052 = vst [vmem:[#allocation50_spill] sm:$0xff] %v9050_v61 }
 0x53d   : > { %v2777_v6 = vadd.f32 %v2648_v36, %v8133_v43  ;;  %v9083_v43 = vld [vmem:[%s6759_s7 + $0x868] sm:$0xff]  ;;  %v9095_v36 = vld [vmem:[%s6759_s7 + $0x860] sm:$0xff] }
 0x53e   : > { %3638 = vxpose.xlu2.b32.cont [6/16] %v9083_v43, 128 }
 0x53f   : > { %2697 = vmatmul.f32.gmra.mxu2 %v8985_v28  ;;  %v9071_v28 = vpop.f32.mrf.mxu1  ;;  %v2841_v58 = vmul.f32 %v2777_v6, %v12055_v37  ;;  %v6475_v6 = vld [vmem:[%s6759_s7 + $0x158] sm:$0xff] }
 0x540   : > { %2980 = vmatmul.f32.gmra.mxu3 %v2840_v13 }
 0x542   : > { %v2650_v14 = vpop.f32.mrf.mxu2  ;;  %2500 = vmatmul.f32.gmra.mxu1 %v9075_v42 }
 0x543   : > { %v9069_v44 = vpop.f32.mrf.mxu3  ;;  %v2651_v17 = vadd.f32 %v2650_v14, %v8995_v33  ;;  %v12057_v14 = vld [vmem:[#allocation54_spill] sm:$0xff] }
 0x544   : > { %12054 = vst [vmem:[#allocation51_spill] sm:$0xff] %v9069_v44 }
 0x545   : > { %v2778_v33 = vadd.f32 %v2651_v17, %v8146_v25  ;;  %v9103_v25 = vld [vmem:[%s6759_s7 + $0x890] sm:$0xff] }
 0x546   : > { %5954 = vllmr.16.mxu2  ;;  %3639 = vxpose.xlu2.b32.cont [7/16] %v9103_v25, 128 }
 0x547   : > { %2700 = vmatmul.f32.gmra.mxu2 %v9004_v27  ;;  %v9091_v11 = vpop.f32.mrf.mxu1 }
 0x548   : > { %5971 = vmatpush.lsf.msrb.mxu2 %v6468_v12  ;;  %2983 = vmatmul.f32.gmra.mxu3 %v2841_v58  ;;  %v2842_v12 = vmul.f32 %v2778_v33, %v12057_v14  ;;  %v6477_v58 = vld [vmem:[%s6759_s7 + $0x108] sm:$0xff]  ;;  %v12060_v33 = vld [vmem:[#allocation55_spill] sm:$0xff] }
 0x54a   : > { %5972 = vmatpush.lsf.msrb.mxu2 %v6469_v0  ;;  %v2653_v5 = vpop.f32.mrf.mxu2  ;;  %2503 = vmatmul.f32.gmra.mxu1 %v9095_v36 }
 0x54b   : > { %v9089_v27 = vpop.f32.mrf.mxu3  ;;  %v2654_v13 = vadd.f32 %v2653_v5, %v9013_v26  ;;  %v12058_v26 = vld [vmem:[#allocation169_spill] sm:$0xff]  ;;  %v6478_v5 = vld [vmem:[%s6759_s7 + $0xe0] sm:$0xff] }
 0x54c   : > { %5973 = vmatpush.lsf.msrb.mxu2 %v6470_v50  ;;  %12056 = vst [vmem:[#allocation52_spill] sm:$0xff] %v9089_v27  ;;  %v6476_v50 = vld [vmem:[%s6759_s7 + $0x130] sm:$0xff] }
 0x54e   : > { %5974 = vmatpush.lsf.msrb.mxu2 %v6471_v48  ;;  %v9115_v48 = vld [vmem:[%s6759_s7 + $0x888] sm:$0xff] }
 0x54f   : > { %2703 = vmatmul.f32.gmra.mxu2 %v9024_v3  ;;  %v2779_v3 = vadd.f32 %v2654_v13, %v12058_v26  ;;  %v9111_v37 = vpop.f32.mrf.mxu1  ;;  %v6479_v13 = vld [vmem:[%s6759_s7 + $0xb8] sm:$0xff]  ;;  %v9130_v26 = vld [vmem:[%s6759_s7 + $0x8b0] sm:$0xff] }
 0x550   : > { %5975 = vmatpush.lsf.msrb.mxu2 %v6472_v1  ;;  %2986 = vmatmul.f32.gmra.mxu3 %v2842_v12  ;;  %v6480_v12 = vld [vmem:[%s6759_s7 + $0x90] sm:$0xff] }
 0x552   : > { %5976 = vmatpush.lsf.msrb.mxu2 %v6473_v22  ;;  %v2656_v0 = vpop.f32.mrf.mxu2  ;;  %v2843_v22 = vmul.f32 %v2779_v3, %v12060_v33  ;;  %2506 = vmatmul.f32.gmra.mxu1 %v9115_v48  ;;  %v6482_v3 = vld [vmem:[%s6759_s7 + $0x40] sm:$0xff] }
 0x553   : > { %v9109_v17 = vpop.f32.mrf.mxu3  ;;  %v2657_v1 = vadd.f32 %v2656_v0, %v9033_v63 }
 0x554   : > { %5977 = vmatpush.lsf.msrb.mxu2 %v6474_v9  ;;  %12059 = vst [vmem:[#allocation53_spill] sm:$0xff] %v9109_v17  ;;  %v565_v9 = vld [vmem:[%s6759_s7 + $0x8b8] sm:$0xff] }
 0x555   : > { %3640 = vxpose.xlu2.b32.cont [8/16] %v565_v9, 128 }
 0x556   : > { %5978 = vmatpush.lsf.msrb.mxu2 %v6475_v6  ;;  %v12061_v6 = vld [vmem:[#allocation172_spill] sm:$0xff] }
 0x557   : > { %2706 = vmatmul.f32.gmra.mxu2 %v9044_v20  ;;  %v2780_v63 = vadd.f32 %v2657_v1, %v12061_v6  ;;  %v2462_v20 = vpop.f32.mrf.mxu1  ;;  %v567_v1 = vld [vmem:[%s6759_s7 + $0x8e0] sm:$0xff] }
 0x558   : > { %5979 = vmatpush.lsf.msrb.mxu2 %v6476_v50  ;;  %2989 = vmatmul.f32.gmra.mxu3 %v2843_v22  ;;  %v6481_v50 = vld [vmem:[%s6759_s7 + $0x68] sm:$0xff]  ;;  %v6483_v22 = vld [vmem:[%s6759_s7 + $0x18] sm:$0xff] }
 0x55a   : > { %5980 = vmatpush.lsf.msrb.mxu2 %v6477_v58  ;;  %v2659_v14 = vpop.f32.mrf.mxu2  ;;  %2509 = vmatmul.f32.gmra.mxu1 %v9130_v26 }
 0x55b   : > { %v9126_v0 = vpop.f32.mrf.mxu3  ;;  %v2660_v58 = vadd.f32 %v2659_v14, %v9052_v30  ;;  %v9143_v30 = vld [vmem:[%s6759_s7 + $0x8d8] sm:$0xff]  ;;  %v12066_v14 = vld [vmem:[#allocation58_spill] sm:$0xff] }
 0x55c   : > { %5981 = vmatpush.lsf.msrb.mxu2 %v6478_v5  ;;  %12062 = vst [vmem:[#allocation54_spill] sm:$0xff] %v9126_v0  ;;  %v12063_v5 = vld [vmem:[#allocation56_spill] sm:$0xff]  ;;  %v580_v0 = vld [vmem:[%s6759_s7 + $0x9f0] sm:$0xff] }
 0x55d   : > { %v2844_v33 = vmul.f32 %v2780_v63, %v12063_v5  ;;  %3641 = vxpose.xlu2.b32.cont [9/16] %v567_v1, 128  ;;  %v569_v5 = vld [vmem:[%s6759_s7 + $0x908] sm:$0xff]  ;;  %5824 = vmatpush.lsf.msrb.mxu0 %v580_v0 }
 0x55e   : > { %5982 = vmatpush.lsf.msrb.mxu2 %v6479_v13 }
 0x55f   : > { %2709 = vmatmul.f32.gmra.mxu2 %v9064_v24 }
 0x560   : > { %5983 = vmatpush.lsf.msrb.mxu2 %v6480_v12  ;;  %2992 = vmatmul.f32.gmra.mxu3 %v2844_v33  ;;  %v12064_v12 = vld [vmem:[#allocation174_spill] sm:$0xff] }
 0x561   : > { %v2781_v6 = vadd.f32 %v2660_v58, %v12064_v12 }
 0x562   : > { %5984 = vmatpush.lsf.msrb.mxu2 %v6481_v50  ;;  %v2662_v13 = vpop.f32.mrf.mxu2  ;;  %2512 = vmatmul.f32.gmra.mxu1 %v9143_v30 }
 0x563   : > { %v9140_v50 = vpop.f32.mrf.mxu3  ;;  %v2663_v24 = vadd.f32 %v2662_v13, %v9071_v28  ;;  %v2845_v63 = vmul.f32 %v2781_v6, %v12066_v14  ;;  %v571_v6 = vld [vmem:[%s6759_s7 + $0x930] sm:$0xff] }
 0x564   : > { %5985 = vmatpush.lsf.msrb.mxu2 %v6482_v3  ;;  %12065 = vst [vmem:[#allocation169_spill] sm:$0xff] %v9140_v50  ;;  %v2465_v3 = vpop.f32.mrf.mxu1 }
 0x565   : > { %3642 = vxpose.xlu2.b32.cont [10/16] %v569_v5, 128 }
 0x566   : > { %5986 = vmatpush.lsf.msrb.mxu2 %v6483_v22  ;;  %v12067_v22 = vld [vmem:[#allocation176_spill] sm:$0xff] }
 0x567   : > { %2712 = vmatmul.f32.gmra.mxu2 %v9083_v43  ;;  %v2782_v58 = vadd.f32 %v2663_v24, %v12067_v22  ;;  %v12069_v43 = vld [vmem:[#allocation60_spill] sm:$0xff] }
 0x568   : > { %2995 = vmatmul.f32.gmra.mxu3 %v2845_v63  ;;  %v12070_v63 = vld [vmem:[#allocation178_spill] sm:$0xff] }
 0x569   : > { %v2846_v13 = vmul.f32 %v2782_v58, %v12069_v43  ;;  %v573_v58 = vld [vmem:[%s6759_s7 + $0x958] sm:$0xff] }
 0x56a   : > { %v2665_v33 = vpop.f32.mrf.mxu2  ;;  %2515 = vmatmul.f32.gmra.mxu1 %v9154_v39 }
 0x56b   : > { %v9151_v12 = vpop.f32.mrf.mxu3  ;;  %v2666_v28 = vadd.f32 %v2665_v33, %v9091_v11 }
 0x56c   : > { %12068 = vst [vmem:[#allocation55_spill] sm:$0xff] %v9151_v12  ;;  %v2468_v7 = vpop.f32.mrf.mxu1 }
 0x56d   : > { %3643 = vxpose.xlu2.b32.cont [11/16] %v571_v6, 128  ;;  %v2783_v24 = vadd.f32 %v2666_v28, %v12070_v63 }
 0x56f   : > { %2715 = vmatmul.f32.gmra.mxu2 %v9103_v25  ;;  %v12072_v25 = vld [vmem:[#allocation62_spill] sm:$0xff] }
 0x570   : > { %2998 = vmatmul.f32.gmra.mxu3 %v2846_v13  ;;  %v2847_v33 = vmul.f32 %v2783_v24, %v12072_v25  ;;  %v12073_v13 = vld [vmem:[#allocation180_spill] sm:$0xff]  ;;  %v12076_v25 = vld [vmem:[#allocation182_spill] sm:$0xff] }
 0x572   : > { %v2668_v14 = vpop.f32.mrf.mxu2  ;;  %2518 = vmatmul.f32.gmra.mxu1 %v9165_v10 }
 0x573   : > { %v9162_v22 = vpop.f32.mrf.mxu3  ;;  %v2669_v11 = vadd.f32 %v2668_v14, %v9111_v37  ;;  %v12075_v37 = vld [vmem:[#allocation64_spill] sm:$0xff] }
 0x574   : > { %12071 = vst [vmem:[#allocation172_spill] sm:$0xff] %v9162_v22  ;;  %v2471_v18 = vpop.f32.mrf.mxu1  ;;  %v575_v14 = vld [vmem:[%s6759_s7 + $0x980] sm:$0xff] }
 0x575   : > { %3644 = vxpose.xlu2.b32.cont [12/16] %v573_v58, 128  ;;  %v2784_v28 = vadd.f32 %v2669_v11, %v12073_v13 }
 0x577   : > { %2718 = vmatmul.f32.gmra.mxu2 %v565_v9  ;;  %v2848_v9 = vmul.f32 %v2784_v28, %v12075_v37  ;;  %v12079_v37 = vld [vmem:[#allocation184_spill] sm:$0xff] }
 0x578   : > { %3001 = vmatmul.f32.gmra.mxu3 %v2847_v33 }
 0x57a   : > { %v2671_v43 = vpop.f32.mrf.mxu2  ;;  %2521 = vmatmul.f32.gmra.mxu1 %v9175_v19 }
 0x57b   : > { %v9172_v63 = vpop.f32.mrf.mxu3  ;;  %v2672_v53 = vadd.f32 %v2671_v43, %v2462_v20  ;;  %v12078_v20 = vld [vmem:[#allocation67_spill] sm:$0xff]  ;;  %v577_v43 = vld [vmem:[%s6759_s7 + $0x9a8] sm:$0xff] }
 0x57c   : > { %12074 = vst [vmem:[#allocation56_spill] sm:$0xff] %v9172_v63  ;;  %v2474_v60 = vpop.f32.mrf.mxu1 }
 0x57d   : > { %3645 = vxpose.xlu2.b32.cont [13/16] %v575_v14, 128  ;;  %v2785_v33 = vadd.f32 %v2672_v53, %v12076_v25  ;;  %v576_v25 = vld [vmem:[%s6759_s7 + $0x9a0] sm:$0xff] }
 0x57f   : > { %2721 = vmatmul.f32.gmra.mxu2 %v567_v1  ;;  %v2849_v1 = vmul.f32 %v2785_v33, %v12078_v20  ;;  %v12082_v20 = vld [vmem:[#allocation186_spill] sm:$0xff] }
 0x580   : > { %3004 = vmatmul.f32.gmra.mxu3 %v2848_v9 }
 0x582   : > { %v2674_v24 = vpop.f32.mrf.mxu2  ;;  %2524 = vmatmul.f32.gmra.mxu1 %v574_v4 }
 0x583   : > { %v9181_v11 = vpop.f32.mrf.mxu3  ;;  %v2675_v52 = vadd.f32 %v2674_v24, %v2465_v3  ;;  %v12081_v3 = vld [vmem:[#allocation70_spill] sm:$0xff] }
 0x584   : > { %12077 = vst [vmem:[#allocation174_spill] sm:$0xff] %v9181_v11  ;;  %v2477_v13 = vpop.f32.mrf.mxu1 }
 0x585   : > { %3646 = vxpose.xlu2.b32.cont [14/16] %v577_v43, 128  ;;  %v2786_v9 = vadd.f32 %v2675_v52, %v12079_v37  ;;  %v578_v37 = vld [vmem:[%s6759_s7 + $0x9c8] sm:$0xff] }
 0x586   : > { %5825 = vmatpush.lsf.msrb.mxu0 %v578_v37 }
 0x587   : > { %2724 = vmatmul.f32.gmra.mxu2 %v569_v5  ;;  %v2850_v24 = vmul.f32 %v2786_v9, %v12081_v3  ;;  %v579_v5 = vld [vmem:[%s6759_s7 + $0x9d0] sm:$0xff]  ;;  %v12085_v9 = vld [vmem:[#allocation188_spill] sm:$0xff] }
 0x588   : > { %3007 = vmatmul.f32.gmra.mxu3 %v2849_v1  ;;  %5826 = vmatpush.lsf.msrb.mxu0 %v576_v25 }
 0x58a   : > { %v2677_v28 = vpop.f32.mrf.mxu2  ;;  %2527 = vmatmul.f32.gmra.mxu1 %v576_v25  ;;  %5827 = vmatpush.lsf.msrb.mxu0 %v574_v4  ;;  %v12090_v4 = vld [vmem:[#allocation82_spill] sm:$0xff] }
 0x58b   : > { %v9187_v22 = vpop.f32.mrf.mxu3  ;;  %v2678_v11 = vadd.f32 %v2677_v28, %v2468_v7 }
 0x58c   : > { %12080 = vst [vmem:[#allocation58_spill] sm:$0xff] %v9187_v22  ;;  %v2480_v53 = vpop.f32.mrf.mxu1  ;;  %v12084_v22 = vld [vmem:[#allocation73_spill] sm:$0xff]  ;;  %5828 = vmatpush.lsf.msrb.mxu0 %v9175_v19 }
 0x58d   : > { %3647 = vxpose.xlu2.b32.cont [15/16] %v579_v5, 128  ;;  %v2787_v1 = vadd.f32 %v2678_v11, %v12082_v20  ;;  %v12086_v20 = vld [vmem:[#allocation76_spill] sm:$0xff] }
 0x58e   : > { %5829 = vmatpush.lsf.msrb.mxu0 %v9165_v10  ;;  %v12091_v10 = vld [vmem:[#allocation194_spill] sm:$0xff] }
 0x58f   : > { %2727 = vmatmul.f32.gmra.mxu2 %v571_v6  ;;  %v2851_v7 = vmul.f32 %v2787_v1, %v12084_v22  ;;  %v581_v6 = vld [vmem:[%s6759_s7 + $0x9f8] sm:$0xff]  ;;  %v12087_v22 = vld [vmem:[#allocation190_spill] sm:$0xff] }
 0x590   : > { %3010 = vmatmul.f32.gmra.mxu3 %v2850_v24  ;;  %5830 = vmatpush.lsf.msrb.mxu0 %v9154_v39 }
 0x592   : > { %v2680_v33 = vpop.f32.mrf.mxu2  ;;  %2530 = vmatmul.f32.gmra.mxu1 %v578_v37  ;;  %5831 = vmatpush.lsf.msrb.mxu0 %v9143_v30  ;;  %v12092_v30 = vld [vmem:[#allocation85_spill] sm:$0xff] }
 0x593   : > { %v9193_v63 = vpop.f32.mrf.mxu3  ;;  %v2681_v17 = vadd.f32 %v2680_v33, %v2471_v18 }
 0x594   : > { %12083 = vst [vmem:[#allocation176_spill] sm:$0xff] %v9193_v63  ;;  %v2483_v52 = vpop.f32.mrf.mxu1  ;;  %5832 = vmatpush.lsf.msrb.mxu0 %v9130_v26 }
 0x595   : > { %3648 = vxpose.xlu2.b32.end [16/16] %v581_v6, 128  ;;  %v2788_v3 = vadd.f32 %v2681_v17, %v12085_v9 }
 0x596   : > { %5833 = vmatpush.lsf.msrb.mxu0 %v9115_v48 }
 0x597   : > { %2730 = vmatmul.f32.gmra.mxu2 %v573_v58  ;;  %v2852_v63 = vmul.f32 %v2788_v3, %v12086_v20 }
 0x598   : > { %3013 = vmatmul.f32.gmra.mxu3 %v2851_v7  ;;  %v12088_v7 = vld [vmem:[#allocation79_spill] sm:$0xff]  ;;  %5834 = vmatpush.lsf.msrb.mxu0 %v9095_v36  ;;  %v12093_v36 = vld [vmem:[#allocation89_spill] sm:$0xff] }
 0x59a   : > { %v2683_v28 = vpop.f32.mrf.mxu2  ;;  %2533 = vmatmul.f32.gmra.mxu1 %v580_v0  ;;  %v12089_v0 = vld [vmem:[#allocation192_spill] sm:$0xff]  ;;  %5835 = vmatpush.lsf.msrb.mxu0 %v9075_v42 }
 0x59b   : > { %v9199_v24 = vpop.f32.mrf.mxu3  ;;  %v2684_v11 = vadd.f32 %v2683_v28, %v2474_v60 }
 0x59c   : > { %v2486_v50 = vpop.f32.mrf.mxu1  ;;  %5836 = vmatpush.lsf.msrb.mxu0 %v9056_v40 }
 0x59d   : > { %v2789_v58 = vadd.f32 %v2684_v11, %v12087_v22 }
 0x59e   : > { %5837 = vmatpush.lsf.msrb.mxu0 %v9037_v54  ;;  %v12094_v54 = vld [vmem:[#allocation93_spill] sm:$0xff] }
 0x59f   : > { %2733 = vmatmul.f32.gmra.mxu2 %v575_v14  ;;  %v2853_v9 = vmul.f32 %v2789_v58, %v12088_v7 }
 0x5a0   : > { %3016 = vmatmul.f32.gmra.mxu3 %v2852_v63  ;;  %5838 = vmatpush.lsf.msrb.mxu0 %v9017_v16 }
 0x5a2   : > { %v2686_v18 = vpop.f32.mrf.mxu2  ;;  %5839 = vmatpush.lsf.msrb.mxu0 %v8998_v23 }
 0x5a3   : > { %v9204_v33 = vpop.f32.mrf.mxu3  ;;  %v2687_v17 = vadd.f32 %v2686_v18, %v2477_v13 }
 0x5a4   : > { %v2489_v1 = vpop.f32.mrf.mxu1 }
 0x5a5   : > { %v2790_v63 = vadd.f32 %v2687_v17, %v12089_v0  ;;  %v12095_v17 = vld [vmem:[#allocation96_spill] sm:$0xff] }
 0x5a7   : > { %2736 = vmatmul.f32.gmra.mxu2 %v577_v43  ;;  %v2854_v13 = vmul.f32 %v2790_v63, %v12090_v4 }
 0x5a8   : > { %3019 = vmatmul.f32.gmra.mxu3 %v2853_v9 }
 0x5aa   : > { %v2689_v60 = vpop.f32.mrf.mxu2 }
 0x5ab   : > { %v9210_v14 = vpop.f32.mrf.mxu3  ;;  %v2690_v25 = vadd.f32 %v2689_v60, %v2480_v53  ;;  %v12096_v60 = vld [vmem:[#allocation201_spill] sm:$0xff] }
 0x5ac   : > { %v2492_v43 = vpop.f32.mrf.mxu1 }
 0x5ad   : > { %v2791_v37 = vadd.f32 %v2690_v25, %v12091_v10 }
 0x5af   : > { %2739 = vmatmul.f32.gmra.mxu2 %v579_v5  ;;  %v2855_v53 = vmul.f32 %v2791_v37, %v12092_v30 }
 0x5b0   : > { %3022 = vmatmul.f32.gmra.mxu3 %v2854_v13 }
 0x5b2   : > { %v2692_v19 = vpop.f32.mrf.mxu2 }
 0x5b3   : > { %v9218_v28 = vpop.f32.mrf.mxu3  ;;  %v2693_v39 = vadd.f32 %v2692_v19, %v2483_v52  ;;  %v12098_v19 = vld [vmem:[#allocation204_spill] sm:$0xff] }
 0x5b4   : > { %v2495_v26 = vpop.f32.mrf.mxu1 }
 0x5b5   : > { %v2792_v48 = vadd.f32 %v2693_v39, %v8328_v15 }
 0x5b7   : > { %2742 = vmatmul.f32.gmra.mxu2 %v581_v6  ;;  %v2856_v52 = vmul.f32 %v2792_v48, %v12093_v36 }
 0x5b8   : > { %3025 = vmatmul.f32.gmra.mxu3 %v2855_v53 }
 0x5ba   : > { %v2695_v5 = vpop.f32.mrf.mxu2 }
 0x5bb   : > { %v9226_v3 = vpop.f32.mrf.mxu3  ;;  %v2696_v42 = vadd.f32 %v2695_v5, %v2486_v50 }
 0x5bc   : > { %v2498_v11 = vpop.f32.mrf.mxu1 }
 0x5bd   : > { %v2793_v40 = vadd.f32 %v2696_v42, %v8341_v49  ;;  %v12102_v42 = vld [vmem:[#allocation106_spill] sm:$0xff] }
 0x5bf   : > { %v2857_v22 = vmul.f32 %v2793_v40, %v12094_v54  ;;  %v12103_v54 = vld [vmem:[#allocation110_spill] sm:$0xff] }
 0x5c0   : > { %3028 = vmatmul.f32.gmra.mxu3 %v2856_v52 }
 0x5c2   : > { %v2698_v6 = vpop.f32.mrf.mxu2 }
 0x5c3   : > { %v9232_v20 = vpop.f32.mrf.mxu3  ;;  %v2699_v18 = vadd.f32 %v2698_v6, %v2489_v1  ;;  %v12097_v1 = vld [vmem:[#allocation99_spill] sm:$0xff] }
 0x5c4   : > { %v2501_v23 = vpop.f32.mrf.mxu1 }
 0x5c5   : > { %v2794_v58 = vadd.f32 %v2699_v18, %v8354_v21 }
 0x5c7   : > { %v2858_v7 = vmul.f32 %v2794_v58, %v12095_v17  ;;  %v12104_v17 = vld [vmem:[#allocation112_spill] sm:$0xff] }
 0x5c8   : > { %3031 = vmatmul.f32.gmra.mxu3 %v2857_v22 }
 0x5ca   : > { %v2701_v15 = vpop.f32.mrf.mxu2 }
 0x5cb   : > { %v9236_v16 = vpop.f32.mrf.mxu3  ;;  %v2702_v50 = vadd.f32 %v2701_v15, %v2492_v43  ;;  %v12100_v43 = vld [vmem:[#allocation102_spill] sm:$0xff] }
 0x5cc   : > { %v2504_v4 = vpop.f32.mrf.mxu1 }
 0x5cd   : > { %v2795_v49 = vadd.f32 %v2702_v50, %v12096_v60 }
 0x5cf   : > { %v2859_v25 = vmul.f32 %v2795_v49, %v12097_v1 }
 0x5d0   : > { %3034 = vmatmul.f32.gmra.mxu3 %v2858_v7 }
 0x5d2   : > { %v2704_v9 = vpop.f32.mrf.mxu2 }
 0x5d3   : > { %v9240_v0 = vpop.f32.mrf.mxu3  ;;  %v2705_v63 = vadd.f32 %v2704_v9, %v2495_v26 }
 0x5d4   : > { %v2507_v30 = vpop.f32.mrf.mxu1 }
 0x5d5   : > { %v2796_v21 = vadd.f32 %v2705_v63, %v12098_v19  ;;  %v12105_v63 = vld [vmem:[#allocation114_spill] sm:$0xff] }
 0x5d7   : > { %v2860_v39 = vmul.f32 %v2796_v21, %v12100_v43  ;;  %v12106_v21 = vld [vmem:[#allocation117_spill] sm:$0xff] }
 0x5d8   : > { %3037 = vmatmul.f32.gmra.mxu3 %v2859_v25 }
 0x5da   : > { %v2707_v13 = vpop.f32.mrf.mxu2 }
 0x5db   : > { %v9244_v10 = vpop.f32.mrf.mxu3  ;;  %v2708_v37 = vadd.f32 %v2707_v13, %v2498_v11 }
 0x5dc   : > { %12099 = vst [vmem:[#allocation60_spill] sm:$0xff] %v9244_v10  ;;  %v2510_v40 = vpop.f32.mrf.mxu1 }
 0x5dd   : > { %v2797_v5 = vadd.f32 %v2708_v37, %v8393_v47 }
 0x5df   : > { %v2861_v36 = vmul.f32 %v2797_v5, %v12102_v42 }
 0x5e0   : > { %3040 = vmatmul.f32.gmra.mxu3 %v2860_v39 }
 0x5e2   : > { %v2710_v53 = vpop.f32.mrf.mxu2 }
 0x5e3   : > { %v9248_v48 = vpop.f32.mrf.mxu3  ;;  %v2711_v26 = vadd.f32 %v2710_v53, %v2501_v23 }
 0x5e4   : > { %12101 = vst [vmem:[#allocation178_spill] sm:$0xff] %v9248_v48  ;;  %v2513_v50 = vpop.f32.mrf.mxu1 }
 0x5e5   : > { %v2798_v6 = vadd.f32 %v2711_v26, %v8406_v62  ;;  %v12108_v26 = vld [vmem:[#allocation120_spill] sm:$0xff] }
 0x5e7   : > { %v2862_v22 = vmul.f32 %v2798_v6, %v12103_v54  ;;  %v12110_v54 = vld [vmem:[#allocation123_spill] sm:$0xff] }
 0x5e8   : > { %3043 = vmatmul.f32.gmra.mxu3 %v2861_v36 }
 0x5ea   : > { %v2713_v52 = vpop.f32.mrf.mxu2 }
 0x5eb   : > { %v9252_v18 = vpop.f32.mrf.mxu3  ;;  %v2714_v11 = vadd.f32 %v2713_v52, %v2504_v4  ;;  %v12109_v52 = vld [vmem:[#allocation217_spill] sm:$0xff] }
 0x5ec   : > { %v2516_v25 = vpop.f32.mrf.mxu1 }
 0x5ed   : > { %v2799_v58 = vadd.f32 %v2714_v11, %v8417_v2 }
 0x5ef   : > { %v2863_v7 = vmul.f32 %v2799_v58, %v12104_v17  ;;  %v12111_v58 = vld [vmem:[#allocation219_spill] sm:$0xff] }
 0x5f0   : > { %3046 = vmatmul.f32.gmra.mxu3 %v2862_v22 }
 0x5f2   : > { %v2716_v15 = vpop.f32.mrf.mxu2 }
 0x5f3   : > { %v9256_v47 = vpop.f32.mrf.mxu3  ;;  %v2717_v23 = vadd.f32 %v2716_v15, %v2507_v30  ;;  %v12107_v30 = vld [vmem:[#allocation214_spill] sm:$0xff] }
 0x5f4   : > { %v2519_v43 = vpop.f32.mrf.mxu1 }
 0x5f5   : > { %v2800_v62 = vadd.f32 %v2717_v23, %v8430_v31 }
 0x5f7   : > { %v2864_v1 = vmul.f32 %v2800_v62, %v12105_v63  ;;  %v12113_v63 = vld [vmem:[#allocation222_spill] sm:$0xff] }
 0x5f8   : > { %3049 = vmatmul.f32.gmra.mxu3 %v2863_v7 }
 0x5fa   : > { %v2719_v9 = vpop.f32.mrf.mxu2 }
 0x5fb   : > { %v9260_v60 = vpop.f32.mrf.mxu3  ;;  %v2720_v49 = vadd.f32 %v2719_v9, %v2510_v40  ;;  %v12112_v9 = vld [vmem:[#allocation126_spill] sm:$0xff] }
 0x5fd   : > { %v2801_v2 = vadd.f32 %v2720_v49, %v8443_v57  ;;  %v2522_v57 = vpop.f32.mrf.mxu1 }
 0x5ff   : > { %v2865_v37 = vmul.f32 %v2801_v2, %v12106_v21  ;;  %v12114_v2 = vld [vmem:[#allocation129_spill] sm:$0xff] }
 0x600   : > { %3052 = vmatmul.f32.gmra.mxu3 %v2864_v1 }
 0x602   : > { %v2722_v4 = vpop.f32.mrf.mxu2 }
 0x603   : > { %v9264_v13 = vpop.f32.mrf.mxu3  ;;  %v2723_v19 = vadd.f32 %v2722_v4, %v2513_v50 }
 0x605   : > { %v2802_v31 = vadd.f32 %v2723_v19, %v12107_v30  ;;  %v2525_v17 = vpop.f32.mrf.mxu1 }
 0x607   : > { %v2866_v42 = vmul.f32 %v2802_v31, %v12108_v26 }
 0x608   : > { %3055 = vmatmul.f32.gmra.mxu3 %v2865_v37 }
 0x60a   : > { %v2725_v39 = vpop.f32.mrf.mxu2 }
 0x60b   : > { %v9268_v53 = vpop.f32.mrf.mxu3  ;;  %v2726_v5 = vadd.f32 %v2725_v39, %v2516_v25 }
 0x60d   : > { %v2803_v6 = vadd.f32 %v2726_v5, %v12109_v52  ;;  %v2528_v21 = vpop.f32.mrf.mxu1  ;;  %v12116_v5 = vld [vmem:[#allocation131_spill] sm:$0xff]  ;;  %v12117_v52 = vld [vmem:[#allocation228_spill] sm:$0xff] }
 0x60f   : > { %v2867_v22 = vmul.f32 %v2803_v6, %v12110_v54  ;;  %v12118_v54 = vld [vmem:[#allocation133_spill] sm:$0xff] }
 0x610   : > { %3058 = vmatmul.f32.gmra.mxu3 %v2866_v42 }
 0x612   : > { %v2728_v36 = vpop.f32.mrf.mxu2 }
 0x613   : > { %v9272_v40 = vpop.f32.mrf.mxu3  ;;  %v2729_v11 = vadd.f32 %v2728_v36, %v2519_v43  ;;  %v12115_v43 = vld [vmem:[#allocation225_spill] sm:$0xff] }
 0x615   : > { %v2804_v50 = vadd.f32 %v2729_v11, %v12111_v58  ;;  %v2531_v42 = vpop.f32.mrf.mxu1 }
 0x617   : > { %v2868_v62 = vmul.f32 %v2804_v50, %v12112_v9 }
 0x618   : > { %3061 = vmatmul.f32.gmra.mxu3 %v2867_v22 }
 0x61a   : > { %v2731_v15 = vpop.f32.mrf.mxu2 }
 0x61b   : > { %v9276_v23 = vpop.f32.mrf.mxu3  ;;  %v2732_v7 = vadd.f32 %v2731_v15, %v2522_v57  ;;  %v12119_v15 = vld [vmem:[#allocation231_spill] sm:$0xff] }
 0x61d   : > { %v2805_v1 = vadd.f32 %v2732_v7, %v12113_v63  ;;  %v2534_v50 = vpop.f32.mrf.mxu1  ;;  %v12121_v63 = vld [vmem:[#allocation233_spill] sm:$0xff] }
 0x61f   : > { %v2869_v19 = vmul.f32 %v2805_v1, %v12114_v2  ;;  %v12122_v2 = vld [vmem:[#allocation137_spill] sm:$0xff] }
 0x620   : > { %3064 = vmatmul.f32.gmra.mxu3 %v2868_v62  ;;  %v12120_v62 = vld [vmem:[#allocation135_spill] sm:$0xff] }
 0x622   : > { %v2734_v49 = vpop.f32.mrf.mxu2 }
 0x623   : > { %v9280_v25 = vpop.f32.mrf.mxu3  ;;  %v2735_v4 = vadd.f32 %v2734_v49, %v2525_v17 }
 0x625   : > { %v2806_v39 = vadd.f32 %v2735_v4, %v12115_v43 }
 0x627   : > { %v2870_v26 = vmul.f32 %v2806_v39, %v12116_v5 }
 0x628   : > { %3067 = vmatmul.f32.gmra.mxu3 %v2869_v19 }
 0x62a   : > { %v2737_v37 = vpop.f32.mrf.mxu2 }
 0x62b   : > { %v9284_v30 = vpop.f32.mrf.mxu3  ;;  %v2738_v31 = vadd.f32 %v2737_v37, %v2528_v21 }
 0x62d   : > { %v2807_v6 = vadd.f32 %v2738_v31, %v12117_v52 }
 0x62f   : > { %v2871_v22 = vmul.f32 %v2807_v6, %v12118_v54 }
 0x630   : > { %3070 = vmatmul.f32.gmra.mxu3 %v2870_v26 }
 0x632   : > { %v2740_v36 = vpop.f32.mrf.mxu2 }
 0x633   : > { %v9288_v57 = vpop.f32.mrf.mxu3  ;;  %v2741_v11 = vadd.f32 %v2740_v36, %v2531_v42 }
 0x635   : > { %v2808_v58 = vadd.f32 %v2741_v11, %v12119_v15  ;;  %v3094_v15 = vsel %vm3083_vm1, %v8954_v34, -inf  ;;  %v3108_v34 = vsel %vm3083_vm1, %v9069_v44, -inf }
 0x637   : > { %v2872_v49 = vmul.f32 %v2808_v58, %v12120_v62  ;;  %v3087_v58 = vsel %vm3083_vm1, %v8909_v46, -inf  ;;  %v3085_v62 = vsel %vm3083_vm1, %v8884_v45, -inf  ;;  %v3110_v46 = vsel %vm3083_vm1, %v9089_v27, -inf  ;;  %v9351_v45 = vpop.f32.mrf.mxu0 }
 0x638   : > { %3073 = vmatmul.f32.gmra.mxu3 %v2871_v22  ;;  %12129 = vst [vmem:[#allocation70_spill] sm:$0xff] %v9351_v45 }
 0x63a   : > { %v2743_v17 = vpop.f32.mrf.mxu2 }
 0x63b   : > { %v9292_v7 = vpop.f32.mrf.mxu3  ;;  %v2744_v9 = vadd.f32 %v2743_v17, %v2534_v50  ;;  %v3090_v50 = vsel %vm3083_vm1, %v8933_v55, -inf  ;;  %v3092_v17 = vsel %vm3083_vm1, %v8943_v32, -inf  ;;  %v3084_v55 = vsel %vm3083_vm1, %v8873_v41, -inf }
 0x63c   : > { %v3091_v32 = vmax.f32 %v3085_v62, %v3090_v50 }
 0x63d   : > { %v2809_v1 = vadd.f32 %v2744_v9, %v12121_v63  ;;  %v3102_v9 = vsel %vm3083_vm1, %v9010_v35, -inf  ;;  %v3095_v63 = vmax.f32 %v3087_v58, %v3094_v15  ;;  %v3096_v58 = vsel %vm3083_vm1, %v8965_v56, -inf  ;;  %v12132_v56 = vld [vmem:[#allocation58_spill] sm:$0xff] }
 0x63f   : > { %v2873_v19 = vmul.f32 %v2809_v1, %v12122_v2  ;;  %v3088_v1 = vsel %vm3083_vm1, %v8921_v29, -inf  ;;  %v3098_v2 = vsel %vm3083_vm1, %v8976_v51, -inf  ;;  %v3103_v15 = vmax.f32 %v3095_v63, %v3102_v9  ;;  %v12130_v9 = vld [vmem:[#allocation54_spill] sm:$0xff] }
 0x640   : > { %3076 = vmatmul.f32.gmra.mxu3 %v2872_v49  ;;  %v3086_v49 = vsel %vm3083_vm1, %v8897_v38, -inf  ;;  %v3106_v29 = vsel %vm3083_vm1, %v9050_v61, -inf  ;;  %v3118_v51 = vsel %vm3083_vm1, %v9151_v12, -inf  ;;  %v3089_v41 = vmax.f32 %v3084_v55, %v3088_v1  ;;  %v12133_v55 = vld [vmem:[#allocation53_spill] sm:$0xff]  ;;  %v12135_v1 = vld [vmem:[#allocation174_spill] sm:$0xff] }
 0x641   : > { %v3093_v38 = vmax.f32 %v3086_v49, %v3092_v17  ;;  %v3099_v35 = vmax.f32 %v3091_v32, %v3098_v2  ;;  %v3111_v50 = vmax.f32 %v3103_v15, %v3110_v46  ;;  %v3104_v17 = vsel %vm3083_vm1, %v9030_v8, -inf  ;;  %v12131_v49 = vld [vmem:[#allocation169_spill] sm:$0xff]  ;;  %v12134_v46 = vld [vmem:[#allocation56_spill] sm:$0xff] }
 0x642   : > { %v3114_v62 = vsel %vm3083_vm1, %v12130_v9, -inf  ;;  %v3116_v63 = vsel %vm3083_vm1, %v12131_v49, -inf  ;;  %v3126_v61 = vsel %vm3083_vm1, %v12132_v56, -inf  ;;  %v3097_v44 = vmax.f32 %v3089_v41, %v3096_v58  ;;  %v12136_v41 = vld [vmem:[#allocation172_spill] sm:$0xff] }
 0x643   : > { %v9296_v4 = vpop.f32.mrf.mxu3  ;;  %v3107_v12 = vmax.f32 %v3099_v35, %v3106_v29  ;;  %v3122_v32 = vsel %vm3083_vm1, %v12134_v46, -inf  ;;  %v3124_v2 = vsel %vm3083_vm1, %v12135_v1, -inf  ;;  %v3130_v29 = vsel %vm3083_vm1, %v9199_v24, -inf }
 0x644   : > { %v3105_v15 = vmax.f32 %v3097_v44, %v3104_v17  ;;  %v12137_v44 = vld [vmem:[#allocation176_spill] sm:$0xff]  ;;  %v9395_v17 = vpop.f32.mrf.mxu0 }
 0x645   : > { %v3115_v9 = vmax.f32 %v3107_v12, %v3114_v62  ;;  %v3140_v12 = vsel %vm3083_vm1, %v9232_v20, -inf  ;;  %12138 = vst [vmem:[#allocation186_spill] sm:$0xff] %v9395_v17 }
 0x647   : > { %v3123_v58 = vmax.f32 %v3115_v9, %v3122_v32  ;;  %v3146_v32 = vsel %vm3083_vm1, %v9244_v10, -inf }
 0x648   : > { %3079 = vmatmul.f32.gmra.mxu3 %v2873_v19  ;;  %v3100_v19 = vsel %vm3083_vm1, %v8991_v59, -inf }
 0x649   : > { %v3101_v45 = vmax.f32 %v3093_v38, %v3100_v19  ;;  %v3112_v38 = vsel %vm3083_vm1, %v12133_v55, -inf  ;;  %v3134_v19 = vsel %vm3083_vm1, %v9210_v14, -inf }
 0x64a   : > { %v3113_v35 = vmax.f32 %v3105_v15, %v3112_v38 }
 0x64b   : > { %v9299_v21 = vpop.f32.mrf.mxu3  ;;  %v3109_v27 = vmax.f32 %v3101_v45, %v3108_v34  ;;  %v3120_v45 = vsel %vm3083_vm1, %v12136_v41, -inf  ;;  %v3132_v34 = vsel %vm3083_vm1, %v9204_v33, -inf }
 0x64c   : > { %v3121_v62 = vmax.f32 %v3113_v35, %v3120_v45  ;;  %v3166_v35 = vsel %vm3083_vm1, %v9284_v30, -inf }
 0x64d   : > { %v3117_v49 = vmax.f32 %v3109_v27, %v3116_v63  ;;  %v3128_v27 = vsel %vm3083_vm1, %v12137_v44, -inf  ;;  %v3131_v63 = vmax.f32 %v3123_v58, %v3130_v29 }
 0x64e   : > { %v3129_v15 = vmax.f32 %v3121_v62, %v3128_v27  ;;  %v3152_v27 = vsel %vm3083_vm1, %v9256_v47, -inf }
 0x653   : > { %v9301_v37 = vpop.f32.mrf.mxu3 }
 0x654   : > { %12123 = vst [vmem:[#allocation62_spill] sm:$0xff] %v9301_v37 }
 0x65b   : > { %v9303_v43 = vpop.f32.mrf.mxu3 }
 0x65c   : > { %12124 = vst [vmem:[#allocation180_spill] sm:$0xff] %v9303_v43 }
 0x663   : > { %v9305_v39 = vpop.f32.mrf.mxu3 }
 0x664   : > { %12125 = vst [vmem:[#allocation64_spill] sm:$0xff] %v9305_v39 }
 0x66b   : > { %v9307_v31 = vpop.f32.mrf.mxu3 }
 0x66c   : > { %12126 = vst [vmem:[#allocation182_spill] sm:$0xff] %v9307_v31 }
 0x673   : > { %v9309_v5 = vpop.f32.mrf.mxu3 }
 0x674   : > { %12127 = vst [vmem:[#allocation67_spill] sm:$0xff] %v9309_v5 }
 0x67b   : > { %v9311_v26 = vpop.f32.mrf.mxu3 }
 0x683   : > { %v9313_v42 = vpop.f32.mrf.mxu3 }
 0x68b   : > { %v9315_v36 = vpop.f32.mrf.mxu3 }
 0x693   : > { %v9317_v52 = vpop.f32.mrf.mxu3 }
 0x69b   : > { %v9319_v6 = vpop.f32.mrf.mxu3 }
 0x6a3   : > { %v9321_v11 = vpop.f32.mrf.mxu3 }
 0x6ab   : > { %v9323_v54 = vpop.f32.mrf.mxu3 }
 0x6b3   : > { %v9325_v22 = vpop.f32.mrf.mxu3 }
 0x6b4   : > { %12128 = vst [vmem:[#allocation184_spill] sm:$0xff] %v9325_v22  ;;  %v3119_v22 = vmax.f32 %v3111_v50, %v3118_v51  ;;  %v3142_v51 = vsel %vm3083_vm1, %v9236_v16, -inf  ;;  %v3125_v50 = vmax.f32 %v3117_v49, %v3124_v2  ;;  %v3148_v2 = vsel %vm3083_vm1, %v9248_v48, -inf }
 0x6b6   : > { %v3127_v56 = vmax.f32 %v3119_v22, %v3126_v61  ;;  %v3138_v61 = vsel %vm3083_vm1, %v9226_v3, -inf  ;;  %v3150_v22 = vsel %vm3083_vm1, %v9252_v18, -inf  ;;  %v3133_v38 = vmax.f32 %v3125_v50, %v3132_v34 }
 0x6b7   : > { %v3139_v17 = vmax.f32 %v3131_v63, %v3138_v61  ;;  %v3154_v34 = vsel %vm3083_vm1, %v9260_v60, -inf  ;;  %v3162_v61 = vsel %vm3083_vm1, %v9276_v23, -inf }
 0x6b8   : > { %v3135_v55 = vmax.f32 %v3127_v56, %v3134_v19  ;;  %v3136_v56 = vsel %vm3083_vm1, %v9218_v28, -inf  ;;  %v3158_v19 = vsel %vm3083_vm1, %v9268_v53, -inf  ;;  %v3141_v45 = vmax.f32 %v3133_v38, %v3140_v12 }
 0x6b9   : > { %v3137_v58 = vmax.f32 %v3129_v15, %v3136_v56  ;;  %v3147_v50 = vmax.f32 %v3139_v17, %v3146_v32  ;;  %v3164_v12 = vsel %vm3083_vm1, %v9280_v25, -inf  ;;  %v3160_v17 = vsel %vm3083_vm1, %v9272_v40, -inf }
 0x6ba   : > { %v3143_v9 = vmax.f32 %v3135_v55, %v3142_v51  ;;  %v3144_v55 = vsel %vm3083_vm1, %v9240_v0, -inf  ;;  %v3156_v51 = vsel %vm3083_vm1, %v9264_v13, -inf  ;;  %v3149_v10 = vmax.f32 %v3141_v45, %v3148_v2 }
 0x6bb   : > { %v9361_v59 = vpop.f32.mrf.mxu3  ;;  %v3145_v62 = vmax.f32 %v3137_v58, %v3144_v55  ;;  %v3155_v63 = vmax.f32 %v3147_v50, %v3154_v34  ;;  %v3170_v56 = vsel %vm3083_vm1, %v9292_v7, -inf  ;;  %v3172_v32 = vsel %vm3083_vm1, %v9296_v4, -inf }
 0x6bc   : > { %v3151_v29 = vmax.f32 %v3143_v9, %v3150_v22  ;;  %v3174_v22 = vsel %vm3083_vm1, %v9299_v21, -inf  ;;  %v3157_v38 = vmax.f32 %v3149_v10, %v3156_v51  ;;  %v3182_v2 = vsel %vm3083_vm1, %v9307_v31, -inf  ;;  %v9439_v51 = vpop.f32.mrf.mxu0 }
 0x6bd   : > { %v3163_v15 = vmax.f32 %v3155_v63, %v3162_v61  ;;  %v3168_v10 = vsel %vm3083_vm1, %v9288_v57, -inf  ;;  %v3180_v55 = vsel %vm3083_vm1, %v9305_v39, -inf  ;;  %v3190_v34 = vsel %vm3083_vm1, %v9315_v36, -inf  ;;  %12139 = vst [vmem:[#allocation73_spill] sm:$0xff] %v9439_v51 }
 0x6be   : > { %v3159_v48 = vmax.f32 %v3151_v29, %v3158_v19  ;;  %v3153_v19 = vmax.f32 %v3145_v62, %v3152_v27  ;;  %v3165_v45 = vmax.f32 %v3157_v38, %v3164_v12  ;;  %v3176_v12 = vsel %vm3083_vm1, %v9301_v37, -inf }
 0x6bf   : > { %v3171_v58 = vmax.f32 %v3163_v15, %v3170_v56  ;;  %v3188_v62 = vsel %vm3083_vm1, %v9313_v42, -inf  ;;  %v3198_v63 = vsel %vm3083_vm1, %v9323_v54, -inf }
 0x6c0   : > { %v3167_v9 = vmax.f32 %v3159_v48, %v3166_v35  ;;  %v3178_v48 = vsel %vm3083_vm1, %v9303_v43, -inf  ;;  %v3161_v35 = vmax.f32 %v3153_v19, %v3160_v17  ;;  %v3173_v50 = vmax.f32 %v3165_v45, %v3172_v32 }
 0x6c1   : > { %v3184_v32 = vsel %vm3083_vm1, %v9309_v5, -inf  ;;  %v3196_v19 = vsel %vm3083_vm1, %v9321_v11, -inf }
 0x6c2   : > { %v3175_v29 = vmax.f32 %v3167_v9, %v3174_v22  ;;  %v3186_v22 = vsel %vm3083_vm1, %v9311_v26, -inf  ;;  %v3169_v38 = vmax.f32 %v3161_v35, %v3168_v10  ;;  %v3179_v9 = vmax.f32 %v3171_v58, %v3178_v48 }
 0x6c3   : > { %v9397_v49 = vpop.f32.mrf.mxu3  ;;  %v3181_v17 = vmax.f32 %v3173_v50, %v3180_v55  ;;  %v3192_v10 = vsel %vm3083_vm1, %v9317_v52, -inf  ;;  %v3202_v48 = vsel %vm3083_vm1, %v9361_v59, -inf }
 0x6c4   : > { %v3183_v27 = vmax.f32 %v3175_v29, %v3182_v2  ;;  %v3194_v2 = vsel %vm3083_vm1, %v9319_v6, -inf  ;;  %v3177_v45 = vmax.f32 %v3169_v38, %v3176_v12  ;;  %v3187_v29 = vmax.f32 %v3179_v9, %v3186_v22 }
 0x6c5   : > { %v3189_v51 = vmax.f32 %v3181_v17, %v3188_v62  ;;  %v3204_v55 = vsel %vm3083_vm1, %v9397_v49, -inf }
 0x6c6   : > { %v3191_v56 = vmax.f32 %v3183_v27, %v3190_v34  ;;  %v3185_v34 = vmax.f32 %v3177_v45, %v3184_v32  ;;  %v3195_v35 = vmax.f32 %v3187_v29, %v3194_v2  ;;  %v12140_v27 = vld [vmem:[#allocation184_spill] sm:$0xff] }
 0x6c7   : > { %v3197_v58 = vmax.f32 %v3189_v51, %v3196_v19  ;;  %v3200_v43 = vsel %vm3083_vm1, %v12140_v27, -inf  ;;  %v12145_v45 = vld [vmem:[#allocation52_spill] sm:$0xff] }
 0x6c8   : > { %v3199_v37 = vmax.f32 %v3191_v56, %v3198_v63  ;;  %v3193_v12 = vmax.f32 %v3185_v34, %v3192_v10  ;;  %v3203_v22 = vmax.f32 %v3195_v35, %v3202_v48  ;;  %v9467_v63 = vpop.f32.mrf.mxu0  ;;  %v12147_v48 = vld [vmem:[#allocation50_spill] sm:$0xff] }
 0x6c9   : > { %v3205_v62 = vmax.f32 %v3197_v58, %v3204_v55  ;;  %12141 = vst [vmem:[#allocation188_spill] sm:$0xff] %v9467_v63  ;;  %v12149_v58 = vld [vmem:[#allocation49_spill] sm:$0xff] }
 0x6ca   : > { %v3201_v38 = vmax.f32 %v3193_v12, %v3200_v43  ;;  %v12146_v43 = vld [vmem:[#allocation51_spill] sm:$0xff] }
 0x6cb   : > { %v9441_v61 = vpop.f32.mrf.mxu3 }
 0x6cc   : > { %v3206_v15 = vsel %vm3083_vm1, %v9441_v61, -inf  ;;  %v3208_v17 = vmax.f32 %v3201_v38, %v3203_v22  ;;  %v12150_v22 = vld [vmem:[#allocation246_spill] sm:$0xff] }
 0x6cd   : > { %v3207_v50 = vmax.f32 %v3199_v37, %v3206_v15 }
 0x6cf   : > { %v3209_v9 = vmax.f32 %v3205_v62, %v3207_v50 }
 0x6d0   : > { %v9469_v31 = vpop.f32.mrf.mxu0 }
 0x6d1   : > { %v3210_v56 = vmax.f32 %v3208_v17, %v3209_v9  ;;  %12142 = vst [vmem:[#allocation76_spill] sm:$0xff] %v9469_v31  ;;  %v12151_v9 = vld [vmem:[#allocation245_spill] sm:$0xff] }
 0x6d3   : > { %v3211_v39 = vrot.slane %v3210_v56, 4 }
 0x6d5   : > { %v3212_v5 = vmax.f32 %v3210_v56, %v3211_v39 }
 0x6d7   : > { %v3213_v32 = vrot.slane %v3212_v5, 2 }
 0x6d8   : > { %v9471_v2 = vpop.f32.mrf.mxu0 }
 0x6d9   : > { %12143 = vst [vmem:[#allocation190_spill] sm:$0xff] %v9471_v2  ;;  %v3214_v37 = vmax.f32 %v3212_v5, %v3213_v32 }
 0x6db   : > { %v3215_v51 = vrot.slane %v3214_v37, 1 }
 0x6dd   : > { %v9473_v19 = vmax.f32 %v3214_v37, %v3215_v51  ;;  %v12152_v37 = vld [vmem:[#allocation8_spill] sm:$0xff] }
 0x6df   : > { %v3232_v29 = vsub.f32 %v12145_v45, %v9473_v19  ;;  %v3231_v10 = vsub.f32 %v12146_v43, %v9473_v19  ;;  %v3230_v55 = vsub.f32 %v12147_v48, %v9473_v19  ;;  %v3229_v39 = vsub.f32 %v9030_v8, %v9473_v19 }
 0x6e0   : > { %v9475_v15 = vpop.f32.mrf.mxu0  ;;  %v3228_v50 = vsub.f32 %v12149_v58, %v9473_v19  ;;  %v3227_v62 = vsub.f32 %v12150_v22, %v9473_v19  ;;  %v3226_v17 = vsub.f32 %v12151_v9, %v9473_v19  ;;  %v3280_v8 = vsub.f32 %v9441_v61, %v9473_v19 }
 0x6e1   : > { %12144 = vst [vmem:[#allocation79_spill] sm:$0xff] %v9475_v15  ;;  %v3311_v34 = vmul.f32 1.442695, %v3232_v29  ;;  %v3309_v35 = vmul.f32 1.442695, %v3231_v10  ;;  %v3225_v51 = vsub.f32 %v12152_v37, %v9473_v19  ;;  %v12153_v29 = vld [vmem:[#allocation46_spill] sm:$0xff]  ;;  %v3248_v48 = vsub.f32 %v9236_v16, %v9473_v19 }
 0x6e2   : > { %v3307_v12 = vmul.f32 1.442695, %v3230_v55  ;;  %v3305_v38 = vmul.f32 1.442695, %v3229_v39  ;;  %v3303_v56 = vmul.f32 1.442695, %v3228_v50  ;;  %v3224_v43 = vsub.f32 %v12153_v29, %v9473_v19 }
 0x6e3   : > { %6242 = vpow2.f32 %v3311_v34  ;;  %v3301_v45 = vmul.f32 1.442695, %v3227_v62  ;;  %v3299_v55 = vmul.f32 1.442695, %v3226_v17  ;;  %v3407_v61 = vmul.f32 1.442695, %v3280_v8 }
 0x6e4   : > { %6244 = vpow2.f32 %v3309_v35  ;;  %v12154_v34 = vld [vmem:[#allocation45_spill] sm:$0xff]  ;;  %v3247_v50 = vsub.f32 %v9232_v20, %v9473_v19  ;;  %v12156_v16 = vld [vmem:[#allocation242_spill] sm:$0xff]  ;;  %v3295_v62 = vmul.f32 1.442695, %v3224_v43  ;;  %v3246_v9 = vsub.f32 %v9226_v3, %v9473_v19  ;;  %v6485_v8 = vld [vmem:[%s6759_s7 + $0x520] sm:$0xff] }
 0x6e5   : > { %6246 = vpow2.f32 %v3307_v12  ;;  %v3223_v39 = vsub.f32 %v12154_v34, %v9473_v19  ;;  %v3297_v12 = vmul.f32 1.442695, %v3225_v51  ;;  %v3222_v22 = vsub.f32 %v12156_v16, %v9473_v19  ;;  %v12157_v20 = vld [vmem:[#allocation241_spill] sm:$0xff]  ;;  %v12158_v3 = vld [vmem:[#allocation42_spill] sm:$0xff] }
 0x6e6   : > { %6248 = vpow2.f32 %v3305_v38  ;;  %v3343_v17 = vmul.f32 1.442695, %v3248_v48  ;;  %v3221_v51 = vsub.f32 %v12157_v20, %v9473_v19  ;;  %v3245_v43 = vsub.f32 %v9218_v28, %v9473_v19  ;;  %v12159_v28 = vld [vmem:[#allocation41_spill] sm:$0xff] }
 0x6e7   : > { %6250 = vpow2.f32 %v3303_v56  ;;  %v6484_v56 = vld [vmem:[%s6759_s7 + $0x20] sm:$0xff]  ;;  %v3341_v34 = vmul.f32 1.442695, %v3247_v50  ;;  %v3220_v48 = vsub.f32 %v12158_v3, %v9473_v19  ;;  %v3339_v16 = vmul.f32 1.442695, %v3246_v9 }
 0x6e8   : > { %v9485_v5 = vpop.f32.mrf.mxu0  ;;  %6252 = vpow2.f32 %v3301_v45  ;;  %v6130_v37 = vpack.i.bf16 %v6485_v8, %v6484_v56  ;;  %v3293_v45 = vmul.f32 1.442695, %v3223_v39  ;;  %v3244_v39 = vsub.f32 %v9210_v14, %v9473_v19  ;;  %v6486_v8 = vld [vmem:[%s6759_s7 + $0x48] sm:$0xff]  ;;  %v12161_v9 = vld [vmem:[#allocation40_spill] sm:$0xff] }
 0x6e9   : > { %12148 = vst [vmem:[#allocation192_spill] sm:$0xff] %v9485_v5  ;;  %v9495_v32 = vpop.eup %6242  ;;  %6254 = vpow2.f32 %v3299_v55  ;;  %v3291_v55 = vmul.f32 1.442695, %v3222_v22  ;;  %v3219_v50 = vsub.f32 %v12159_v28, %v9473_v19  ;;  %v3243_v22 = vsub.f32 %v9204_v33, %v9473_v19  ;;  %v12163_v28 = vld [vmem:[#allocation238_spill] sm:$0xff] }
 0x6ea   : > { %3665 = vmatpush.msra.mxu0 %v9495_v32  ;;  %v9502_v10 = vpop.eup %6244  ;;  %6256 = vpow2.f32 %v3407_v61  ;;  %6131 = vxpose.xlu1.b32.start [1/16] %v6130_v37, 128  ;;  %v6487_v37 = vld [vmem:[%s6759_s7 + $0x548] sm:$0xff]  ;;  %v3287_v3 = vmul.f32 1.442695, %v3220_v48  ;;  %v3242_v33 = vsub.f32 %v9199_v24, %v9473_v19 }
 0x6eb   : > { %v9509_v35 = vpop.eup %6246  ;;  %6258 = vpow2.f32 %v3297_v12  ;;  %v3289_v12 = vmul.f32 1.442695, %v3221_v51  ;;  %v6132_v20 = vpack.i.bf16 %v6487_v37, %v6486_v8  ;;  %v3217_v8 = vsub.f32 %v12163_v28, %v9473_v19 }
 0x6ec   : > { %3666 = vmatpush.msra.mxu0 %v9502_v10  ;;  %v9518_v38 = vpop.eup %6248  ;;  %6260 = vpow2.f32 %v3295_v62  ;;  %v3337_v62 = vmul.f32 1.442695, %v3245_v43  ;;  %v3335_v43 = vmul.f32 1.442695, %v3244_v39  ;;  %v3285_v37 = vmul.f32 1.442695, %v3219_v50 }
 0x6ed   : > { %v9527_v29 = vpop.eup %6250  ;;  %6262 = vpow2.f32 %v3343_v17  ;;  %v3218_v17 = vsub.f32 %v12161_v9, %v9473_v19  ;;  %v3333_v9 = vmul.f32 1.442695, %v3243_v22  ;;  %v12164_v39 = vld [vmem:[#allocation58_spill] sm:$0xff] }
 0x6ee   : > { %3667 = vmatpush.msra.mxu0 %v9509_v35  ;;  %v9534_v61 = vpop.eup %6252  ;;  %6264 = vpow2.f32 %v3293_v45 }
 0x6ef   : > { %v9541_v56 = vpop.eup %6254  ;;  %6266 = vpow2.f32 %v3341_v34 }
 0x6f0   : > { %v9511_v58 = vpop.f32.mrf.mxu0  ;;  %3668 = vmatpush.msra.mxu0 %v9518_v38  ;;  %v9547_v14 = vpop.eup %6256  ;;  %6268 = vpow2.f32 %v3291_v55  ;;  %v3241_v55 = vsub.f32 %v12137_v44, %v9473_v19  ;;  %v3264_v44 = vsub.f32 %v9299_v21, %v9473_v19  ;;  %v6488_v21 = vld [vmem:[%s6759_s7 + $0x70] sm:$0xff] }
 0x6f1   : > { %12155 = vst [vmem:[#allocation82_spill] sm:$0xff] %v9511_v58  ;;  %v9552_v51 = vpop.eup %6258  ;;  %6270 = vpow2.f32 %v3339_v16  ;;  %v3240_v16 = vsub.f32 %v12164_v39, %v9473_v19  ;;  %v3283_v58 = vmul.f32 1.442695, %v3218_v17 }
 0x6f2   : > { %3669 = vmatpush.msra.mxu0 %v9527_v29  ;;  %12160 = vst [vmem:[#allocation194_spill] sm:$0xff] %v9547_v14  ;;  %v9558_v34 = vpop.eup %6260  ;;  %6272 = vpow2.f32 %v3289_v12  ;;  %6133 = vxpose.xlu1.b32.cont [2/16] %v6132_v20, 128  ;;  %v3331_v12 = vmul.f32 1.442695, %v3242_v33  ;;  %v3281_v20 = vmul.f32 1.442695, %v3217_v8  ;;  %v6489_v33 = vld [vmem:[%s6759_s7 + $0x570] sm:$0xff] }
 0x6f3   : > { %v9563_v48 = vpop.eup %6262  ;;  %6274 = vpow2.f32 %v3337_v62  ;;  %v3239_v62 = vsub.f32 %v12135_v1, %v9473_v19  ;;  %v3329_v28 = vmul.f32 1.442695, %v3241_v55  ;;  %v3238_v1 = vsub.f32 %v12134_v46, %v9473_v19 }
 0x6f4   : > { %3670 = vmatpush.msra.mxu0 %v9534_v61  ;;  %v9567_v24 = vpop.eup %6264  ;;  %6276 = vpow2.f32 %v3287_v3  ;;  %3778 = vmatpush.msra.mxu1 %v9563_v48  ;;  %v3263_v3 = vsub.f32 %v9296_v4, %v9473_v19  ;;  %v3327_v8 = vmul.f32 1.442695, %v3240_v16  ;;  %v3262_v4 = vsub.f32 %v9292_v7, %v9473_v19 }
 0x6f5   : > { %v9573_v50 = vpop.eup %6266  ;;  %6278 = vpow2.f32 %v3335_v43  ;;  %v6134_v43 = vpack.i.bf16 %v6489_v33, %v6488_v21  ;;  %v3375_v55 = vmul.f32 1.442695, %v3264_v44  ;;  %v3237_v21 = vsub.f32 %v12136_v41, %v9473_v19  ;;  %v12166_v41 = vld [vmem:[#allocation55_spill] sm:$0xff] }
 0x6f6   : > { %3671 = vmatpush.msra.mxu0 %v9541_v56  ;;  %v9577_v22 = vpop.eup %6268  ;;  %6280 = vpow2.f32 %v3285_v37  ;;  %3779 = vmatpush.msra.mxu1 %v9573_v50  ;;  %v3325_v33 = vmul.f32 1.442695, %v3239_v62  ;;  %v3261_v7 = vsub.f32 %v9288_v57, %v9473_v19  ;;  %v3373_v16 = vmul.f32 1.442695, %v3263_v3 }
 0x6f7   : > { %v9583_v17 = vpop.eup %6270  ;;  %6282 = vpow2.f32 %v3333_v9  ;;  %v3323_v62 = vmul.f32 1.442695, %v3238_v1  ;;  %v3260_v57 = vsub.f32 %v9284_v30, %v9473_v19  ;;  %v3371_v3 = vmul.f32 1.442695, %v3262_v4  ;;  %v6490_v30 = vld [vmem:[%s6759_s7 + $0x98] sm:$0xff] }
 0x6f8   : > { %v9554_v45 = vpop.f32.mrf.mxu0  ;;  %3672 = vmatpush.msra.mxu0 %v9552_v51  ;;  %v9589_v39 = vpop.eup %6272  ;;  %6284 = vpow2.f32 %v3283_v58  ;;  %3780 = vmatpush.msra.mxu1 %v9583_v17  ;;  %v3321_v1 = vmul.f32 1.442695, %v3237_v21  ;;  %v6491_v4 = vld [vmem:[%s6759_s7 + $0x598] sm:$0xff] }
 0x6f9   : > { %12162 = vst [vmem:[#allocation85_spill] sm:$0xff] %v9554_v45  ;;  %v9595_v37 = vpop.eup %6274  ;;  %6286 = vpow2.f32 %v3331_v12  ;;  %v3236_v12 = vsub.f32 %v12166_v41, %v9473_v19  ;;  %v3259_v45 = vsub.f32 %v9280_v25, %v9473_v19  ;;  %v3258_v25 = vsub.f32 %v9276_v23, %v9473_v19 }
 0x6fa   : > { %3673 = vmatpush.msra.mxu0 %v9558_v34  ;;  %v9599_v9 = vpop.eup %6276  ;;  %6288 = vpow2.f32 %v3281_v20  ;;  %3781 = vmatpush.msra.mxu1 %v9595_v37 }
 0x6fb   : > { %v9605_v46 = vpop.eup %6278  ;;  %6290 = vpow2.f32 %v3329_v28  ;;  %6135 = vxpose.xlu1.b32.cont [3/16] %v6134_v43, 128  ;;  %v12167_v43 = vld [vmem:[#allocation169_spill] sm:$0xff] }
 0x6fc   : > { %3674 = vmatpush.msra.mxu0 %v9567_v24  ;;  %v9611_v44 = vpop.eup %6280  ;;  %6292 = vpow2.f32 %v3327_v8  ;;  %3782 = vmatpush.msra.mxu1 %v9605_v46  ;;  %v3235_v41 = vsub.f32 %v12167_v43, %v9473_v19  ;;  %v12168_v43 = vld [vmem:[#allocation54_spill] sm:$0xff] }
 0x6fd   : > { %v9617_v20 = vpop.eup %6282  ;;  %6294 = vpow2.f32 %v3375_v55  ;;  %v6136_v55 = vpack.i.bf16 %v6491_v4, %v6490_v30  ;;  %v3234_v21 = vsub.f32 %v12168_v43, %v9473_v19  ;;  %v12169_v30 = vld [vmem:[#allocation53_spill] sm:$0xff]  ;;  %v3365_v43 = vmul.f32 1.442695, %v3259_v45 }
 0x6fe   : > { %3675 = vmatpush.msra.mxu0 %v9577_v22  ;;  %v9621_v28 = vpop.eup %6284  ;;  %6296 = vpow2.f32 %v3325_v33  ;;  %3783 = vmatpush.msra.mxu1 %v9617_v20  ;;  %v3319_v33 = vmul.f32 1.442695, %v3236_v12  ;;  %v3233_v4 = vsub.f32 %v12169_v30, %v9473_v19  ;;  %v3317_v2 = vmul.f32 1.442695, %v3235_v41 }
 0x6ff   : > { %v9627_v8 = vpop.eup %6286  ;;  %6298 = vpow2.f32 %v3373_v16  ;;  %v3363_v45 = vmul.f32 1.442695, %v3258_v25  ;;  %v6492_v25 = vld [vmem:[%s6759_s7 + $0xc0] sm:$0xff] }
 0x700   : > { %3676 = vmatpush.msra.mxu0 %v9589_v39  ;;  %v9607_v58 = vpop.f32.mrf.mxu0  ;;  %v9633_v63 = vpop.eup %6288  ;;  %6300 = vpow2.f32 %v3323_v62  ;;  %3784 = vmatpush.msra.mxu1 %v9627_v8  ;;  %v3257_v62 = vsub.f32 %v9272_v40, %v9473_v19  ;;  %v3279_v40 = vsub.f32 %v9397_v49, %v9473_v19  ;;  %v3278_v49 = vsub.f32 %v9361_v59, %v9473_v19 }
 0x701   : > { %12165 = vst [vmem:[#allocation89_spill] sm:$0xff] %v9607_v58  ;;  %v3369_v58 = vmul.f32 1.442695, %v3261_v7  ;;  %v9639_v31 = vpop.eup %6290  ;;  %v3367_v7 = vmul.f32 1.442695, %v3260_v57  ;;  %6302 = vpow2.f32 %v3371_v3  ;;  %v3256_v57 = vsub.f32 %v9268_v53, %v9473_v19 }
 0x702   : > { %3677 = vmatpush.msra.mxu0 %v9599_v9  ;;  %v9643_v16 = vpop.eup %6292  ;;  %6304 = vpow2.f32 %v3321_v1  ;;  %3785 = vmatpush.msra.mxu1 %v9639_v31  ;;  %v3315_v3 = vmul.f32 1.442695, %v3234_v21  ;;  %v3277_v59 = vsub.f32 %v12140_v27, %v9473_v19 }
 0x703   : > { %v9649_v12 = vpop.eup %6294  ;;  %6306 = vpow2.f32 %v3369_v58  ;;  %6137 = vxpose.xlu1.b32.cont [4/16] %v6136_v55, 128  ;;  %v3255_v58 = vsub.f32 %v9264_v13, %v9473_v19  ;;  %v3313_v55 = vmul.f32 1.442695, %v3233_v4  ;;  %v3254_v13 = vsub.f32 %v9260_v60, %v9473_v19 }
 0x704   : > { %3678 = vmatpush.msra.mxu0 %v9611_v44  ;;  %v9653_v23 = vpop.eup %6296  ;;  %6308 = vpow2.f32 %v3319_v33  ;;  %3891 = vmatpush.msra.mxu2 %v9649_v12  ;;  %v3361_v33 = vmul.f32 1.442695, %v3257_v62  ;;  %v3405_v62 = vmul.f32 1.442695, %v3279_v40 }
 0x705   : > { %3786 = vmatpush.msra.mxu1 %v9643_v16  ;;  %v9659_v41 = vpop.eup %6298  ;;  %6310 = vpow2.f32 %v3367_v7  ;;  %v6493_v7 = vld [vmem:[%s6759_s7 + $0x5c0] sm:$0xff]  ;;  %v3355_v40 = vmul.f32 1.442695, %v3254_v13 }
 0x706   : > { %3679 = vmatpush.msra.mxu0 %v9621_v28  ;;  %v9666_v53 = vpop.eup %6300  ;;  %6312 = vpow2.f32 %v3317_v2  ;;  %3892 = vmatpush.msra.mxu2 %v9659_v41  ;;  %v6138_v30 = vpack.i.bf16 %v6493_v7, %v6492_v25  ;;  %v3359_v2 = vmul.f32 1.442695, %v3256_v57  ;;  %v3253_v25 = vsub.f32 %v9256_v47, %v9473_v19 }
 0x707   : > { %3787 = vmatpush.msra.mxu1 %v9653_v23  ;;  %v9672_v21 = vpop.eup %6302  ;;  %6314 = vpow2.f32 %v3365_v43  ;;  %v3357_v7 = vmul.f32 1.442695, %v3255_v58  ;;  %v3276_v57 = vsub.f32 %v9323_v54, %v9473_v19  ;;  %v3252_v47 = vsub.f32 %v9252_v18, %v9473_v19 }
 0x708   : > { %3680 = vmatpush.msra.mxu0 %v9633_v63  ;;  %v9661_v1 = vpop.f32.mrf.mxu0  ;;  %6316 = vpow2.f32 %v3315_v3  ;;  %3893 = vmatpush.msra.mxu2 %v9672_v21  ;;  %v3403_v3 = vmul.f32 1.442695, %v3278_v49  ;;  %v3275_v54 = vsub.f32 %v9321_v11, %v9473_v19  ;;  %v3401_v58 = vmul.f32 1.442695, %v3277_v59  ;;  %v12171_v49 = vld [vmem:[#allocation178_spill] sm:$0xff]  ;;  %v6494_v59 = vld [vmem:[%s6759_s7 + $0xe8] sm:$0xff] }
 0x709   : > { %5808 = vmatmul.lmr.bf16.vlgmr.msra.gmra.16.mxu0  ;;  %12170 = vst [vmem:[#allocation93_spill] sm:$0xff] %v9661_v1  ;;  %v9678_v1 = vpop.eup %6304  ;;  %3788 = vmatpush.msra.mxu1 %v9666_v53  ;;  %6318 = vpow2.f32 %v3363_v45  ;;  %v3251_v18 = vsub.f32 %v12171_v49, %v9473_v19  ;;  %v3274_v11 = vsub.f32 %v9319_v6, %v9473_v19  ;;  %v3351_v49 = vmul.f32 1.442695, %v3252_v47 }
 0x70a   : > { %4004 = vmatpush.msra.mxu0 %v9547_v14  ;;  %v9684_v4 = vpop.eup %6306  ;;  %6320 = vpow2.f32 %v3313_v55  ;;  %v3273_v6 = vsub.f32 %v9317_v52, %v9473_v19 }
 0x70b   : > { %v9688_v43 = vpop.eup %6308  ;;  %3894 = vmatpush.msra.mxu2 %v9684_v4  ;;  %3789 = vmatpush.msra.mxu1 %v9678_v1  ;;  %6322 = vpow2.f32 %v3361_v33  ;;  %v3353_v33 = vmul.f32 1.442695, %v3253_v25  ;;  %v12173_v25 = vld [vmem:[#allocation60_spill] sm:$0xff] }
 0x70c   : > { %v9694_v60 = vpop.eup %6310  ;;  %6139 = vxpose.xlu1.b32.cont [5/16] %v6138_v30, 128  ;;  %6324 = vpow2.f32 %v3359_v2  ;;  %v3399_v2 = vmul.f32 1.442695, %v3276_v57  ;;  %v3397_v57 = vmul.f32 1.442695, %v3275_v54 }
 0x70d   : > { %v9698_v27 = vpop.eup %6312  ;;  %3895 = vmatpush.msra.mxu2 %v9694_v60  ;;  %3790 = vmatpush.msra.mxu1 %v9688_v43  ;;  %6326 = vpow2.f32 %v3405_v62  ;;  %v6495_v62 = vld [vmem:[%s6759_s7 + $0x5e8] sm:$0xff] }
 0x70e   : > { %v9704_v45 = vpop.eup %6314  ;;  %6328 = vpow2.f32 %v3357_v7  ;;  %v6140_v14 = vpack.i.bf16 %v6495_v62, %v6494_v59  ;;  %v3250_v7 = vsub.f32 %v12173_v25, %v9473_v19  ;;  %v3249_v59 = vsub.f32 %v9240_v0, %v9473_v19 }
 0x70f   : > { %v9708_v55 = vpop.eup %6316  ;;  %3896 = vmatpush.msra.mxu2 %v9704_v45  ;;  %3791 = vmatpush.msra.mxu1 %v9698_v27  ;;  %6330 = vpow2.f32 %v3403_v3  ;;  %v3349_v62 = vmul.f32 1.442695, %v3251_v18  ;;  %v3395_v25 = vmul.f32 1.442695, %v3274_v11  ;;  %v3270_v11 = vsub.f32 %v9311_v26, %v9473_v19 }
 0x710   : > { %v9714_v30 = vpop.eup %6318  ;;  %v9716_v13 = vpop.f32.mrf.mxu0  ;;  %6332 = vpow2.f32 %v3355_v40  ;;  %v3272_v40 = vsub.f32 %v9315_v36, %v9473_v19  ;;  %v3347_v54 = vmul.f32 1.442695, %v3250_v7  ;;  %v3393_v36 = vmul.f32 1.442695, %v3273_v6  ;;  %v6496_v7 = vld [vmem:[%s6759_s7 + $0x110] sm:$0xff] }
 0x711   : > { %5809 = vmatmul.lmr.bf16.gmra.16.mxu0  ;;  %12172 = vst [vmem:[#allocation96_spill] sm:$0xff] %v9716_v13  ;;  %v9722_v15 = vpop.eup %6320  ;;  %3897 = vmatpush.msra.mxu2 %v9714_v30  ;;  %6334 = vpow2.f32 %v3401_v58  ;;  %v3271_v58 = vsub.f32 %v9313_v42, %v9473_v19  ;;  %v6497_v42 = vld [vmem:[%s6759_s7 + $0x610] sm:$0xff] }
 0x712   : > { %3792 = vmatpush.msra.mxu1 %v9708_v55  ;;  %v9728_v13 = vpop.eup %6322  ;;  %6336 = vpow2.f32 %v3353_v33 }
 0x713   : > { %v9732_v3 = vpop.eup %6324  ;;  %3898 = vmatpush.msra.mxu2 %v9728_v13  ;;  %6338 = vpow2.f32 %v3399_v2  ;;  %v3391_v2 = vmul.f32 1.442695, %v3272_v40  ;;  %v3389_v26 = vmul.f32 1.442695, %v3271_v58 }
 0x714   : > { %3793 = vmatpush.msra.mxu1 %v9722_v15  ;;  %v9738_v47 = vpop.eup %6326  ;;  %6141 = vxpose.xlu1.b32.cont [6/16] %v6140_v14, 128  ;;  %6340 = vpow2.f32 %v3351_v49  ;;  %v3345_v14 = vmul.f32 1.442695, %v3249_v59  ;;  %v6142_v49 = vpack.i.bf16 %v6497_v42, %v6496_v7  ;;  %v3387_v42 = vmul.f32 1.442695, %v3270_v11 }
 0x715   : > { %12174 = vst [vmem:[#allocation201_spill] sm:$0xff] %v9738_v47  ;;  %5913 = vmatmul.lmr.bf16.vlgmr.msra.gmra.16.mxu1  ;;  %v9742_v52 = vpop.eup %6328  ;;  %3899 = vmatpush.msra.mxu2 %v9732_v3  ;;  %6342 = vpow2.f32 %v3397_v57 }
 0x716   : > { %4005 = vmatpush.msra.mxu0 %v9738_v47  ;;  %v9746_v0 = vpop.eup %6330  ;;  %6344 = vpow2.f32 %v3349_v62  ;;  %v12179_v62 = vld [vmem:[#allocation67_spill] sm:$0xff] }
 0x717   : > { %12175 = vst [vmem:[#allocation99_spill] sm:$0xff] %v9746_v0  ;;  %v9750_v18 = vpop.eup %6332  ;;  %3900 = vmatpush.msra.mxu2 %v9742_v52  ;;  %6346 = vpow2.f32 %v3395_v25  ;;  %v3269_v47 = vsub.f32 %v12179_v62, %v9473_v19 }
 0x718   : > { %4006 = vmatpush.msra.mxu0 %v9746_v0  ;;  %v9754_v33 = vpop.eup %6334  ;;  %6348 = vpow2.f32 %v3347_v54  ;;  %v9766_v59 = vpop.f32.mrf.mxu0  ;;  %v12181_v54 = vld [vmem:[#allocation182_spill] sm:$0xff] }
 0x719   : > { %5810 = vmatmul.lmr.bf16.gmra.16.mxu0  ;;  %12176 = vst [vmem:[#allocation204_spill] sm:$0xff] %v9754_v33  ;;  %v9760_v6 = vpop.eup %6336  ;;  %3901 = vmatpush.msra.mxu2 %v9750_v18  ;;  %6350 = vpow2.f32 %v3393_v36  ;;  %v3268_v7 = vsub.f32 %v12181_v54, %v9473_v19  ;;  %v12183_v36 = vld [vmem:[#allocation64_spill] sm:$0xff]  ;;  %v3385_v62 = vmul.f32 1.442695, %v3269_v47  ;;  %v6498_v47 = vld [vmem:[%s6759_s7 + $0x138] sm:$0xff] }
 0x71a   : > { %4007 = vmatpush.msra.mxu0 %v9754_v33  ;;  %v9764_v57 = vpop.eup %6338  ;;  %12178 = vst [vmem:[#allocation106_spill] sm:$0xff] %v9766_v59  ;;  %6352 = vpow2.f32 %v3345_v14  ;;  %v3267_v14 = vsub.f32 %v12183_v36, %v9473_v19 }
 0x71b   : > { %12177 = vst [vmem:[#allocation102_spill] sm:$0xff] %v9764_v57  ;;  %v9770_v40 = vpop.eup %6340  ;;  %3902 = vmatpush.msra.mxu2 %v9760_v6  ;;  %6354 = vpow2.f32 %v3391_v2  ;;  %v3383_v5 = vmul.f32 1.442695, %v3268_v7 }
 0x71c   : > { %4008 = vmatpush.msra.mxu0 %v9764_v57  ;;  %v9774_v25 = vpop.eup %6342  ;;  %6143 = vxpose.xlu1.b32.cont [7/16] %v6142_v49, 128  ;;  %6356 = vpow2.f32 %v3389_v26  ;;  %v12185_v49 = vld [vmem:[#allocation180_spill] sm:$0xff]  ;;  %v6499_v26 = vld [vmem:[%s6759_s7 + $0x638] sm:$0xff]  ;;  %v12187_v57 = vld [vmem:[#allocation62_spill] sm:$0xff] }
 0x71d   : > { %12180 = vst [vmem:[#allocation110_spill] sm:$0xff] %v9774_v25  ;;  %5914 = vmatmul.lmr.bf16.gmra.16.mxu1  ;;  %v9778_v59 = vpop.eup %6344  ;;  %3903 = vmatpush.msra.mxu2 %v9770_v40  ;;  %v3266_v54 = vsub.f32 %v12185_v49, %v9473_v19  ;;  %6358 = vpow2.f32 %v3387_v42  ;;  %v6144_v36 = vpack.i.bf16 %v6499_v26, %v6498_v47 }
 0x71e   : > { %4009 = vmatpush.msra.mxu0 %v9774_v25  ;;  %v9782_v58 = vpop.eup %6346  ;;  %v3265_v25 = vsub.f32 %v12187_v57, %v9473_v19  ;;  %6360 = vpow2.f32 %v3385_v62  ;;  %v6500_v62 = vld [vmem:[%s6759_s7 + $0x160] sm:$0xff] }
 0x71f   : > { %12182 = vst [vmem:[#allocation112_spill] sm:$0xff] %v9782_v58  ;;  %v9786_v11 = vpop.eup %6348  ;;  %3904 = vmatpush.msra.mxu2 %v9778_v59  ;;  %v3379_v49 = vmul.f32 1.442695, %v3266_v54  ;;  %6362 = vpow2.f32 %v3383_v5  ;;  %v6501_v54 = vld [vmem:[%s6759_s7 + $0x660] sm:$0xff] }
 0x720   : > { %4010 = vmatpush.msra.mxu0 %v9782_v58  ;;  %v9790_v2 = vpop.eup %6350  ;;  %v3381_v58 = vmul.f32 1.442695, %v3267_v14  ;;  %v9808_v42 = vpop.f32.mrf.mxu0  ;;  %v3377_v57 = vmul.f32 1.442695, %v3265_v25  ;;  %v6146_v5 = vpack.i.bf16 %v6501_v54, %v6500_v62 }
 0x721   : > { %5811 = vmatmul.lmr.bf16.gmra.16.mxu0  ;;  %12184 = vst [vmem:[#allocation114_spill] sm:$0xff] %v9790_v2  ;;  %v9794_v0 = vpop.eup %6352  ;;  %3905 = vmatpush.msra.mxu2 %v9786_v11 }
 0x722   : > { %4011 = vmatpush.msra.mxu0 %v9790_v2  ;;  %v9800_v33 = vpop.eup %6354  ;;  %12189 = vst [vmem:[#allocation120_spill] sm:$0xff] %v9808_v42  ;;  %6364 = vpow2.f32 %v3381_v58  ;;  %v6505_v42 = vld [vmem:[%s6759_s7 + $0x6b0] sm:$0xff]  ;;  %v6506_v2 = vld [vmem:[%s6759_s7 + $0x1d8] sm:$0xff] }
 0x723   : > { %12186 = vst [vmem:[#allocation117_spill] sm:$0xff] %v9800_v33  ;;  %3906 = vmatpush.msra.mxu2 %v9794_v0  ;;  %v9806_v7 = vpop.eup %6356  ;;  %6366 = vpow2.f32 %v3379_v49  ;;  %v6502_v49 = vld [vmem:[%s6759_s7 + $0x188] sm:$0xff] }
 0x724   : > { %4012 = vmatpush.msra.mxu0 %v9800_v33  ;;  %12188 = vst [vmem:[#allocation214_spill] sm:$0xff] %v9806_v7  ;;  %5955 = vmatmul.lmr.bf16.vlgmr.msra.gmra.16.mxu2  ;;  %v9811_v19 = vpop.eup %6358  ;;  %6368 = vpow2.f32 %v3377_v57  ;;  %v6503_v57 = vld [vmem:[%s6759_s7 + $0x688] sm:$0xff]  ;;  %v6507_v33 = vld [vmem:[%s6759_s7 + $0x6d8] sm:$0xff] }
 0x725   : > { %5915 = vmatmul.lmr.bf16.gmra.16.mxu1  ;;  %6145 = vxpose.xlu1.b32.cont [8/16] %v6144_v36, 128  ;;  %12190 = vst [vmem:[#allocation217_spill] sm:$0xff] %v9811_v19  ;;  %v9814_v14 = vpop.eup %6360  ;;  %v6148_v62 = vpack.i.bf16 %v6503_v57, %v6502_v49  ;;  %v6152_v49 = vpack.i.bf16 %v6507_v33, %v6506_v2  ;;  %v6511_v33 = vld [vmem:[%s6759_s7 + $0x728] sm:$0xff] }
 0x726   : > { %4013 = vmatpush.msra.mxu0 %v9806_v7  ;;  %12191 = vst [vmem:[#allocation123_spill] sm:$0xff] %v9814_v14  ;;  %v9819_v47 = vpop.eup %6362  ;;  %v6513_v7 = vld [vmem:[%s6759_s7 + $0x750] sm:$0xff] }
 0x727   : > { %12192 = vst [vmem:[#allocation219_spill] sm:$0xff] %v9819_v47 }
 0x728   : > { %4014 = vmatpush.msra.mxu0 %v9811_v19  ;;  %v9822_v25 = vpop.eup %6364  ;;  %v9827_v26 = vpop.f32.mrf.mxu0 }
 0x729   : > { %5812 = vmatmul.lmr.bf16.gmra.16.mxu0  ;;  %12193 = vst [vmem:[#allocation126_spill] sm:$0xff] %v9822_v25  ;;  %v9825_v58 = vpop.eup %6366 }
 0x72a   : > { %4015 = vmatpush.msra.mxu0 %v9814_v14  ;;  %12194 = vst [vmem:[#allocation222_spill] sm:$0xff] %v9827_v26  ;;  %v9830_v36 = vpop.eup %6368  ;;  %v6522_v14 = vld [vmem:[%s6759_s7 + $0x680] sm:$0xff] }
 0x72c   : > { %4016 = vmatpush.msra.mxu0 %v9819_v47  ;;  %5956 = vmatmul.lmr.bf16.gmra.16.mxu2 }
 0x72d   : > { %5916 = vmatmul.lmr.bf16.gmra.16.mxu1  ;;  %6147 = vxpose.xlu1.b32.cont [9/16] %v6146_v5, 128  ;;  %v6504_v5 = vld [vmem:[%s6759_s7 + $0x1b0] sm:$0xff] }
 0x72e   : > { %4017 = vmatpush.msra.mxu0 %v9822_v25  ;;  %v6150_v26 = vpack.i.bf16 %v6505_v42, %v6504_v5  ;;  %v6530_v25 = vld [vmem:[%s6759_s7 + $0x540] sm:$0xff] }
 0x730   : > { %4018 = vmatpush.msra.mxu0 %v9825_v58  ;;  %v9835_v54 = vpop.f32.mrf.mxu0 }
 0x731   : > { %5813 = vmatmul.lmr.bf16.gmra.16.mxu0  ;;  %12195 = vst [vmem:[#allocation129_spill] sm:$0xff] %v9835_v54  ;;  %v6509_v54 = vld [vmem:[%s6759_s7 + $0x700] sm:$0xff] }
 0x732   : > { %4019 = vmatpush.msra.mxu0 %v9830_v36 }
 0x734   : > { %5957 = vmatmul.lmr.bf16.gmra.16.mxu2 }
 0x735   : > { %5917 = vmatmul.lmr.bf16.gmra.16.mxu1  ;;  %6149 = vxpose.xlu1.b32.cont [10/16] %v6148_v62, 128  ;;  %v6508_v62 = vld [vmem:[%s6759_s7 + $0x200] sm:$0xff] }
 0x736   : > { %v6154_v42 = vpack.i.bf16 %v6509_v54, %v6508_v62 }
 0x738   : > { %v9841_v57 = vpop.f32.mrf.mxu0 }
 0x739   : > { %5814 = vmatmul.lmr.bf16.gmra.16.mxu0  ;;  %12196 = vst [vmem:[#allocation225_spill] sm:$0xff] %v9841_v57  ;;  %v6512_v57 = vld [vmem:[%s6759_s7 + $0x250] sm:$0xff] }
 0x73a   : > { %v6158_v54 = vpack.i.bf16 %v6513_v7, %v6512_v57  ;;  %v9861_v57 = vpop.trf.xlu0 }
 0x73b   : > { %12202 = vst [vmem:[#allocation233_spill] sm:$0xff] %v9861_v57 }
 0x73c   : > { %5958 = vmatmul.lmr.bf16.gmra.16.mxu2 }
 0x73d   : > { %5918 = vmatmul.lmr.bf16.gmra.16.mxu1  ;;  %6151 = vxpose.xlu1.b32.cont [11/16] %v6150_v26, 128  ;;  %v6510_v26 = vld [vmem:[%s6759_s7 + $0x228] sm:$0xff] }
 0x73e   : > { %v6156_v2 = vpack.i.bf16 %v6511_v33, %v6510_v26 }
 0x740   : > { %v9845_v5 = vpop.f32.mrf.mxu0 }
 0x741   : > { %5815 = vmatmul.lmr.bf16.gmra.16.mxu0  ;;  %12197 = vst [vmem:[#allocation131_spill] sm:$0xff] %v9845_v5  ;;  %v6515_v5 = vld [vmem:[%s6759_s7 + $0x778] sm:$0xff] }
 0x744   : > { %5959 = vmatmul.lmr.bf16.gmra.16.mxu2 }
 0x745   : > { %5919 = vmatmul.lmr.bf16.gmra.16.mxu1  ;;  %6153 = vxpose.xlu1.b32.cont [12/16] %v6152_v49, 128 }
 0x748   : > { %v9849_v49 = vpop.f32.mrf.mxu0 }
 0x749   : > { %5816 = vmatmul.lmr.bf16.gmra.16.mxu0  ;;  %12198 = vst [vmem:[#allocation228_spill] sm:$0xff] %v9849_v49  ;;  %v6518_v49 = vld [vmem:[%s6759_s7 + $0x720] sm:$0xff] }
 0x74c   : > { %5960 = vmatmul.lmr.bf16.gmra.16.mxu2 }
 0x74d   : > { %5920 = vmatmul.lmr.bf16.gmra.16.mxu1  ;;  %6155 = vxpose.xlu1.b32.cont [13/16] %v6154_v42, 128  ;;  %v6514_v42 = vld [vmem:[%s6759_s7 + $0x278] sm:$0xff] }
 0x74e   : > { %v6160_v19 = vpack.i.bf16 %v6515_v5, %v6514_v42  ;;  %v6517_v42 = vld [vmem:[%s6759_s7 + $0x748] sm:$0xff] }
 0x750   : > { %v9853_v62 = vpop.f32.mrf.mxu0 }
 0x751   : > { %5817 = vmatmul.lmr.bf16.gmra.16.mxu0  ;;  %12199 = vst [vmem:[#allocation133_spill] sm:$0xff] %v9853_v62  ;;  %v6519_v62 = vld [vmem:[%s6759_s7 + $0x6f8] sm:$0xff] }
 0x754   : > { %5961 = vmatmul.lmr.bf16.gmra.16.mxu2 }
 0x755   : > { %5921 = vmatmul.lmr.bf16.gmra.16.mxu1  ;;  %6157 = vxpose.xlu1.b32.cont [14/16] %v6156_v2, 128  ;;  %v6516_v2 = vld [vmem:[%s6759_s7 + $0x770] sm:$0xff] }
 0x758   : > { %v9857_v26 = vpop.f32.mrf.mxu0 }
 0x759   : > { %5818 = vmatmul.lmr.bf16.gmra.16.mxu0  ;;  %12200 = vst [vmem:[#allocation231_spill] sm:$0xff] %v9857_v26  ;;  %v6520_v26 = vld [vmem:[%s6759_s7 + $0x6d0] sm:$0xff] }
 0x75c   : > { %5962 = vmatmul.lmr.bf16.gmra.16.mxu2 }
 0x75d   : > { %5922 = vmatmul.lmr.bf16.gmra.16.mxu1  ;;  %6159 = vxpose.xlu1.b32.cont [15/16] %v6158_v54, 128 }
 0x760   : > { %v9859_v7 = vpop.f32.mrf.mxu0 }
 0x761   : > { %5819 = vmatmul.lmr.bf16.gmra.16.mxu0  ;;  %12201 = vst [vmem:[#allocation135_spill] sm:$0xff] %v9859_v7 }
 0x764   : > { %5963 = vmatmul.lmr.bf16.gmra.16.mxu2 }
 0x765   : > { %5923 = vmatmul.lmr.bf16.gmra.16.mxu1  ;;  %6161 = vxpose.xlu1.b32.end [16/16] %v6160_v19, 128  ;;  %v9865_v19 = vpop.trf.xlu0 }
 0x766   : > { %12204 = vst [vmem:[#allocation56_spill] sm:$0xff] %v9865_v19 }
 0x768   : > { %v9863_v5 = vpop.f32.mrf.mxu0 }
 0x769   : > { %5820 = vmatmul.lmr.bf16.gmra.16.mxu0  ;;  %12203 = vst [vmem:[#allocation137_spill] sm:$0xff] %v9863_v5  ;;  %v6521_v5 = vld [vmem:[%s6759_s7 + $0x6a8] sm:$0xff] }
 0x76c   : > { %5964 = vmatmul.lmr.bf16.gmra.16.mxu2 }
 0x76d   : > { %5924 = vmatmul.lmr.bf16.gmra.16.mxu1  ;;  %v9870_v54 = vpop.trf.xlu0 }
 0x76e   : > { %12206 = vst [vmem:[#allocation172_spill] sm:$0xff] %v9870_v54 }
 0x771   : > { %5821 = vmatmul.lmr.bf16.gmra.16.mxu0 }
 0x774   : > { %5965 = vmatmul.lmr.bf16.gmra.16.mxu2 }
 0x775   : > { %5925 = vmatmul.lmr.bf16.gmra.16.mxu1 }
 0x779   : > { %5822 = vmatmul.lmr.bf16.gmra.16.mxu0 }
 0x77c   : > { %5966 = vmatmul.lmr.bf16.gmra.16.mxu2 }
 0x77d   : > { %5926 = vmatmul.lmr.bf16.gmra.16.mxu1 }
 0x781   : > { %5823 = vmatmul.lmr.bf16.gmra.16.mxu0 }
 0x784   : > { %5967 = vmatmul.lmr.bf16.gmra.16.mxu2 }
 0x785   : > { %5927 = vmatmul.lmr.bf16.gmra.16.mxu1 }
 0x786   : > { %v9867_v33 = vpop.f32.mrf.mxu0 }
 0x787   : > { %12205 = vst [vmem:[#allocation174_spill] sm:$0xff] %v9867_v33 }
 0x788   : > { %5840 = vllmr.16.mxu0 }
 0x78a   : > { %5857 = vmatpush.lsf.msrb.mxu0 %v6516_v2 }
 0x78c   : > { %5858 = vmatpush.lsf.msrb.mxu0 %v6517_v42  ;;  %5968 = vmatmul.lmr.bf16.gmra.16.mxu2 }
 0x78d   : > { %5928 = vmatmul.lmr.bf16.gmra.16.mxu1 }
 0x78e   : > { %5859 = vmatpush.lsf.msrb.mxu0 %v6518_v49  ;;  %v9876_v7 = vpop.f32.mrf.mxu0  ;;  %v9884_v49 = vpop.trf.xlu0 }
 0x78f   : > { %12207 = vst [vmem:[#allocation176_spill] sm:$0xff] %v9876_v7 }
 0x790   : > { %5860 = vmatpush.lsf.msrb.mxu0 %v6519_v62  ;;  %12210 = vst [vmem:[#allocation51_spill] sm:$0xff] %v9884_v49  ;;  %v6523_v62 = vld [vmem:[%s6759_s7 + $0x658] sm:$0xff] }
 0x791   : > { %v9878_v33 = vpop.trf.xlu1 }
 0x792   : > { %5861 = vmatpush.lsf.msrb.mxu0 %v6520_v26  ;;  %12208 = vst [vmem:[#allocation184_spill] sm:$0xff] %v9878_v33  ;;  %v9880_v2 = vpop.f32.mrf.mxu1  ;;  %v11568_v42 = vunpack.i.l.bf16 %v9878_v33  ;;  %v6524_v26 = vld [vmem:[%s6759_s7 + $0x630] sm:$0xff] }
 0x793   : > { %12209 = vst [vmem:[#allocation52_spill] sm:$0xff] %v9880_v2  ;;  %v6525_v2 = vld [vmem:[%s6759_s7 + $0x608] sm:$0xff] }
 0x794   : > { %5862 = vmatpush.lsf.msrb.mxu0 %v6521_v5  ;;  %5969 = vmatmul.lmr.bf16.gmra.16.mxu2 }
 0x795   : > { %3729 = vmatmul.f32.gmra.mxu0 %v11568_v42  ;;  %3842 = vmatmul.f32.gmra.mxu1 %v9861_v57  ;;  %v6526_v42 = vld [vmem:[%s6759_s7 + $0x5e0] sm:$0xff]  ;;  %v6529_v57 = vld [vmem:[%s6759_s7 + $0x568] sm:$0xff] }
 0x796   : > { %5863 = vmatpush.lsf.msrb.mxu0 %v6522_v14  ;;  %v9898_v47 = vpop.f32.mrf.mxu0 }
 0x797   : > { %12213 = vst [vmem:[#allocation246_spill] sm:$0xff] %v9898_v47 }
 0x798   : > { %5864 = vmatpush.lsf.msrb.mxu0 %v6523_v62  ;;  %v9903_v62 = vpop.trf.xlu0 }
 0x799   : > { %v9892_v5 = vpop.trf.xlu1  ;;  %12214 = vst [vmem:[#allocation245_spill] sm:$0xff] %v9903_v62 }
 0x79a   : > { %5865 = vmatpush.lsf.msrb.mxu0 %v6524_v26  ;;  %12211 = vst [vmem:[#allocation50_spill] sm:$0xff] %v9892_v5  ;;  %v9894_v7 = vpop.f32.mrf.mxu1  ;;  %v11570_v14 = vunpack.i.l.bf16 %v9892_v5  ;;  %v6527_v26 = vld [vmem:[%s6759_s7 + $0x5b8] sm:$0xff] }
 0x79b   : > { %12212 = vst [vmem:[#allocation49_spill] sm:$0xff] %v9894_v7  ;;  %v11573_v7 = vunpack.i.h.bf16 %v9878_v33 }
 0x79c   : > { %5866 = vmatpush.lsf.msrb.mxu0 %v6525_v2  ;;  %5970 = vmatmul.lmr.bf16.gmra.16.mxu2  ;;  %v6528_v2 = vld [vmem:[%s6759_s7 + $0x590] sm:$0xff] }
 0x79d   : > { %3732 = vmatmul.f32.gmra.mxu0 %v11570_v14  ;;  %3845 = vmatmul.f32.gmra.mxu1 %v9865_v19  ;;  %v6533_v19 = vld [vmem:[%s6759_s7 + $0x9c8] sm:$0xff] }
 0x79e   : > { %5867 = vmatpush.lsf.msrb.mxu0 %v6526_v42 }
 0x7a0   : > { %5868 = vmatpush.lsf.msrb.mxu0 %v6527_v26  ;;  %v9920_v26 = vpop.f32.mrf.mxu0 }
 0x7a1   : > { %v9909_v47 = vpop.trf.xlu1  ;;  %12217 = vst [vmem:[#allocation45_spill] sm:$0xff] %v9920_v26  ;;  %v6534_v26 = vld [vmem:[%s6759_s7 + $0x9a0] sm:$0xff] }
 0x7a2   : > { %5869 = vmatpush.lsf.msrb.mxu0 %v6528_v2  ;;  %12215 = vst [vmem:[#allocation8_spill] sm:$0xff] %v9909_v47  ;;  %v9911_v42 = vpop.f32.mrf.mxu1  ;;  %v11576_v14 = vunpack.i.l.bf16 %v9909_v47  ;;  %v6531_v2 = vld [vmem:[%s6759_s7 + $0x518] sm:$0xff] }
 0x7a3   : > { %12216 = vst [vmem:[#allocation46_spill] sm:$0xff] %v9911_v42  ;;  %5987 = vllmr.16.mxu2  ;;  %v6532_v42 = vld [vmem:[%s6759_s7 + $0x9f0] sm:$0xff] }
 0x7a4   : > { %5870 = vmatpush.lsf.msrb.mxu0 %v6529_v57  ;;  %3955 = vmatmul.f32.gmra.mxu2 %v11573_v7  ;;  %v9924_v57 = vpop.trf.xlu0 }
 0x7a5   : > { %3735 = vmatmul.f32.gmra.mxu0 %v11576_v14  ;;  %3848 = vmatmul.f32.gmra.mxu1 %v9870_v54  ;;  %12218 = vst [vmem:[#allocation242_spill] sm:$0xff] %v9924_v57 }
 0x7a6   : > { %5871 = vmatpush.lsf.msrb.mxu0 %v6530_v25  ;;  %6004 = vmatpush.lsf.msrb.mxu2 %v6532_v42  ;;  %v11578_v25 = vunpack.i.h.bf16 %v9892_v5  ;;  %v6535_v42 = vld [vmem:[%s6759_s7 + $0x978] sm:$0xff]  ;;  %v6537_v5 = vld [vmem:[%s6759_s7 + $0x928] sm:$0xff] }
 0x7a8   : > { %5872 = vmatpush.lsf.msrb.mxu0 %v6531_v2  ;;  %6005 = vmatpush.lsf.msrb.mxu2 %v6533_v19  ;;  %v9941_v19 = vpop.f32.mrf.mxu0  ;;  %v6536_v2 = vld [vmem:[%s6759_s7 + $0x950] sm:$0xff] }
 0x7a9   : > { %v9929_v7 = vpop.trf.xlu1  ;;  %12221 = vst [vmem:[#allocation41_spill] sm:$0xff] %v9941_v19 }
 0x7aa   : > { %12219 = vst [vmem:[#allocation241_spill] sm:$0xff] %v9929_v7  ;;  %v9931_v33 = vpop.f32.mrf.mxu1  ;;  %v11581_v14 = vunpack.i.l.bf16 %v9929_v7  ;;  %6006 = vmatpush.lsf.msrb.mxu2 %v6534_v26  ;;  %v11590_v19 = vunpack.i.h.bf16 %v9929_v7 }
 0x7ab   : > { %12220 = vst [vmem:[#allocation42_spill] sm:$0xff] %v9931_v33  ;;  %v11583_v33 = vunpack.i.h.bf16 %v9909_v47 }
 0x7ac   : > { %3958 = vmatmul.f32.gmra.mxu2 %v11578_v25  ;;  %v9945_v26 = vpop.trf.xlu0 }
 0x7ad   : > { %3738 = vmatmul.f32.gmra.mxu0 %v11581_v14  ;;  %3851 = vmatmul.f32.gmra.mxu1 %v9884_v49  ;;  %12222 = vst [vmem:[#allocation40_spill] sm:$0xff] %v9945_v26 }
 0x7ae   : > { %6007 = vmatpush.lsf.msrb.mxu2 %v6535_v42  ;;  %v6538_v42 = vld [vmem:[%s6759_s7 + $0x900] sm:$0xff] }
 0x7b0   : > { %6008 = vmatpush.lsf.msrb.mxu2 %v6536_v2  ;;  %v6539_v2 = vld [vmem:[%s6759_s7 + $0x8d8] sm:$0xff] }
 0x7b1   : > { %v9947_v54 = vpop.trf.xlu1 }
 0x7b2   : > { %12223 = vst [vmem:[#allocation238_spill] sm:$0xff] %v9947_v54  ;;  %v9949_v25 = vpop.f32.mrf.mxu1  ;;  %6009 = vmatpush.lsf.msrb.mxu2 %v6537_v5  ;;  %v11584_v14 = vunpack.i.l.bf16 %v9947_v54  ;;  %v9961_v5 = vpop.f32.mrf.mxu0 }
 0x7b3   : > { %12224 = vst [vmem:[#allocation58_spill] sm:$0xff] %v9949_v25  ;;  %v6540_v25 = vld [vmem:[%s6759_s7 + $0x8b0] sm:$0xff] }
 0x7b4   : > { %6010 = vmatpush.lsf.msrb.mxu2 %v6538_v42  ;;  %12225 = vst [vmem:[#allocation55_spill] sm:$0xff] %v9961_v5 }
 0x7b5   : > { %3961 = vmatmul.f32.gmra.mxu2 %v11583_v33  ;;  %3741 = vmatmul.f32.gmra.mxu0 %v11584_v14  ;;  %v6541_v33 = vld [vmem:[%s6759_s7 + $0x888] sm:$0xff] }
 0x7b6   : > { %3854 = vmatmul.f32.gmra.mxu1 %v9903_v62  ;;  %6011 = vmatpush.lsf.msrb.mxu2 %v6539_v2  ;;  %v9970_v62 = vpop.trf.xlu0  ;;  %v6542_v2 = vld [vmem:[%s6759_s7 + $0x860] sm:$0xff] }
 0x7b7   : > { %12228 = vst [vmem:[#allocation53_spill] sm:$0xff] %v9970_v62 }
 0x7b8   : > { %6012 = vmatpush.lsf.msrb.mxu2 %v6540_v25  ;;  %v6543_v25 = vld [vmem:[%s6759_s7 + $0x838] sm:$0xff] }
 0x7b9   : > { %v9964_v42 = vpop.trf.xlu1 }
 0x7ba   : > { %12226 = vst [vmem:[#allocation169_spill] sm:$0xff] %v9964_v42  ;;  %v9966_v49 = vpop.f32.mrf.mxu1  ;;  %6013 = vmatpush.lsf.msrb.mxu2 %v6541_v33  ;;  %v11591_v14 = vunpack.i.l.bf16 %v9964_v42  ;;  %v11593_v33 = vunpack.i.h.bf16 %v9947_v54  ;;  %v9986_v7 = vpop.f32.mrf.mxu0 }
 0x7bb   : > { %12227 = vst [vmem:[#allocation54_spill] sm:$0xff] %v9966_v49  ;;  %v6544_v49 = vld [vmem:[%s6759_s7 + $0x810] sm:$0xff]  ;;  %v10019_v54 = vpop.f32.mrf.mxu2 }
 0x7bc   : > { %6014 = vmatpush.lsf.msrb.mxu2 %v6542_v2  ;;  %v6545_v2 = vld [vmem:[%s6759_s7 + $0x7e8] sm:$0xff]  ;;  %12231 = vst [vmem:[#allocation67_spill] sm:$0xff] %v9986_v7 }
 0x7bd   : > { %3964 = vmatmul.f32.gmra.mxu2 %v11590_v19  ;;  %3744 = vmatmul.f32.gmra.mxu0 %v11591_v14  ;;  %v6546_v14 = vld [vmem:[%s6759_s7 + $0x7c0] sm:$0xff]  ;;  %12239 = vst [vmem:[#allocation250_spill] sm:$0xff] %v10019_v54 }
 0x7be   : > { %3857 = vmatmul.f32.gmra.mxu1 %v9924_v57  ;;  %6015 = vmatpush.lsf.msrb.mxu2 %v6543_v25  ;;  %v6547_v25 = vld [vmem:[%s6759_s7 + $0x798] sm:$0xff] }
 0x7c0   : > { %6016 = vmatpush.lsf.msrb.mxu2 %v6544_v49  ;;  %v9994_v49 = vpop.trf.xlu0 }
 0x7c1   : > { %v9981_v5 = vpop.trf.xlu1  ;;  %12232 = vst [vmem:[#allocation182_spill] sm:$0xff] %v9994_v49 }
 0x7c2   : > { %12229 = vst [vmem:[#allocation178_spill] sm:$0xff] %v9981_v5  ;;  %v9983_v47 = vpop.f32.mrf.mxu1  ;;  %6017 = vmatpush.lsf.msrb.mxu2 %v6545_v2  ;;  %v11594_v19 = vunpack.i.l.bf16 %v9981_v5  ;;  %v11598_v2 = vunpack.i.h.bf16 %v9964_v42  ;;  %v10004_v57 = vpop.f32.mrf.mxu0 }
 0x7c3   : > { %12230 = vst [vmem:[#allocation60_spill] sm:$0xff] %v9983_v47 }
 0x7c4   : > { %6018 = vmatpush.lsf.msrb.mxu2 %v6546_v14  ;;  %12235 = vst [vmem:[#allocation62_spill] sm:$0xff] %v10004_v57 }
 0x7c5   : > { %3967 = vmatmul.f32.gmra.mxu2 %v11593_v33  ;;  %3747 = vmatmul.f32.gmra.mxu0 %v11594_v19 }
 0x7c6   : > { %3860 = vmatmul.f32.gmra.mxu1 %v9945_v26  ;;  %6019 = vmatpush.lsf.msrb.mxu2 %v6547_v25  ;;  %v11601_v25 = vunpack.i.h.bf16 %v9981_v5 }
 0x7c8   : > { %v10011_v33 = vpop.trf.xlu0 }
 0x7c9   : > { %v9999_v47 = vpop.trf.xlu1  ;;  %12236 = vst [vmem:[#allocation247_spill] sm:$0xff] %v10011_v33 }
 0x7ca   : > { %12233 = vst [vmem:[#allocation64_spill] sm:$0xff] %v9999_v47  ;;  %v10001_v7 = vpop.f32.mrf.mxu1  ;;  %v11599_v14 = vunpack.i.l.bf16 %v9999_v47 }
 0x7cb   : > { %12234 = vst [vmem:[#allocation180_spill] sm:$0xff] %v10001_v7 }
 0x7cd   : > { %3970 = vmatmul.f32.gmra.mxu2 %v11598_v2  ;;  %3750 = vmatmul.f32.gmra.mxu0 %v11599_v14  ;;  %v10026_v2 = vpop.f32.mrf.mxu0  ;;  %v11608_v14 = vunpack.i.h.bf16 %v9999_v47 }
 0x7ce   : > { %3863 = vmatmul.f32.gmra.mxu1 %v9970_v62  ;;  %12240 = vst [vmem:[#allocation251_spill] sm:$0xff] %v10026_v2 }
 0x7d0   : > { %v10029_v57 = vpop.trf.xlu0 }
 0x7d1   : > { %v10014_v19 = vpop.trf.xlu1  ;;  %12241 = vst [vmem:[#allocation252_spill] sm:$0xff] %v10029_v57 }
 0x7d2   : > { %12237 = vst [vmem:[#allocation248_spill] sm:$0xff] %v10014_v19  ;;  %v10016_v26 = vpop.f32.mrf.mxu1  ;;  %v11602_v7 = vunpack.i.l.bf16 %v10014_v19  ;;  %v11611_v2 = vunpack.i.h.bf16 %v10014_v19 }
 0x7d3   : > { %12238 = vst [vmem:[#allocation249_spill] sm:$0xff] %v10016_v26 }
 0x7d5   : > { %3973 = vmatmul.f32.gmra.mxu2 %v11601_v25  ;;  %3753 = vmatmul.f32.gmra.mxu0 %v11602_v7  ;;  %v10041_v25 = vpop.f32.mrf.mxu2  ;;  %v10043_v7 = vpop.f32.mrf.mxu0 }
 0x7d6   : > { %3866 = vmatmul.f32.gmra.mxu1 %v9994_v49  ;;  %12244 = vst [vmem:[#allocation255_spill] sm:$0xff] %v10041_v25 }
 0x7d7   : > { %12245 = vst [vmem:[#allocation256_spill] sm:$0xff] %v10043_v7 }
 0x7d8   : > { %v10051_v42 = vpop.trf.xlu0 }
 0x7d9   : > { %v10031_v62 = vpop.trf.xlu1  ;;  %12248 = vst [vmem:[#allocation259_spill] sm:$0xff] %v10051_v42 }
 0x7da   : > { %12242 = vst [vmem:[#allocation253_spill] sm:$0xff] %v10031_v62  ;;  %v10033_v26 = vpop.f32.mrf.mxu1  ;;  %v11609_v54 = vunpack.i.l.bf16 %v10031_v62 }
 0x7db   : > { %12243 = vst [vmem:[#allocation254_spill] sm:$0xff] %v10033_v26 }
 0x7dd   : > { %3976 = vmatmul.f32.gmra.mxu2 %v11608_v14  ;;  %3756 = vmatmul.f32.gmra.mxu0 %v11609_v54  ;;  %v10058_v14 = vpop.f32.mrf.mxu2  ;;  %v11616_v54 = vunpack.i.h.bf16 %v10031_v62 }
 0x7de   : > { %3869 = vmatmul.f32.gmra.mxu1 %v10011_v33  ;;  %12249 = vst [vmem:[#allocation260_spill] sm:$0xff] %v10058_v14 }
 0x7e1   : > { %v10046_v49 = vpop.trf.xlu1 }
 0x7e2   : > { %12246 = vst [vmem:[#allocation257_spill] sm:$0xff] %v10046_v49  ;;  %v10048_v5 = vpop.f32.mrf.mxu1  ;;  %v11612_v26 = vunpack.i.l.bf16 %v10046_v49 }
 0x7e3   : > { %12247 = vst [vmem:[#allocation258_spill] sm:$0xff] %v10048_v5  ;;  %v10065_v5 = vpop.f32.mrf.mxu0 }
 0x7e4   : > { %12252 = vst [vmem:[#allocation263_spill] sm:$0xff] %v10065_v5 }
 0x7e5   : > { %3979 = vmatmul.f32.gmra.mxu2 %v11611_v2  ;;  %3759 = vmatmul.f32.gmra.mxu0 %v11612_v26  ;;  %v10072_v2 = vpop.trf.xlu0  ;;  %v11618_v26 = vunpack.i.h.bf16 %v10046_v49  ;;  %v10081_v5 = vpop.f32.mrf.mxu2 }
 0x7e6   : > { %3872 = vmatmul.f32.gmra.mxu1 %v10029_v57  ;;  %12253 = vst [vmem:[#allocation264_spill] sm:$0xff] %v10072_v2 }
 0x7e7   : > { %12256 = vst [vmem:[#allocation267_spill] sm:$0xff] %v10081_v5 }
 0x7e9   : > { %v10061_v25 = vpop.trf.xlu1 }
 0x7ea   : > { %12250 = vst [vmem:[#allocation261_spill] sm:$0xff] %v10061_v25  ;;  %v10063_v7 = vpop.f32.mrf.mxu1  ;;  %v11617_v33 = vunpack.i.l.bf16 %v10061_v25 }
 0x7eb   : > { %12251 = vst [vmem:[#allocation262_spill] sm:$0xff] %v10063_v7  ;;  %v10083_v19 = vpop.f32.mrf.mxu0 }
 0x7ec   : > { %12257 = vst [vmem:[#allocation268_spill] sm:$0xff] %v10083_v19 }
 0x7ed   : > { %3982 = vmatmul.f32.gmra.mxu2 %v11616_v54  ;;  %3762 = vmatmul.f32.gmra.mxu0 %v11617_v33  ;;  %v10089_v54 = vld [vmem:[#allocation4 + $0x1b0] sm:$0xf]  ;;  %v10092_v33 = vpop.trf.xlu0 }
 0x7ee   : > { %3875 = vmatmul.f32.gmra.mxu1 %v10051_v42  ;;  %12258 = vst [vmem:[#allocation269_spill] sm:$0xff] %v10092_v33 }
 0x7ef   : > { %5668 = vmatpush.msk.msra.mxu1 %vm4373_vm2, %v10089_v54 }
 0x7f1   : > { %v10076_v14 = vpop.trf.xlu1 }
 0x7f2   : > { %12254 = vst [vmem:[#allocation265_spill] sm:$0xff] %v10076_v14  ;;  %v10078_v57 = vpop.f32.mrf.mxu1  ;;  %v11619_v7 = vunpack.i.l.bf16 %v10076_v14  ;;  %v11633_v42 = vunpack.i.h.bf16 %v10076_v14 }
 0x7f3   : > { %12255 = vst [vmem:[#allocation266_spill] sm:$0xff] %v10078_v57  ;;  %v11628_v57 = vunpack.i.h.bf16 %v10061_v25 }
 0x7f5   : > { %3985 = vmatmul.f32.gmra.mxu2 %v11618_v26  ;;  %3765 = vmatmul.f32.gmra.mxu0 %v11619_v7  ;;  %v10106_v7 = vpop.f32.mrf.mxu2  ;;  %v10112_v49 = vpop.trf.xlu0 }
 0x7f6   : > { %3878 = vmatmul.f32.gmra.mxu1 %v10072_v2  ;;  %12261 = vst [vmem:[#allocation272_spill] sm:$0xff] %v10106_v7  ;;  %v10109_v2 = vpop.f32.mrf.mxu0 }
 0x7f7   : > { %12262 = vst [vmem:[#allocation273_spill] sm:$0xff] %v10109_v2 }
 0x7f9   : > { %v10097_v5 = vpop.trf.xlu1 }
 0x7fa   : > { %12259 = vst [vmem:[#allocation270_spill] sm:$0xff] %v10097_v5  ;;  %v10099_v19 = vpop.f32.mrf.mxu1  ;;  %v11629_v26 = vunpack.i.l.bf16 %v10097_v5  ;;  %v11635_v2 = vunpack.i.h.bf16 %v10097_v5 }
 0x7fb   : > { %12260 = vst [vmem:[#allocation271_spill] sm:$0xff] %v10099_v19 }
 0x7fd   : > { %3988 = vmatmul.f32.gmra.mxu2 %v11628_v57  ;;  %3768 = vmatmul.f32.gmra.mxu0 %v11629_v26  ;;  %v10124_v57 = vpop.f32.mrf.mxu2  ;;  %v10134_v47 = vpop.trf.xlu0 }
 0x7fe   : > { %3881 = vmatmul.f32.gmra.mxu1 %v10092_v33  ;;  %12265 = vst [vmem:[#allocation276_spill] sm:$0xff] %v10124_v57  ;;  %v10126_v26 = vpop.f32.mrf.mxu0 }
 0x7ff   : > { %12266 = vst [vmem:[#allocation277_spill] sm:$0xff] %v10126_v26 }
 0x800   : > { %12269 = vst [vmem:[#allocation280_spill] sm:$0xff] %v10134_v47 }
 0x801   : > { %v10114_v62 = vpop.trf.xlu1 }
 0x802   : > { %12263 = vst [vmem:[#allocation274_spill] sm:$0xff] %v10114_v62  ;;  %v10116_v19 = vpop.f32.mrf.mxu1  ;;  %v11634_v25 = vunpack.i.l.bf16 %v10114_v62 }
 0x803   : > { %12264 = vst [vmem:[#allocation275_spill] sm:$0xff] %v10116_v19 }
 0x805   : > { %3991 = vmatmul.f32.gmra.mxu2 %v11633_v42  ;;  %3771 = vmatmul.f32.gmra.mxu0 %v11634_v25  ;;  %v11638_v42 = vunpack.i.h.bf16 %v10114_v62  ;;  %v10142_v25 = vpop.f32.mrf.mxu2 }
 0x806   : > { %3884 = vmatmul.f32.gmra.mxu1 %v10112_v49  ;;  %12270 = vst [vmem:[#allocation281_spill] sm:$0xff] %v10142_v25  ;;  %v10144_v26 = vpop.f32.mrf.mxu0  ;;  %v12342_v25 = vld [vmem:[#allocation69_spill] sm:$0xff] }
 0x807   : > { %12271 = vst [vmem:[#allocation282_spill] sm:$0xff] %v10144_v26 }
 0x809   : > { %v10129_v7 = vpop.trf.xlu1 }
 0x80a   : > { %12267 = vst [vmem:[#allocation278_spill] sm:$0xff] %v10129_v7  ;;  %v10131_v33 = vpop.f32.mrf.mxu1  ;;  %v11636_v19 = vunpack.i.l.bf16 %v10129_v7 }
 0x80b   : > { %12268 = vst [vmem:[#allocation279_spill] sm:$0xff] %v10131_v33 }
 0x80d   : > { %3994 = vmatmul.f32.gmra.mxu2 %v11635_v2  ;;  %3774 = vmatmul.f32.gmra.mxu0 %v11636_v19  ;;  %v11639_v2 = vunpack.i.h.bf16 %v10129_v7  ;;  %v10155_v33 = vpop.f32.mrf.mxu2 }
 0x80e   : > { %3887 = vmatmul.f32.gmra.mxu1 %v10134_v47  ;;  %12274 = vst [vmem:[#allocation285_spill] sm:$0xff] %v10155_v33  ;;  %v10157_v47 = vpop.f32.mrf.mxu0  ;;  %v12338_v33 = vld [vmem:[#allocation72_spill] sm:$0xff] }
 0x80f   : > { %12275 = vst [vmem:[#allocation286_spill] sm:$0xff] %v10157_v47 }
 0x812   : > { %v10146_v57 = vpop.f32.mrf.mxu1 }
 0x813   : > { %12272 = vst [vmem:[#allocation283_spill] sm:$0xff] %v10146_v57 }
 0x815   : > { %3997 = vmatmul.f32.gmra.mxu2 %v11638_v42  ;;  %5841 = vmatmul.lmr.bf16.vlgmr.msra.gmra.16.mxu0 }
 0x816   : > { %5669 = vmatmul.msk.f32.vlgmr.msra.gmra.mxu1 %vm3083_vm1, %v9633_v63  ;;  %v10167_v63 = vpop.f32.mrf.mxu0 }
 0x817   : > { %12277 = vst [vmem:[#allocation288_spill] sm:$0xff] %v10167_v63  ;;  %v12334_v63 = vld [vmem:[#allocation75_spill] sm:$0xff] }
 0x81a   : > { %v10153_v19 = vpop.f32.mrf.mxu1 }
 0x81b   : > { %12273 = vst [vmem:[#allocation284_spill] sm:$0xff] %v10153_v19 }
 0x81d   : > { %4000 = vmatmul.f32.gmra.mxu2 %v11639_v2  ;;  %5842 = vmatmul.lmr.bf16.gmra.16.mxu0 }
 0x81e   : > { %5670 = vmatmul.msk.f32.gmra.mxu1 %vm3083_vm1, %v9621_v28  ;;  %v10173_v57 = vpop.f32.mrf.mxu0 }
 0x81f   : > { %12279 = vst [vmem:[#allocation290_spill] sm:$0xff] %v10173_v57 }
 0x822   : > { %v10163_v42 = vpop.f32.mrf.mxu1 }
 0x823   : > { %12276 = vst [vmem:[#allocation287_spill] sm:$0xff] %v10163_v42 }
 0x825   : > { %5843 = vmatmul.lmr.bf16.gmra.16.mxu0 }
 0x826   : > { %5671 = vmatmul.msk.f32.gmra.mxu1 %vm3083_vm1, %v9611_v44  ;;  %v10179_v28 = vpop.f32.mrf.mxu0 }
 0x827   : > { %12281 = vst [vmem:[#allocation292_spill] sm:$0xff] %v10179_v28  ;;  %v12332_v28 = vld [vmem:[#allocation165_spill] sm:$0xff] }
 0x82a   : > { %v10169_v19 = vpop.f32.mrf.mxu1 }
 0x82b   : > { %12278 = vst [vmem:[#allocation289_spill] sm:$0xff] %v10169_v19 }
 0x82d   : > { %5844 = vmatmul.lmr.bf16.gmra.16.mxu0 }
 0x82e   : > { %5672 = vmatmul.msk.f32.gmra.mxu1 %vm3083_vm1, %v9599_v9  ;;  %v10187_v19 = vpop.f32.mrf.mxu0 }
 0x82f   : > { %12284 = vst [vmem:[#allocation295_spill] sm:$0xff] %v10187_v19  ;;  %v12330_v19 = vld [vmem:[#allocation167_spill] sm:$0xff] }
 0x833   : > { %v10175_v2 = vpop.f32.mrf.mxu1 }
 0x834   : > { %12280 = vst [vmem:[#allocation291_spill] sm:$0xff] %v10175_v2 }
 0x835   : > { %5845 = vmatmul.lmr.bf16.gmra.16.mxu0 }
 0x836   : > { %5673 = vmatmul.msk.f32.gmra.mxu1 %vm3083_vm1, %v9589_v39  ;;  %v10195_v39 = vpop.f32.mrf.mxu0 }
 0x837   : > { %12286 = vst [vmem:[#allocation297_spill] sm:$0xff] %v10195_v39  ;;  %v12329_v39 = vld [vmem:[#allocation230_spill] sm:$0xff] }
 0x83b   : > { %v10181_v42 = vpop.f32.mrf.mxu1 }
 0x83c   : > { %12282 = vst [vmem:[#allocation293_spill] sm:$0xff] %v10181_v42 }
 0x83d   : > { %5846 = vmatmul.lmr.bf16.gmra.16.mxu0 }
 0x83e   : > { %5674 = vmatmul.msk.f32.gmra.mxu1 %vm3083_vm1, %v9577_v22  ;;  %v10201_v22 = vpop.f32.mrf.mxu0 }
 0x83f   : > { %12288 = vst [vmem:[#allocation299_spill] sm:$0xff] %v10201_v22 }
 0x843   : > { %v10185_v44 = vpop.f32.mrf.mxu1 }
 0x844   : > { %12283 = vst [vmem:[#allocation294_spill] sm:$0xff] %v10185_v44 }
 0x845   : > { %5847 = vmatmul.lmr.bf16.gmra.16.mxu0 }
 0x846   : > { %5675 = vmatmul.msk.f32.gmra.mxu1 %vm3083_vm1, %v9567_v24  ;;  %v10207_v24 = vpop.f32.mrf.mxu0 }
 0x847   : > { %12290 = vst [vmem:[#allocation301_spill] sm:$0xff] %v10207_v24 }
 0x84b   : > { %v10191_v9 = vpop.f32.mrf.mxu1 }
 0x84c   : > { %12285 = vst [vmem:[#allocation296_spill] sm:$0xff] %v10191_v9 }
 0x84d   : > { %5848 = vmatmul.lmr.bf16.gmra.16.mxu0 }
 0x84e   : > { %5676 = vmatmul.msk.f32.gmra.mxu1 %vm3083_vm1, %v9558_v34 }
 0x853   : > { %v10197_v42 = vpop.f32.mrf.mxu1 }
 0x854   : > { %12287 = vst [vmem:[#allocation298_spill] sm:$0xff] %v10197_v42  ;;  %v10215_v42 = vpop.f32.mrf.mxu0 }
 0x855   : > { %5849 = vmatmul.lmr.bf16.gmra.16.mxu0  ;;  %12293 = vst [vmem:[#allocation304_spill] sm:$0xff] %v10215_v42 }
 0x856   : > { %5677 = vmatmul.msk.f32.gmra.mxu1 %vm3083_vm1, %v9552_v51 }
 0x85b   : > { %v10203_v44 = vpop.f32.mrf.mxu1 }
 0x85c   : > { %12289 = vst [vmem:[#allocation300_spill] sm:$0xff] %v10203_v44 }
 0x85d   : > { %5850 = vmatmul.lmr.bf16.gmra.16.mxu0 }
 0x85e   : > { %5678 = vmatmul.msk.f32.gmra.mxu1 %vm3083_vm1, %v9541_v56  ;;  %v10223_v56 = vpop.f32.mrf.mxu0 }
 0x85f   : > { %12295 = vst [vmem:[#allocation306_spill] sm:$0xff] %v10223_v56 }
 0x863   : > { %v10209_v9 = vpop.f32.mrf.mxu1 }
 0x864   : > { %12291 = vst [vmem:[#allocation302_spill] sm:$0xff] %v10209_v9  ;;  %v10225_v9 = vpop.trf.xlu2 }
 0x865   : > { %5851 = vmatmul.lmr.bf16.gmra.16.mxu0  ;;  %12296 = vst [vmem:[#allocation307_spill] sm:$0xff] %v10225_v9 }
 0x866   : > { %5679 = vmatmul.msk.f32.gmra.mxu1 %vm3083_vm1, %v9534_v61 }
 0x86b   : > { %v10213_v34 = vpop.f32.mrf.mxu1 }
 0x86c   : > { %12292 = vst [vmem:[#allocation303_spill] sm:$0xff] %v10213_v34  ;;  %v10231_v61 = vpop.trf.xlu2  ;;  %v10233_v34 = vpop.f32.mrf.mxu0 }
 0x86d   : > { %5852 = vmatmul.lmr.bf16.gmra.16.mxu0  ;;  %12298 = vst [vmem:[#allocation309_spill] sm:$0xff] %v10231_v61 }
 0x86e   : > { %5680 = vmatmul.msk.f32.gmra.mxu1 %vm3083_vm1, %v9527_v29  ;;  %12299 = vst [vmem:[#allocation310_spill] sm:$0xff] %v10233_v34 }
 0x873   : > { %v10219_v51 = vpop.f32.mrf.mxu1 }
 0x874   : > { %12294 = vst [vmem:[#allocation305_spill] sm:$0xff] %v10219_v51  ;;  %v10241_v51 = vpop.f32.mrf.mxu0 }
 0x875   : > { %5853 = vmatmul.lmr.bf16.gmra.16.mxu0  ;;  %12302 = vst [vmem:[#allocation313_spill] sm:$0xff] %v10241_v51 }
 0x876   : > { %5681 = vmatmul.msk.f32.gmra.mxu1 %vm3083_vm1, %v9518_v38  ;;  %v10239_v38 = vpop.trf.xlu2 }
 0x877   : > { %12301 = vst [vmem:[#allocation312_spill] sm:$0xff] %v10239_v38 }
 0x87b   : > { %v10227_v44 = vpop.f32.mrf.mxu1 }
 0x87c   : > { %12297 = vst [vmem:[#allocation308_spill] sm:$0xff] %v10227_v44 }
 0x87d   : > { %5854 = vmatmul.lmr.bf16.gmra.16.mxu0 }
 0x87e   : > { %5682 = vmatmul.msk.f32.gmra.mxu1 %vm3083_vm1, %v9509_v35  ;;  %v10247_v35 = vpop.trf.xlu2 }
 0x87f   : > { %12304 = vst [vmem:[#allocation315_spill] sm:$0xff] %v10247_v35 }
 0x883   : > { %v10235_v29 = vpop.f32.mrf.mxu1 }
 0x884   : > { %12300 = vst [vmem:[#allocation311_spill] sm:$0xff] %v10235_v29  ;;  %v10251_v29 = vpop.f32.mrf.mxu0 }
 0x885   : > { %5855 = vmatmul.lmr.bf16.gmra.16.mxu0  ;;  %12305 = vst [vmem:[#allocation316_spill] sm:$0xff] %v10251_v29 }
 0x886   : > { %5683 = vmatmul.msk.f32.gmra.mxu1 %vm3083_vm1, %v9502_v10  ;;  %v10258_v51 = vpop.trf.xlu2 }
 0x887   : > { %12306 = vst [vmem:[#allocation317_spill] sm:$0xff] %v10258_v51 }
 0x88b   : > { %v10243_v56 = vpop.f32.mrf.mxu1 }
 0x88c   : > { %12303 = vst [vmem:[#allocation314_spill] sm:$0xff] %v10243_v56 }
 0x88d   : > { %5856 = vmatmul.lmr.bf16.gmra.16.mxu0 }
 0x88e   : > { %5684 = vmatmul.msk.f32.gmra.mxu1 %vm3083_vm1, %v9495_v32  ;;  %v10263_v32 = vpop.f32.mrf.mxu0  ;;  %v10270_v29 = vpop.trf.xlu2 }
 0x88f   : > { %12307 = vst [vmem:[#allocation318_spill] sm:$0xff] %v10263_v32 }
 0x890   : > { %12308 = vst [vmem:[#allocation319_spill] sm:$0xff] %v10270_v29 }
 0x893   : > { %v10249_v44 = vpop.f32.mrf.mxu1 }
 0x894   : > { %5873 = vllmr.16.mxu0 }
 0x895   : > { %4068 = vmatmul.f32.gmra.mxu0 %v10225_v9 }
 0x896   : > { %5685 = vmatmul.msk.f32.gmra.mxu1 %vm3083_vm1, %v9722_v15  ;;  %v10272_v15 = vpop.f32.mrf.mxu0 }
 0x897   : > { %12309 = vst [vmem:[#allocation320_spill] sm:$0xff] %v10272_v15 }
 0x89b   : > { %v10256_v10 = vpop.f32.mrf.mxu1 }
 0x89d   : > { %4071 = vmatmul.f32.gmra.mxu0 %v10231_v61 }
 0x89e   : > { %5686 = vmatmul.msk.f32.gmra.mxu1 %vm3083_vm1, %v9708_v55  ;;  %v10279_v55 = vpop.trf.xlu2  ;;  %v10281_v32 = vpop.f32.mrf.mxu0 }
 0x89f   : > { %12310 = vst [vmem:[#allocation321_spill] sm:$0xff] %v10279_v55 }
 0x8a0   : > { %12311 = vst [vmem:[#allocation322_spill] sm:$0xff] %v10281_v32 }
 0x8a3   : > { %v10265_v56 = vpop.f32.mrf.mxu1 }
 0x8a5   : > { %4074 = vmatmul.f32.gmra.mxu0 %v10239_v38 }
 0x8a6   : > { %5687 = vmatmul.msk.f32.gmra.mxu1 %vm3083_vm1, %v9698_v27  ;;  %v10288_v27 = vpop.trf.xlu2  ;;  %v10292_v38 = vpop.f32.mrf.mxu0 }
 0x8a7   : > { %12312 = vst [vmem:[#allocation323_spill] sm:$0xff] %v10288_v27 }
 0x8a8   : > { %12313 = vst [vmem:[#allocation324_spill] sm:$0xff] %v10292_v38 }
 0x8ab   : > { %v10274_v34 = vpop.f32.mrf.mxu1 }
 0x8ad   : > { %4077 = vmatmul.f32.gmra.mxu0 %v10247_v35 }
 0x8ae   : > { %5688 = vmatmul.msk.f32.gmra.mxu1 %vm3083_vm1, %v9688_v43  ;;  %v10299_v32 = vpop.trf.xlu2 }
 0x8af   : > { %12314 = vst [vmem:[#allocation325_spill] sm:$0xff] %v10299_v32 }
 0x8b3   : > { %v10283_v42 = vpop.f32.mrf.mxu1 }
 0x8b5   : > { %4080 = vmatmul.f32.gmra.mxu0 %v10258_v51 }
 0x8b6   : > { %5689 = vmatmul.msk.f32.gmra.mxu1 %vm3083_vm1, %v9678_v1  ;;  %v10304_v1 = vpop.f32.mrf.mxu0  ;;  %v10311_v38 = vpop.trf.xlu2 }
 0x8b7   : > { %12315 = vst [vmem:[#allocation326_spill] sm:$0xff] %v10304_v1 }
 0x8b8   : > { %12316 = vst [vmem:[#allocation327_spill] sm:$0xff] %v10311_v38 }
 0x8bb   : > { %v10290_v15 = vpop.f32.mrf.mxu1 }
 0x8bd   : > { %4083 = vmatmul.f32.gmra.mxu0 %v10270_v29 }
 0x8be   : > { %5690 = vmatmul.msk.f32.gmra.mxu1 %vm3083_vm1, %v9666_v53  ;;  %v10313_v53 = vpop.f32.mrf.mxu0 }
 0x8bf   : > { %12317 = vst [vmem:[#allocation328_spill] sm:$0xff] %v10313_v53 }
 0x8c3   : > { %v10297_v43 = vpop.f32.mrf.mxu1 }
 0x8c5   : > { %4086 = vmatmul.f32.gmra.mxu0 %v10279_v55 }
 0x8c6   : > { %5691 = vmatmul.msk.f32.gmra.mxu1 %vm3083_vm1, %v9653_v23  ;;  %v10320_v23 = vpop.trf.xlu2  ;;  %v10322_v55 = vpop.f32.mrf.mxu0 }
 0x8c7   : > { %12318 = vst [vmem:[#allocation329_spill] sm:$0xff] %v10320_v23 }
 0x8cb   : > { %v10306_v51 = vpop.f32.mrf.mxu1 }
 0x8cd   : > { %4089 = vmatmul.f32.gmra.mxu0 %v10288_v27 }
 0x8ce   : > { %5692 = vmatmul.msk.f32.gmra.mxu1 %vm3083_vm1, %v9643_v16  ;;  %v10329_v16 = vpop.trf.xlu2  ;;  %v10331_v24 = vpop.f32.mrf.mxu0 }
 0x8cf   : > { %12319 = vst [vmem:[#allocation330_spill] sm:$0xff] %v10329_v16 }
 0x8d3   : > { %v10315_v29 = vpop.f32.mrf.mxu1 }
 0x8d5   : > { %4092 = vmatmul.f32.gmra.mxu0 %v10299_v32 }
 0x8d6   : > { %5693 = vmatmul.msk.f32.gmra.mxu1 %vm3083_vm1, %v9639_v31  ;;  %v10336_v32 = vpop.trf.xlu2 }
 0x8d7   : > { %12320 = vst [vmem:[#allocation331_spill] sm:$0xff] %v10336_v32 }
 0x8db   : > { %v10324_v35 = vpop.f32.mrf.mxu1 }
 0x8dd   : > { %4095 = vmatmul.f32.gmra.mxu0 %v10311_v38  ;;  %v10341_v38 = vpop.f32.mrf.mxu0 }
 0x8de   : > { %5694 = vmatmul.msk.f32.gmra.mxu1 %vm3083_vm1, %v9627_v8  ;;  %v10343_v8 = vpop.f32.mrf.mxu2 }
 0x8df   : > { %12321 = vst [vmem:[#allocation332_spill] sm:$0xff] %v10343_v8  ;;  %v12337_v8 = vld [vmem:[#allocation221_spill] sm:$0xff] }
 0x8e3   : > { %v4424_v27 = vpop.f32.mrf.mxu1 }
 0x8e5   : > { %4098 = vmatmul.f32.gmra.mxu0 %v10320_v23  ;;  %v10348_v23 = vpop.trf.xlu2 }
 0x8e6   : > { %5695 = vmatmul.msk.f32.gmra.mxu1 %vm3083_vm1, %v9617_v20  ;;  %12322 = vst [vmem:[#allocation333_spill] sm:$0xff] %v10348_v23  ;;  %v10350_v20 = vpop.f32.mrf.mxu0  ;;  %v10352_v22 = vpop.f32.mrf.mxu2 }
 0x8e7   : > { %12323 = vst [vmem:[#allocation334_spill] sm:$0xff] %v10350_v20 }
 0x8e8   : > { %12324 = vst [vmem:[#allocation335_spill] sm:$0xff] %v10352_v22 }
 0x8eb   : > { %v4427_v31 = vpop.f32.mrf.mxu1 }
 0x8ed   : > { %4101 = vmatmul.f32.gmra.mxu0 %v10329_v16 }
 0x8ee   : > { %5696 = vmatmul.msk.f32.gmra.mxu1 %vm3083_vm1, %v9605_v46  ;;  %v10357_v46 = vpop.trf.xlu2  ;;  %v10359_v9 = vpop.f32.mrf.mxu0 }
 0x8ef   : > { %12325 = vst [vmem:[#allocation336_spill] sm:$0xff] %v10357_v46  ;;  %v10361_v2 = vpop.f32.mrf.mxu2 }
 0x8f0   : > { %12326 = vst [vmem:[#allocation337_spill] sm:$0xff] %v10359_v9 }
 0x8f1   : > { %12327 = vst [vmem:[#allocation338_spill] sm:$0xff] %v10361_v2  ;;  %v12336_v2 = vld [vmem:[#allocation163_spill] sm:$0xff] }
 0x8f3   : > { %v4430_v61 = vpop.f32.mrf.mxu1 }
 0x8f5   : > { %4104 = vmatmul.f32.gmra.mxu0 %v10336_v32 }
 0x8f6   : > { %5697 = vmatmul.msk.f32.gmra.mxu1 %vm3083_vm1, %v9595_v37  ;;  %v12328_v37 = vld [vmem:[#allocation170_spill] sm:$0xff]  ;;  %v10373_v26 = vpop.trf.xlu2 }
 0x8f7   : > { %v2182_v53 = vadd.f32 %v12329_v39, %v12328_v37  ;;  %12335 = vst [vmem:[#allocation170_spill] sm:$0xff] %v10373_v26  ;;  %v10378_v37 = vpop.f32.mrf.mxu0 }
 0x8f8   : > { %12339 = vst [vmem:[#allocation230_spill] sm:$0xff] %v10378_v37 }
 0x8f9   : > { %v4601_v47 = vmul.f32 %v2182_v53, %v12334_v63  ;;  %v10386_v63 = vpop.f32.mrf.mxu2  ;;  %v12345_v53 = vld [vmem:[#allocation213_spill] sm:$0xff] }
 0x8fa   : > { %12343 = vst [vmem:[#allocation167_spill] sm:$0xff] %v10386_v63 }
 0x8fb   : > { %v4433_v16 = vpop.f32.mrf.mxu1 }
 0x8fd   : > { %4107 = vmatmul.f32.gmra.mxu0 %v10348_v23  ;;  %v12331_v23 = vld [vmem:[#allocation227_spill] sm:$0xff] }
 0x8fe   : > { %5698 = vmatmul.msk.f32.gmra.mxu1 %vm3083_vm1, %v9583_v17  ;;  %v2179_v1 = vadd.f32 %v12331_v23, %v12330_v19  ;;  %v12333_v17 = vld [vmem:[#allocation224_spill] sm:$0xff] }
 0x8ff   : > { %v2176_v57 = vadd.f32 %v12333_v17, %v12332_v28  ;;  %v12341_v19 = vld [vmem:[#allocation216_spill] sm:$0xff] }
 0x900   : > { %v4600_v9 = vmul.f32 %v2179_v1, %v12338_v33 }
 0x901   : > { %v4599_v28 = vmul.f32 %v2176_v57, %v12342_v25 }
 0x903   : > { %v4436_v32 = vpop.f32.mrf.mxu1  ;;  %v4663_v1 = vmul.f32 %v4599_v28, %v4433_v16  ;;  %v12355_v28 = vld [vmem:[#allocation59_spill] sm:$0xff] }
 0x904   : > { %v4664_v17 = vmul.f32 %v4600_v9, %v4436_v32  ;;  %v12351_v9 = vld [vmem:[#allocation209_spill] sm:$0xff] }
 0x905   : > { %4110 = vmatmul.f32.gmra.mxu0 %v10357_v46  ;;  %v2173_v46 = vadd.f32 %v12337_v8, %v12336_v2  ;;  %v12344_v2 = vld [vmem:[#allocation159_spill] sm:$0xff]  ;;  %v12347_v8 = vld [vmem:[#allocation157_spill] sm:$0xff] }
 0x906   : > { %5699 = vmatmul.msk.f32.gmra.mxu1 %vm3083_vm1, %v9573_v50  ;;  %v12340_v50 = vld [vmem:[#allocation161_spill] sm:$0xff]  ;;  %v2167_v33 = vadd.f32 %v12345_v53, %v12344_v2 }
 0x907   : > { %v2170_v23 = vadd.f32 %v12341_v19, %v12340_v50  ;;  %v12349_v50 = vld [vmem:[#allocation63_spill] sm:$0xff]  ;;  %v12353_v2 = vld [vmem:[#allocation153_spill] sm:$0xff] }
 0x909   : > { %v4597_v19 = vmul.f32 %v2170_v23, %v12349_v50 }
 0x90b   : > { %v4439_v22 = vpop.f32.mrf.mxu1  ;;  %v4661_v20 = vmul.f32 %v4597_v19, %v4427_v31  ;;  %v10408_v31 = vpop.f32.mrf.mxu2  ;;  %v12361_v19 = vld [vmem:[#allocation24_spill] sm:$0xff] }
 0x90c   : > { %v4665_v39 = vmul.f32 %v4601_v47, %v4439_v22  ;;  %v12346_v47 = vld [vmem:[#allocation66_spill] sm:$0xff] }
 0x90d   : > { %4113 = vmatmul.f32.gmra.mxu0 %v10373_v26  ;;  %v4598_v22 = vmul.f32 %v2173_v46, %v12346_v47  ;;  %v12348_v26 = vld [vmem:[#allocation211_spill] sm:$0xff]  ;;  %v12358_v47 = vld [vmem:[#allocation57_spill] sm:$0xff] }
 0x90e   : > { %5700 = vmatmul.msk.f32.gmra.mxu1 %vm3083_vm1, %v9563_v48  ;;  %4714 = vmatpush.msra.mxu2 %v4665_v39  ;;  %v2164_v37 = vadd.f32 %v12348_v26, %v12347_v8  ;;  %v12350_v48 = vld [vmem:[#allocation155_spill] sm:$0xff]  ;;  %v12352_v39 = vld [vmem:[#allocation61_spill] sm:$0xff] }
 0x90f   : > { %v4662_v57 = vmul.f32 %v4598_v22, %v4430_v61  ;;  %v2161_v32 = vadd.f32 %v12351_v9, %v12350_v48  ;;  %v4596_v63 = vmul.f32 %v2167_v33, %v12352_v39  ;;  %v12354_v46 = vld [vmem:[#allocation107_spill] sm:$0xff]  ;;  %v12359_v33 = vld [vmem:[#allocation149_spill] sm:$0xff]  ;;  %v12364_v48 = vld [vmem:[#allocation22_spill] sm:$0xff] }
 0x910   : > { %4715 = vmatpush.msra.mxu2 %v4664_v17  ;;  %v2158_v16 = vadd.f32 %v12354_v46, %v12353_v2  ;;  %v4595_v17 = vmul.f32 %v2164_v37, %v12355_v28  ;;  %v12356_v26 = vld [vmem:[#allocation151_spill] sm:$0xff]  ;;  %v12366_v39 = vld [vmem:[#allocation198_spill] sm:$0xff]  ;;  %v12367_v46 = vld [vmem:[#allocation20_spill] sm:$0xff] }
 0x911   : > { %v4660_v53 = vmul.f32 %v4596_v63, %v4424_v27  ;;  %v12357_v61 = vld [vmem:[#allocation103_spill] sm:$0xff]  ;;  %v4594_v22 = vmul.f32 %v2161_v32, %v12358_v47  ;;  %v12363_v63 = vld [vmem:[#allocation200_spill] sm:$0xff]  ;;  %v12365_v32 = vld [vmem:[#allocation145_spill] sm:$0xff] }
 0x912   : > { %4716 = vmatpush.msra.mxu2 %v4663_v1  ;;  %v2155_v23 = vadd.f32 %v12357_v61, %v12356_v26  ;;  %v4659_v1 = vmul.f32 %v4595_v17, %v10324_v35  ;;  %v12360_v8 = vld [vmem:[#allocation203_spill] sm:$0xff]  ;;  %v4593_v37 = vmul.f32 %v2158_v16, %v12361_v19  ;;  %v2146_v2 = vadd.f32 %v12366_v39, %v12365_v32  ;;  %v12369_v17 = vld [vmem:[#allocation90_spill] sm:$0xff] }
 0x913   : > { %v10394_v25 = vpop.f32.mrf.mxu1  ;;  %v2152_v50 = vadd.f32 %v12360_v8, %v12359_v33  ;;  %v4658_v27 = vmul.f32 %v4594_v22, %v10315_v29  ;;  %v12368_v29 = vld [vmem:[#allocation143_spill] sm:$0xff]  ;;  %v12370_v26 = vld [vmem:[#allocation18_spill] sm:$0xff] }
 0x914   : > { %4717 = vmatpush.msra.mxu2 %v4662_v57  ;;  %v4592_v9 = vmul.f32 %v2155_v23, %v12364_v48  ;;  %v4657_v35 = vmul.f32 %v4593_v37, %v10306_v51  ;;  %v12371_v51 = vld [vmem:[#allocation141_spill] sm:$0xff]  ;;  %v12372_v47 = vld [vmem:[#allocation86_spill] sm:$0xff]  ;;  %v12375_v19 = vld [vmem:[#allocation83_spill] sm:$0xff] }
 0x915   : > { %v4591_v28 = vmul.f32 %v2152_v50, %v12367_v46  ;;  %v2140_v22 = vadd.f32 %v12372_v47, %v12371_v51  ;;  %v12374_v50 = vld [vmem:[#allocation139_spill] sm:$0xff]  ;;  %v12391_v47 = vld [vmem:[#allocation37_spill] sm:$0xff] }
 0x916   : > { %5701 = vmatmul.msk.f32.gmra.mxu1 %vm3083_vm1, %v9794_v0  ;;  %4718 = vmatpush.msra.mxu2 %v4661_v20  ;;  %v12362_v20 = vld [vmem:[#allocation147_spill] sm:$0xff]  ;;  %v4656_v16 = vmul.f32 %v4592_v9, %v10297_v43  ;;  %v10434_v43 = vpop.f32.mrf.mxu2  ;;  %v2137_v37 = vadd.f32 %v12375_v19, %v12374_v50 }
 0x917   : > { %v2149_v57 = vadd.f32 %v12363_v63, %v12362_v20  ;;  %v4655_v23 = vmul.f32 %v4591_v28, %v10290_v15  ;;  %v12377_v63 = vld [vmem:[#allocation12_spill] sm:$0xff]  ;;  %v12390_v51 = vld [vmem:[#allocation199_spill] sm:$0xff] }
 0x918   : > { %4719 = vmatpush.msra.mxu2 %v4660_v53  ;;  %v2143_v53 = vadd.f32 %v12369_v17, %v12368_v29 }
 0x919   : > { %v4590_v61 = vmul.f32 %v2149_v57, %v12370_v26  ;;  %v4587_v57 = vmul.f32 %v2140_v22, %v12377_v63  ;;  %v12387_v26 = vld [vmem:[#allocation202_spill] sm:$0xff]  ;;  %v12392_v22 = vld [vmem:[#allocation197_spill] sm:$0xff] }
 0x91a   : > { %4720 = vmatpush.msra.mxu2 %v4659_v1  ;;  %v12373_v1 = vld [vmem:[#allocation16_spill] sm:$0xff] }
 0x91b   : > { %v10414_v0 = vpop.f32.mrf.mxu1  ;;  %v4589_v33 = vmul.f32 %v2146_v2, %v12373_v1  ;;  %v4654_v8 = vmul.f32 %v4590_v61, %v10283_v42  ;;  %v12378_v42 = vld [vmem:[#allocation11_spill] sm:$0xff]  ;;  %v12393_v1 = vld [vmem:[#allocation128_spill] sm:$0xff] }
 0x91c   : > { %4721 = vmatpush.msra.mxu2 %v4658_v27  ;;  %v12376_v27 = vld [vmem:[#allocation14_spill] sm:$0xff]  ;;  %v4586_v9 = vmul.f32 %v2137_v37, %v12378_v42  ;;  %v12388_v61 = vld [vmem:[#allocation39_spill] sm:$0xff]  ;;  %v12396_v37 = vld [vmem:[#allocation125_spill] sm:$0xff] }
 0x91d   : > { %v4588_v20 = vmul.f32 %v2143_v53, %v12376_v27  ;;  %v4653_v15 = vmul.f32 %v4589_v33, %v10274_v34  ;;  %v2224_v33 = vadd.f32 %v12393_v1, %v12392_v22  ;;  %v12400_v42 = vld [vmem:[#allocation118_spill] sm:$0xff]  ;;  %v12405_v22 = vld [vmem:[#allocation191_spill] sm:$0xff]  ;;  %v12406_v1 = vld [vmem:[#allocation29_spill] sm:$0xff] }
 0x91e   : > { %5702 = vmatmul.msk.f32.gmra.mxu1 %vm3083_vm1, %v9786_v11  ;;  %4722 = vmatpush.msra.mxu2 %v4657_v35  ;;  %v4651_v35 = vmul.f32 %v4587_v57, %v10256_v10  ;;  %v4650_v32 = vmul.f32 %v4586_v9, %v10249_v44  ;;  %v10451_v34 = vpop.f32.mrf.mxu2  ;;  %v12398_v57 = vld [vmem:[#allocation195_spill] sm:$0xff] }
 0x91f   : > { %v4652_v48 = vmul.f32 %v4588_v20, %v10265_v56  ;;  %v12397_v20 = vld [vmem:[#allocation121_spill] sm:$0xff]  ;;  %v4615_v9 = vmul.f32 %v2224_v33, %v12400_v42 }
 0x920   : > { %4723 = vmatpush.msra.mxu2 %v4656_v16 }
 0x922   : > { %4724 = vmatpush.msra.mxu2 %v4655_v23  ;;  %v2230_v23 = vadd.f32 %v12388_v61, %v12387_v26  ;;  %v12402_v26 = vld [vmem:[#allocation31_spill] sm:$0xff] }
 0x923   : > { %v10436_v11 = vpop.f32.mrf.mxu1 }
 0x924   : > { %4725 = vmatpush.msra.mxu2 %v4654_v8  ;;  %v12394_v8 = vld [vmem:[#allocation124_spill] sm:$0xff] }
 0x925   : > { %v4617_v50 = vmul.f32 %v2230_v23, %v12394_v8  ;;  %v12403_v23 = vld [vmem:[#allocation115_spill] sm:$0xff]  ;;  %v2212_v8 = vadd.f32 %v12406_v1, %v12405_v22 }
 0x926   : > { %5703 = vmatmul.msk.f32.gmra.mxu1 %vm3083_vm1, %v9778_v59  ;;  %4726 = vmatpush.msra.mxu2 %v4653_v15  ;;  %v10459_v59 = vpop.f32.mrf.mxu2 }
 0x927   : > { %12379 = vst [vmem:[#allocation227_spill] sm:$0xff] %v10459_v59  ;;  %v12501_v59 = vld [vmem:[#allocation154_spill] sm:$0xff] }
 0x928   : > { %4727 = vmatpush.msra.mxu2 %v4652_v48 }
 0x92a   : > { %4728 = vmatpush.msra.mxu2 %v4651_v35 }
 0x92b   : > { %v10449_v39 = vpop.f32.mrf.mxu1 }
 0x92c   : > { %4729 = vmatpush.msra.mxu2 %v4650_v32  ;;  %v12401_v32 = vld [vmem:[#allocation193_spill] sm:$0xff] }
 0x92d   : > { %5988 = vmatmul.lmr.bf16.vlgmr.msra.gmra.16.mxu2  ;;  %v2215_v61 = vadd.f32 %v12402_v26, %v12401_v32  ;;  %v12416_v32 = vld [vmem:[#allocation104_spill] sm:$0xff] }
 0x92e   : > { %5704 = vmatmul.msk.f32.gmra.mxu1 %vm3083_vm1, %v9770_v40  ;;  %v10465_v44 = vpop.f32.mrf.mxu2 }
 0x92f   : > { %12380 = vst [vmem:[#allocation165_spill] sm:$0xff] %v10465_v44  ;;  %v12495_v44 = vld [vmem:[#allocation76_spill] sm:$0xff] }
 0x933   : > { %v10455_v56 = vpop.f32.mrf.mxu1 }
 0x935   : > { %5989 = vmatmul.lmr.bf16.gmra.16.mxu2 }
 0x936   : > { %5705 = vmatmul.msk.f32.gmra.mxu1 %vm3083_vm1, %v9760_v6  ;;  %v10471_v40 = vpop.f32.mrf.mxu2 }
 0x937   : > { %12381 = vst [vmem:[#allocation224_spill] sm:$0xff] %v10471_v40  ;;  %v12494_v40 = vld [vmem:[#allocation232_spill] sm:$0xff] }
 0x93b   : > { %v10461_v10 = vpop.f32.mrf.mxu1 }
 0x93d   : > { %5990 = vmatmul.lmr.bf16.gmra.16.mxu2 }
 0x93e   : > { %5706 = vmatmul.msk.f32.gmra.mxu1 %vm3083_vm1, %v9750_v18  ;;  %v10479_v28 = vpop.f32.mrf.mxu2 }
 0x93f   : > { %12382 = vst [vmem:[#allocation75_spill] sm:$0xff] %v10479_v28 }
 0x943   : > { %v10467_v2 = vpop.f32.mrf.mxu1 }
 0x945   : > { %5991 = vmatmul.lmr.bf16.gmra.16.mxu2 }
 0x946   : > { %5707 = vmatmul.msk.f32.gmra.mxu1 %vm3083_vm1, %v9742_v52  ;;  %v10485_v52 = vpop.f32.mrf.mxu2 }
 0x947   : > { %12383 = vst [vmem:[#allocation163_spill] sm:$0xff] %v10485_v52 }
 0x94b   : > { %v10473_v46 = vpop.f32.mrf.mxu1 }
 0x94d   : > { %5992 = vmatmul.lmr.bf16.gmra.16.mxu2 }
 0x94e   : > { %5708 = vmatmul.msk.f32.gmra.mxu1 %vm3083_vm1, %v9732_v3  ;;  %v10489_v3 = vpop.f32.mrf.mxu2 }
 0x94f   : > { %12384 = vst [vmem:[#allocation221_spill] sm:$0xff] %v10489_v3  ;;  %v12493_v3 = vld [vmem:[#allocation158_spill] sm:$0xff] }
 0x953   : > { %v10477_v6 = vpop.f32.mrf.mxu1 }
 0x955   : > { %5993 = vmatmul.lmr.bf16.gmra.16.mxu2 }
 0x956   : > { %5709 = vmatmul.msk.f32.gmra.mxu1 %vm3083_vm1, %v9728_v13  ;;  %v10493_v13 = vpop.f32.mrf.mxu2 }
 0x957   : > { %12385 = vst [vmem:[#allocation72_spill] sm:$0xff] %v10493_v13  ;;  %v12491_v13 = vld [vmem:[#allocation234_spill] sm:$0xff] }
 0x95b   : > { %v4469_v18 = vpop.f32.mrf.mxu1 }
 0x95d   : > { %5994 = vmatmul.lmr.bf16.gmra.16.mxu2 }
 0x95e   : > { %5710 = vmatmul.msk.f32.gmra.mxu1 %vm3083_vm1, %v9714_v30  ;;  %v10497_v53 = vpop.f32.mrf.mxu2 }
 0x95f   : > { %12386 = vst [vmem:[#allocation161_spill] sm:$0xff] %v10497_v53  ;;  %v12489_v53 = vld [vmem:[#allocation236_spill] sm:$0xff] }
 0x963   : > { %v4472_v16 = vpop.f32.mrf.mxu1 }
 0x965   : > { %5995 = vmatmul.lmr.bf16.gmra.16.mxu2 }
 0x966   : > { %5711 = vmatmul.msk.f32.gmra.mxu1 %vm3083_vm1, %v9704_v45 }
 0x96b   : > { %v4475_v29 = vpop.f32.mrf.mxu1 }
 0x96d   : > { %5996 = vmatmul.lmr.bf16.gmra.16.mxu2 }
 0x96e   : > { %5712 = vmatmul.msk.f32.gmra.mxu1 %vm3083_vm1, %v9694_v60  ;;  %v10505_v60 = vpop.f32.mrf.mxu2 }
 0x96f   : > { %12389 = vst [vmem:[#allocation216_spill] sm:$0xff] %v10505_v60 }
 0x973   : > { %v4478_v17 = vpop.f32.mrf.mxu1 }
 0x975   : > { %5997 = vmatmul.lmr.bf16.gmra.16.mxu2 }
 0x976   : > { %5713 = vmatmul.msk.f32.gmra.mxu1 %vm3083_vm1, %v9684_v4  ;;  %v2227_v4 = vadd.f32 %v12391_v47, %v12390_v51 }
 0x978   : > { %v4616_v15 = vmul.f32 %v2227_v4, %v12397_v20  ;;  %v10523_v4 = vpop.f32.mrf.mxu2  ;;  %v12410_v20 = vld [vmem:[#allocation9_spill] sm:$0xff] }
 0x979   : > { %12404 = vst [vmem:[#allocation69_spill] sm:$0xff] %v10523_v4  ;;  %v12486_v4 = vld [vmem:[#allocation192_spill] sm:$0xff] }
 0x97b   : > { %v4481_v30 = vpop.f32.mrf.mxu1 }
 0x97c   : > { %v4679_v47 = vmul.f32 %v4615_v9, %v4481_v30  ;;  %v12411_v30 = vld [vmem:[#allocation187_spill] sm:$0xff] }
 0x97d   : > { %5998 = vmatmul.lmr.bf16.gmra.16.mxu2 }
 0x97e   : > { %5714 = vmatmul.msk.f32.gmra.mxu1 %vm3083_vm1, %v9672_v21  ;;  %v12395_v21 = vld [vmem:[#allocation196_spill] sm:$0xff] }
 0x97f   : > { %v2221_v27 = vadd.f32 %v12396_v37, %v12395_v21  ;;  %v12409_v21 = vld [vmem:[#allocation27_spill] sm:$0xff] }
 0x981   : > { %v4614_v51 = vmul.f32 %v2221_v27, %v12403_v23  ;;  %v12412_v27 = vld [vmem:[#allocation109_spill] sm:$0xff] }
 0x983   : > { %v4484_v45 = vpop.f32.mrf.mxu1  ;;  %v4678_v33 = vmul.f32 %v4614_v51, %v4478_v17  ;;  %v12414_v17 = vld [vmem:[#allocation185_spill] sm:$0xff] }
 0x984   : > { %v4680_v35 = vmul.f32 %v4616_v15, %v4484_v45  ;;  %v4612_v15 = vmul.f32 %v2215_v61, %v12410_v20  ;;  %v12418_v61 = vld [vmem:[#allocation101_spill] sm:$0xff] }
 0x985   : > { %5999 = vmatmul.lmr.bf16.gmra.16.mxu2 }
 0x986   : > { %5715 = vmatmul.msk.f32.gmra.mxu1 %vm3083_vm1, %v9659_v41  ;;  %v12399_v41 = vld [vmem:[#allocation33_spill] sm:$0xff]  ;;  %v4676_v9 = vmul.f32 %v4612_v15, %v4472_v16  ;;  %v10545_v16 = vpop.f32.mrf.mxu2  ;;  %v12426_v15 = vld [vmem:[#allocation94_spill] sm:$0xff] }
 0x987   : > { %v2218_v48 = vadd.f32 %v12399_v41, %v12398_v57  ;;  %v2206_v57 = vadd.f32 %v12412_v27, %v12411_v30  ;;  %v12413_v41 = vld [vmem:[#allocation108_spill] sm:$0xff]  ;;  %12420 = vst [vmem:[#allocation159_spill] sm:$0xff] %v10545_v16  ;;  %v12427_v30 = vld [vmem:[#allocation177_spill] sm:$0xff] }
 0x988   : > { %v4611_v42 = vmul.f32 %v2212_v8, %v12413_v41  ;;  %v12428_v27 = vld [vmem:[#allocation13_spill] sm:$0xff]  ;;  %v12429_v41 = vld [vmem:[#allocation91_spill] sm:$0xff] }
 0x98a   : > { %v4675_v23 = vmul.f32 %v4611_v42, %v4469_v18 }
 0x98b   : > { %v4487_v19 = vpop.f32.mrf.mxu1 }
 0x98c   : > { %v4681_v63 = vmul.f32 %v4617_v50, %v4487_v19  ;;  %v12407_v50 = vld [vmem:[#allocation10_spill] sm:$0xff] }
 0x98d   : > { %6000 = vmatmul.lmr.bf16.gmra.16.mxu2  ;;  %v4613_v19 = vmul.f32 %v2218_v48, %v12407_v50  ;;  %v12415_v48 = vld [vmem:[#allocation105_spill] sm:$0xff]  ;;  %v12422_v50 = vld [vmem:[#allocation98_spill] sm:$0xff] }
 0x98e   : > { %5716 = vmatmul.msk.f32.gmra.mxu1 %vm3083_vm1, %v9649_v12  ;;  %4827 = vmatpush.msra.mxu3 %v4681_v63  ;;  %v12408_v12 = vld [vmem:[#allocation189_spill] sm:$0xff] }
 0x98f   : > { %v2209_v37 = vadd.f32 %v12409_v21, %v12408_v12  ;;  %v4677_v63 = vmul.f32 %v4613_v19, %v4475_v29  ;;  %v12417_v29 = vld [vmem:[#allocation183_spill] sm:$0xff] }
 0x990   : > { %4828 = vmatpush.msra.mxu3 %v4680_v35  ;;  %v2203_v35 = vadd.f32 %v12415_v48, %v12414_v17  ;;  %v2200_v51 = vadd.f32 %v12418_v61, %v12417_v29  ;;  %v12424_v21 = vld [vmem:[#allocation179_spill] sm:$0xff]  ;;  %v12431_v17 = vld [vmem:[#allocation237_spill] sm:$0xff]  ;;  %v12435_v61 = vld [vmem:[#allocation84_spill] sm:$0xff] }
 0x991   : > { %v4610_v26 = vmul.f32 %v2209_v37, %v12416_v32  ;;  %v12425_v37 = vld [vmem:[#allocation15_spill] sm:$0xff] }
 0x992   : > { %4829 = vmatpush.msra.mxu3 %v4679_v47  ;;  %v12419_v47 = vld [vmem:[#allocation100_spill] sm:$0xff]  ;;  %v2194_v20 = vadd.f32 %v12425_v37, %v12424_v21 }
 0x993   : > { %v10528_v45 = vpop.f32.mrf.mxu1  ;;  %v4609_v22 = vmul.f32 %v2206_v57, %v12419_v47  ;;  %v4674_v1 = vmul.f32 %v4610_v26, %v10477_v6  ;;  %v2191_v57 = vadd.f32 %v12428_v27, %v12427_v30  ;;  %v10602_v30 = vpop.f32.mrf.mxu0  ;;  %v12448_v27 = vld [vmem:[#allocation8_spill] sm:$0xff] }
 0x994   : > { %4830 = vmatpush.msra.mxu3 %v4678_v33  ;;  %v12423_v33 = vld [vmem:[#allocation97_spill] sm:$0xff] }
 0x995   : > { %6001 = vmatmul.lmr.bf16.gmra.16.mxu2  ;;  %v4608_v12 = vmul.f32 %v2203_v35, %v12423_v33  ;;  %v4673_v18 = vmul.f32 %v4609_v22, %v10473_v46  ;;  %v12432_v35 = vld [vmem:[#allocation87_spill] sm:$0xff]  ;;  %v12437_v22 = vld [vmem:[#allocation81_spill] sm:$0xff] }
 0x996   : > { %5717 = vmatmul.msk.f32.gmra.mxu1 %vm3083_vm1, %v9830_v36  ;;  %4831 = vmatpush.msra.mxu3 %v4677_v63  ;;  %v12421_v36 = vld [vmem:[#allocation181_spill] sm:$0xff]  ;;  %v4607_v63 = vmul.f32 %v2200_v51, %v12426_v15  ;;  %v4605_v32 = vmul.f32 %v2194_v20, %v12432_v35  ;;  %v4604_v51 = vmul.f32 %v2191_v57, %v12435_v61  ;;  %v12446_v15 = vld [vmem:[#allocation123_spill] sm:$0xff] }
 0x997   : > { %v2197_v19 = vadd.f32 %v12422_v50, %v12421_v36  ;;  %v4672_v6 = vmul.f32 %v4608_v12, %v10467_v2  ;;  %v12438_v50 = vld [vmem:[#allocation126_spill] sm:$0xff]  ;;  %v12450_v57 = vld [vmem:[#allocation217_spill] sm:$0xff] }
 0x998   : > { %4832 = vmatpush.msra.mxu3 %v4676_v9  ;;  %v4671_v46 = vmul.f32 %v4607_v63, %v10461_v10  ;;  %v12430_v9 = vld [vmem:[#allocation175_spill] sm:$0xff]  ;;  %v4669_v47 = vmul.f32 %v4605_v32, %v10449_v39  ;;  %v10573_v10 = vpop.f32.mrf.mxu2  ;;  %v4668_v36 = vmul.f32 %v4604_v51, %v10436_v11  ;;  %v12459_v51 = vld [vmem:[#allocation169_spill] sm:$0xff] }
 0x999   : > { %v4606_v42 = vmul.f32 %v2197_v19, %v12429_v41  ;;  %v2188_v48 = vadd.f32 %v12431_v17, %v12430_v9  ;;  %12436 = vst [vmem:[#allocation213_spill] sm:$0xff] %v10573_v10  ;;  %v12442_v11 = vld [vmem:[#allocation219_spill] sm:$0xff] }
 0x99a   : > { %4833 = vmatpush.msra.mxu3 %v4675_v23  ;;  %v12434_v23 = vld [vmem:[#allocation235_spill] sm:$0xff] }
 0x99b   : > { %v10547_v8 = vpop.f32.mrf.mxu1  ;;  %v4670_v26 = vmul.f32 %v4606_v42, %v10455_v56  ;;  %v12439_v56 = vld [vmem:[#allocation78_spill] sm:$0xff]  ;;  %v10614_v17 = vpop.f32.mrf.mxu0 }
 0x99c   : > { %4834 = vmatpush.msra.mxu3 %v4674_v1  ;;  %v4603_v1 = vmul.f32 %v2188_v48, %v12437_v22  ;;  %v12454_v48 = vld [vmem:[#allocation214_spill] sm:$0xff] }
 0x99d   : > { %6002 = vmatmul.lmr.bf16.gmra.16.mxu2  ;;  %v12461_v22 = vld [vmem:[#allocation114_spill] sm:$0xff] }
 0x99e   : > { %5718 = vmatmul.msk.f32.gmra.mxu1 %vm3083_vm1, %v9825_v58  ;;  %4835 = vmatpush.msra.mxu3 %v4673_v18  ;;  %v12433_v58 = vld [vmem:[#allocation173_spill] sm:$0xff]  ;;  %v4667_v33 = vmul.f32 %v4603_v1, %v10414_v0  ;;  %v12440_v18 = vld [vmem:[#allocation184_spill] sm:$0xff] }
 0x99f   : > { %v2185_v29 = vadd.f32 %v12434_v23, %v12433_v58  ;;  %v12441_v21 = vunpack.i.l.bf16 %v12440_v18  ;;  %v12458_v23 = vld [vmem:[#allocation117_spill] sm:$0xff] }
 0x9a0   : > { %4836 = vmatpush.msra.mxu3 %v4672_v6  ;;  %v10590_v37 = vpop.f32.mrf.mxu2 }
 0x9a1   : > { %v4602_v19 = vmul.f32 %v2185_v29, %v12439_v56  ;;  %12443 = vst [vmem:[#allocation66_spill] sm:$0xff] %v10590_v37  ;;  %v12463_v56 = vld [vmem:[#allocation178_spill] sm:$0xff] }
 0x9a2   : > { %4837 = vmatpush.msra.mxu3 %v4671_v46  ;;  %v12452_v46 = vld [vmem:[#allocation241_spill] sm:$0xff] }
 0x9a3   : > { %v10567_v2 = vpop.f32.mrf.mxu1  ;;  %v4666_v12 = vmul.f32 %v4602_v19, %v10394_v25  ;;  %v12444_v25 = vld [vmem:[#allocation50_spill] sm:$0xff]  ;;  %v12453_v9 = vunpack.i.l.bf16 %v12452_v46  ;;  %v10626_v29 = vpop.f32.mrf.mxu0  ;;  %v12464_v19 = vunpack.i.l.bf16 %v12463_v56 }
 0x9a4   : > { %4838 = vmatpush.msra.mxu3 %v4670_v26  ;;  %v12445_v20 = vunpack.i.l.bf16 %v12444_v25  ;;  %v12456_v26 = vld [vmem:[#allocation238_spill] sm:$0xff] }
 0x9a5   : > { %6003 = vmatmul.lmr.bf16.gmra.16.mxu2  ;;  %v12457_v58 = vunpack.i.l.bf16 %v12456_v26 }
 0x9a6   : > { %5719 = vmatmul.msk.f32.gmra.mxu1 %vm3083_vm1, %v12438_v50  ;;  %4839 = vmatpush.msra.mxu3 %v4669_v47  ;;  %v12460_v47 = vunpack.i.l.bf16 %v12459_v51 }
 0x9a8   : > { %4840 = vmatpush.msra.mxu3 %v4668_v36  ;;  %v10598_v63 = vpop.f32.mrf.mxu2 }
 0x9a9   : > { %12447 = vst [vmem:[#allocation157_spill] sm:$0xff] %v10598_v63 }
 0x9aa   : > { %4841 = vmatpush.msra.mxu3 %v4667_v33  ;;  %v12465_v33 = vld [vmem:[#allocation112_spill] sm:$0xff] }
 0x9ab   : > { %v10582_v39 = vpop.f32.mrf.mxu1  ;;  %v10636_v36 = vpop.f32.mrf.mxu0 }
 0x9ac   : > { %4842 = vmatpush.msra.mxu3 %v4666_v12  ;;  %6020 = vllmr.16.mxu2 }
 0x9ad   : > { %6057 = vmatmul.lmr.bf16.vlgmr.msra.gmra.16.mxu3  ;;  %4778 = vmatmul.f32.gmra.mxu2 %v12441_v21 }
 0x9ae   : > { %5720 = vmatmul.msk.f32.gmra.mxu1 %vm3083_vm1, %v12442_v11  ;;  %5772 = vmatpush.msk.msra.mxu3 %vm4373_vm2, %v10089_v54  ;;  %v12449_v54 = vunpack.i.l.bf16 %v12448_v27 }
 0x9b0   : > { %v10608_v41 = vpop.f32.mrf.mxu2 }
 0x9b1   : > { %12451 = vst [vmem:[#allocation211_spill] sm:$0xff] %v10608_v41  ;;  %v12479_v41 = vld [vmem:[#allocation257_spill] sm:$0xff] }
 0x9b2   : > { %v12480_v63 = vunpack.i.l.bf16 %v12479_v41 }
 0x9b3   : > { %v10592_v0 = vpop.f32.mrf.mxu1  ;;  %v10648_v11 = vpop.f32.mrf.mxu0 }
 0x9b5   : > { %6058 = vmatmul.lmr.bf16.gmra.16.mxu3  ;;  %4781 = vmatmul.f32.gmra.mxu2 %v12445_v20  ;;  %v12467_v20 = vld [vmem:[#allocation64_spill] sm:$0xff] }
 0x9b6   : > { %5721 = vmatmul.msk.f32.gmra.mxu1 %vm3083_vm1, %v12446_v15  ;;  %v12468_v15 = vunpack.i.l.bf16 %v12467_v20 }
 0x9b8   : > { %v10620_v32 = vpop.f32.mrf.mxu2 }
 0x9b9   : > { %12455 = vst [vmem:[#allocation63_spill] sm:$0xff] %v10620_v32 }
 0x9bb   : > { %v10600_v6 = vpop.f32.mrf.mxu1 }
 0x9bd   : > { %6059 = vmatmul.lmr.bf16.gmra.16.mxu3  ;;  %4784 = vmatmul.f32.gmra.mxu2 %v12449_v54  ;;  %v12469_v54 = vld [vmem:[#allocation110_spill] sm:$0xff] }
 0x9be   : > { %5722 = vmatmul.msk.f32.gmra.mxu1 %vm3083_vm1, %v12450_v57 }
 0x9c0   : > { %v10634_v1 = vpop.f32.mrf.mxu2 }
 0x9c1   : > { %12462 = vst [vmem:[#allocation155_spill] sm:$0xff] %v10634_v1 }
 0x9c3   : > { %v10610_v42 = vpop.f32.mrf.mxu1 }
 0x9c5   : > { %6060 = vmatmul.lmr.bf16.gmra.16.mxu3  ;;  %4787 = vmatmul.f32.gmra.mxu2 %v12453_v9 }
 0x9c6   : > { %5723 = vmatmul.msk.f32.gmra.mxu1 %vm3083_vm1, %v12454_v48  ;;  %v12471_v48 = vld [vmem:[#allocation248_spill] sm:$0xff] }
 0x9c8   : > { %v10644_v12 = vpop.f32.mrf.mxu2 }
 0x9c9   : > { %12466 = vst [vmem:[#allocation209_spill] sm:$0xff] %v10644_v12 }
 0x9cb   : > { %v10618_v35 = vpop.f32.mrf.mxu1 }
 0x9cd   : > { %6061 = vmatmul.lmr.bf16.gmra.16.mxu3  ;;  %4790 = vmatmul.f32.gmra.mxu2 %v12457_v58  ;;  %v12472_v58 = vunpack.i.l.bf16 %v12471_v48 }
 0x9ce   : > { %5724 = vmatmul.msk.f32.gmra.mxu1 %vm3083_vm1, %v12458_v23  ;;  %v10658_v23 = vpop.f32.mrf.mxu0 }
 0x9d0   : > { %v10654_v57 = vpop.f32.mrf.mxu2 }
 0x9d1   : > { %12470 = vst [vmem:[#allocation61_spill] sm:$0xff] %v10654_v57 }
 0x9d3   : > { %v10628_v61 = vpop.f32.mrf.mxu1 }
 0x9d5   : > { %6062 = vmatmul.lmr.bf16.gmra.16.mxu3  ;;  %4793 = vmatmul.f32.gmra.mxu2 %v12460_v47  ;;  %v12473_v47 = vld [vmem:[#allocation102_spill] sm:$0xff] }
 0x9d6   : > { %5725 = vmatmul.msk.f32.gmra.mxu1 %vm3083_vm1, %v12461_v22  ;;  %v10668_v1 = vpop.f32.mrf.mxu0 }
 0x9db   : > { %v10638_v50 = vpop.f32.mrf.mxu1 }
 0x9dd   : > { %6063 = vmatmul.lmr.bf16.gmra.16.mxu3  ;;  %4796 = vmatmul.f32.gmra.mxu2 %v12464_v19  ;;  %v10662_v19 = vpop.f32.mrf.mxu2 }
 0x9de   : > { %5726 = vmatmul.msk.f32.gmra.mxu1 %vm3083_vm1, %v12465_v33  ;;  %12474 = vst [vmem:[#allocation153_spill] sm:$0xff] %v10662_v19  ;;  %v12475_v33 = vld [vmem:[#allocation253_spill] sm:$0xff]  ;;  %v10676_v37 = vpop.f32.mrf.mxu0 }
 0x9df   : > { %12482 = vst [vmem:[#allocation59_spill] sm:$0xff] %v10676_v37  ;;  %v12487_v19 = vld [vmem:[#allocation201_spill] sm:$0xff] }
 0x9e3   : > { %v10646_v21 = vpop.f32.mrf.mxu1 }
 0x9e5   : > { %6064 = vmatmul.lmr.bf16.gmra.16.mxu3  ;;  %4799 = vmatmul.f32.gmra.mxu2 %v12468_v15  ;;  %v12476_v15 = vunpack.i.l.bf16 %v12475_v33 }
 0x9e6   : > { %5727 = vmatmul.msk.f32.gmra.mxu1 %vm3083_vm1, %v12469_v54  ;;  %v12477_v54 = vld [vmem:[#allocation204_spill] sm:$0xff]  ;;  %v10693_v37 = vpop.f32.mrf.mxu0 }
 0x9e7   : > { %12496 = vst [vmem:[#allocation103_spill] sm:$0xff] %v10693_v37  ;;  %v12505_v37 = vld [vmem:[#allocation152_spill] sm:$0xff] }
 0x9eb   : > { %v4523_v9 = vpop.f32.mrf.mxu1 }
 0x9ed   : > { %6065 = vmatmul.lmr.bf16.gmra.16.mxu3  ;;  %4802 = vmatmul.f32.gmra.mxu2 %v12472_v58  ;;  %v10670_v58 = vpop.f32.mrf.mxu2 }
 0x9ee   : > { %5728 = vmatmul.msk.f32.gmra.mxu1 %vm3083_vm1, %v12473_v47  ;;  %12478 = vst [vmem:[#allocation107_spill] sm:$0xff] %v10670_v58  ;;  %v12481_v47 = vld [vmem:[#allocation99_spill] sm:$0xff] }
 0x9f3   : > { %v4526_v22 = vpop.f32.mrf.mxu1 }
 0x9f5   : > { %6066 = vmatmul.lmr.bf16.gmra.16.mxu3  ;;  %4805 = vmatmul.f32.gmra.mxu2 %v12476_v15  ;;  %v12483_v15 = vld [vmem:[#allocation261_spill] sm:$0xff]  ;;  %v10684_v58 = vpop.f32.mrf.mxu2 }
 0x9f6   : > { %5729 = vmatmul.msk.f32.gmra.mxu1 %vm3083_vm1, %v12477_v54  ;;  %v12484_v16 = vunpack.i.l.bf16 %v12483_v15  ;;  %v12485_v54 = vld [vmem:[#allocation88_spill] sm:$0xff]  ;;  %12488 = vst [vmem:[#allocation151_spill] sm:$0xff] %v10684_v58  ;;  %v12499_v58 = vld [vmem:[#allocation229_spill] sm:$0xff] }
 0x9f7   : > { %v2278_v60 = vadd.f32 %v12486_v4, %v12485_v54  ;;  %v12497_v4 = vld [vmem:[#allocation156_spill] sm:$0xff] }
 0x9f9   : > { %v4633_v52 = vmul.f32 %v2278_v60, %v12493_v3  ;;  %v12502_v3 = vld [vmem:[#allocation194_spill] sm:$0xff] }
 0x9fb   : > { %v4529_v32 = vpop.f32.mrf.mxu1 }
 0x9fd   : > { %6067 = vmatmul.lmr.bf16.gmra.16.mxu3  ;;  %4808 = vmatmul.f32.gmra.mxu2 %v12480_v63  ;;  %v12490_v63 = vld [vmem:[#allocation79_spill] sm:$0xff] }
 0x9fe   : > { %5730 = vmatmul.msk.f32.gmra.mxu1 %vm3083_vm1, %v12481_v47  ;;  %v2275_v57 = vadd.f32 %v12490_v63, %v12489_v53  ;;  %v12492_v47 = vld [vmem:[#allocation190_spill] sm:$0xff]  ;;  %v12500_v53 = vld [vmem:[#allocation188_spill] sm:$0xff] }
 0x9ff   : > { %v2272_v12 = vadd.f32 %v12492_v47, %v12491_v13  ;;  %v2266_v63 = vadd.f32 %v12500_v53, %v12499_v58  ;;  %v12509_v58 = vld [vmem:[#allocation150_spill] sm:$0xff] }
 0xa00   : > { %v4632_v54 = vmul.f32 %v2275_v57, %v12497_v4  ;;  %v12507_v4 = vld [vmem:[#allocation223_spill] sm:$0xff] }
 0xa01   : > { %v4631_v13 = vmul.f32 %v2272_v12, %v12501_v59  ;;  %v4629_v53 = vmul.f32 %v2266_v63, %v12509_v58  ;;  %v12510_v12 = vld [vmem:[#allocation220_spill] sm:$0xff] }
 0xa03   : > { %v4532_v10 = vpop.f32.mrf.mxu1 }
 0xa04   : > { %v4696_v47 = vmul.f32 %v4632_v54, %v4532_v10 }
 0xa05   : > { %6068 = vmatmul.lmr.bf16.gmra.16.mxu3  ;;  %4811 = vmatmul.f32.gmra.mxu2 %v12484_v16  ;;  %v2269_v16 = vadd.f32 %v12495_v44, %v12494_v40  ;;  %v12503_v44 = vld [vmem:[#allocation226_spill] sm:$0xff]  ;;  %v12504_v40 = vld [vmem:[#allocation73_spill] sm:$0xff] }
 0xa06   : > { %5731 = vmatmul.msk.f32.gmra.mxu1 %vm3083_vm1, %v12487_v19  ;;  %v12498_v19 = vunpack.i.l.bf16 %v10076_v14  ;;  %v2263_v60 = vadd.f32 %v12504_v40, %v12503_v44  ;;  %v4693_v40 = vmul.f32 %v4629_v53, %v4523_v9  ;;  %v12521_v53 = vld [vmem:[#allocation212_spill] sm:$0xff] }
 0xa07   : > { %v4630_v57 = vmul.f32 %v2269_v16, %v12505_v37  ;;  %v12513_v37 = vunpack.i.l.bf16 %v10097_v5  ;;  %v12515_v16 = vld [vmem:[#allocation48_spill] sm:$0xff] }
 0xa09   : > { %v4694_v59 = vmul.f32 %v4630_v57, %v4526_v22  ;;  %v12517_v22 = vld [vmem:[#allocation146_spill] sm:$0xff] }
 0xa0b   : > { %v4535_v28 = vpop.f32.mrf.mxu1 }
 0xa0c   : > { %v4697_v15 = vmul.f32 %v4633_v52, %v4535_v28  ;;  %v4695_v28 = vmul.f32 %v4631_v13, %v4529_v32  ;;  %v10706_v52 = vpop.f32.mrf.mxu2  ;;  %v12514_v32 = vld [vmem:[#allocation218_spill] sm:$0xff] }
 0xa0d   : > { %6069 = vmatmul.lmr.bf16.gmra.16.mxu3  ;;  %4814 = vmatmul.f32.gmra.mxu2 %v12498_v19  ;;  %12506 = vst [vmem:[#allocation57_spill] sm:$0xff] %v10706_v52  ;;  %v12508_v19 = vld [vmem:[#allocation186_spill] sm:$0xff]  ;;  %v2254_v13 = vadd.f32 %v12515_v16, %v12514_v32  ;;  %v12527_v16 = vld [vmem:[#allocation140_spill] sm:$0xff] }
 0xa0e   : > { %5732 = vmatmul.msk.f32.gmra.mxu1 %vm3083_vm1, %v12502_v3  ;;  %4940 = vmatpush.msra.mxu0 %v4697_v15  ;;  %v2260_v14 = vadd.f32 %v12508_v19, %v12507_v4  ;;  %v12511_v15 = vld [vmem:[#allocation70_spill] sm:$0xff]  ;;  %v12512_v3 = vld [vmem:[#allocation148_spill] sm:$0xff]  ;;  %v12519_v4 = vld [vmem:[#allocation47_spill] sm:$0xff] }
 0xa0f   : > { %v2257_v54 = vadd.f32 %v12511_v15, %v12510_v12  ;;  %v4628_v44 = vmul.f32 %v2263_v60, %v12512_v3  ;;  %v12520_v60 = vld [vmem:[#allocation144_spill] sm:$0xff]  ;;  %v12523_v15 = vld [vmem:[#allocation142_spill] sm:$0xff] }
 0xa10   : > { %4941 = vmatpush.msra.mxu0 %v4696_v47  ;;  %v10720_v47 = vpop.f32.mrf.mxu0  ;;  %v4627_v63 = vmul.f32 %v2260_v14, %v12517_v22  ;;  %v4625_v3 = vmul.f32 %v2254_v13, %v12523_v15  ;;  %v12528_v22 = vunpack.i.l.bf16 %v10114_v62  ;;  %v12529_v13 = vld [vmem:[#allocation208_spill] sm:$0xff]  ;;  %v12536_v15 = vld [vmem:[#allocation206_spill] sm:$0xff] }
 0xa11   : > { %12516 = vst [vmem:[#allocation149_spill] sm:$0xff] %v10720_v47  ;;  %v4692_v57 = vmul.f32 %v4628_v44, %v10646_v21  ;;  %v4626_v9 = vmul.f32 %v2257_v54, %v12520_v60  ;;  %v12525_v44 = vld [vmem:[#allocation210_spill] sm:$0xff]  ;;  %v12532_v60 = vld [vmem:[#allocation207_spill] sm:$0xff]  ;;  %v12595_v47 = vld [vmem:[#allocation77_spill] sm:$0xff] }
 0xa12   : > { %4942 = vmatpush.msra.mxu0 %v4695_v28  ;;  %v12518_v28 = vld [vmem:[#allocation215_spill] sm:$0xff]  ;;  %v4691_v58 = vmul.f32 %v4627_v63, %v10638_v50  ;;  %v4689_v50 = vmul.f32 %v4625_v3, %v10618_v35  ;;  %v12530_v63 = vld [vmem:[#allocation44_spill] sm:$0xff] }
 0xa13   : > { %v10711_v10 = vpop.f32.mrf.mxu1  ;;  %v2251_v19 = vadd.f32 %v12519_v4, %v12518_v28  ;;  %v12537_v3 = vld [vmem:[#allocation240_spill] sm:$0xff] }
 0xa14   : > { %4943 = vmatpush.msra.mxu0 %v4694_v59  ;;  %v12522_v59 = vld [vmem:[#allocation244_spill] sm:$0xff]  ;;  %v10734_v21 = vpop.f32.mrf.mxu2 }
 0xa15   : > { %6070 = vmatmul.lmr.bf16.gmra.16.mxu3  ;;  %4817 = vmatmul.f32.gmra.mxu2 %v12513_v37  ;;  %v2248_v12 = vadd.f32 %v12522_v59, %v12521_v53  ;;  %v4690_v37 = vmul.f32 %v4626_v9, %v10628_v61  ;;  %12524 = vst [vmem:[#allocation203_spill] sm:$0xff] %v10734_v21  ;;  %v4624_v54 = vmul.f32 %v2251_v19, %v12527_v16  ;;  %v12533_v9 = vld [vmem:[#allocation43_spill] sm:$0xff]  ;;  %v12535_v19 = vld [vmem:[#allocation136_spill] sm:$0xff]  ;;  %v12539_v16 = vld [vmem:[#allocation205_spill] sm:$0xff] }
 0xa16   : > { %4944 = vmatpush.msra.mxu0 %v4693_v40  ;;  %v12526_v40 = vld [vmem:[#allocation243_spill] sm:$0xff]  ;;  %v2242_v61 = vadd.f32 %v12530_v63, %v12529_v13  ;;  %v12543_v63 = vunpack.i.l.bf16 %v10129_v7  ;;  %v12573_v21 = vld [vmem:[#allocation182_spill] sm:$0xff]  ;;  %v12592_v7 = vld [vmem:[#allocation80_spill] sm:$0xff] }
 0xa17   : > { %v2245_v32 = vadd.f32 %v12526_v40, %v12525_v44  ;;  %v4688_v4 = vmul.f32 %v4624_v54, %v10610_v42  ;;  %v12538_v44 = vld [vmem:[#allocation134_spill] sm:$0xff]  ;;  %v12540_v54 = vld [vmem:[#allocation239_spill] sm:$0xff] }
 0xa18   : > { %4945 = vmatpush.msra.mxu0 %v4692_v57  ;;  %v12531_v57 = vld [vmem:[#allocation138_spill] sm:$0xff]  ;;  %v10748_v53 = vpop.f32.mrf.mxu0  ;;  %v4621_v40 = vmul.f32 %v2242_v61, %v12538_v44 }
 0xa19   : > { %v4623_v28 = vmul.f32 %v2248_v12, %v12531_v57  ;;  %12534 = vst [vmem:[#allocation24_spill] sm:$0xff] %v10748_v53  ;;  %v4622_v35 = vmul.f32 %v2245_v32, %v12535_v19  ;;  %v12544_v61 = vld [vmem:[#allocation130_spill] sm:$0xff]  ;;  %v12547_v19 = vld [vmem:[#allocation233_spill] sm:$0xff] }
 0xa1a   : > { %4946 = vmatpush.msra.mxu0 %v4691_v58  ;;  %v2239_v58 = vadd.f32 %v12533_v9, %v12532_v60  ;;  %v4685_v32 = vmul.f32 %v4621_v40, %v10582_v39 }
 0xa1b   : > { %v10732_v14 = vpop.f32.mrf.mxu1  ;;  %v4687_v59 = vmul.f32 %v4623_v28, %v10600_v6  ;;  %v4686_v12 = vmul.f32 %v4622_v35, %v10592_v0  ;;  %v12545_v28 = vld [vmem:[#allocation127_spill] sm:$0xff]  ;;  %v6548_v35 = vld [vmem:[#allocation4 + $0x1b0] sm:$0xf] }
 0xa1c   : > { %4947 = vmatpush.msra.mxu0 %v4690_v37  ;;  %v2236_v37 = vadd.f32 %v12537_v3, %v12536_v15  ;;  %v10762_v6 = vpop.f32.mrf.mxu2  ;;  %v12550_v15 = vld [vmem:[#allocation56_spill] sm:$0xff] }
 0xa1d   : > { %6071 = vmatmul.lmr.bf16.gmra.16.mxu3  ;;  %4820 = vmatmul.f32.gmra.mxu2 %v12528_v22  ;;  %v12541_v22 = vld [vmem:[#allocation132_spill] sm:$0xff]  ;;  %12542 = vst [vmem:[#allocation147_spill] sm:$0xff] %v10762_v6 }
 0xa1e   : > { %4948 = vmatpush.msra.mxu0 %v4689_v50  ;;  %v2233_v50 = vadd.f32 %v12540_v54, %v12539_v16  ;;  %v4620_v13 = vmul.f32 %v2239_v58, %v12541_v22  ;;  %v4619_v57 = vmul.f32 %v2236_v37, %v12544_v61  ;;  %v12552_v37 = vld [vmem:[#allocation172_spill] sm:$0xff]  ;;  %v12556_v54 = vld [vmem:[#allocation51_spill] sm:$0xff] }
 0xa20   : > { %4949 = vmatpush.msra.mxu0 %v4688_v4  ;;  %v4684_v0 = vmul.f32 %v4620_v13, %v10567_v2  ;;  %v4618_v4 = vmul.f32 %v2233_v50, %v12545_v28  ;;  %v4683_v60 = vmul.f32 %v4619_v57, %v10547_v8  ;;  %v10770_v9 = vpop.f32.mrf.mxu0  ;;  %v12563_v28 = vld [vmem:[#allocation242_spill] sm:$0xff] }
 0xa21   : > { %12546 = vst [vmem:[#allocation200_spill] sm:$0xff] %v10770_v9 }
 0xa22   : > { %4950 = vmatpush.msra.mxu0 %v4687_v59  ;;  %v4682_v39 = vmul.f32 %v4618_v4, %v10528_v45 }
 0xa23   : > { %v10756_v42 = vpop.f32.mrf.mxu1 }
 0xa24   : > { %4951 = vmatpush.msra.mxu0 %v4686_v12  ;;  %v10793_v12 = vpop.f32.mrf.mxu2 }
 0xa25   : > { %6072 = vmatmul.lmr.bf16.gmra.16.mxu3  ;;  %4823 = vmatmul.f32.gmra.mxu2 %v12543_v63  ;;  %12555 = vst [vmem:[#allocation90_spill] sm:$0xff] %v10793_v12  ;;  %v12560_v63 = vld [vmem:[#allocation245_spill] sm:$0xff] }
 0xa26   : > { %4952 = vmatpush.msra.mxu0 %v4685_v32 }
 0xa28   : > { %4953 = vmatpush.msra.mxu0 %v4684_v0  ;;  %v10781_v8 = vpop.f32.mrf.mxu0 }
 0xa29   : > { %12549 = vst [vmem:[#allocation145_spill] sm:$0xff] %v10781_v8  ;;  %v12590_v8 = vld [vmem:[#allocation35_spill] sm:$0xff] }
 0xa2a   : > { %4954 = vmatpush.msra.mxu0 %v4683_v60 }
 0xa2b   : > { %v10773_v58 = vpop.f32.mrf.mxu1 }
 0xa2c   : > { %4955 = vmatpush.msra.mxu0 %v4682_v39  ;;  %v10804_v32 = vpop.f32.mrf.mxu2 }
 0xa2d   : > { %4891 = vmatmul.f32.gmra.mxu3 %v12547_v19  ;;  %5874 = vmatmul.lmr.bf16.vlgmr.msra.gmra.16.mxu0  ;;  %12559 = vst [vmem:[#allocation86_spill] sm:$0xff] %v10804_v32 }
 0xa2e   : > { %5733 = vmatpush.msk.msra.mxu0 %vm4373_vm2, %v6548_v35  ;;  %v12566_v35 = vld [vmem:[#allocation40_spill] sm:$0xff] }
 0xa30   : > { %v10777_v2 = vpop.f32.mrf.mxu3  ;;  %v10789_v44 = vpop.f32.mrf.mxu0 }
 0xa31   : > { %12548 = vst [vmem:[#allocation22_spill] sm:$0xff] %v10777_v2  ;;  %v12591_v2 = vld [vmem:[#allocation231_spill] sm:$0xff] }
 0xa32   : > { %12553 = vst [vmem:[#allocation20_spill] sm:$0xff] %v10789_v44  ;;  %v12587_v44 = vld [vmem:[#allocation135_spill] sm:$0xff]  ;;  %v2320_v9 = vadd.f32 %v12591_v2, %v12590_v8 }
 0xa33   : > { %v10779_v59 = vpop.f32.mrf.mxu1  ;;  %v12602_v8 = vld [vmem:[#allocation131_spill] sm:$0xff] }
 0xa34   : > { %v10814_v4 = vpop.f32.mrf.mxu2 }
 0xa35   : > { %4894 = vmatmul.f32.gmra.mxu3 %v12550_v15  ;;  %5875 = vmatmul.lmr.bf16.gmra.16.mxu0 }
 0xa38   : > { %v10784_v45 = vpop.f32.mrf.mxu3  ;;  %v10798_v50 = vpop.f32.mrf.mxu0 }
 0xa39   : > { %12551 = vst [vmem:[#allocation198_spill] sm:$0xff] %v10784_v45 }
 0xa3a   : > { %12557 = vst [vmem:[#allocation18_spill] sm:$0xff] %v10798_v50  ;;  %v12585_v50 = vld [vmem:[#allocation137_spill] sm:$0xff] }
 0xa3b   : > { %v10786_v3 = vpop.f32.mrf.mxu1 }
 0xa3d   : > { %4897 = vmatmul.f32.gmra.mxu3 %v12552_v37  ;;  %5876 = vmatmul.lmr.bf16.gmra.16.mxu0  ;;  %v10825_v37 = vpop.f32.mrf.mxu2 }
 0xa3e   : > { %12568 = vst [vmem:[#allocation11_spill] sm:$0xff] %v10825_v37  ;;  %v12603_v37 = vld [vmem:[#allocation71_spill] sm:$0xff] }
 0xa40   : > { %v10791_v40 = vpop.f32.mrf.mxu3  ;;  %v10809_v57 = vpop.f32.mrf.mxu0 }
 0xa41   : > { %12554 = vst [vmem:[#allocation143_spill] sm:$0xff] %v10791_v40 }
 0xa42   : > { %12562 = vst [vmem:[#allocation139_spill] sm:$0xff] %v10809_v57 }
 0xa43   : > { %v10795_v16 = vpop.f32.mrf.mxu1 }
 0xa45   : > { %4900 = vmatmul.f32.gmra.mxu3 %v12556_v54  ;;  %5877 = vmatmul.lmr.bf16.gmra.16.mxu0  ;;  %v10832_v12 = vpop.f32.mrf.mxu2 }
 0xa46   : > { %12572 = vst [vmem:[#allocation199_spill] sm:$0xff] %v10832_v12 }
 0xa48   : > { %v10800_v22 = vpop.f32.mrf.mxu3  ;;  %v10820_v19 = vpop.f32.mrf.mxu0 }
 0xa49   : > { %12558 = vst [vmem:[#allocation141_spill] sm:$0xff] %v10800_v22  ;;  %v12583_v22 = vld [vmem:[#allocation259_spill] sm:$0xff] }
 0xa4a   : > { %12565 = vst [vmem:[#allocation14_spill] sm:$0xff] %v10820_v19  ;;  %v12577_v19 = vld [vmem:[#allocation247_spill] sm:$0xff] }
 0xa4b   : > { %v10802_v13 = vpop.f32.mrf.mxu1 }
 0xa4d   : > { %4903 = vmatmul.f32.gmra.mxu3 %v12560_v63  ;;  %5878 = vmatmul.lmr.bf16.gmra.16.mxu0  ;;  %v12569_v63 = vld [vmem:[#allocation53_spill] sm:$0xff]  ;;  %v10839_v52 = vpop.f32.mrf.mxu2 }
 0xa4e   : > { %12576 = vst [vmem:[#allocation128_spill] sm:$0xff] %v10839_v52 }
 0xa50   : > { %v10807_v61 = vpop.f32.mrf.mxu3 }
 0xa51   : > { %12561 = vst [vmem:[#allocation16_spill] sm:$0xff] %v10807_v61  ;;  %v12580_v61 = vld [vmem:[#allocation252_spill] sm:$0xff] }
 0xa53   : > { %v10811_v0 = vpop.f32.mrf.mxu1 }
 0xa55   : > { %4906 = vmatmul.f32.gmra.mxu3 %v12563_v28  ;;  %5879 = vmatmul.lmr.bf16.gmra.16.mxu0  ;;  %v10828_v28 = vpop.f32.mrf.mxu0 }
 0xa56   : > { %12570 = vst [vmem:[#allocation202_spill] sm:$0xff] %v10828_v28 }
 0xa58   : > { %v10816_v60 = vpop.f32.mrf.mxu3 }
 0xa59   : > { %12564 = vst [vmem:[#allocation83_spill] sm:$0xff] %v10816_v60 }
 0xa5b   : > { %v10818_v39 = vpop.f32.mrf.mxu1 }
 0xa5d   : > { %4909 = vmatmul.f32.gmra.mxu3 %v12566_v35  ;;  %5880 = vmatmul.lmr.bf16.gmra.16.mxu0  ;;  %v10835_v35 = vpop.f32.mrf.mxu0 }
 0xa5e   : > { %12574 = vst [vmem:[#allocation37_spill] sm:$0xff] %v10835_v35 }
 0xa60   : > { %v10823_v15 = vpop.f32.mrf.mxu3 }
 0xa61   : > { %12567 = vst [vmem:[#allocation12_spill] sm:$0xff] %v10823_v15 }
 0xa63   : > { %v4568_v54 = vpop.f32.mrf.mxu1 }
 0xa65   : > { %4912 = vmatmul.f32.gmra.mxu3 %v12569_v63  ;;  %5881 = vmatmul.lmr.bf16.gmra.16.mxu0  ;;  %v10844_v28 = vpop.f32.mrf.mxu0 }
 0xa66   : > { %12579 = vst [vmem:[#allocation196_spill] sm:$0xff] %v10844_v28 }
 0xa68   : > { %v10830_v32 = vpop.f32.mrf.mxu3 }
 0xa69   : > { %12571 = vst [vmem:[#allocation39_spill] sm:$0xff] %v10830_v32 }
 0xa6b   : > { %v4571_v6 = vpop.f32.mrf.mxu1 }
 0xa6d   : > { %4915 = vmatmul.f32.gmra.mxu3 %v12573_v21  ;;  %5882 = vmatmul.lmr.bf16.gmra.16.mxu0  ;;  %v10847_v21 = vpop.f32.mrf.mxu2 }
 0xa6e   : > { %12581 = vst [vmem:[#allocation125_spill] sm:$0xff] %v10847_v21  ;;  %v12594_v21 = vld [vmem:[#allocation133_spill] sm:$0xff] }
 0xa70   : > { %v10837_v60 = vpop.f32.mrf.mxu3 }
 0xa71   : > { %12575 = vst [vmem:[#allocation197_spill] sm:$0xff] %v10837_v60  ;;  %v10851_v60 = vpop.f32.mrf.mxu0 }
 0xa72   : > { %12582 = vst [vmem:[#allocation121_spill] sm:$0xff] %v10851_v60  ;;  %v12593_v60 = vld [vmem:[#allocation34_spill] sm:$0xff] }
 0xa73   : > { %v4574_v15 = vpop.f32.mrf.mxu1 }
 0xa75   : > { %4918 = vmatmul.f32.gmra.mxu3 %v12577_v19  ;;  %5883 = vmatmul.lmr.bf16.gmra.16.mxu0  ;;  %v12584_v19 = vld [vmem:[#allocation38_spill] sm:$0xff] }
 0xa76   : > { %v2326_v40 = vadd.f32 %v12585_v50, %v12584_v19  ;;  %v12596_v50 = vld [vmem:[#allocation264_spill] sm:$0xff] }
 0xa78   : > { %v10842_v63 = vpop.f32.mrf.mxu3  ;;  %v4649_v53 = vmul.f32 %v2326_v40, %v12592_v7  ;;  %v12601_v7 = vld [vmem:[#allocation119_spill] sm:$0xff] }
 0xa79   : > { %12578 = vst [vmem:[#allocation124_spill] sm:$0xff] %v10842_v63  ;;  %v12586_v63 = vld [vmem:[#allocation36_spill] sm:$0xff]  ;;  %v10871_v12 = vpop.f32.mrf.mxu0  ;;  %v2311_v40 = vadd.f32 %v12602_v8, %v12601_v7 }
 0xa7a   : > { %v2323_v28 = vadd.f32 %v12587_v44, %v12586_v63  ;;  %v12597_v44 = vld [vmem:[#allocation122_spill] sm:$0xff]  ;;  %v12598_v63 = vld [vmem:[#allocation228_spill] sm:$0xff]  ;;  %12599 = vst [vmem:[#allocation118_spill] sm:$0xff] %v10871_v12 }
 0xa7b   : > { %v4577_v32 = vpop.f32.mrf.mxu1  ;;  %v2314_v19 = vadd.f32 %v12598_v63, %v12597_v44 }
 0xa7c   : > { %v4648_v5 = vmul.f32 %v2323_v28, %v12595_v47 }
 0xa7d   : > { %4921 = vmatmul.f32.gmra.mxu3 %v12580_v61  ;;  %5884 = vmatmul.lmr.bf16.gmra.16.mxu0  ;;  %v10860_v61 = vpop.f32.mrf.mxu2 }
 0xa7e   : > { %12589 = vst [vmem:[#allocation33_spill] sm:$0xff] %v10860_v61  ;;  %v12600_v61 = vld [vmem:[#allocation74_spill] sm:$0xff] }
 0xa80   : > { %v10849_v57 = vpop.f32.mrf.mxu3 }
 0xa83   : > { %v4580_v35 = vpop.f32.mrf.mxu1 }
 0xa84   : > { %v4712_v2 = vmul.f32 %v4648_v5, %v4580_v35  ;;  %v12607_v5 = vld [vmem:[#allocation113_spill] sm:$0xff] }
 0xa85   : > { %4924 = vmatmul.f32.gmra.mxu3 %v12583_v22  ;;  %5885 = vmatmul.lmr.bf16.gmra.16.mxu0  ;;  %v2317_v22 = vadd.f32 %v12594_v21, %v12593_v60  ;;  %v10882_v12 = vpop.f32.mrf.mxu2  ;;  %v12609_v35 = vld [vmem:[#allocation65_spill] sm:$0xff] }
 0xa87   : > { %v4646_v60 = vmul.f32 %v2317_v22, %v12603_v37  ;;  %v12612_v37 = vld [vmem:[#allocation222_spill] sm:$0xff] }
 0xa88   : > { %v10858_v45 = vpop.f32.mrf.mxu3 }
 0xa89   : > { %12588 = vst [vmem:[#allocation195_spill] sm:$0xff] %v10858_v45  ;;  %v4647_v45 = vmul.f32 %v2320_v9, %v12600_v61  ;;  %v4710_v63 = vmul.f32 %v4646_v60, %v4574_v15  ;;  %v4644_v61 = vmul.f32 %v2311_v40, %v12609_v35  ;;  %v12614_v15 = vld [vmem:[#allocation25_spill] sm:$0xff]  ;;  %v12615_v60 = vld [vmem:[#allocation120_spill] sm:$0xff] }
 0xa8b   : > { %v4583_v62 = vpop.f32.mrf.mxu1  ;;  %v4711_v21 = vmul.f32 %v4647_v45, %v4577_v32  ;;  %v12610_v45 = vld [vmem:[#allocation269_spill] sm:$0xff]  ;;  %v12611_v32 = vld [vmem:[#allocation111_spill] sm:$0xff] }
 0xa8c   : > { %v4713_v52 = vmul.f32 %v4649_v53, %v4583_v62  ;;  %v12604_v62 = vld [vmem:[#allocation116_spill] sm:$0xff]  ;;  %v12605_v53 = vld [vmem:[#allocation225_spill] sm:$0xff]  ;;  %v2302_v22 = vadd.f32 %v12612_v37, %v12611_v32 }
 0xa8d   : > { %4927 = vmatmul.f32.gmra.mxu3 %v12596_v50  ;;  %5886 = vmatmul.lmr.bf16.gmra.16.mxu0  ;;  %v2308_v28 = vadd.f32 %v12605_v53, %v12604_v62  ;;  %v12606_v50 = vld [vmem:[#allocation68_spill] sm:$0xff]  ;;  %v10893_v62 = vpop.f32.mrf.mxu0  ;;  %v12616_v53 = vld [vmem:[#allocation30_spill] sm:$0xff] }
 0xa8e   : > { %5053 = vmatpush.msra.mxu2 %v4713_v52  ;;  %v4645_v44 = vmul.f32 %v2314_v19, %v12606_v50  ;;  %v12608_v52 = vld [vmem:[#allocation129_spill] sm:$0xff]  ;;  %v4708_v19 = vmul.f32 %v4644_v61, %v4568_v54  ;;  %v12621_v61 = vld [vmem:[#allocation46_spill] sm:$0xff]  ;;  %v12623_v32 = vld [vmem:[#allocation96_spill] sm:$0xff] }
 0xa8f   : > { %v2305_v9 = vadd.f32 %v12608_v52, %v12607_v5  ;;  %v12619_v52 = vld [vmem:[#allocation28_spill] sm:$0xff] }
 0xa90   : > { %v10877_v47 = vpop.f32.mrf.mxu3  ;;  %5054 = vmatpush.msra.mxu2 %v4712_v2  ;;  %v4709_v7 = vmul.f32 %v4645_v44, %v4571_v6  ;;  %v12613_v2 = vld [vmem:[#allocation32_spill] sm:$0xff]  ;;  %v12617_v44 = vld [vmem:[#allocation23_spill] sm:$0xff]  ;;  %v4641_v35 = vmul.f32 %v2302_v22, %v12619_v52  ;;  %v12627_v22 = vld [vmem:[#allocation93_spill] sm:$0xff] }
 0xa91   : > { %v4643_v8 = vmul.f32 %v2308_v28, %v12613_v2  ;;  %v4642_v50 = vmul.f32 %v2305_v9, %v12616_v53  ;;  %v12620_v28 = vld [vmem:[#allocation246_spill] sm:$0xff]  ;;  %v12628_v53 = vld [vmem:[#allocation171_spill] sm:$0xff]  ;;  %v12631_v52 = vld [vmem:[#allocation168_spill] sm:$0xff] }
 0xa92   : > { %5055 = vmatpush.msra.mxu2 %v4711_v21  ;;  %v2299_v21 = vadd.f32 %v12615_v60, %v12614_v15  ;;  %v12624_v9 = vld [vmem:[#allocation26_spill] sm:$0xff] }
 0xa93   : > { %v4707_v6 = vmul.f32 %v4643_v8, %v10818_v39  ;;  %v4706_v54 = vmul.f32 %v4642_v50, %v10811_v0  ;;  %v4705_v39 = vmul.f32 %v4641_v35, %v10802_v13  ;;  %v10909_v8 = vpop.f32.mrf.mxu2  ;;  %v12626_v0 = vld [vmem:[#allocation19_spill] sm:$0xff]  ;;  %v12630_v13 = vld [vmem:[#allocation89_spill] sm:$0xff] }
 0xa94   : > { %5056 = vmatpush.msra.mxu2 %v4710_v63  ;;  %v12618_v63 = vld [vmem:[#allocation106_spill] sm:$0xff]  ;;  %v4640_v2 = vmul.f32 %v2299_v21, %v12624_v9  ;;  %v2290_v60 = vadd.f32 %v12627_v22, %v12626_v0 }
 0xa95   : > { %4930 = vmatmul.f32.gmra.mxu3 %v12610_v45  ;;  %5887 = vmatmul.lmr.bf16.gmra.16.mxu0  ;;  %v2296_v5 = vadd.f32 %v12618_v63, %v12617_v44  ;;  %v12622_v45 = vld [vmem:[#allocation21_spill] sm:$0xff]  ;;  %v12636_v9 = vld [vmem:[#allocation42_spill] sm:$0xff] }
 0xa96   : > { %5057 = vmatpush.msra.mxu2 %v4709_v7  ;;  %v3802_v7 = vadd.f32 %v12621_v61, %v12620_v28  ;;  %v2293_v37 = vadd.f32 %v12623_v32, %v12622_v45  ;;  %v12629_v44 = vld [vmem:[#allocation17_spill] sm:$0xff]  ;;  %v10926_v45 = vpop.f32.mrf.mxu0 }
 0xa97   : > { %v4639_v50 = vmul.f32 %v2296_v5, %v12628_v53  ;;  %v2287_v63 = vadd.f32 %v12630_v13, %v12629_v44  ;;  %v12633_v61 = vld [vmem:[#allocation85_spill] sm:$0xff]  ;;  %v12634_v5 = vld [vmem:[#allocation166_spill] sm:$0xff]  ;;  %v12640_v53 = vld [vmem:[#allocation267_spill] sm:$0xff] }
 0xa98   : > { %v10897_v40 = vpop.f32.mrf.mxu3  ;;  %5058 = vmatpush.msra.mxu2 %v4708_v19  ;;  %v12625_v19 = vld [vmem:[#allocation260_spill] sm:$0xff]  ;;  %v4638_v35 = vmul.f32 %v2293_v37, %v12631_v52 }
 0xa99   : > { %v3915_v15 = vadd.f32 %v12625_v19, %v3802_v7  ;;  %v12637_v37 = vld [vmem:[#allocation92_spill] sm:$0xff]  ;;  %v12638_v19 = vld [vmem:[#allocation82_spill] sm:$0xff] }
 0xa9a   : > { %5059 = vmatpush.msra.mxu2 %v4707_v6  ;;  %v4704_v6 = vmul.f32 %v4640_v2, %v10795_v16  ;;  %v4637_v16 = vmul.f32 %v2290_v60, %v12634_v5  ;;  %v4702_v32 = vmul.f32 %v4638_v35, %v10779_v59  ;;  %v12642_v60 = vld [vmem:[#allocation162_spill] sm:$0xff]  ;;  %v12643_v52 = vld [vmem:[#allocation160_spill] sm:$0xff] }
 0xa9b   : > { %v4028_v21 = vadd.f32 %v10322_v55, %v3915_v15  ;;  %v12635_v55 = vld [vmem:[#allocation45_spill] sm:$0xff]  ;;  %v12639_v15 = vld [vmem:[#allocation164_spill] sm:$0xff]  ;;  %v10940_v13 = vpop.f32.mrf.mxu2 }
 0xa9c   : > { %5060 = vmatpush.msra.mxu2 %v4706_v54  ;;  %v4703_v54 = vmul.f32 %v4639_v50, %v10786_v3  ;;  %v3805_v2 = vadd.f32 %v12636_v9, %v12635_v55  ;;  %v2281_v3 = vadd.f32 %v12638_v19, %v12637_v37  ;;  %v4636_v0 = vmul.f32 %v2287_v63, %v12639_v15  ;;  %v12649_v37 = vld [vmem:[#allocation54_spill] sm:$0xff] }
 0xa9d   : > { %4933 = vmatmul.f32.gmra.mxu3 %v10112_v49  ;;  %5888 = vmatmul.lmr.bf16.gmra.16.mxu0  ;;  %v12632_v49 = vld [vmem:[#allocation95_spill] sm:$0xff]  ;;  %v4701_v22 = vmul.f32 %v4637_v16, %v10773_v58  ;;  %v12647_v55 = vunpack.i.h.bf16 %v12440_v18 }
 0xa9e   : > { %5061 = vmatpush.msra.mxu2 %v4705_v39  ;;  %v2284_v7 = vadd.f32 %v12633_v61, %v12632_v49  ;;  %v4119_v39 = vmax.f32 %v4028_v21, 1e-20  ;;  %v3918_v50 = vadd.f32 %v12640_v53, %v3805_v2  ;;  %v4700_v44 = vmul.f32 %v4636_v0, %v10756_v42  ;;  %v12644_v61 = vld [vmem:[#allocation41_spill] sm:$0xff]  ;;  %v12645_v42 = vld [vmem:[#allocation58_spill] sm:$0xff]  ;;  %v12650_v0 = vld [vmem:[#allocation276_spill] sm:$0xff] }
 0xa9f   : > { %v4634_v63 = vmul.f32 %v2281_v3, %v12643_v52 }
 0xaa0   : > { %v10922_v28 = vpop.f32.mrf.mxu3  ;;  %5062 = vmatpush.msra.mxu2 %v4704_v6  ;;  %v12641_v6 = vld [vmem:[#allocation280_spill] sm:$0xff]  ;;  %v4635_v59 = vmul.f32 %v2284_v7, %v12642_v60  ;;  %6370 = vrcp.f32 %v4119_v39  ;;  %v4031_v21 = vadd.f32 %v10331_v24, %v3918_v50  ;;  %v3808_v7 = vadd.f32 %v12645_v42, %v12644_v61  ;;  %v12648_v39 = vld [vmem:[#allocation55_spill] sm:$0xff]  ;;  %v12657_v61 = vld [vmem:[#allocation337_spill] sm:$0xff] }
 0xaa1   : > { %v3811_v19 = vadd.f32 %v12649_v37, %v12648_v39  ;;  %v12660_v37 = vld [vmem:[#allocation285_spill] sm:$0xff] }
 0xaa2   : > { %5063 = vmatpush.msra.mxu2 %v4703_v54  ;;  %v4699_v58 = vmul.f32 %v4635_v59, %v10732_v14  ;;  %v4698_v54 = vmul.f32 %v4634_v63, %v10711_v10  ;;  %v4120_v5 = vmax.f32 %v4031_v21, 1e-20  ;;  %v12653_v59 = vld [vmem:[#allocation67_spill] sm:$0xff] }
 0xaa3   : > { %v10959_v9 = vpop.f32.mrf.mxu2  ;;  %v3924_v18 = vadd.f32 %v12650_v0, %v3811_v19  ;;  %v12661_v19 = vunpack.i.h.bf16 %v12452_v46  ;;  %v12666_v46 = vunpack.i.h.bf16 %v12456_v26 }
 0xaa4   : > { %5064 = vmatpush.msra.mxu2 %v4702_v32  ;;  %v12646_v32 = vld [vmem:[#allocation272_spill] sm:$0xff]  ;;  %6372 = vrcp.f32 %v4120_v5 }
 0xaa5   : > { %4936 = vmatmul.f32.gmra.mxu3 %v12641_v6  ;;  %5889 = vmatmul.lmr.bf16.gmra.16.mxu0  ;;  %v3921_v24 = vadd.f32 %v12646_v32, %v3808_v7  ;;  %v12659_v32 = vld [vmem:[#allocation180_spill] sm:$0xff] }
 0xaa6   : > { %5065 = vmatpush.msra.mxu2 %v4701_v22  ;;  %v6371_v16 = vpop.eup %6370  ;;  %v12651_v22 = vunpack.i.h.bf16 %v12444_v25 }
 0xaa7   : > { %v4034_v10 = vadd.f32 %v10341_v38, %v3921_v24  ;;  %v12652_v38 = vld [vmem:[#allocation334_spill] sm:$0xff] }
 0xaa8   : > { %v10945_v35 = vpop.f32.mrf.mxu3  ;;  %5066 = vmatpush.msra.mxu2 %v4700_v44  ;;  %v4037_v53 = vadd.f32 %v12652_v38, %v3924_v18  ;;  %v12654_v44 = vld [vmem:[#allocation60_spill] sm:$0xff]  ;;  %v12664_v38 = vld [vmem:[#allocation249_spill] sm:$0xff] }
 0xaa9   : > { %v4121_v3 = vmax.f32 %v4034_v10, 1e-20  ;;  %v3814_v21 = vadd.f32 %v12654_v44, %v12653_v59 }
 0xaaa   : > { %v10948_v49 = vpop.f32.mrf.mxu0  ;;  %5067 = vmatpush.msra.mxu2 %v4699_v58  ;;  %v6373_v15 = vpop.eup %6372  ;;  %v4122_v52 = vmax.f32 %v4037_v53, 1e-20  ;;  %v12655_v58 = vld [vmem:[#allocation281_spill] sm:$0xff] }
 0xaab   : > { %6374 = vrcp.f32 %v4121_v3  ;;  %v10974_v60 = vpop.f32.mrf.mxu2  ;;  %v3927_v25 = vadd.f32 %v12655_v58, %v3814_v21  ;;  %v12662_v3 = vld [vmem:[#allocation230_spill] sm:$0xff]  ;;  %v12665_v21 = vld [vmem:[#allocation332_spill] sm:$0xff] }
 0xaac   : > { %5068 = vmatpush.msra.mxu2 %v4698_v54  ;;  %v12656_v54 = vunpack.i.h.bf16 %v12448_v27  ;;  %6376 = vrcp.f32 %v4122_v52 }
 0xaad   : > { %5004 = vmatmul.f32.gmra.mxu0 %v12647_v55  ;;  %6021 = vmatmul.lmr.bf16.vlgmr.msra.gmra.16.mxu2  ;;  %v4040_v42 = vadd.f32 %v12657_v61, %v3927_v25  ;;  %v12667_v61 = vld [vmem:[#allocation256_spill] sm:$0xff] }
 0xaae   : > { %5736 = vmatmul.msk.f32.vlgmr.msra.gmra.mxu3 %vm3083_vm1, %v6371_v16  ;;  %v12658_v16 = vld [vmem:[#allocation62_spill] sm:$0xff] }
 0xaaf   : > { %v3817_v24 = vadd.f32 %v12659_v32, %v12658_v16  ;;  %v4123_v55 = vmax.f32 %v4040_v42, 1e-20  ;;  %v12668_v42 = vld [vmem:[#allocation254_spill] sm:$0xff] }
 0xab0   : > { %v10957_v14 = vpop.f32.mrf.mxu3  ;;  %v3823_v16 = vadd.f32 %v12668_v42, %v12667_v61  ;;  %v12676_v61 = vld [vmem:[#allocation262_spill] sm:$0xff] }
 0xab1   : > { %v6375_v63 = vpop.eup %6374  ;;  %v3930_v27 = vadd.f32 %v12660_v37, %v3817_v24  ;;  %6378 = vrcp.f32 %v4123_v55  ;;  %v12669_v55 = vld [vmem:[#allocation335_spill] sm:$0xff] }
 0xab2   : > { %v10961_v2 = vpop.f32.mrf.mxu0  ;;  %v6377_v39 = vpop.eup %6376  ;;  %v3936_v26 = vadd.f32 %v12669_v55, %v3823_v16  ;;  %v12678_v55 = vunpack.i.h.bf16 %v12467_v20 }
 0xab3   : > { %v10989_v10 = vpop.f32.mrf.mxu2 }
 0xab5   : > { %5007 = vmatmul.f32.gmra.mxu0 %v12651_v22  ;;  %6022 = vmatmul.lmr.bf16.gmra.16.mxu2  ;;  %v12663_v22 = vld [vmem:[#allocation251_spill] sm:$0xff] }
 0xab6   : > { %5737 = vmatmul.msk.f32.gmra.mxu3 %vm3083_vm1, %v6373_v15  ;;  %v4043_v15 = vadd.f32 %v12662_v3, %v3930_v27  ;;  %v3820_v53 = vadd.f32 %v12664_v38, %v12663_v22  ;;  %v12671_v3 = vld [vmem:[#allocation263_spill] sm:$0xff] }
 0xab7   : > { %v6379_v44 = vpop.eup %6378 }
 0xab8   : > { %v10970_v50 = vpop.f32.mrf.mxu3  ;;  %v4124_v59 = vmax.f32 %v4043_v15, 1e-20  ;;  %v3933_v52 = vadd.f32 %v12665_v21, %v3820_v53  ;;  %v12672_v15 = vld [vmem:[#allocation258_spill] sm:$0xff] }
 0xab9   : > { %v3826_v22 = vadd.f32 %v12672_v15, %v12671_v3  ;;  %v12680_v3 = vld [vmem:[#allocation266_spill] sm:$0xff] }
 0xaba   : > { %v10972_v6 = vpop.f32.mrf.mxu0  ;;  %6380 = vrcp.f32 %v4124_v59  ;;  %v4046_v58 = vadd.f32 %v10602_v30, %v3933_v52  ;;  %v4049_v30 = vadd.f32 %v10614_v17, %v3936_v26  ;;  %v12673_v59 = vld [vmem:[#allocation338_spill] sm:$0xff] }
 0xabc   : > { %v4125_v32 = vmax.f32 %v4046_v58, 1e-20  ;;  %v4126_v38 = vmax.f32 %v4049_v30, 1e-20  ;;  %v12675_v58 = vld [vmem:[#allocation268_spill] sm:$0xff]  ;;  %v12679_v30 = vld [vmem:[#allocation273_spill] sm:$0xff] }
 0xabd   : > { %5010 = vmatmul.f32.gmra.mxu0 %v12656_v54  ;;  %6023 = vmatmul.lmr.bf16.gmra.16.mxu2  ;;  %v3829_v42 = vadd.f32 %v12676_v61, %v12675_v58  ;;  %v3832_v15 = vadd.f32 %v12680_v3, %v12679_v30  ;;  %v12683_v58 = vld [vmem:[#allocation271_spill] sm:$0xff] }
 0xabe   : > { %5738 = vmatmul.msk.f32.gmra.mxu3 %vm3083_vm1, %v6375_v63  ;;  %v11006_v63 = vpop.f32.mrf.mxu2  ;;  %6382 = vrcp.f32 %v4125_v32  ;;  %v12686_v30 = vld [vmem:[#allocation275_spill] sm:$0xff] }
 0xabf   : > { %6384 = vrcp.f32 %v4126_v38  ;;  %v3945_v20 = vadd.f32 %v10408_v31, %v3832_v15 }
 0xac0   : > { %v10983_v7 = vpop.f32.mrf.mxu3  ;;  %v6381_v24 = vpop.eup %6380 }
 0xac2   : > { %v10985_v5 = vpop.f32.mrf.mxu0 }
 0xac4   : > { %v6383_v53 = vpop.eup %6382 }
 0xac5   : > { %5013 = vmatmul.f32.gmra.mxu0 %v12661_v19  ;;  %6024 = vmatmul.lmr.bf16.gmra.16.mxu2  ;;  %v6385_v32 = vpop.eup %6384 }
 0xac6   : > { %5739 = vmatmul.msk.f32.gmra.mxu3 %vm3083_vm1, %v6377_v39  ;;  %v12670_v39 = vunpack.i.h.bf16 %v12459_v51  ;;  %v11022_v27 = vpop.f32.mrf.mxu2  ;;  %v3939_v51 = vadd.f32 %v12673_v59, %v3826_v22  ;;  %v12681_v59 = vunpack.i.h.bf16 %v12471_v48  ;;  %v12684_v48 = vunpack.i.h.bf16 %v12475_v33 }
 0xac8   : > { %v10996_v0 = vpop.f32.mrf.mxu3  ;;  %v4052_v17 = vadd.f32 %v10626_v29, %v3939_v51 }
 0xaca   : > { %v10998_v18 = vpop.f32.mrf.mxu0  ;;  %v4127_v16 = vmax.f32 %v4052_v17, 1e-20  ;;  %v12682_v17 = vld [vmem:[#allocation277_spill] sm:$0xff] }
 0xacb   : > { %v3835_v61 = vadd.f32 %v12683_v58, %v12682_v17  ;;  %v12690_v58 = vld [vmem:[#allocation286_spill] sm:$0xff] }
 0xacc   : > { %6386 = vrcp.f32 %v4127_v16 }
 0xacd   : > { %5016 = vmatmul.f32.gmra.mxu0 %v12666_v46  ;;  %6025 = vmatmul.lmr.bf16.gmra.16.mxu2  ;;  %v3948_v31 = vadd.f32 %v10434_v43, %v3835_v61  ;;  %v12691_v61 = vld [vmem:[#allocation279_spill] sm:$0xff] }
 0xace   : > { %5740 = vmatmul.msk.f32.gmra.mxu3 %vm3083_vm1, %v6379_v44  ;;  %v12674_v44 = vunpack.i.h.bf16 %v12463_v56  ;;  %v11037_v46 = vpop.f32.mrf.mxu2 }
 0xad0   : > { %v11009_v25 = vpop.f32.mrf.mxu3 }
 0xad2   : > { %v11011_v54 = vpop.f32.mrf.mxu0 }
 0xad5   : > { %5019 = vmatmul.f32.gmra.mxu0 %v12670_v39  ;;  %6026 = vmatmul.lmr.bf16.gmra.16.mxu2 }
 0xad6   : > { %5741 = vmatmul.msk.f32.gmra.mxu3 %vm3083_vm1, %v6381_v24  ;;  %v12677_v24 = vld [vmem:[#allocation167_spill] sm:$0xff]  ;;  %v11052_v38 = vpop.f32.mrf.mxu2 }
 0xad7   : > { %v3942_v56 = vadd.f32 %v12677_v24, %v3829_v42 }
 0xad8   : > { %v11020_v37 = vpop.f32.mrf.mxu3 }
 0xad9   : > { %v4055_v29 = vadd.f32 %v10636_v36, %v3942_v56  ;;  %v4058_v36 = vadd.f32 %v10648_v11, %v3945_v20  ;;  %v4061_v11 = vadd.f32 %v10658_v23, %v3948_v31  ;;  %v4875_v56 = vadd.f32 %v10849_v57, %v10814_v4  ;;  %v12688_v20 = vld [vmem:[#allocation11_spill] sm:$0xff] }
 0xada   : > { %v11024_v19 = vpop.f32.mrf.mxu0  ;;  %v12692_v31 = vld [vmem:[#allocation227_spill] sm:$0xff] }
 0xadb   : > { %v4128_v22 = vmax.f32 %v4055_v29, 1e-20  ;;  %v4129_v42 = vmax.f32 %v4058_v36, 1e-20  ;;  %v12685_v29 = vld [vmem:[#allocation282_spill] sm:$0xff] }
 0xadc   : > { %v3838_v43 = vadd.f32 %v12686_v30, %v12685_v29  ;;  %v4130_v3 = vmax.f32 %v4061_v11, 1e-20  ;;  %v12693_v11 = vld [vmem:[#allocation261_spill] sm:$0xff]  ;;  %v12696_v30 = vld [vmem:[#allocation199_spill] sm:$0xff] }
 0xadd   : > { %5022 = vmatmul.f32.gmra.mxu0 %v12674_v44  ;;  %6027 = vmatmul.lmr.bf16.gmra.16.mxu2  ;;  %6388 = vrcp.f32 %v4128_v22 }
 0xade   : > { %5742 = vmatmul.msk.f32.gmra.mxu3 %vm3083_vm1, %v6383_v53  ;;  %v6387_v53 = vpop.eup %6386  ;;  %6390 = vrcp.f32 %v4129_v42  ;;  %v3951_v22 = vadd.f32 %v10451_v34, %v3838_v43  ;;  %v3841_v34 = vadd.f32 %v12691_v61, %v12690_v58  ;;  %v4881_v43 = vadd.f32 %v10877_v47, %v12696_v30  ;;  %v12701_v61 = vld [vmem:[#allocation265_spill] sm:$0xff]  ;;  %v12703_v47 = vld [vmem:[#allocation103_spill] sm:$0xff] }
 0xadf   : > { %6392 = vrcp.f32 %v4130_v3 }
 0xae0   : > { %v11033_v21 = vpop.f32.mrf.mxu3  ;;  %v4064_v23 = vadd.f32 %v10668_v1, %v3951_v22  ;;  %v12695_v1 = vld [vmem:[#allocation59_spill] sm:$0xff]  ;;  %v12697_v22 = vld [vmem:[#allocation288_spill] sm:$0xff] }
 0xae2   : > { %v11035_v52 = vpop.f32.mrf.mxu0  ;;  %v4131_v42 = vmax.f32 %v4064_v23, 1e-20 }
 0xae3   : > { %v6389_v16 = vpop.eup %6388 }
 0xae4   : > { %v6391_v15 = vpop.eup %6390  ;;  %6394 = vrcp.f32 %v4131_v42 }
 0xae5   : > { %5025 = vmatmul.f32.gmra.mxu0 %v12678_v55  ;;  %6028 = vmatmul.lmr.bf16.gmra.16.mxu2 }
 0xae6   : > { %5743 = vmatmul.msk.f32.gmra.mxu3 %vm3083_vm1, %v6385_v32  ;;  %v11069_v32 = vpop.f32.mrf.mxu2 }
 0xae8   : > { %v11046_v26 = vpop.f32.mrf.mxu3 }
 0xaea   : > { %v11048_v39 = vpop.f32.mrf.mxu0 }
 0xaed   : > { %5028 = vmatmul.f32.gmra.mxu0 %v12681_v59  ;;  %6029 = vmatmul.lmr.bf16.gmra.16.mxu2  ;;  %v12689_v59 = vld [vmem:[#allocation195_spill] sm:$0xff] }
 0xaee   : > { %5744 = vmatmul.msk.f32.gmra.mxu3 %vm3083_vm1, %v6387_v53  ;;  %v12687_v53 = vunpack.i.h.bf16 %v12479_v41  ;;  %v11087_v4 = vpop.f32.mrf.mxu2  ;;  %v4878_v36 = vadd.f32 %v12689_v59, %v12688_v20 }
 0xaf0   : > { %v11059_v51 = vpop.f32.mrf.mxu3 }
 0xaf2   : > { %v11061_v44 = vpop.f32.mrf.mxu0 }
 0xaf5   : > { %5031 = vmatmul.f32.gmra.mxu0 %v12684_v48  ;;  %6030 = vmatmul.lmr.bf16.gmra.16.mxu2  ;;  %v3954_v48 = vadd.f32 %v12692_v31, %v3841_v34  ;;  %v12702_v34 = vunpack.i.h.bf16 %v12701_v61  ;;  %v12704_v31 = vld [vmem:[#allocation128_spill] sm:$0xff]  ;;  %v12712_v61 = vld [vmem:[#allocation125_spill] sm:$0xff] }
 0xaf6   : > { %5745 = vmatmul.msk.f32.gmra.mxu3 %vm3083_vm1, %v6389_v16  ;;  %v6393_v16 = vpop.eup %6392 }
 0xaf8   : > { %v11072_v24 = vpop.f32.mrf.mxu3 }
 0xafa   : > { %v4987_v55 = vpop.f32.mrf.mxu0 }
 0xafb   : > { %v11078_v33 = vadd.f32 %v4987_v55, %v4875_v56  ;;  %v12694_v56 = vunpack.i.h.bf16 %v12693_v11  ;;  %v4067_v55 = vadd.f32 %v12695_v1, %v3954_v48  ;;  %v4884_v48 = vadd.f32 %v10897_v40, %v12704_v31  ;;  %v12706_v1 = vld [vmem:[#allocation284_spill] sm:$0xff]  ;;  %v12711_v40 = vld [vmem:[#allocation149_spill] sm:$0xff] }
 0xafd   : > { %5034 = vmatmul.f32.gmra.mxu0 %v12687_v53  ;;  %6031 = vmatmul.lmr.bf16.gmra.16.mxu2  ;;  %v12698_v53 = vld [vmem:[#allocation283_spill] sm:$0xff]  ;;  %v4132_v20 = vmax.f32 %v4067_v55, 1e-20 }
 0xafe   : > { %5746 = vmatmul.msk.f32.gmra.mxu3 %vm3083_vm1, %v6391_v15  ;;  %v11104_v15 = vpop.f32.mrf.mxu2  ;;  %v3844_v23 = vadd.f32 %v12698_v53, %v12697_v22  ;;  %v12708_v53 = vld [vmem:[#allocation224_spill] sm:$0xff] }
 0xaff   : > { %6396 = vrcp.f32 %v4132_v20  ;;  %v12709_v20 = vld [vmem:[#allocation270_spill] sm:$0xff] }
 0xb00   : > { %v11085_v57 = vpop.f32.mrf.mxu3 }
 0xb02   : > { %v4990_v17 = vpop.f32.mrf.mxu0 }
 0xb03   : > { %v11093_v41 = vadd.f32 %v4990_v17, %v4878_v36  ;;  %v6395_v36 = vpop.eup %6394  ;;  %v12700_v17 = vld [vmem:[#allocation165_spill] sm:$0xff] }
 0xb04   : > { %v3957_v58 = vadd.f32 %v12700_v17, %v3844_v23 }
 0xb05   : > { %5037 = vmatmul.f32.gmra.mxu0 %v12694_v56  ;;  %6032 = vmatmul.lmr.bf16.gmra.16.mxu2  ;;  %v12705_v56 = vld [vmem:[#allocation290_spill] sm:$0xff]  ;;  %v6397_v22 = vpop.eup %6396 }
 0xb06   : > { %5747 = vmatmul.msk.f32.gmra.mxu3 %vm3083_vm1, %v6393_v16  ;;  %v4070_v42 = vadd.f32 %v12703_v47, %v3957_v58  ;;  %v3847_v55 = vadd.f32 %v12706_v1, %v12705_v56  ;;  %v12713_v47 = vld [vmem:[#allocation174_spill] sm:$0xff]  ;;  %v12716_v56 = vld [vmem:[#allocation287_spill] sm:$0xff] }
 0xb08   : > { %v11100_v29 = vpop.f32.mrf.mxu3  ;;  %v4133_v30 = vmax.f32 %v4070_v42, 1e-20  ;;  %v3960_v23 = vadd.f32 %v12708_v53, %v3847_v55  ;;  %v12714_v42 = vld [vmem:[#allocation52_spill] sm:$0xff] }
 0xb09   : > { %v3796_v31 = vadd.f32 %v12714_v42, %v12713_v47  ;;  %v12724_v42 = vld [vmem:[#allocation24_spill] sm:$0xff] }
 0xb0a   : > { %v4993_v3 = vpop.f32.mrf.mxu0  ;;  %6398 = vrcp.f32 %v4133_v30  ;;  %v4073_v17 = vadd.f32 %v12711_v40, %v3960_v23  ;;  %v12720_v40 = vld [vmem:[#allocation274_spill] sm:$0xff] }
 0xb0b   : > { %v11108_v59 = vadd.f32 %v4993_v3, %v4881_v43  ;;  %v11123_v3 = vpop.f32.mrf.mxu2 }
 0xb0c   : > { %v4134_v55 = vmax.f32 %v4073_v17, 1e-20 }
 0xb0d   : > { %12699 = vst [vmem:[#allocation193_spill] sm:$0xff] %v11108_v59  ;;  %5040 = vmatmul.f32.gmra.mxu0 %v12702_v34  ;;  %6033 = vmatmul.lmr.bf16.gmra.16.mxu2  ;;  %v4887_v34 = vadd.f32 %v10922_v28, %v12712_v61  ;;  %v12722_v28 = vld [vmem:[#allocation326_spill] sm:$0xff] }
 0xb0e   : > { %5748 = vmatmul.msk.f32.gmra.mxu3 %vm3083_vm1, %v6395_v36  ;;  %v12710_v36 = vunpack.i.h.bf16 %v12709_v20  ;;  %v12718_v20 = vld [vmem:[#allocation250_spill] sm:$0xff]  ;;  %6400 = vrcp.f32 %v4134_v55 }
 0xb10   : > { %v11115_v16 = vpop.f32.mrf.mxu3  ;;  %v6399_v30 = vpop.eup %6398 }
 0xb12   : > { %v4996_v11 = vpop.f32.mrf.mxu0 }
 0xb13   : > { %v11121_v43 = vadd.f32 %v4996_v11, %v4884_v48  ;;  %v12715_v11 = vld [vmem:[#allocation292_spill] sm:$0xff]  ;;  %v11146_v47 = vpop.f32.mrf.mxu2 }
 0xb14   : > { %v3850_v1 = vadd.f32 %v12716_v56, %v12715_v11  ;;  %12723 = vst [vmem:[#allocation191_spill] sm:$0xff] %v11146_v47  ;;  %v12727_v11 = vld [vmem:[#allocation176_spill] sm:$0xff]  ;;  %v12728_v56 = vld [vmem:[#allocation49_spill] sm:$0xff]  ;;  %v6401_v47 = vpop.eup %6400 }
 0xb15   : > { %12707 = vst [vmem:[#allocation31_spill] sm:$0xff] %v11121_v43  ;;  %5043 = vmatmul.f32.gmra.mxu0 %v12710_v36  ;;  %6034 = vmatmul.lmr.bf16.gmra.16.mxu2  ;;  %v12719_v36 = vld [vmem:[#allocation75_spill] sm:$0xff]  ;;  %v12721_v43 = vunpack.i.h.bf16 %v12720_v40  ;;  %v12730_v40 = vld [vmem:[#allocation289_spill] sm:$0xff] }
 0xb16   : > { %5749 = vmatmul.msk.f32.gmra.mxu3 %vm3083_vm1, %v6397_v22  ;;  %v3909_v22 = vadd.f32 %v12718_v20, %v3796_v31  ;;  %v3963_v23 = vadd.f32 %v12719_v36, %v3850_v1  ;;  %v3799_v1 = vadd.f32 %v12728_v56, %v12727_v11  ;;  %v12729_v36 = vld [vmem:[#allocation295_spill] sm:$0xff] }
 0xb18   : > { %v11130_v58 = vpop.f32.mrf.mxu3  ;;  %v4022_v61 = vadd.f32 %v12722_v28, %v3909_v22  ;;  %v4076_v17 = vadd.f32 %v12724_v42, %v3963_v23  ;;  %v3853_v22 = vadd.f32 %v12730_v40, %v12729_v36  ;;  %v12732_v23 = vld [vmem:[#allocation163_spill] sm:$0xff] }
 0xb1a   : > { %v4999_v48 = vpop.f32.mrf.mxu0  ;;  %v4117_v20 = vmax.f32 %v4022_v61, 1e-20  ;;  %v4135_v28 = vmax.f32 %v4076_v17, 1e-20  ;;  %v3966_v42 = vadd.f32 %v12732_v23, %v3853_v22  ;;  %v12736_v61 = vld [vmem:[#allocation200_spill] sm:$0xff]  ;;  %v12740_v23 = vld [vmem:[#allocation209_spill] sm:$0xff] }
 0xb1b   : > { %v11138_v53 = vadd.f32 %v4999_v48, %v4887_v34  ;;  %v12726_v48 = vld [vmem:[#allocation33_spill] sm:$0xff]  ;;  %v4824_v17 = vpop.f32.mrf.mxu2 }
 0xb1c   : > { %v4890_v31 = vadd.f32 %v10945_v35, %v12726_v48  ;;  %6402 = vrcp.f32 %v4117_v20  ;;  %v12735_v35 = vld [vmem:[#allocation328_spill] sm:$0xff]  ;;  %v4079_v11 = vadd.f32 %v12736_v61, %v3966_v42  ;;  %v12741_v42 = vld [vmem:[#allocation22_spill] sm:$0xff]  ;;  %v12742_v61 = vld [vmem:[#allocation307_spill] sm:$0xff] }
 0xb1d   : > { %12717 = vst [vmem:[#allocation115_spill] sm:$0xff] %v11138_v53  ;;  %5046 = vmatmul.f32.gmra.mxu0 %v12721_v43  ;;  %6035 = vmatmul.lmr.bf16.gmra.16.mxu2  ;;  %v12731_v53 = vld [vmem:[#allocation255_spill] sm:$0xff]  ;;  %6404 = vrcp.f32 %v4135_v28  ;;  %v12739_v28 = vld [vmem:[#allocation221_spill] sm:$0xff] }
 0xb1e   : > { %5750 = vmatmul.msk.f32.gmra.mxu3 %vm3083_vm1, %v6399_v30  ;;  %v3912_v55 = vadd.f32 %v12731_v53, %v3799_v1  ;;  %v4893_v53 = vadd.f32 %v10957_v14, %v10882_v12  ;;  %v4136_v20 = vmax.f32 %v4079_v11, 1e-20  ;;  %v12743_v12 = vld [vmem:[#allocation145_spill] sm:$0xff] }
 0xb20   : > { %v11149_v34 = vpop.f32.mrf.mxu3  ;;  %v4025_v48 = vadd.f32 %v12735_v35, %v3912_v55  ;;  %v4845_v35 = vadd.f32 %v12741_v42, %v12740_v23  ;;  %v12747_v23 = vld [vmem:[#allocation61_spill] sm:$0xff] }
 0xb21   : > { %12725 = vst [vmem:[#allocation29_spill] sm:$0xff] %v11149_v34  ;;  %v12733_v34 = vld [vmem:[#allocation278_spill] sm:$0xff] }
 0xb22   : > { %v5002_v43 = vpop.f32.mrf.mxu0  ;;  %v12734_v59 = vunpack.i.h.bf16 %v12733_v34  ;;  %v4118_v1 = vmax.f32 %v4025_v48, 1e-20  ;;  %v12737_v34 = vld [vmem:[#allocation297_spill] sm:$0xff]  ;;  %v6403_v22 = vpop.eup %6402  ;;  %v4958_v48 = vadd.f32 %v10948_v49, %v4845_v35  ;;  %v12748_v49 = vld [vmem:[#allocation198_spill] sm:$0xff] }
 0xb23   : > { %v11157_v30 = vadd.f32 %v5002_v43, %v4890_v31  ;;  %v4848_v42 = vadd.f32 %v12748_v49, %v12747_v23  ;;  %v12749_v35 = vld [vmem:[#allocation309_spill] sm:$0xff]  ;;  %v12755_v23 = vld [vmem:[#allocation143_spill] sm:$0xff]  ;;  %v12756_v49 = vld [vmem:[#allocation312_spill] sm:$0xff] }
 0xb24   : > { %6406 = vrcp.f32 %v4118_v1 }
 0xb25   : > { %5049 = vmatmul.f32.gmra.mxu0 %v12734_v59  ;;  %6036 = vmatmul.lmr.bf16.gmra.16.mxu2  ;;  %v12738_v59 = vld [vmem:[#allocation291_spill] sm:$0xff]  ;;  %6408 = vrcp.f32 %v4136_v20 }
 0xb26   : > { %5751 = vmatmul.msk.f32.gmra.mxu3 %vm3083_vm1, %v6401_v47  ;;  %v3856_v36 = vadd.f32 %v12738_v59, %v12737_v34  ;;  %v6405_v47 = vpop.eup %6404  ;;  %v12744_v34 = vld [vmem:[#allocation299_spill] sm:$0xff]  ;;  %v12745_v59 = vld [vmem:[#allocation293_spill] sm:$0xff] }
 0xb28   : > { %v4937_v31 = vpop.f32.mrf.mxu3  ;;  %v3969_v55 = vadd.f32 %v12739_v28, %v3856_v36  ;;  %v3859_v36 = vadd.f32 %v12745_v59, %v12744_v34  ;;  %v12746_v28 = vld [vmem:[#allocation72_spill] sm:$0xff]  ;;  %v12752_v34 = vld [vmem:[#allocation294_spill] sm:$0xff] }
 0xb29   : > { %v11168_v56 = vadd.f32 %v4937_v31, %v4824_v17  ;;  %v4896_v17 = vadd.f32 %v10970_v50, %v10909_v8  ;;  %v12750_v8 = vld [vmem:[#allocation20_spill] sm:$0xff] }
 0xb2a   : > { %v5005_v43 = vpop.f32.mrf.mxu0  ;;  %v4082_v14 = vadd.f32 %v12743_v12, %v3969_v55  ;;  %v3972_v55 = vadd.f32 %v12746_v28, %v3859_v36 }
 0xb2b   : > { %v11172_v40 = vadd.f32 %v5005_v43, %v4893_v53 }
 0xb2c   : > { %v4085_v50 = vadd.f32 %v12750_v8, %v3972_v55  ;;  %v12754_v55 = vld [vmem:[#allocation153_spill] sm:$0xff]  ;;  %v4902_v8 = vadd.f32 %v10996_v0, %v10959_v9 }
 0xb2d   : > { %5117 = vmatmul.f32.gmra.mxu2 %v12742_v61  ;;  %5734 = vmatmul.msk.f32.vlgmr.msra.gmra.mxu0 %vm3083_vm1, %v6403_v22  ;;  %v4137_v22 = vmax.f32 %v4082_v14, 1e-20  ;;  %v4961_v61 = vadd.f32 %v10961_v2, %v4848_v42  ;;  %v4899_v14 = vadd.f32 %v10983_v7, %v10940_v13  ;;  %v4851_v2 = vadd.f32 %v12755_v23, %v12754_v55  ;;  %v12757_v13 = vld [vmem:[#allocation18_spill] sm:$0xff] }
 0xb2e   : > { %5752 = vmatmul.msk.f32.gmra.mxu3 %vm3083_vm1, %v6405_v47  ;;  %v6407_v47 = vpop.eup %6406  ;;  %v4138_v36 = vmax.f32 %v4085_v50, 1e-20 }
 0xb2f   : > { %v6409_v20 = vpop.eup %6408  ;;  %6410 = vrcp.f32 %v4137_v22  ;;  %v12753_v22 = vld [vmem:[#allocation161_spill] sm:$0xff]  ;;  %v4964_v42 = vadd.f32 %v10972_v6, %v4851_v2  ;;  %v12760_v6 = vld [vmem:[#allocation216_spill] sm:$0xff]  ;;  %v12763_v2 = vld [vmem:[#allocation315_spill] sm:$0xff] }
 0xb30   : > { %v5070_v11 = vpop.f32.mrf.mxu2  ;;  %6412 = vrcp.f32 %v4138_v36  ;;  %v12761_v36 = vld [vmem:[#allocation107_spill] sm:$0xff] }
 0xb31   : > { %v11184_v31 = vadd.f32 %v5070_v11, %v4958_v48  ;;  %v5285_v53 = vpop.f32.mrf.mxu3 }
 0xb32   : > { %v5008_v43 = vpop.f32.mrf.mxu0 }
 0xb33   : > { %v11188_v1 = vadd.f32 %v5008_v43, %v4896_v17  ;;  %v12751_v43 = vld [vmem:[#allocation301_spill] sm:$0xff] }
 0xb34   : > { %v3862_v59 = vadd.f32 %v12752_v34, %v12751_v43  ;;  %v12759_v43 = vld [vmem:[#allocation296_spill] sm:$0xff] }
 0xb35   : > { %5120 = vmatmul.f32.gmra.mxu2 %v12749_v35  ;;  %5735 = vmatmul.msk.f32.gmra.mxu0 %vm3083_vm1, %v6407_v47 }
 0xb36   : > { %5753 = vmatmul.msk.f32.gmra.mxu3 %vm3083_vm1, %v6409_v20  ;;  %v6411_v20 = vpop.eup %6410  ;;  %v3975_v28 = vadd.f32 %v12753_v22, %v3862_v59 }
 0xb37   : > { %v6413_v9 = vpop.eup %6412 }
 0xb38   : > { %v5073_v12 = vpop.f32.mrf.mxu2  ;;  %v4088_v7 = vadd.f32 %v12757_v13, %v3975_v28  ;;  %v12762_v28 = vld [vmem:[#allocation141_spill] sm:$0xff] }
 0xb39   : > { %v11200_v48 = vadd.f32 %v5073_v12, %v4961_v61  ;;  %v5288_v11 = vpop.f32.mrf.mxu3  ;;  %v11215_v12 = vld [vmem:[#allocation4 + $0x1c8] ss:$0 sm:$0xff]  ;;  %v4854_v55 = vadd.f32 %v12762_v28, %v12761_v36  ;;  %v12769_v36 = vld [vmem:[#allocation16_spill] sm:$0xff] }
 0xb3a   : > { %v5011_v17 = vpop.f32.mrf.mxu0  ;;  %v4139_v59 = vmax.f32 %v4088_v7, 1e-20 }
 0xb3b   : > { %v11204_v47 = vadd.f32 %v5011_v17, %v4899_v14  ;;  %v12758_v17 = vld [vmem:[#allocation304_spill] sm:$0xff]  ;;  %v4967_v13 = vadd.f32 %v10985_v5, %v4854_v55 }
 0xb3c   : > { %v3865_v34 = vadd.f32 %v12759_v43, %v12758_v17  ;;  %6414 = vrcp.f32 %v4139_v59  ;;  %v12766_v17 = vld [vmem:[#allocation298_spill] sm:$0xff] }
 0xb3d   : > { %5123 = vmatmul.f32.gmra.mxu2 %v12756_v49 }
 0xb3e   : > { %5754 = vmatmul.msk.f32.gmra.mxu3 %vm3083_vm1, %v6411_v20  ;;  %v3978_v0 = vadd.f32 %v12760_v6, %v3865_v34  ;;  %v12767_v6 = vld [vmem:[#allocation69_spill] sm:$0xff] }
 0xb40   : > { %v5076_v35 = vpop.f32.mrf.mxu2 }
 0xb41   : > { %v5077_v50 = vadd.f32 %v5076_v35, %v4964_v42  ;;  %v5291_v61 = vpop.f32.mrf.mxu3  ;;  %v4905_v42 = vadd.f32 %v11009_v25, %v10974_v60  ;;  %v12770_v60 = vld [vmem:[#allocation317_spill] sm:$0xff]  ;;  %v12771_v25 = vld [vmem:[#allocation14_spill] sm:$0xff] }
 0xb42   : > { %v5014_v14 = vpop.f32.mrf.mxu0 }
 0xb43   : > { %v5377_v22 = vmul.f32 %v5285_v53, %v5077_v50  ;;  %v11219_v20 = vadd.f32 %v5014_v14, %v4902_v8  ;;  %v12764_v53 = vld [vmem:[#allocation139_spill] sm:$0xff]  ;;  %v12765_v14 = vld [vmem:[#allocation306_spill] sm:$0xff] }
 0xb44   : > { %v4091_v49 = vadd.f32 %v12764_v53, %v3978_v0  ;;  %v3868_v43 = vadd.f32 %v12766_v17, %v12765_v14  ;;  %v12768_v0 = vld [vmem:[#allocation151_spill] sm:$0xff]  ;;  %v4908_v53 = vadd.f32 %v11020_v37, %v10989_v10  ;;  %v12778_v37 = vld [vmem:[#allocation202_spill] sm:$0xff] }
 0xb45   : > { %v5409_v23 = vadd.f32 %v5377_v22, %v11215_v12  ;;  %5126 = vmatmul.f32.gmra.mxu2 %v12763_v2  ;;  %v4857_v28 = vadd.f32 %v12769_v36, %v12768_v0  ;;  %v12777_v10 = vld [vmem:[#allocation319_spill] sm:$0xff] }
 0xb46   : > { %5755 = vmatmul.msk.f32.gmra.mxu3 %vm3083_vm1, %v6413_v9  ;;  %v4140_v34 = vmax.f32 %v4091_v49, 1e-20  ;;  %v6415_v9 = vpop.eup %6414  ;;  %v3981_v5 = vadd.f32 %v12767_v6, %v3868_v43  ;;  %v12776_v6 = vld [vmem:[#allocation83_spill] sm:$0xff] }
 0xb47   : > { %5442 = vst.msk [vmem:[%s11226_s11 + $0x10] sm:$0xff] %vm5439_vm3, %v5409_v23  ;;  %v4970_v2 = vadd.f32 %v10998_v18, %v4857_v28 }
 0xb48   : > { %v5079_v7 = vpop.f32.mrf.mxu2  ;;  %6416 = vrcp.f32 %v4140_v34  ;;  %v4094_v23 = vadd.f32 %v12771_v25, %v3981_v5 }
 0xb49   : > { %v5080_v35 = vadd.f32 %v5079_v7, %v4967_v13  ;;  %v5294_v8 = vpop.f32.mrf.mxu3 }
 0xb4a   : > { %v5017_v50 = vpop.f32.mrf.mxu0  ;;  %v4141_v14 = vmax.f32 %v4094_v23, 1e-20 }
 0xb4b   : > { %v5378_v22 = vmul.f32 %v5288_v11, %v5080_v35  ;;  %v11242_v59 = vadd.f32 %v5017_v50, %v4905_v42  ;;  %v12772_v42 = vld [vmem:[#allocation310_spill] sm:$0xff]  ;;  %v12773_v35 = vld [vmem:[#allocation300_spill] sm:$0xff] }
 0xb4c   : > { %v3871_v50 = vadd.f32 %v12773_v35, %v12772_v42  ;;  %6418 = vrcp.f32 %v4141_v14  ;;  %v12782_v14 = vld [vmem:[#allocation203_spill] sm:$0xff] }
 0xb4d   : > { %v5410_v55 = vadd.f32 %v5378_v22, %v11215_v12  ;;  %5129 = vmatmul.f32.gmra.mxu2 %v12770_v60  ;;  %v12774_v22 = vld [vmem:[#allocation159_spill] sm:$0xff] }
 0xb4e   : > { %5756 = vmatmul.msk.f32.gmra.mxu3 %vm3083_vm1, %v6415_v9  ;;  %v6417_v34 = vpop.eup %6416  ;;  %v3984_v18 = vadd.f32 %v12774_v22, %v3871_v50  ;;  %v12775_v9 = vld [vmem:[#allocation57_spill] sm:$0xff] }
 0xb4f   : > { %5443 = vst.msk [vmem:[%s11226_s11 + $0x18] sm:$0xff] %vm5439_vm3, %v5410_v55  ;;  %v4860_v5 = vadd.f32 %v12776_v6, %v12775_v9  ;;  %v4911_v55 = vadd.f32 %v11033_v21, %v11006_v63  ;;  %v12781_v50 = vld [vmem:[#allocation213_spill] sm:$0xff]  ;;  %v4914_v6 = vadd.f32 %v11046_v26, %v11022_v27  ;;  %v12791_v27 = vld [vmem:[#allocation323_spill] sm:$0xff]  ;;  %v12792_v26 = vld [vmem:[#allocation196_spill] sm:$0xff] }
 0xb50   : > { %v5082_v11 = vpop.f32.mrf.mxu2  ;;  %v4097_v36 = vadd.f32 %v12778_v37, %v3984_v18  ;;  %v12784_v63 = vld [vmem:[#allocation321_spill] sm:$0xff]  ;;  %v12786_v37 = vld [vmem:[#allocation316_spill] sm:$0xff] }
 0xb51   : > { %v5083_v49 = vadd.f32 %v5082_v11, %v4970_v2  ;;  %v5297_v13 = vpop.f32.mrf.mxu3  ;;  %v4973_v28 = vadd.f32 %v11011_v54, %v4860_v5  ;;  %v12779_v2 = vld [vmem:[#allocation313_spill] sm:$0xff]  ;;  %v12780_v11 = vld [vmem:[#allocation302_spill] sm:$0xff] }
 0xb52   : > { %v5020_v7 = vpop.f32.mrf.mxu0  ;;  %v6419_v35 = vpop.eup %6418  ;;  %v12785_v21 = vld [vmem:[#allocation37_spill] sm:$0xff] }
 0xb53   : > { %v5379_v17 = vmul.f32 %v5291_v61, %v5083_v49  ;;  %v11258_v43 = vadd.f32 %v5020_v7, %v4908_v53  ;;  %v3874_v53 = vadd.f32 %v12780_v11, %v12779_v2  ;;  %v4142_v49 = vmax.f32 %v4097_v36, 1e-20  ;;  %v12787_v36 = vld [vmem:[#allocation303_spill] sm:$0xff]  ;;  %v12788_v2 = vld [vmem:[#allocation66_spill] sm:$0xff] }
 0xb54   : > { %v12789_v11 = vld [vmem:[#allocation147_spill] sm:$0xff] }
 0xb55   : > { %v5411_v0 = vadd.f32 %v5379_v17, %v11215_v12  ;;  %5132 = vmatmul.f32.gmra.mxu2 %v12777_v10  ;;  %v3987_v54 = vadd.f32 %v12781_v50, %v3874_v53  ;;  %v12783_v17 = vld [vmem:[#allocation12_spill] sm:$0xff]  ;;  %6420 = vrcp.f32 %v4142_v49  ;;  %v12790_v53 = vld [vmem:[#allocation39_spill] sm:$0xff] }
 0xb56   : > { %5757 = vmatmul.msk.f32.gmra.mxu3 %vm3083_vm1, %v6417_v34  ;;  %v4863_v34 = vadd.f32 %v12783_v17, %v12782_v14  ;;  %v4866_v49 = vadd.f32 %v12790_v53, %v12789_v11  ;;  %v12800_v53 = vld [vmem:[#allocation320_spill] sm:$0xff] }
 0xb57   : > { %5444 = vst.msk [vmem:[%s11226_s11 + $0x20] sm:$0xff] %vm5439_vm3, %v5411_v0  ;;  %v4100_v18 = vadd.f32 %v12785_v21, %v3987_v54  ;;  %v4917_v54 = vadd.f32 %v11059_v51, %v11037_v46  ;;  %v12798_v46 = vld [vmem:[#allocation325_spill] sm:$0xff] }
 0xb58   : > { %v5085_v61 = vpop.f32.mrf.mxu2  ;;  %v4976_v9 = vadd.f32 %v11024_v19, %v4863_v34  ;;  %v4979_v50 = vadd.f32 %v11035_v52, %v4866_v49  ;;  %v12799_v51 = vld [vmem:[#allocation121_spill] sm:$0xff]  ;;  %v12801_v49 = vld [vmem:[#allocation308_spill] sm:$0xff] }
 0xb59   : > { %v5086_v60 = vadd.f32 %v5085_v61, %v4973_v28  ;;  %v5300_v25 = vpop.f32.mrf.mxu3  ;;  %v3877_v28 = vadd.f32 %v12787_v36, %v12786_v37  ;;  %v4143_v61 = vmax.f32 %v4100_v18, 1e-20  ;;  %v12797_v37 = vld [vmem:[#allocation197_spill] sm:$0xff] }
 0xb5a   : > { %v5023_v23 = vpop.f32.mrf.mxu0 }
 0xb5b   : > { %v5380_v7 = vmul.f32 %v5294_v8, %v5086_v60  ;;  %v11274_v42 = vadd.f32 %v5023_v23, %v4911_v55  ;;  %v6421_v23 = vpop.eup %6420  ;;  %v3990_v19 = vadd.f32 %v12788_v2, %v3877_v28  ;;  %6422 = vrcp.f32 %v4143_v61 }
 0xb5d   : > { %v5412_v22 = vadd.f32 %v5380_v7, %v11215_v12  ;;  %5135 = vmatmul.f32.gmra.mxu2 %v12784_v63  ;;  %v12794_v63 = vld [vmem:[#allocation305_spill] sm:$0xff] }
 0xb5e   : > { %5758 = vmatmul.msk.f32.gmra.mxu3 %vm3083_vm1, %v6419_v35  ;;  %v4103_v35 = vadd.f32 %v12792_v26, %v3990_v19 }
 0xb5f   : > { %5445 = vst.msk [vmem:[%s11226_s11 + $0x28] sm:$0xff] %vm5439_vm3, %v5412_v22  ;;  %v12793_v22 = vld [vmem:[#allocation318_spill] sm:$0xff] }
 0xb60   : > { %v5088_v8 = vpop.f32.mrf.mxu2  ;;  %v3880_v21 = vadd.f32 %v12794_v63, %v12793_v22  ;;  %v4144_v18 = vmax.f32 %v4103_v35, 1e-20 }
 0xb61   : > { %v5089_v5 = vadd.f32 %v5088_v8, %v4976_v9  ;;  %v5303_v0 = vpop.f32.mrf.mxu3 }
 0xb62   : > { %v5026_v10 = vpop.f32.mrf.mxu0  ;;  %6424 = vrcp.f32 %v4144_v18  ;;  %v4923_v18 = vadd.f32 %v11085_v57, %v11069_v32 }
 0xb63   : > { %v5381_v55 = vmul.f32 %v5297_v13, %v5089_v5  ;;  %v11290_v60 = vadd.f32 %v5026_v10, %v4914_v6  ;;  %v6423_v6 = vpop.eup %6422  ;;  %v12795_v5 = vld [vmem:[#allocation157_spill] sm:$0xff]  ;;  %v12796_v10 = vld [vmem:[#allocation90_spill] sm:$0xff] }
 0xb64   : > { %v3993_v52 = vadd.f32 %v12795_v5, %v3880_v21  ;;  %v4869_v36 = vadd.f32 %v12797_v37, %v12796_v10  ;;  %v12808_v10 = vld [vmem:[#allocation311_spill] sm:$0xff] }
 0xb65   : > { %v5413_v7 = vadd.f32 %v5381_v55, %v11215_v12  ;;  %5138 = vmatmul.f32.gmra.mxu2 %v12791_v27 }
 0xb66   : > { %5759 = vmatmul.msk.f32.gmra.mxu3 %vm3083_vm1, %v6421_v23  ;;  %v4106_v61 = vadd.f32 %v12799_v51, %v3993_v52  ;;  %v4982_v55 = vadd.f32 %v11048_v39, %v4869_v36  ;;  %v4920_v23 = vadd.f32 %v11072_v24, %v11052_v38  ;;  %v12805_v38 = vld [vmem:[#allocation327_spill] sm:$0xff]  ;;  %v12806_v24 = vld [vmem:[#allocation118_spill] sm:$0xff] }
 0xb67   : > { %5446 = vst.msk [vmem:[%s11226_s11 + $0x30] sm:$0xff] %vm5439_vm3, %v5413_v7  ;;  %v3883_v7 = vadd.f32 %v12801_v49, %v12800_v53  ;;  %v12807_v52 = vld [vmem:[#allocation322_spill] sm:$0xff]  ;;  %v12811_v53 = vld [vmem:[#allocation324_spill] sm:$0xff] }
 0xb68   : > { %v5091_v13 = vpop.f32.mrf.mxu2  ;;  %v4145_v27 = vmax.f32 %v4106_v61, 1e-20  ;;  %v3886_v37 = vadd.f32 %v12808_v10, %v12807_v52  ;;  %v12809_v61 = vld [vmem:[#allocation63_spill] sm:$0xff]  ;;  %v12812_v49 = vld [vmem:[#allocation314_spill] sm:$0xff] }
 0xb69   : > { %v5092_v14 = vadd.f32 %v5091_v13, %v4979_v50  ;;  %v5306_v17 = vpop.f32.mrf.mxu3  ;;  %v6425_v50 = vpop.eup %6424  ;;  %v12802_v13 = vld [vmem:[#allocation211_spill] sm:$0xff] }
 0xb6a   : > { %v5029_v34 = vpop.f32.mrf.mxu0  ;;  %v3996_v39 = vadd.f32 %v12802_v13, %v3883_v7  ;;  %6426 = vrcp.f32 %v4145_v27  ;;  %v3889_v7 = vadd.f32 %v12812_v49, %v12811_v53 }
 0xb6b   : > { %v5382_v9 = vmul.f32 %v5300_v25, %v5092_v14  ;;  %v11306_v8 = vadd.f32 %v5029_v34, %v4917_v54  ;;  %v12803_v54 = vld [vmem:[#allocation86_spill] sm:$0xff]  ;;  %v12804_v14 = vld [vmem:[#allocation124_spill] sm:$0xff] }
 0xb6c   : > { %v4872_v34 = vadd.f32 %v12804_v14, %v12803_v54  ;;  %v4109_v63 = vadd.f32 %v12806_v24, %v3996_v39  ;;  %v12814_v14 = vld [vmem:[#allocation330_spill] sm:$0xff] }
 0xb6d   : > { %v5414_v28 = vadd.f32 %v5382_v9, %v11215_v12  ;;  %5141 = vmatmul.f32.gmra.mxu2 %v12798_v46 }
 0xb6e   : > { %5760 = vmatmul.msk.f32.gmra.mxu3 %vm3083_vm1, %v6423_v6  ;;  %v4985_v21 = vadd.f32 %v11061_v44, %v4872_v34  ;;  %v4146_v36 = vmax.f32 %v4109_v63, 1e-20  ;;  %v3999_v44 = vadd.f32 %v12809_v61, %v3886_v37  ;;  %v12820_v61 = vld [vmem:[#allocation31_spill] sm:$0xff] }
 0xb6f   : > { %5447 = vst.msk [vmem:[%s11226_s11 + $0x38] sm:$0xff] %vm5439_vm3, %v5414_v28 }
 0xb70   : > { %v5094_v25 = vpop.f32.mrf.mxu2  ;;  %v6427_v51 = vpop.eup %6426  ;;  %6428 = vrcp.f32 %v4146_v36  ;;  %v4112_v32 = vadd.f32 %v10893_v62, %v3999_v44  ;;  %v12813_v62 = vld [vmem:[#allocation155_spill] sm:$0xff]  ;;  %v12817_v36 = vld [vmem:[#allocation333_spill] sm:$0xff] }
 0xb71   : > { %v5095_v2 = vadd.f32 %v5094_v25, %v4982_v55  ;;  %v5309_v19 = vpop.f32.mrf.mxu3  ;;  %v12810_v25 = vld [vmem:[#allocation329_spill] sm:$0xff]  ;;  %v4002_v39 = vadd.f32 %v12813_v62, %v3889_v7  ;;  %v12823_v62 = vld [vmem:[#allocation170_spill] sm:$0xff] }
 0xb72   : > { %v5032_v11 = vpop.f32.mrf.mxu0  ;;  %v4147_v27 = vmax.f32 %v4112_v32, 1e-20 }
 0xb73   : > { %v5383_v26 = vmul.f32 %v5303_v0, %v5095_v2  ;;  %v11322_v35 = vadd.f32 %v5032_v11, %v4920_v23 }
 0xb74   : > { %6430 = vrcp.f32 %v4147_v27 }
 0xb75   : > { %v5415_v22 = vadd.f32 %v5383_v26, %v11215_v12  ;;  %5144 = vmatmul.f32.gmra.mxu2 %v12805_v38 }
 0xb76   : > { %5761 = vmatmul.msk.f32.gmra.mxu3 %vm3083_vm1, %v6425_v50  ;;  %v6429_v13 = vpop.eup %6428 }
 0xb77   : > { %5448 = vst.msk [vmem:[%s11226_s11 + $0x40] sm:$0xff] %vm5439_vm3, %v5415_v22 }
 0xb78   : > { %v5097_v0 = vpop.f32.mrf.mxu2 }
 0xb79   : > { %v5098_v9 = vadd.f32 %v5097_v0, %v4985_v21  ;;  %v5312_v6 = vpop.f32.mrf.mxu3 }
 0xb7a   : > { %v5035_v5 = vpop.f32.mrf.mxu0  ;;  %v6431_v21 = vpop.eup %6430 }
 0xb7b   : > { %v5384_v28 = vmul.f32 %v5306_v17, %v5098_v9  ;;  %v11338_v46 = vadd.f32 %v5035_v5, %v4923_v18  ;;  %v4926_v17 = vadd.f32 %v11100_v29, %v11087_v4  ;;  %v4929_v29 = vadd.f32 %v11115_v16, %v11104_v15  ;;  %v12815_v18 = vld [vmem:[#allocation331_spill] sm:$0xff]  ;;  %v12816_v15 = vld [vmem:[#allocation193_spill] sm:$0xff] }
 0xb7d   : > { %v5416_v55 = vadd.f32 %v5384_v28, %v11215_v12  ;;  %5147 = vmatmul.f32.gmra.mxu2 %v12810_v25 }
 0xb7e   : > { %5762 = vmatmul.msk.f32.gmra.mxu3 %vm3083_vm1, %v6427_v51  ;;  %v12818_v51 = vld [vmem:[#allocation191_spill] sm:$0xff] }
 0xb7f   : > { %5449 = vst.msk [vmem:[%s11226_s11 + $0x48] sm:$0xff] %vm5439_vm3, %v5416_v55 }
 0xb80   : > { %v5100_v57 = vpop.f32.mrf.mxu2 }
 0xb81   : > { %v5101_v23 = vadd.f32 %v5100_v57, %v11078_v33  ;;  %v5315_v2 = vpop.f32.mrf.mxu3  ;;  %v4115_v33 = vadd.f32 %v10926_v45, %v4002_v39 }
 0xb82   : > { %v5038_v11 = vpop.f32.mrf.mxu0 }
 0xb83   : > { %v5385_v26 = vmul.f32 %v5309_v19, %v5101_v23  ;;  %v11352_v50 = vadd.f32 %v5038_v11, %v4926_v17  ;;  %v4148_v38 = vmax.f32 %v4115_v33, 1e-20  ;;  %v12821_v23 = vld [vmem:[#allocation336_spill] sm:$0xff]  ;;  %v12822_v11 = vld [vmem:[#allocation115_spill] sm:$0xff] }
 0xb85   : > { %v5417_v54 = vadd.f32 %v5385_v26, %v11215_v12  ;;  %5150 = vmatmul.f32.gmra.mxu2 %v12814_v14  ;;  %6432 = vrcp.f32 %v4148_v38 }
 0xb86   : > { %5763 = vmatmul.msk.f32.gmra.mxu3 %vm3083_vm1, %v6429_v13 }
 0xb87   : > { %5450 = vst.msk [vmem:[%s11226_s11 + $0x50] sm:$0xff] %vm5439_vm3, %v5417_v54 }
 0xb88   : > { %v5103_v4 = vpop.f32.mrf.mxu2 }
 0xb89   : > { %v5104_v19 = vadd.f32 %v5103_v4, %v11093_v41  ;;  %v5318_v34 = vpop.f32.mrf.mxu3  ;;  %v4932_v41 = vadd.f32 %v11130_v58, %v11123_v3  ;;  %v12819_v3 = vld [vmem:[#allocation29_spill] sm:$0xff] }
 0xb8a   : > { %v5041_v22 = vpop.f32.mrf.mxu0  ;;  %v4935_v58 = vadd.f32 %v12819_v3, %v12818_v51 }
 0xb8b   : > { %v5386_v24 = vmul.f32 %v5312_v6, %v5104_v19  ;;  %v11364_v63 = vadd.f32 %v5041_v22, %v4929_v29  ;;  %v6433_v10 = vpop.eup %6432 }
 0xb8d   : > { %v5418_v0 = vadd.f32 %v5386_v24, %v11215_v12  ;;  %5153 = vmatmul.f32.gmra.mxu2 %v12815_v18 }
 0xb8e   : > { %5764 = vmatmul.msk.f32.gmra.mxu3 %vm3083_vm1, %v6431_v21 }
 0xb8f   : > { %5451 = vst.msk [vmem:[%s11226_s11 + $0x58] sm:$0xff] %vm5439_vm3, %v5418_v0 }
 0xb90   : > { %v5106_v45 = vpop.f32.mrf.mxu2 }
 0xb91   : > { %v5107_v16 = vadd.f32 %v5106_v45, %v12816_v15  ;;  %v5321_v9 = vpop.f32.mrf.mxu3 }
 0xb92   : > { %v5044_v6 = vpop.f32.mrf.mxu0 }
 0xb93   : > { %v5387_v5 = vmul.f32 %v5315_v2, %v5107_v16  ;;  %v11374_v52 = vadd.f32 %v5044_v6, %v4932_v41 }
 0xb95   : > { %v5419_v37 = vadd.f32 %v5387_v5, %v11215_v12  ;;  %5156 = vmatmul.f32.gmra.mxu2 %v12817_v36 }
 0xb96   : > { %5765 = vmatmul.msk.f32.gmra.mxu3 %vm3083_vm1, %v6433_v10 }
 0xb97   : > { %5452 = vst.msk [vmem:[%s11226_s11 + $0x60] sm:$0xff] %vm5439_vm3, %v5419_v37 }
 0xb98   : > { %v5109_v28 = vpop.f32.mrf.mxu2 }
 0xb99   : > { %v5110_v44 = vadd.f32 %v5109_v28, %v12820_v61  ;;  %v5324_v55 = vpop.f32.mrf.mxu3 }
 0xb9a   : > { %v5047_v25 = vpop.f32.mrf.mxu0 }
 0xb9b   : > { %v5388_v32 = vmul.f32 %v5318_v34, %v5110_v44  ;;  %v11384_v57 = vadd.f32 %v5047_v25, %v4935_v58 }
 0xb9d   : > { %v5420_v17 = vadd.f32 %v5388_v32, %v11215_v12  ;;  %5159 = vmatmul.f32.gmra.mxu2 %v12821_v23 }
 0xb9f   : > { %5453 = vst.msk [vmem:[%s11226_s11 + $0x68] sm:$0xff] %vm5439_vm3, %v5420_v17 }
 0xba0   : > { %v5112_v2 = vpop.f32.mrf.mxu2 }
 0xba1   : > { %v5113_v53 = vadd.f32 %v5112_v2, %v12822_v11  ;;  %v5327_v49 = vpop.f32.mrf.mxu3 }
 0xba2   : > { %v5050_v7 = vpop.f32.mrf.mxu0 }
 0xba3   : > { %v5389_v27 = vmul.f32 %v5321_v9, %v5113_v53  ;;  %v11392_v26 = vadd.f32 %v5050_v7, %v11168_v56 }
 0xba5   : > { %v5421_v13 = vadd.f32 %v5389_v27, %v11215_v12  ;;  %5162 = vmatmul.f32.gmra.mxu2 %v12823_v62 }
 0xba7   : > { %5454 = vst.msk [vmem:[%s11226_s11 + $0x70] sm:$0xff] %vm5439_vm3, %v5421_v13 }
 0xba8   : > { %v5115_v39 = vpop.f32.mrf.mxu2 }
 0xba9   : > { %v5116_v54 = vadd.f32 %v5115_v39, %v11157_v30  ;;  %v5330_v14 = vpop.f32.mrf.mxu3 }
 0xbaa   : > { %v5279_v33 = vpop.f32.mrf.mxu0 }
 0xbab   : > { %v5390_v4 = vmul.f32 %v5324_v55, %v5116_v54  ;;  %v5375_v29 = vmul.f32 %v5279_v33, %v11184_v31 }
 0xbad   : > { %v5422_v19 = vadd.f32 %v5390_v4, %v11215_v12  ;;  %v5407_v56 = vadd.f32 %v5375_v29, %v11215_v12 }
 0xbaf   : > { %5455 = vst.msk [vmem:[%s11226_s11 + $0x78] sm:$0xff] %vm5439_vm3, %v5422_v19 }
 0xbb0   : > { %5440 = vst.msk [vmem:[%s11226_s11] sm:$0xff] %vm5439_vm3, %v5407_v56  ;;  %v5118_v34 = vpop.f32.mrf.mxu2 }
 0xbb1   : > { %v5119_v22 = vadd.f32 %v5118_v34, %v11172_v40  ;;  %v5333_v30 = vpop.f32.mrf.mxu3 }
 0xbb2   : > { %v5282_v38 = vpop.f32.mrf.mxu0 }
 0xbb3   : > { %v5391_v24 = vmul.f32 %v5327_v49, %v5119_v22  ;;  %v5376_v21 = vmul.f32 %v5282_v38, %v11200_v48 }
 0xbb5   : > { %v5423_v31 = vadd.f32 %v5391_v24, %v11215_v12  ;;  %v5408_v0 = vadd.f32 %v5376_v21, %v11215_v12 }
 0xbb7   : > { %5456 = vst.msk [vmem:[%s11226_s11 + $0x80] sm:$0xff] %vm5439_vm3, %v5423_v31 }
 0xbb8   : > { %5441 = vst.msk [vmem:[%s11226_s11 + $0x8] sm:$0xff] %vm5439_vm3, %v5408_v0  ;;  %v5121_v18 = vpop.f32.mrf.mxu2 }
 0xbb9   : > { %v5122_v45 = vadd.f32 %v5121_v18, %v11188_v1  ;;  %v5336_v41 = vpop.f32.mrf.mxu3 }
 0xbbb   : > { %v5392_v40 = vmul.f32 %v5330_v14, %v5122_v45 }
 0xbbd   : > { %v5424_v15 = vadd.f32 %v5392_v40, %v11215_v12 }
 0xbbf   : > { %5457 = vst.msk [vmem:[%s11226_s11 + $0x88] sm:$0xff] %vm5439_vm3, %v5424_v15 }
 0xbc0   : > { %v5124_v48 = vpop.f32.mrf.mxu2 }
 0xbc1   : > { %v5125_v16 = vadd.f32 %v5124_v48, %v11204_v47  ;;  %v5339_v9 = vpop.f32.mrf.mxu3 }
 0xbc3   : > { %v5393_v6 = vmul.f32 %v5333_v30, %v5125_v16 }
 0xbc5   : > { %v5425_v5 = vadd.f32 %v5393_v6, %v11215_v12 }
 0xbc7   : > { %5458 = vst.msk [vmem:[%s11226_s11 + $0x90] sm:$0xff] %vm5439_vm3, %v5425_v5 }
 0xbc8   : > { %v5127_v10 = vpop.f32.mrf.mxu2 }
 0xbc9   : > { %v5128_v1 = vadd.f32 %v5127_v10, %v11219_v20  ;;  %v5342_v37 = vpop.f32.mrf.mxu3 }
 0xbcb   : > { %v5394_v36 = vmul.f32 %v5336_v41, %v5128_v1 }
 0xbcd   : > { %v5426_v28 = vadd.f32 %v5394_v36, %v11215_v12 }
 0xbcf   : > { %5459 = vst.msk [vmem:[%s11226_s11 + $0x98] sm:$0xff] %vm5439_vm3, %v5426_v28 }
 0xbd0   : > { %v5130_v51 = vpop.f32.mrf.mxu2 }
 0xbd1   : > { %v5131_v47 = vadd.f32 %v5130_v51, %v11242_v59  ;;  %v5345_v3 = vpop.f32.mrf.mxu3 }
 0xbd3   : > { %v5395_v58 = vmul.f32 %v5339_v9, %v5131_v47 }
 0xbd5   : > { %v5427_v61 = vadd.f32 %v5395_v58, %v11215_v12 }
 0xbd7   : > { %5460 = vst.msk [vmem:[%s11226_s11 + $0xa0] sm:$0xff] %vm5439_vm3, %v5427_v61 }
 0xbd8   : > { %v5133_v44 = vpop.f32.mrf.mxu2 }
 0xbd9   : > { %v5134_v20 = vadd.f32 %v5133_v44, %v11258_v43  ;;  %v5348_v55 = vpop.f32.mrf.mxu3 }
 0xbdb   : > { %v5396_v25 = vmul.f32 %v5342_v37, %v5134_v20 }
 0xbdd   : > { %v5428_v32 = vadd.f32 %v5396_v25, %v11215_v12 }
 0xbdf   : > { %5461 = vst.msk [vmem:[%s11226_s11 + $0xa8] sm:$0xff] %vm5439_vm3, %v5428_v32 }
 0xbe0   : > { %v5136_v17 = vpop.f32.mrf.mxu2 }
 0xbe1   : > { %v5137_v59 = vadd.f32 %v5136_v17, %v11274_v42  ;;  %v5351_v2 = vpop.f32.mrf.mxu3 }
 0xbe3   : > { %v5397_v23 = vmul.f32 %v5345_v3, %v5137_v59 }
 0xbe5   : > { %v5429_v11 = vadd.f32 %v5397_v23, %v11215_v12 }
 0xbe7   : > { %5462 = vst.msk [vmem:[%s11226_s11 + $0xb0] sm:$0xff] %vm5439_vm3, %v5429_v11 }
 0xbe8   : > { %v5139_v53 = vpop.f32.mrf.mxu2 }
 0xbe9   : > { %v5140_v43 = vadd.f32 %v5139_v53, %v11290_v60  ;;  %v5354_v27 = vpop.f32.mrf.mxu3 }
 0xbeb   : > { %v5398_v49 = vmul.f32 %v5348_v55, %v5140_v43 }
 0xbed   : > { %v5430_v7 = vadd.f32 %v5398_v49, %v11215_v12 }
 0xbef   : > { %5463 = vst.msk [vmem:[%s11226_s11 + $0xb8] sm:$0xff] %vm5439_vm3, %v5430_v7 }
 0xbf0   : > { %v5142_v13 = vpop.f32.mrf.mxu2 }
 0xbf1   : > { %v5143_v42 = vadd.f32 %v5142_v13, %v11306_v8  ;;  %v5357_v54 = vpop.f32.mrf.mxu3 }
 0xbf3   : > { %v5399_v62 = vmul.f32 %v5351_v2, %v5143_v42 }
 0xbf5   : > { %v5431_v39 = vadd.f32 %v5399_v62, %v11215_v12 }
 0xbf7   : > { %5464 = vst.msk [vmem:[%s11226_s11 + $0xc0] sm:$0xff] %vm5439_vm3, %v5431_v39 }
 0xbf8   : > { %v5145_v14 = vpop.f32.mrf.mxu2 }
 0xbf9   : > { %v5146_v60 = vadd.f32 %v5145_v14, %v11322_v35  ;;  %v5360_v8 = vpop.f32.mrf.mxu3 }
 0xbfb   : > { %v5400_v33 = vmul.f32 %v5354_v27, %v5146_v60 }
 0xbfd   : > { %v5432_v4 = vadd.f32 %v5400_v33, %v11215_v12 }
 0xbff   : > { %5465 = vst.msk [vmem:[%s11226_s11 + $0xc8] sm:$0xff] %vm5439_vm3, %v5432_v4 }
 0xc00   : > { %v5148_v29 = vpop.f32.mrf.mxu2 }
 0xc01   : > { %v5149_v19 = vadd.f32 %v5148_v29, %v11338_v46  ;;  %v5363_v38 = vpop.f32.mrf.mxu3 }
 0xc03   : > { %v5401_v56 = vmul.f32 %v5357_v54, %v5149_v19 }
 0xc05   : > { %v5433_v34 = vadd.f32 %v5401_v56, %v11215_v12 }
 0xc07   : > { %5466 = vst.msk [vmem:[%s11226_s11 + $0xd0] sm:$0xff] %vm5439_vm3, %v5433_v34 }
 0xc08   : > { %v5151_v22 = vpop.f32.mrf.mxu2 }
 0xc09   : > { %v5152_v30 = vadd.f32 %v5151_v22, %v11352_v50  ;;  %v5366_v18 = vpop.f32.mrf.mxu3 }
 0xc0b   : > { %v5402_v35 = vmul.f32 %v5360_v8, %v5152_v30 }
 0xc0d   : > { %v5434_v24 = vadd.f32 %v5402_v35, %v11215_v12 }
 0xc0f   : > { %5467 = vst.msk [vmem:[%s11226_s11 + $0xd8] sm:$0xff] %vm5439_vm3, %v5434_v24 }
 0xc10   : > { %v5154_v21 = vpop.f32.mrf.mxu2 }
 0xc11   : > { %v5155_v46 = vadd.f32 %v5154_v21, %v11364_v63  ;;  %v5369_v15 = vpop.f32.mrf.mxu3 }
 0xc13   : > { %v5403_v31 = vmul.f32 %v5363_v38, %v5155_v46 }
 0xc15   : > { %v5435_v0 = vadd.f32 %v5403_v31, %v11215_v12 }
 0xc17   : > { %5468 = vst.msk [vmem:[%s11226_s11 + $0xe0] sm:$0xff] %vm5439_vm3, %v5435_v0 }
 0xc18   : > { %v5157_v45 = vpop.f32.mrf.mxu2 }
 0xc19   : > { %v5158_v50 = vadd.f32 %v5157_v45, %v11374_v52  ;;  %v5372_v10 = vpop.f32.mrf.mxu3 }
 0xc1b   : > { %v5404_v41 = vmul.f32 %v5366_v18, %v5158_v50 }
 0xc1d   : > { %v5436_v40 = vadd.f32 %v5404_v41, %v11215_v12 }
 0xc1f   : > { %5469 = vst.msk [vmem:[%s11226_s11 + $0xe8] sm:$0xff] %vm5439_vm3, %v5436_v40 }
 0xc20   : > { %v5160_v48 = vpop.f32.mrf.mxu2 }
 0xc21   : > { %v5161_v16 = vadd.f32 %v5160_v48, %v11384_v57 }
 0xc23   : > { %v5405_v63 = vmul.f32 %v5369_v15, %v5161_v16 }
 0xc25   : > { %v5437_v9 = vadd.f32 %v5405_v63, %v11215_v12 }
 0xc27   : > { %5470 = vst.msk [vmem:[%s11226_s11 + $0xf0] sm:$0xff] %vm5439_vm3, %v5437_v9 }
 0xc28   : > { %v5163_v6 = vpop.f32.mrf.mxu2 }
 0xc29   : > { %v5164_v5 = vadd.f32 %v5163_v6, %v11392_v26 }
 0xc2b   : > { %v5406_v1 = vmul.f32 %v5372_v10, %v5164_v5 }
 0xc2d   : > { %v5438_v52 = vadd.f32 %v5406_v1, %v11215_v12 }
 0xc2f   : > { %5471 = vst.msk [vmem:[%s11226_s11 + $0xf8] sm:$0xff] %vm5439_vm3, %v5438_v52 }
 0xc30 PF: > { %p14_p1 = scmp.ge.s32.totalorder %s6725_s24, 10   ;;  %s12824_s12 = smov %s6639_s13 }
 0xc31   : > { %s12825_s13 = smov %s6643_s14  ;;  %s12826_s14 = smov %s6735_s29 }
 0xc32   : > { %s12827_s15 = smov %s6725_s24  ;;  %16 = sbr.rel (!%p14_p1) target bundleno = 4 (0x4), region = 79 }
 0xc37   :  { %5493 = vsyncpa [#allocation3], 1 }
 0xc38   :  { %5495 = vsyncpa [#allocation3 + $0x1], 1 }
 0xc39   :  { %5496 = vsyncpa [#allocation5], 1 }

</bundles_post_ra>
